<compile_context>
chip_gen: v6e
topology: v6e:2x2x1
jax: 0.10.0
libtpu: 0.0.40
codegen_flags: <defaults>
</compile_context>

<pallas_src>
import functools

import jax
import jax.numpy as jnp
from jax.experimental import pallas as pl
from jax.experimental.pallas import tpu as pltpu

NUM_CLASSES = 53
CLS_PAD = 128          # lane-dense classifier output (sliced to 53 in wrapper)
ENET_OUT = 1280
STEM_CH = 32
BN_EPS = 1e-5


def _round_up(x, m):
    return (x + m - 1) // m * m


# ---------------------------------------------------------------------------
# Fused Pallas kernel: stem matmul + SiLU -> head matmul + SiLU -> GAP accum
# -> (last step) classifier matmul.
# ---------------------------------------------------------------------------
def _fused_kernel(x_ref, w1_ref, b1_ref, w2_ref, b2_ref, wc_ref, bc_ref,
                  o_ref, acc_ref, *, hw, padded):
    t = pl.program_id(1)
    tm = x_ref.shape[1]

    @pl.when(t == 0)
    def _():
        acc_ref[...] = jnp.zeros_like(acc_ref)

    x = x_ref[0]                                            # (tm, K) bf16
    # conv_stem (im2col matmul, BN scale folded into w1) + shift + SiLU (f32)
    h = jnp.dot(x, w1_ref[...], preferred_element_type=jnp.float32)
    h = h + b1_ref[...]
    h = h * jax.nn.sigmoid(h)
    # conv_head 1x1 (BN scale folded into w2) + shift + SiLU (f32)
    y = jnp.dot(h.astype(jnp.bfloat16), w2_ref[...],
                preferred_element_type=jnp.float32)
    y = y + b2_ref[...]
    y = y * jax.nn.sigmoid(y)

    if padded:  # zero out rows past the true spatial extent before pooling
        row = t * tm + jax.lax.broadcasted_iota(jnp.int32, (tm, 1), 0)
        y = jnp.where(row < hw, y, 0.0)

    # global average pool: per-tile partial sum into persistent f32 scratch
    acc_ref[...] += jnp.sum(y, axis=0, keepdims=True)       # (1, 1280)

    @pl.when(t == pl.num_programs(1) - 1)
    def _():
        pooled = acc_ref[...] * (1.0 / hw)                  # (1, 1280) f32
        logits = jnp.dot(pooled, wc_ref[...],
                         preferred_element_type=jnp.float32) + bc_ref[...]
        o_ref[0] = jnp.broadcast_to(logits, o_ref.shape[1:])


def fused_forward(patches, p, hw, tm):
    """patches: (N, HW_pad, K) bf16. Returns (N, CLS_PAD) logits (padded)."""
    N, HW_pad, K = patches.shape
    T = HW_pad // tm
    kernel = functools.partial(_fused_kernel, hw=hw, padded=(HW_pad != hw))
    out = pl.pallas_call(
        kernel,
        out_shape=jax.ShapeDtypeStruct((N, 8, CLS_PAD), jnp.float32),
        grid=(N, T),
        in_specs=[
            pl.BlockSpec((1, tm, K), lambda b, t: (b, t, 0)),
            pl.BlockSpec((K, STEM_CH), lambda b, t: (0, 0)),
            pl.BlockSpec((1, STEM_CH), lambda b, t: (0, 0)),
            pl.BlockSpec((STEM_CH, ENET_OUT), lambda b, t: (0, 0)),
            pl.BlockSpec((1, ENET_OUT), lambda b, t: (0, 0)),
            pl.BlockSpec((ENET_OUT, CLS_PAD), lambda b, t: (0, 0)),
            pl.BlockSpec((1, CLS_PAD), lambda b, t: (0, 0)),
        ],
        out_specs=pl.BlockSpec((1, 8, CLS_PAD), lambda b, t: (b, 0, 0)),
        scratch_shapes=[pltpu.VMEM((1, ENET_OUT), jnp.float32)],
        compiler_params=pltpu.CompilerParams(
            dimension_semantics=("parallel", "arbitrary")),
    )(patches, p["w1"], p["b1"], p["w2"], p["b2"], p["wc"], p["bc"])
    return out[:, 0, :]                                      # (N, CLS_PAD)


# ---------------------------------------------------------------------------
# Glue: im2col (pure JAX reshuffle; compute stays in the kernel above)
# ---------------------------------------------------------------------------
def im2col(x_nhwc, kh, kw, stride, pad):
    N, H, W, C = x_nhwc.shape
    xp = jnp.pad(x_nhwc, ((0, 0), (pad, pad), (pad, pad), (0, 0)))
    Ho = (H + 2 * pad - kh) // stride + 1
    Wo = (W + 2 * pad - kw) // stride + 1
    cols = []
    for i in range(kh):
        for j in range(kw):
            cols.append(
                xp[:, i:i + stride * Ho:stride, j:j + stride * Wo:stride, :])
    patches = jnp.concatenate(cols, axis=-1)      # feature order (kh, kw, C)
    return patches.reshape(N, Ho * Wo, kh * kw * C), Ho, Wo


# ---------------------------------------------------------------------------
# Deterministic synthetic parameters (shapes from the module __init__).
# BN scale is folded into the weight columns; weights stored bf16, shifts f32.
# ---------------------------------------------------------------------------
def init_params(key):
    ks = jax.random.split(key, 8)

    def bn_fold(kg, kb, c):
        gamma = 1.0 + 0.1 * jax.random.normal(kg, (c,), jnp.float32)
        beta = 0.1 * jax.random.normal(kb, (c,), jnp.float32)
        mean = jnp.zeros((c,), jnp.float32)
        var = jnp.ones((c,), jnp.float32)
        scale = gamma / jnp.sqrt(var + BN_EPS)
        shift = beta - mean * scale
        return scale, shift

    # conv_stem: Conv2d(3, 32, k=3, stride 2, pad 1, bias=False) + bn1
    w_stem = 0.1 * jax.random.normal(ks[0], (3, 3, 3, STEM_CH), jnp.float32)
    s1, t1 = bn_fold(ks[1], ks[2], STEM_CH)
    # conv_head: 1x1 conv 32 -> 1280 (bias=False) + bn2
    w_head = 0.05 * jax.random.normal(ks[3], (STEM_CH, ENET_OUT), jnp.float32)
    s2, t2 = bn_fold(ks[4], ks[5], ENET_OUT)
    # classifier: Linear(1280, 53), output padded to 128 lanes
    w_cls = 0.02 * jax.random.normal(ks[6], (ENET_OUT, NUM_CLASSES), jnp.float32)
    b_cls = 0.01 * jax.random.normal(ks[7], (NUM_CLASSES,), jnp.float32)

    w1 = w_stem.reshape(3 * 3 * 3, STEM_CH) * s1[None, :]     # BN scale folded
    w2 = w_head * s2[None, :]
    wc = jnp.zeros((ENET_OUT, CLS_PAD), jnp.float32).at[:, :NUM_CLASSES].set(w_cls)
    bc = jnp.zeros((1, CLS_PAD), jnp.float32).at[0, :NUM_CLASSES].set(b_cls)

    return dict(
        w1=w1.astype(jnp.bfloat16), b1=t1.reshape(1, STEM_CH),
        w2=w2.astype(jnp.bfloat16), b2=t2.reshape(1, ENET_OUT),
        wc=wc, bc=bc,
    )


# ---------------------------------------------------------------------------
# Forward passes
# ---------------------------------------------------------------------------
def forward(p, x_nchw, tm_max=512):
    x = jnp.transpose(x_nchw, (0, 2, 3, 1))                   # NCHW -> NHWC
    patches, Ho, Wo = im2col(x, 3, 3, stride=2, pad=1)        # (N, HW, 27)
    HW = Ho * Wo
    tm = min(tm_max, _round_up(HW, 8))
    HW_pad = pl.cdiv(HW, tm) * tm
    if HW_pad != HW:
        patches = jnp.pad(patches, ((0, 0), (0, HW_pad - HW), (0, 0)))
    patches = patches.astype(jnp.bfloat16)
    logits = fused_forward(patches, p, HW, tm)                # (N, CLS_PAD)
    return logits[:, :NUM_CLASSES]


def forward_ref(p, x_nchw):
    """Pure-JAX reference of the same computation, for correctness checking."""
    N = x_nchw.shape[0]
    x = jnp.transpose(x_nchw, (0, 2, 3, 1))
    patches, Ho, Wo = im2col(x, 3, 3, stride=2, pad=1)
    HW = Ho * Wo
    pb = patches.astype(jnp.bfloat16).reshape(N * HW, -1)
    h = jnp.dot(pb, p["w1"], preferred_element_type=jnp.float32) + p["b1"]
    h = h * jax.nn.sigmoid(h)
    y = jnp.dot(h.astype(jnp.bfloat16), p["w2"],
                preferred_element_type=jnp.float32) + p["b2"]
    y = y * jax.nn.sigmoid(y)
    pooled = y.reshape(N, HW, ENET_OUT).sum(axis=1) * (1.0 / HW)
    logits = jnp.dot(pooled, p["wc"],
                     preferred_element_type=jnp.float32) + p["bc"]
    return logits[:, :NUM_CLASSES]


# ---------------------------------------------------------------------------
if __name__ == "__main__":
    key = jax.random.PRNGKey(0)
    kx, kp = jax.random.split(key)

    N, Cin, H, W = 2, 3, 32, 32
    x = jax.random.normal(kx, (N, Cin, H, W), jnp.float32)
    params = init_params(kp)

    out = forward(params, x)
    out = jax.block_until_ready(out)
    assert out.shape == (N, NUM_CLASSES), out.shape

    ref = forward_ref(params, x)
    assert jnp.allclose(out, ref, atol=1e-2, rtol=1e-2), (
        float(jnp.max(jnp.abs(out - ref))))

    print("KERNEL_OK")
</pallas_src>

<mosaic_0001>
module attributes {stable_mosaic.version = 11 : i64} {
  func.func @_fused_kernel(%arg0: i32, %arg1: i32, %arg2: memref<1x256x27xbf16, #tpu.memory_space<vmem>>, %arg3: memref<27x32xbf16, #tpu.memory_space<vmem>>, %arg4: memref<1x32xf32, #tpu.memory_space<vmem>>, %arg5: memref<32x1280xbf16, #tpu.memory_space<vmem>>, %arg6: memref<1x1280xf32, #tpu.memory_space<vmem>>, %arg7: memref<1280x128xf32, #tpu.memory_space<vmem>>, %arg8: memref<1x128xf32, #tpu.memory_space<vmem>>, %arg9: memref<1x8x128xf32, #tpu.memory_space<vmem>>, %arg10: memref<1x1280xf32, #tpu.memory_space<vmem>>) attributes {dimension_semantics = [#tpu.dimension_semantics<parallel>, #tpu.dimension_semantics<arbitrary>], iteration_bounds = array<i64: 2, 1>, scalar_prefetch = 0 : i64, scratch_operands = 1 : i64, tpu.core_type = #tpu.core_type<tc>, window_params = [{transform_indices = @transform_0, window_bounds = array<i64: 1, 256, 27>}, {pipeline_mode = #tpu.pipeline_mode<synchronous>, transform_indices = @transform_1, window_bounds = array<i64: 27, 32>}, {pipeline_mode = #tpu.pipeline_mode<synchronous>, transform_indices = @transform_2, window_bounds = array<i64: 1, 32>}, {pipeline_mode = #tpu.pipeline_mode<synchronous>, transform_indices = @transform_3, window_bounds = array<i64: 32, 1280>}, {pipeline_mode = #tpu.pipeline_mode<synchronous>, transform_indices = @transform_4, window_bounds = array<i64: 1, 1280>}, {pipeline_mode = #tpu.pipeline_mode<synchronous>, transform_indices = @transform_5, window_bounds = array<i64: 1280, 128>}, {pipeline_mode = #tpu.pipeline_mode<synchronous>, transform_indices = @transform_6, window_bounds = array<i64: 1, 128>}, {transform_indices = @transform_7, window_bounds = array<i64: 1, 8, 128>}]} {
    %c0_i32 = arith.constant 0 : i32
    %0 = arith.cmpi eq, %arg1, %c0_i32 : i32
    %1 = arith.extui %0 : i1 to i32
    %c0_i32_0 = arith.constant 0 : i32
    %2 = arith.cmpi ne, %1, %c0_i32_0 : i32
    scf.if %2 {
      %cst_21 = arith.constant 0.000000e+00 : f32
      %36 = vector.broadcast %cst_21 : f32 to vector<1x1280xf32>
      %c0_22 = arith.constant 0 : index
      %c0_23 = arith.constant 0 : index
      %37 = vector.load %arg10[%c0_22, %c0_23] : memref<1x1280xf32, #tpu.memory_space<vmem>>, vector<1x1280xf32>
      tpu.vector_store %arg10[%c0_22, %c0_23], %36 {strides = array<i32>} : memref<1x1280xf32, #tpu.memory_space<vmem>>, vector<1x1280xf32>,
    } else {
    }
    %c0 = arith.constant 0 : index
    %c0_1 = arith.constant 0 : index
    %c0_2 = arith.constant 0 : index
    %3 = vector.load %arg2[%c0, %c0_1, %c0_2] : memref<1x256x27xbf16, #tpu.memory_space<vmem>>, vector<1x256x27xbf16>
    %4 = vector.shape_cast %3 : vector<1x256x27xbf16> to vector<256x27xbf16>
    %c0_3 = arith.constant 0 : index
    %c0_4 = arith.constant 0 : index
    %5 = vector.load %arg3[%c0_3, %c0_4] : memref<27x32xbf16, #tpu.memory_space<vmem>>, vector<27x32xbf16>
    %cst = arith.constant dense<0.000000e+00> : vector<256x32xf32>
    %6 = tpu.matmul %4, %5, %cst {dimension_numbers = #tpu.dot_dimension_numbers<[1], [0], [0], [1], [0, 0, 1, 1], [], []>} : vector<256x27xbf16>, vector<27x32xbf16>, vector<256x32xf32> -> vector<256x32xf32>
    %c0_5 = arith.constant 0 : index
    %c0_6 = arith.constant 0 : index
    %7 = vector.load %arg4[%c0_5, %c0_6] : memref<1x32xf32, #tpu.memory_space<vmem>>, vector<1x32xf32>
    %8 = vector.broadcast %7 : vector<1x32xf32> to vector<256x32xf32>
    %9 = arith.addf %6, %8 : vector<256x32xf32>
    %10 = arith.negf %9 : vector<256x32xf32>
    %11 = math.exp %10 : vector<256x32xf32>
    %cst_7 = arith.constant 1.000000e+00 : f32
    %12 = vector.broadcast %cst_7 : f32 to vector<256x32xf32>
    %13 = arith.addf %12, %11 : vector<256x32xf32>
    %14 = arith.divf %12, %13 : vector<256x32xf32>
    %15 = arith.mulf %9, %14 : vector<256x32xf32>
    %16 = arith.truncf %15 : vector<256x32xf32> to vector<256x32xbf16>
    %c0_8 = arith.constant 0 : index
    %c0_9 = arith.constant 0 : index
    %17 = vector.load %arg5[%c0_8, %c0_9] : memref<32x1280xbf16, #tpu.memory_space<vmem>>, vector<32x1280xbf16>
    %cst_10 = arith.constant dense<0.000000e+00> : vector<256x1280xf32>
    %18 = tpu.matmul %16, %17, %cst_10 {dimension_numbers = #tpu.dot_dimension_numbers<[1], [0], [0], [1], [0, 0, 1, 1], [], []>} : vector<256x32xbf16>, vector<32x1280xbf16>, vector<256x1280xf32> -> vector<256x1280xf32>
    %c0_11 = arith.constant 0 : index
    %c0_12 = arith.constant 0 : index
    %19 = vector.load %arg6[%c0_11, %c0_12] : memref<1x1280xf32, #tpu.memory_space<vmem>>, vector<1x1280xf32>
    %20 = vector.broadcast %19 : vector<1x1280xf32> to vector<256x1280xf32>
    %21 = arith.addf %18, %20 : vector<256x1280xf32>
    %22 = arith.negf %21 : vector<256x1280xf32>
    %23 = math.exp %22 : vector<256x1280xf32>
    %cst_13 = arith.constant 1.000000e+00 : f32
    %24 = vector.broadcast %cst_13 : f32 to vector<256x1280xf32>
    %25 = arith.addf %24, %23 : vector<256x1280xf32>
    %26 = arith.divf %24, %25 : vector<256x1280xf32>
    %27 = arith.mulf %21, %26 : vector<256x1280xf32>
    %c0_14 = arith.constant 0 : index
    %c0_15 = arith.constant 0 : index
    %28 = vector.load %arg10[%c0_14, %c0_15] : memref<1x1280xf32, #tpu.memory_space<vmem>>, vector<1x1280xf32>
    %cst_16 = arith.constant dense<0.000000e+00> : vector<1280xf32>
    %29 = vector.multi_reduction <add>, %27, %cst_16 [0] : vector<256x1280xf32> to vector<1280xf32>
    %30 = vector.shape_cast %29 : vector<1280xf32> to vector<1x1280xf32>
    %31 = arith.addf %28, %30 : vector<1x1280xf32>
    %c0_17 = arith.constant 0 : index
    %c0_18 = arith.constant 0 : index
    %32 = vector.load %arg10[%c0_17, %c0_18] : memref<1x1280xf32, #tpu.memory_space<vmem>>, vector<1x1280xf32>
    tpu.vector_store %arg10[%c0_17, %c0_18], %31 {strides = array<i32>} : memref<1x1280xf32, #tpu.memory_space<vmem>>, vector<1x1280xf32>,
    %c0_i32_19 = arith.constant 0 : i32
    %33 = arith.cmpi eq, %arg1, %c0_i32_19 : i32
    %34 = arith.extui %33 : i1 to i32
    %c0_i32_20 = arith.constant 0 : i32
    %35 = arith.cmpi ne, %34, %c0_i32_20 : i32
    scf.if %35 {
      %c0_21 = arith.constant 0 : index
      %c0_22 = arith.constant 0 : index
      %36 = vector.load %arg10[%c0_21, %c0_22] : memref<1x1280xf32, #tpu.memory_space<vmem>>, vector<1x1280xf32>
      %cst_23 = arith.constant 3.906250e-03 : f32
      %37 = vector.broadcast %cst_23 : f32 to vector<1x1280xf32>
      %38 = arith.mulf %36, %37 : vector<1x1280xf32>
      %c0_24 = arith.constant 0 : index
      %c0_25 = arith.constant 0 : index
      %39 = vector.load %arg7[%c0_24, %c0_25] : memref<1280x128xf32, #tpu.memory_space<vmem>>, vector<1280x128xf32>
      %cst_26 = arith.constant dense<0.000000e+00> : vector<1x128xf32>
      %40 = tpu.matmul %38, %39, %cst_26 {dimension_numbers = #tpu.dot_dimension_numbers<[1], [0], [0], [1], [0, 0, 1, 1], [], []>} : vector<1x1280xf32>, vector<1280x128xf32>, vector<1x128xf32> -> vector<1x128xf32>
      %c0_27 = arith.constant 0 : index
      %c0_28 = arith.constant 0 : index
      %41 = vector.load %arg8[%c0_27, %c0_28] : memref<1x128xf32, #tpu.memory_space<vmem>>, vector<1x128xf32>
      %42 = arith.addf %40, %41 : vector<1x128xf32>
      %43 = vector.shape_cast %42 : vector<1x128xf32> to vector<1x128xf32>
      %44 = vector.broadcast %43 : vector<1x128xf32> to vector<8x128xf32>
      %c0_29 = arith.constant 0 : index
      %c0_30 = arith.constant 0 : index
      %c0_31 = arith.constant 0 : index
      %45 = vector.load %arg9[%c0_29, %c0_30, %c0_31] : memref<1x8x128xf32, #tpu.memory_space<vmem>>, vector<1x8x128xf32>
      %46 = vector.shape_cast %45 : vector<1x8x128xf32> to vector<8x128xf32>
      %47 = vector.shape_cast %44 : vector<8x128xf32> to vector<1x8x128xf32>
      tpu.vector_store %arg9[%c0_29, %c0_30, %c0_31], %47 {strides = array<i32>} : memref<1x8x128xf32, #tpu.memory_space<vmem>>, vector<1x8x128xf32>,
    } else {
    }
    return
  }
  func.func @transform_0(%arg0: i32, %arg1: i32) -> (i32, i32, i32) {
    %c0_i32 = arith.constant 0 : i32
    %c0_i32_0 = arith.constant 0 : i32
    return %arg0, %arg1, %c0_i32 : i32, i32, i32
  }
  func.func @transform_1(%arg0: i32, %arg1: i32) -> (i32, i32) {
    %c0_i32 = arith.constant 0 : i32
    %c0_i32_0 = arith.constant 0 : i32
    %c0_i32_1 = arith.constant 0 : i32
    return %c0_i32, %c0_i32_0 : i32, i32
  }
  func.func @transform_2(%arg0: i32, %arg1: i32) -> (i32, i32) {
    %c0_i32 = arith.constant 0 : i32
    %c0_i32_0 = arith.constant 0 : i32
    %c0_i32_1 = arith.constant 0 : i32
    return %c0_i32, %c0_i32_0 : i32, i32
  }
  func.func @transform_3(%arg0: i32, %arg1: i32) -> (i32, i32) {
    %c0_i32 = arith.constant 0 : i32
    %c0_i32_0 = arith.constant 0 : i32
    %c0_i32_1 = arith.constant 0 : i32
    return %c0_i32, %c0_i32_0 : i32, i32
  }
  func.func @transform_4(%arg0: i32, %arg1: i32) -> (i32, i32) {
    %c0_i32 = arith.constant 0 : i32
    %c0_i32_0 = arith.constant 0 : i32
    %c0_i32_1 = arith.constant 0 : i32
    return %c0_i32, %c0_i32_0 : i32, i32
  }
  func.func @transform_5(%arg0: i32, %arg1: i32) -> (i32, i32) {
    %c0_i32 = arith.constant 0 : i32
    %c0_i32_0 = arith.constant 0 : i32
    %c0_i32_1 = arith.constant 0 : i32
    return %c0_i32, %c0_i32_0 : i32, i32
  }
  func.func @transform_6(%arg0: i32, %arg1: i32) -> (i32, i32) {
    %c0_i32 = arith.constant 0 : i32
    %c0_i32_0 = arith.constant 0 : i32
    %c0_i32_1 = arith.constant 0 : i32
    return %c0_i32, %c0_i32_0 : i32, i32
  }
  func.func @transform_7(%arg0: i32, %arg1: i32) -> (i32, i32, i32) {
    %c0_i32 = arith.constant 0 : i32
    %c0_i32_0 = arith.constant 0 : i32
    %c0_i32_1 = arith.constant 0 : i32
    return %arg0, %c0_i32, %c0_i32_0 : i32, i32, i32
  }
}

</mosaic_0001>

<bundles_post_ra>
// kernel: tpu_custom_call.1
= control target key start
LH: loop header
LB: loop body
LE: loop exit
PB: predicated region body
PF: predicated region fallthrough
CT: control target
= control target key end

     0   :  { %12 = vsyncpa [#allocation4], 0  ;;  %s11956_s0 = inlined_call_operand.vmem [shape: bf16[2,256,27], index: 0, kind: input, shape index: {}]   ;;  %s11957_s1 = inlined_call_operand.vmem [shape: bf16[27,32], index: 1, kind: input, shape index: {}]   ;;  %s11958_s2 = inlined_call_operand.vmem [shape: f32[1,32], index: 2, kind: input, shape index: {}]   ;;  %s11959_s3 = inlined_call_operand.vmem [shape: bf16[32,1280], index: 3, kind: input, shape index: {}]   ;;  %s11960_s4 = inlined_call_operand.vmem [shape: f32[1,1280], index: 4, kind: input, shape index: {}]   ;;  %s11961_s5 = inlined_call_operand.hbm [shape: f32[1280,128], index: 5, kind: input, shape index: {}]   ;;  %s11962_s6 = inlined_call_operand.vmem [shape: f32[1,128], index: 6, kind: input, shape index: {}]   ;;  %s11963_s7 = inlined_call_operand.hbm [shape: f32[2,8,128], index: 7, kind: output, shape index: {}]  }
   0x1   :  { %13 = vsyncpa [#allocation5], 0 }
   0x2   :  { %15 = vsyncpa [#allocation5 + $0x1], 0  ;;  %s7901_s24 = smov 0   ;;  %s7903_s25 = smov 0  }
   0x3   :  { %s7905_s26 = smov 0   ;;  %s7907_s27 = smov 0  }
   0x4   :  { %s7909_s28 = smov 0   ;;  %s7911_s29 = smov 0  }
   0x5 LB: > { %s5480_s30 = sadd.s32 4294967295, %s7851_s29   ;;  %s5481_s8 = sadd.s32 4294967294, %s7851_s29   ;;  %s7851_s29 = sphi %s7911_s29, %s21_s29   ;;  %s7847_s28 = sphi %s7909_s28, %s13012_s28   ;;  %s7843_s27 = sphi %s7907_s27, %s13011_s27   ;;  %s7839_s26 = sphi %s7905_s26, %s13010_s26   ;;  %s7835_s25 = sphi %s7903_s25, %s13009_s25   ;;  %s7831_s24 = sphi %s7901_s24, %s13008_s24  }
   0x6   : > { %s33_s9 = sadd.s32 1, %s7847_s28  ;;  %s194_s10 = sadd.s32 1, %s7839_s26 }
   0x7   : > { %p35_p0 = scmp.ge.s32.totalorder %s33_s9, 2  ;;  %p204_p1 = scmp.ne.s32.totalorder %s7839_s26, %s7835_s25 }
   0x8   : > { %p205_p2 = scmp.eq.s32.totalorder %s5480_s30, 1  ;;  %p210_p3 = scmp.ne.s32.totalorder %s7835_s25, %s7831_s24 }
   0x9   : > { %s13014_s9 = smov (%p35_p0, %s33_s9), 0  ;;  %p211_p5 = scmp.eq.s32.totalorder %s5481_s8, 1 }
   0xa   : > { %p7941_p4 = por %p205_p2, %p204_p1  ;;  %s191_s12 = ssub.s32 %s7847_s28, %s13014_s9 }
   0xb   : > { %p5482_p6 = scmp.ge.s32.totalorder %s7851_s29, 1  ;;  %p192_p7 = scmp.eq.s32.totalorder %s191_s12, 0 }
   0xc   : > { %p7948_p8 = por %p211_p5, %p210_p3  ;;  %p218_p9 = scmp.lt.s32.totalorder %s7851_s29, 3 }
   0xd   : > { %s7954_s14 = scalar_select %p192_p7, %s7839_s26, %s194_s10  }
   0xe   : > { %p7956_p10 = pnand %p5482_p6, %p218_p9  ;;  %p7960_p11 = scmp.eq.s32.totalorder %s5480_s30, 0 }
   0xf   : > { %s7853_s17 = smov [#allocation3]  }
  0x10   : > { %p6221_p12 = pneg %p7956_p10  ;;  %s242_s18 = sshll.u32 %s7853_s17, 4  ;;  %s243_s18 = int_to_ptr.vmem [resolvable:$true] %s242_s18 }
  0x11   : > { %s7756_s19 = scalar_lea.vmem %s243_s18, 20480  ;;  %p7764_p5 = scmp.lt.s32.totalorder %s243_s18, %s243_s18 }
  0x12   : > { %p6222_p13 = pnand %p7960_p11, %p6221_p12  ;;  %p7757_p1 = scmp.ne.s32.totalorder %s243_s18, %s7756_s19 }
  0x13   : > { %p7765_p6 = scmp.lt.s32.totalorder %s7756_s19, %s7756_s19 }
  0x14   : > { %p7747_p0 = pneg %p6222_p13 }
  0x15   : > { %p7766_p7 = por %p7765_p6, %p7764_p5 }
  0x16   : > { %p7759_p2 = pnand %p7757_p1, %p7747_p0 }
  0x18   : > { %p7760_p3 = pneg %p7759_p2 }
  0x1a   : > { %p7767_p9 = pnand %p7766_p7, %p7760_p3 }
  0x1c   : > { %7770 = shalt.err (!%p7767_p9)
}
  0x1d   : > { %s7854_s20 = smov 128   ;;  %s7855_s21 = smov 8  }
  0x1e   : > { %6224 = dma.hbm_to_vmem [thread:$0]  (!%p6222_p13), %s11961_s5, 20480, %s243_s18, [#allocation4], %s7854_s20, %s7854_s20, %s7855_s21  }
  0x1f   : > { %274 = sbr.rel (%p7956_p10) target bundleno = 1403 (0x57b), region = 48 }
  0x24   : > { %7822 = dma.done.wait (%p7960_p11), [#allocation4], 20480  }
  0x25   : > { %7824 = vsyncadd (%p7960_p11), [#allocation4], 4294946816  ;;  %vm514_vm0 = vcmask 1044480   ;;  %p311_p12 = scmp.lt.s32.totalorder %s7843_s27, 1  ;;  %vm515_vm1 = vcmask 1045504   ;;  %v7856_v0 = vmov 65535  }
  0x26   : > { %v516_v1 = vsel %vm514_vm0, 4294967295, %v7856_v0  ;;  %v6287_v3 = vld [vmem:[%s11957_s1 + $0x8] sm:$0x3f]   ;;  %v6288_v4 = vld [vmem:[%s11957_s1] sm:$0xff]   ;;  %vm465_vm2 = vcmask 220160   ;;  %v11969_v30 = vmov 0  }
  0x27   : > { %s312_s30 = scalar_select %p311_p12, %s7843_s27, 1  ;;  %v517_v2 = vsel %vm515_vm1, %v516_v1, 0  ;;  %v6307_v22 = vld [vmem:[%s11959_s3 + $0x5c] ss:$40 sps:$4 sm:$0xff]   ;;  %v6305_v24 = vld [vmem:[%s11959_s3 + $0x58] ss:$40 sps:$4 sm:$0xff]  }
  0x28   : > { %v519_v5 = vand.u32 %v6287_v3, %v517_v2  ;;  %v6310_v23 = vld [vmem:[%s11959_s3 + $0x54] ss:$40 sps:$4 sm:$0xff]   ;;  %v6308_v25 = vld [vmem:[%s11959_s3 + $0x50] ss:$40 sps:$4 sm:$0xff]   ;;  %v6313_v26 = vld [vmem:[%s11959_s3 + $0x4] ss:$40 sps:$4 sm:$0xff]  }
  0x29   : > { %s5981_s8 = sshll.u32 %s312_s30, 7  ;;  %v6316_v27 = vld [vmem:[%s11959_s3 + $0xc] ss:$40 sps:$4 sm:$0xff]   ;;  %v6311_v28 = vld [vmem:[%s11959_s3] ss:$40 sps:$4 sm:$0xff]   ;;  %vm1096_vm3 = vcmask 261120  }
  0x2a   : > { %s7982_s15 = scalar_lea.vmem %s11956_s0, %s5981_s8  ;;  %6175 = vmatprep.subr.bf16.mxu0 %v519_v5  ;;  %6211 = vmatprep.subr.bf16.mxu1 %v519_v5  ;;  %v6314_v29 = vld [vmem:[%s11959_s3 + $0x8] ss:$40 sps:$4 sm:$0xff]   ;;  %v6319_v31 = vld [vmem:[%s11959_s3 + $0x64] ss:$40 sps:$4 sm:$0xff]   ;;  %v8057_v34 = vld [vmem:[%s11958_s2] ss:$0 sm:$0xff] }
  0x2b   : > { %v6289_v6 = vld [vmem:[%s7982_s15] sm:$0xff]   ;;  %6176 = vmatpush3.bf16.msra.mxu0 %v519_v5  ;;  %6213 = vmatpush3.bf16.msra.mxu1 %v519_v5  ;;  %v6290_v7 = vld [vmem:[%s7982_s15 + $0x8] sm:$0xff]   ;;  %v6291_v8 = vld [vmem:[%s7982_s15 + $0x10] sm:$0xff]   ;;  %s307_s20 = sand.u32 1, %s7835_s25   ;;  %s5978_s22 = sshll.u32 %s7843_s27, 7 }
  0x2c   : > { %6179 = vmatprep.mubr.msk.bf16.mxu0 %vm465_vm2, %v6289_v6  ;;  %6177 = vmatprep.subr.bf16.mxu0 %v6288_v4  ;;  %v6292_v9 = vld [vmem:[%s7982_s15 + $0x18] sm:$0xff]   ;;  %v6301_v10 = vld [vmem:[%s7982_s15 + $0x60] sm:$0xff]   ;;  %v6302_v11 = vld [vmem:[%s7982_s15 + $0x68] sm:$0xff]   ;;  %s5487_s21 = sshll.u32 %s307_s20, 3  ;;  %s5393_s12 = scalar_lea.hbm %s11963_s7, %s5978_s22 }
  0x2d   : > { %6212 = vmatprep.subr.bf16.mxu1 %v6288_v4  ;;  %6203 = vmatprep.mubr.msk.bf16.mxu1 %vm465_vm2, %v6301_v10  ;;  %v6303_v12 = vld [vmem:[%s7982_s15 + $0x70] sm:$0xff]   ;;  %v6293_v13 = vld [vmem:[%s7982_s15 + $0x20] sm:$0xff]   ;;  %v6304_v14 = vld [vmem:[%s7982_s15 + $0x78] sm:$0xff]   ;;  %s309_s23 = scalar_lea.vmem [#allocation6], %s5487_s21  ;;  %s7860_s18 = smov [#allocation6]  }
  0x2e   : > { %v6294_v15 = vld [vmem:[%s7982_s15 + $0x28] sm:$0xff]   ;;  %v6295_v16 = vld [vmem:[%s7982_s15 + $0x30] sm:$0xff]   ;;  %v6296_v17 = vld [vmem:[%s7982_s15 + $0x38] sm:$0xff]   ;;  %s5395_s30 = sshll.u32 %s309_s23, 4  ;;  %s7775_s16 = sshll.u32 %s7860_s18, 4  ;;  %s5396_s30 = int_to_ptr.vmem [resolvable:$true] %s5395_s30  ;;  %s7776_s16 = int_to_ptr.vmem [resolvable:$false] %s7775_s16 }
  0x2f   : > { %6178 = vmatpush3.bf16.msra.mxu0 %v6288_v4  ;;  %6214 = vmatpush3.bf16.msra.mxu1 %v6288_v4  ;;  %v6297_v18 = vld [vmem:[%s7982_s15 + $0x40] sm:$0xff]   ;;  %v6298_v19 = vld [vmem:[%s7982_s15 + $0x48] sm:$0xff]   ;;  %v6299_v20 = vld [vmem:[%s7982_s15 + $0x50] sm:$0xff]   ;;  %s7771_s17 = scalar_lea.vmem %s5396_s30, 128  ;;  %s7777_s27 = scalar_lea.vmem %s7776_s16, 256 }
  0x30   : > { %v6300_v21 = vld [vmem:[%s7982_s15 + $0x58] sm:$0xff]   ;;  %1350 = vmatprep.subr.bf16.mxu0 %v6307_v22  ;;  %1157 = vmatprep.subr.bf16.mxu1 %v6310_v23  ;;  %v6322_v32 = vld [vmem:[%s11959_s3 + $0x6c] ss:$40 sps:$4 sm:$0xff]   ;;  %s5382_s15 = scalar_lea.sflag [#allocation5], %s307_s20  ;;  %p7772_p10 = scmp.ne.s32.totalorder %s5396_s30, %s7771_s17 }
  0x31   : > { %p7778_p0 = scmp.lt.s32.totalorder %s5396_s30, %s7776_s16  ;;  %p7779_p1 = scmp.lt.s32.totalorder %s7777_s27, %s7771_s17 }
  0x32   : > { %6180 = vmatmul.mubr.msk.bf16.vlgmr.msra.gmra.mxu0 %vm465_vm2, %v6290_v7  ;;  %6204 = vmatmul.mubr.msk.bf16.vlgmr.msra.gmra.mxu1 %vm465_vm2, %v6302_v11  ;;  %p7773_p11 = pnand %p7772_p10, %p7941_p4 }
  0x33   : > { %6183 = vmatprep.mubr.msk.bf16.mxu0 %vm465_vm2, %v6291_v8  ;;  %6207 = vmatprep.mubr.msk.bf16.mxu1 %vm465_vm2, %v6303_v12  ;;  %p7780_p2 = por %p7779_p1, %p7778_p0 }
  0x34   : > { %1351 = vmatpush1.bf16.msra.mxu0 %v6305_v24  ;;  %1158 = vmatpush1.bf16.msra.mxu1 %v6308_v25  ;;  %p7774_p13 = pneg %p7773_p11 }
  0x35   : > { %1159 = vmatprep.subr.bf16.mxu1 %v6313_v26  ;;  %1352 = vmatprep.subr.bf16.mxu0 %v6316_v27 }
  0x36   : > { %p7781_p3 = pnand %p7780_p2, %p7774_p13 }
  0x38   : > { %1160 = vmatpush1.bf16.msra.mxu1 %v6311_v28  ;;  %1353 = vmatpush1.bf16.msra.mxu0 %v6314_v29  ;;  %v6317_v28 = vld [vmem:[%s11959_s3 + $0x60] ss:$40 sps:$4 sm:$0xff]  }
  0x39   : > { %1543 = vmatprep.subr.bf16.mxu1 %v6319_v31  ;;  %1736 = vmatprep.subr.bf16.mxu0 %v6322_v32 }
  0x3a   : > { %6184 = vmatmul.mubr.msk.bf16.gmra.mxu0 %vm465_vm2, %v6292_v9  ;;  %6208 = vmatmul.mubr.msk.bf16.gmra.mxu1 %vm465_vm2, %v6304_v14 }
  0x3b   : > { %6187 = vmatprep.mubr.msk.bf16.mxu0 %vm465_vm2, %v6293_v13  ;;  %1177 = vmatprep.mubr.bf16.mxu1 %v11969_v30 }
  0x42   : > { %6188 = vmatmul.mubr.msk.bf16.gmra.mxu0 %vm465_vm2, %v6294_v15 }
  0x43   : > { %6191 = vmatprep.mubr.msk.bf16.mxu0 %vm465_vm2, %v6295_v16 }
  0x4a   : > { %6192 = vmatmul.mubr.msk.bf16.gmra.mxu0 %vm465_vm2, %v6296_v17 }
  0x4b   : > { %6195 = vmatprep.mubr.msk.bf16.mxu0 %vm465_vm2, %v6297_v18 }
  0x52   : > { %6196 = vmatmul.mubr.msk.bf16.gmra.mxu0 %vm465_vm2, %v6298_v19 }
  0x53   : > { %6199 = vmatprep.mubr.msk.bf16.mxu0 %vm465_vm2, %v6299_v20 }
  0x5a   : > { %6200 = vmatmul.mubr.msk.bf16.gmra.mxu0 %vm465_vm2, %v6300_v21 }
  0x5b   : > { %1370 = vmatprep.mubr.bf16.mxu0 %v11969_v30 }
  0xf2   : > { %v6181_v33 = vpop.f32.mrf.mxu0 }
  0xf3   : > { %v8063_v38 = vadd.f32 %v6181_v33, %v8057_v34  ;;  %v6320_v33 = vld [vmem:[%s11959_s3 + $0x68] ss:$40 sps:$4 sm:$0xff]  }
  0xf4   : > { %v555_v35 = vpop.f32.mrf.mxu0 }
  0xf5   : > { %v8060_v36 = vadd.f32 %v8057_v34, %v555_v35  ;;  %v5527_v45 = vmul.f32 -1.442695, %v8063_v38 }
  0xf6   : > { %v6182_v37 = vpop.f32.mrf.mxu0 }
  0xf7   : > { %v5525_v39 = vmul.f32 -1.442695, %v8060_v36  ;;  %v8067_v40 = vadd.f32 %v6182_v37, %v8057_v34  ;;  %v6325_v37 = vld [vmem:[%s11959_s3 + $0x14] ss:$40 sps:$4 sm:$0xff]  }
  0xf8   : > { %v558_v41 = vpop.f32.mrf.mxu0 }
  0xf9   : > { %6335 = vpow2.f32 %v5525_v39  ;;  %v5528_v42 = vmul.f32 -1.442695, %v8067_v40  ;;  %v559_v43 = vadd.f32 %v8057_v34, %v558_v41  ;;  %v6328_v39 = vld [vmem:[%s11959_s3 + $0x1c] ss:$40 sps:$4 sm:$0xff]  }
  0xfa   : > { %v6185_v44 = vpop.f32.mrf.mxu0 }
  0xfb   : > { %v5526_v46 = vmul.f32 -1.442695, %v559_v43  ;;  %6337 = vpow2.f32 %v5528_v42  ;;  %v8084_v60 = vadd.f32 %v6185_v44, %v8057_v34  ;;  %v6323_v44 = vld [vmem:[%s11959_s3 + $0x10] ss:$40 sps:$4 sm:$0xff]  }
  0xfc   : > { %v571_v47 = vpop.f32.mrf.mxu0 }
  0xfd   : > { %6339 = vpow2.f32 %v5526_v46  ;;  %v8073_v49 = vadd.f32 %v8057_v34, %v571_v47  ;;  %v5531_v2 = vmul.f32 -1.442695, %v8084_v60  ;;  %v6326_v47 = vld [vmem:[%s11959_s3 + $0x18] ss:$40 sps:$4 sm:$0xff]  }
  0xfe   : > { %v6186_v48 = vpop.f32.mrf.mxu0  ;;  %6341 = vpow2.f32 %v5527_v45 }
  0xff   : > { %v5529_v53 = vmul.f32 -1.442695, %v8073_v49  ;;  %v8081_v55 = vadd.f32 %v6186_v48, %v8057_v34  ;;  %v6331_v48 = vld [vmem:[%s11959_s3 + $0x74] ss:$40 sps:$4 sm:$0xff]  }
 0x100   : > { %v574_v50 = vpop.f32.mrf.mxu0 }
 0x101   : > { %v8076_v51 = vadd.f32 %v8057_v34, %v574_v50  ;;  %v5532_v61 = vmul.f32 -1.442695, %v8081_v55 }
 0x102   : > { %v6189_v52 = vpop.f32.mrf.mxu0 }
 0x103   : > { %v5530_v54 = vmul.f32 -1.442695, %v8076_v51  ;;  %v8102_v18 = vadd.f32 %v6189_v52, %v8057_v34 }
 0x104   : > { %v587_v56 = vpop.f32.mrf.mxu0 }
 0x105   : > { %6343 = vpow2.f32 %v5530_v54  ;;  %v8094_v8 = vadd.f32 %v8057_v34, %v587_v56  ;;  %v5535_v26 = vmul.f32 -1.442695, %v8102_v18 }
 0x106   : > { %v6336_v57 = vpop.eup %6335  ;;  %v6190_v58 = vpop.f32.mrf.mxu0  ;;  %6345 = vpow2.f32 %v5529_v53 }
 0x107   : > { %v778_v59 = vadd.f32 1.0, %v6336_v57  ;;  %v5533_v12 = vmul.f32 -1.442695, %v8094_v8  ;;  %v8099_v15 = vadd.f32 %v6190_v58, %v8057_v34 }
 0x108   : > { %v6338_v62 = vpop.eup %6337  ;;  %v590_v0 = vpop.f32.mrf.mxu0 }
 0x109   : > { %6347 = vrcp.f32 %v778_v59  ;;  %v781_v4 = vadd.f32 1.0, %v6338_v62  ;;  %v8089_v5 = vadd.f32 %v8057_v34, %v590_v0  ;;  %v5536_v21 = vmul.f32 -1.442695, %v8099_v15 }
 0x10a   : > { %v6340_v63 = vpop.eup %6339  ;;  %6349 = vpow2.f32 %v5532_v61  ;;  %v8091_v6 = vpop.f32.mrf.mxu0 }
 0x10b   : > { %v779_v1 = vadd.f32 1.0, %v6340_v63  ;;  %v6342_v3 = vpop.eup %6341  ;;  %v5534_v9 = vmul.f32 -1.442695, %v8089_v5 }
 0x10c   : > { %v780_v7 = vadd.f32 1.0, %v6342_v3  ;;  %v603_v11 = vpop.f32.mrf.mxu0 }
 0x10d   : > { %6351 = vrcp.f32 %v779_v1  ;;  %v8127_v42 = vadd.f32 %v8057_v34, %v603_v11 }
 0x10e   : > { %6353 = vpow2.f32 %v5531_v2  ;;  %v6194_v16 = vpop.f32.mrf.mxu0 }
 0x10f   : > { %6355 = vrcp.f32 %v781_v4  ;;  %v5537_v53 = vmul.f32 -1.442695, %v8127_v42  ;;  %v8151_v58 = vadd.f32 %v6194_v16, %v8057_v34 }
 0x110   : > { %6357 = vrcp.f32 %v780_v7  ;;  %v606_v23 = vpop.f32.mrf.mxu0 }
 0x111   : > { %6359 = vpow2.f32 %v5534_v9  ;;  %v8113_v32 = vadd.f32 %v8057_v34, %v606_v23  ;;  %v5540_v1 = vmul.f32 -1.442695, %v8151_v58 }
 0x112   : > { %v6344_v10 = vpop.eup %6343  ;;  %6361 = vpow2.f32 %v5533_v12 }
 0x113   : > { %v6346_v13 = vpop.eup %6345  ;;  %v783_v14 = vadd.f32 1.0, %v6344_v10  ;;  %v5538_v46 = vmul.f32 -1.442695, %v8113_v32 }
 0x114   : > { %v782_v17 = vadd.f32 1.0, %v6346_v13 }
 0x115   : > { %6363 = vrcp.f32 %v783_v14 }
 0x116   : > { %v6348_v19 = vpop.eup %6347  ;;  %6365 = vrcp.f32 %v782_v17 }
 0x117   : > { %v6350_v20 = vpop.eup %6349  ;;  %v874_v24 = vmul.f32 %v6348_v19, %v8060_v36  ;;  %6367 = vpow2.f32 %v5536_v21  ;;  %v8118_v36 = vpop.f32.mrf.mxu0 }
 0x118   : > { %v785_v31 = vadd.f32 1.0, %v6350_v20  ;;  %6369 = vpow2.f32 %v5535_v26 }
 0x119   : > { %v619_v52 = vpop.f32.mrf.mxu0 }
 0x11a   : > { %v6352_v22 = vpop.eup %6351  ;;  %6371 = vrcp.f32 %v785_v31  ;;  %v8175_v14 = vadd.f32 %v8057_v34, %v619_v52  ;;  %v8194_v31 = vadd.f32 %v8118_v36, %v8057_v34 }
 0x11b   : > { %v875_v25 = vmul.f32 %v6352_v22, %v559_v43  ;;  %v6354_v27 = vpop.eup %6353  ;;  %v6198_v61 = vpop.f32.mrf.mxu0 }
 0x11c   : > { %v6356_v35 = vpop.eup %6355  ;;  %v784_v41 = vadd.f32 1.0, %v6354_v27  ;;  %v5541_v22 = vmul.f32 -1.442695, %v8175_v14  ;;  %v8190_v26 = vadd.f32 %v6198_v61, %v8057_v34 }
 0x11d   : > { %v8110_v29 = vpack.c.bf16 %v875_v25, %v874_v24  ;;  %v6358_v43 = vpop.eup %6357  ;;  %v877_v45 = vmul.f32 %v6356_v35, %v8067_v40  ;;  %v622_v3 = vpop.f32.mrf.mxu0 }
 0x11e   : > { %v6360_v50 = vpop.eup %6359  ;;  %v876_v40 = vmul.f32 %v6358_v43, %v8063_v38  ;;  %6373 = vrcp.f32 %v784_v41  ;;  %v8155_v38 = vadd.f32 %v8091_v6, %v8057_v34  ;;  %v8170_v11 = vadd.f32 %v8057_v34, %v622_v3 }
 0x11f   : > { %5577 = vmatmul.mubr.msk.bf16.vlgmr.msra.gmra.mxu1 %vm1096_vm3, %v8110_v29  ;;  %5593 = vmatmul.mubr.msk.bf16.vlgmr.msra.gmra.mxu0 %vm1096_vm3, %v8110_v29  ;;  %v6362_v54 = vpop.eup %6361  ;;  %v787_v57 = vadd.f32 1.0, %v6360_v50  ;;  %6375 = vpow2.f32 %v5538_v46  ;;  %v5544_v35 = vmul.f32 -1.442695, %v8190_v26  ;;  %v5543_v41 = vmul.f32 -1.442695, %v8194_v31 }
 0x120   : > { %1544 = vmatpush1.bf16.msra.mxu1 %v6317_v28  ;;  %1187 = vmatprep.mubr.bf16.mxu1 %v11969_v30  ;;  %v8148_v56 = vpack.c.bf16 %v877_v45, %v876_v40  ;;  %v786_v62 = vadd.f32 1.0, %v6362_v54  ;;  %6377 = vpow2.f32 %v5537_v53  ;;  %v5539_v6 = vmul.f32 -1.442695, %v8155_v38 }
 0x121   : > { %1380 = vmatprep.mubr.bf16.mxu0 %v11969_v30  ;;  %1737 = vmatpush1.bf16.msra.mxu0 %v6320_v33  ;;  %6379 = vrcp.f32 %v787_v57  ;;  %v5542_v17 = vmul.f32 -1.442695, %v8170_v11 }
 0x122   : > { %1545 = vmatprep.subr.bf16.mxu1 %v6325_v37  ;;  %1738 = vmatprep.subr.bf16.mxu0 %v6328_v39  ;;  %12196 = vst [vmem:[#allocation9_spill] sm:$0xff] %v8148_v56  ;;  %v6364_v59 = vpop.eup %6363  ;;  %6381 = vrcp.f32 %v786_v62 }
 0x123   : > { %v6366_v63 = vpop.eup %6365  ;;  %v879_v0 = vmul.f32 %v6364_v59, %v8076_v51  ;;  %6383 = vpow2.f32 %v5540_v1  ;;  %v8172_v51 = vpop.f32.mrf.mxu0 }
 0x124   : > { %1546 = vmatpush1.bf16.msra.mxu1 %v6323_v44  ;;  %v6368_v2 = vpop.eup %6367  ;;  %v878_v4 = vmul.f32 %v6366_v63, %v8073_v49  ;;  %6385 = vpow2.f32 %v5539_v6  ;;  %v8228_v62 = vadd.f32 %v8172_v51, %v8057_v34 }
 0x125   : > { %1739 = vmatpush1.bf16.msra.mxu0 %v6326_v47  ;;  %1929 = vmatprep.subr.bf16.mxu1 %v6331_v48  ;;  %v6370_v7 = vpop.eup %6369  ;;  %v789_v10 = vadd.f32 1.0, %v6368_v2  ;;  %v635_v20 = vpop.f32.mrf.mxu0 }
 0x126   : > { %v8167_v9 = vpack.c.bf16 %v879_v0, %v878_v4  ;;  %v788_v13 = vadd.f32 1.0, %v6370_v7  ;;  %v8207_v44 = vadd.f32 %v8057_v34, %v635_v20  ;;  %v8214_v48 = vpop.f32.mrf.mxu1  ;;  %v5547_v4 = vmul.f32 -1.442695, %v8228_v62 }
 0x127   : > { %5578 = vmatmul.mubr.msk.bf16.gmra.mxu1 %vm1096_vm3, %v8148_v56  ;;  %5594 = vmatmul.mubr.msk.bf16.gmra.mxu0 %vm1096_vm3, %v8148_v56  ;;  %v6372_v12 = vpop.eup %6371  ;;  %6387 = vrcp.f32 %v789_v10 }
 0x128   : > { %1197 = vmatprep.mubr.bf16.mxu1 %v11969_v30  ;;  %1390 = vmatprep.mubr.bf16.mxu0 %v11969_v30  ;;  %12197 = vst [vmem:[#allocation10_spill] sm:$0xff] %v8167_v9  ;;  %v881_v16 = vmul.f32 %v6372_v12, %v8081_v55  ;;  %6389 = vrcp.f32 %v788_v13  ;;  %v6202_v55 = vpop.f32.mrf.mxu0  ;;  %v5545_v52 = vmul.f32 -1.442695, %v8207_v44  ;;  %v651_v57 = vpop.f32.mrf.mxu1 }
 0x129   : > { %6391 = vpow2.f32 %v5542_v17  ;;  %v8233_v1 = vadd.f32 %v6202_v55, %v8057_v34 }
 0x12a   : > { %6393 = vpow2.f32 %v5541_v22  ;;  %v638_v36 = vpop.f32.mrf.mxu0  ;;  %v6206_v2 = vpop.f32.mrf.mxu1 }
 0x12b   : > { %v6374_v49 = vpop.eup %6373  ;;  %v5548_v7 = vmul.f32 -1.442695, %v8233_v1 }
 0x12c   : > { %v6376_v19 = vpop.eup %6375  ;;  %v880_v21 = vmul.f32 %v6374_v49, %v8084_v60  ;;  %v654_v12 = vpop.f32.mrf.mxu1  ;;  %v8246_v49 = vadd.f32 %v8057_v34, %v651_v57 }
 0x12d   : > { %v6378_v23 = vpop.eup %6377  ;;  %v791_v25 = vadd.f32 1.0, %v6376_v19  ;;  %v8251_v19 = vadd.f32 %v8057_v34, %v654_v12 }
 0x12e   : > { %v8187_v24 = vpack.c.bf16 %v881_v16, %v880_v21  ;;  %v6380_v27 = vpop.eup %6379  ;;  %v790_v28 = vadd.f32 1.0, %v6378_v23  ;;  %v6209_v20 = vpop.f32.mrf.mxu1  ;;  %v5549_v22 = vmul.f32 -1.442695, %v8246_v49 }
 0x12f   : > { %5579 = vmatmul.mubr.msk.bf16.gmra.mxu1 %vm1096_vm3, %v8167_v9  ;;  %5595 = vmatmul.mubr.msk.bf16.gmra.mxu0 %vm1096_vm3, %v8167_v9  ;;  %v6382_v60 = vpop.eup %6381  ;;  %v883_v33 = vmul.f32 %v6380_v27, %v8089_v5  ;;  %6395 = vrcp.f32 %v791_v25  ;;  %v8212_v5 = vadd.f32 %v8057_v34, %v638_v36  ;;  %v5550_v27 = vmul.f32 -1.442695, %v8251_v19 }
 0x130   : > { %1207 = vmatprep.mubr.bf16.mxu1 %v11969_v30  ;;  %1400 = vmatprep.mubr.bf16.mxu0 %v11969_v30  ;;  %12198 = vst [vmem:[#allocation11_spill] sm:$0xff] %v8187_v24  ;;  %v6384_v37 = vpop.eup %6383  ;;  %v882_v39 = vmul.f32 %v6382_v60, %v8094_v8  ;;  %6397 = vrcp.f32 %v790_v28  ;;  %v667_v28 = vpop.f32.mrf.mxu1 }
 0x131   : > { %v6386_v43 = vpop.eup %6385  ;;  %v793_v46 = vadd.f32 1.0, %v6384_v37  ;;  %6399 = vpow2.f32 %v5544_v35  ;;  %v5546_v53 = vmul.f32 -1.442695, %v8212_v5  ;;  %v8265_v35 = vadd.f32 %v8214_v48, %v8057_v34 }
 0x132   : > { %v8209_v45 = vpack.c.bf16 %v883_v33, %v882_v39  ;;  %v792_v50 = vadd.f32 1.0, %v6386_v43  ;;  %6401 = vpow2.f32 %v5543_v41  ;;  %v8270_v39 = vadd.f32 %v6206_v2, %v8057_v34  ;;  %v6210_v41 = vpop.f32.mrf.mxu1 }
 0x133   : > { %6403 = vrcp.f32 %v793_v46  ;;  %v5551_v43 = vmul.f32 -1.442695, %v8265_v35 }
 0x134   : > { %12199 = vst [vmem:[#allocation12_spill] sm:$0xff] %v8209_v45  ;;  %v6388_v47 = vpop.eup %6387  ;;  %6405 = vrcp.f32 %v792_v50  ;;  %v5552_v48 = vmul.f32 -1.442695, %v8270_v39 }
 0x135   : > { %v6390_v8 = vpop.eup %6389  ;;  %v885_v40 = vmul.f32 %v6388_v47, %v8099_v15  ;;  %6407 = vpow2.f32 %v5545_v52 }
 0x136   : > { %v6392_v54 = vpop.eup %6391  ;;  %v884_v59 = vmul.f32 %v6390_v8, %v8102_v18  ;;  %6409 = vpow2.f32 %v5546_v53  ;;  %v670_v8 = vpop.f32.mrf.mxu1  ;;  %v8283_v53 = vadd.f32 %v8057_v34, %v667_v28 }
 0x137   : > { %5580 = vmatmul.mubr.msk.bf16.gmra.mxu1 %vm1096_vm3, %v8187_v24  ;;  %5596 = vmatmul.mubr.msk.bf16.gmra.mxu0 %vm1096_vm3, %v8187_v24  ;;  %v6394_v61 = vpop.eup %6393  ;;  %v795_v0 = vadd.f32 1.0, %v6392_v54 }
 0x138   : > { %1217 = vmatprep.mubr.bf16.mxu1 %v11969_v30  ;;  %1410 = vmatprep.mubr.bf16.mxu0 %v11969_v30  ;;  %v8230_v63 = vpack.c.bf16 %v885_v40, %v884_v59  ;;  %v794_v3 = vadd.f32 1.0, %v6394_v61  ;;  %v8288_v59 = vadd.f32 %v8057_v34, %v670_v8  ;;  %v5553_v61 = vmul.f32 -1.442695, %v8283_v53 }
 0x139   : > { %6411 = vrcp.f32 %v795_v0 }
 0x13a   : > { %12200 = vst [vmem:[#allocation13_spill] sm:$0xff] %v8230_v63  ;;  %6413 = vrcp.f32 %v794_v3  ;;  %v5554_v2 = vmul.f32 -1.442695, %v8288_v59 }
 0x13b   : > { %6415 = vpow2.f32 %v5547_v4 }
 0x13c   : > { %v6396_v15 = vpop.eup %6395  ;;  %6417 = vpow2.f32 %v5548_v7 }
 0x13d   : > { %v6398_v18 = vpop.eup %6397  ;;  %v887_v6 = vmul.f32 %v6396_v15, %v8113_v32 }
 0x13e   : > { %v6400_v10 = vpop.eup %6399  ;;  %v886_v51 = vmul.f32 %v6398_v18, %v8127_v42 }
 0x13f   : > { %5581 = vmatmul.mubr.msk.bf16.gmra.mxu1 %vm1096_vm3, %v8209_v45  ;;  %5597 = vmatmul.mubr.msk.bf16.gmra.mxu0 %vm1096_vm3, %v8209_v45  ;;  %v6402_v13 = vpop.eup %6401  ;;  %v797_v17 = vadd.f32 1.0, %v6400_v10 }
 0x140   : > { %1227 = vmatprep.mubr.bf16.mxu1 %v11969_v30  ;;  %1420 = vmatprep.mubr.bf16.mxu0 %v11969_v30  ;;  %v8248_v16 = vpack.c.bf16 %v887_v6, %v886_v51  ;;  %v6404_v32 = vpop.eup %6403  ;;  %v796_v21 = vadd.f32 1.0, %v6402_v13  ;;  %v8301_v6 = vadd.f32 %v6209_v20, %v8057_v34  ;;  %v8306_v51 = vadd.f32 %v6210_v41, %v8057_v34 }
 0x141   : > { %v6406_v42 = vpop.eup %6405  ;;  %v889_v25 = vmul.f32 %v6404_v32, %v8151_v58  ;;  %6419 = vrcp.f32 %v797_v17 }
 0x142   : > { %12201 = vst [vmem:[#allocation14_spill] sm:$0xff] %v8248_v16  ;;  %v6408_v23 = vpop.eup %6407  ;;  %v888_v60 = vmul.f32 %v6406_v42, %v8155_v38  ;;  %6421 = vrcp.f32 %v796_v21  ;;  %v5556_v32 = vmul.f32 -1.442695, %v8306_v51 }
 0x143   : > { %v6410_v55 = vpop.eup %6409  ;;  %v798_v33 = vadd.f32 1.0, %v6408_v23  ;;  %6423 = vpow2.f32 %v5549_v22 }
 0x144   : > { %v8267_v37 = vpack.c.bf16 %v889_v25, %v888_v60  ;;  %v799_v36 = vadd.f32 1.0, %v6410_v55  ;;  %6425 = vpow2.f32 %v5550_v27 }
 0x145   : > { %6427 = vrcp.f32 %v798_v33 }
 0x146   : > { %12202 = vst [vmem:[#allocation15_spill] sm:$0xff] %v8267_v37  ;;  %v6412_v58 = vpop.eup %6411  ;;  %6429 = vrcp.f32 %v799_v36 }
 0x147   : > { %5582 = vmatmul.mubr.msk.bf16.gmra.mxu1 %vm1096_vm3, %v8230_v63  ;;  %5598 = vmatmul.mubr.msk.bf16.gmra.mxu0 %vm1096_vm3, %v8230_v63  ;;  %v6414_v38 = vpop.eup %6413  ;;  %v891_v47 = vmul.f32 %v6412_v58, %v8170_v11  ;;  %6431 = vpow2.f32 %v5551_v43 }
 0x148   : > { %1237 = vmatprep.mubr.bf16.mxu1 %v11969_v30  ;;  %1430 = vmatprep.mubr.bf16.mxu0 %v11969_v30  ;;  %v6416_v46 = vpop.eup %6415  ;;  %v890_v52 = vmul.f32 %v6414_v38, %v8175_v14  ;;  %6433 = vpow2.f32 %v5552_v48 }
 0x149   : > { %v6418_v50 = vpop.eup %6417  ;;  %v800_v40 = vadd.f32 1.0, %v6416_v46 }
 0x14a   : > { %v8285_v54 = vpack.c.bf16 %v891_v47, %v890_v52  ;;  %v801_v57 = vadd.f32 1.0, %v6418_v50 }
 0x14b   : > { %6435 = vrcp.f32 %v800_v40 }
 0x14c   : > { %12203 = vst [vmem:[#allocation16_spill] sm:$0xff] %v8285_v54  ;;  %6437 = vrcp.f32 %v801_v57 }
 0x14d   : > { %6439 = vpow2.f32 %v5553_v61 }
 0x14e   : > { %v6420_v11 = vpop.eup %6419  ;;  %6441 = vpow2.f32 %v5554_v2  ;;  %v6332_v2 = vld [vmem:[%s11959_s3 + $0x20] ss:$40 sps:$4 sm:$0xff]  }
 0x14f   : > { %5583 = vmatmul.mubr.msk.bf16.gmra.mxu1 %vm1096_vm3, %v8248_v16  ;;  %5599 = vmatmul.mubr.msk.bf16.gmra.mxu0 %vm1096_vm3, %v8248_v16  ;;  %v6422_v14 = vpop.eup %6421  ;;  %v893_v15 = vmul.f32 %v6420_v11, %v8190_v26 }
 0x150   : > { %1247 = vmatprep.mubr.bf16.mxu1 %v11969_v30  ;;  %1440 = vmatprep.mubr.bf16.mxu0 %v11969_v30  ;;  %v6424_v0 = vpop.eup %6423  ;;  %v892_v18 = vmul.f32 %v6422_v14, %v8194_v31  ;;  %v5555_v31 = vmul.f32 -1.442695, %v8301_v6 }
 0x151   : > { %v6426_v3 = vpop.eup %6425  ;;  %v802_v4 = vadd.f32 1.0, %v6424_v0 }
 0x152   : > { %v6428_v7 = vpop.eup %6427  ;;  %v8303_v10 = vpack.c.bf16 %v893_v15, %v892_v18  ;;  %v803_v12 = vadd.f32 1.0, %v6426_v3  ;;  %v6334_v15 = vld [vmem:[%s11959_s3 + $0x24] ss:$40 sps:$4 sm:$0xff]   ;;  %v11966_v3 = vlaneseq }
 0x153   : > { %v6430_v26 = vpop.eup %6429  ;;  %6443 = vrcp.f32 %v802_v4  ;;  %v894_v17 = vmul.f32 %v6428_v7, %v8207_v44  ;;  %v942_v7 = vld [vmem:[%s11960_s4] sm:$0xff] }
 0x154   : > { %12204 = vst [vmem:[#allocation17_spill] sm:$0xff] %v8303_v10  ;;  %v6432_v13 = vpop.eup %6431  ;;  %v895_v34 = vmul.f32 %v6430_v26, %v8212_v5  ;;  %6445 = vrcp.f32 %v803_v12  ;;  %v8428_v18 = vshrl.u32 %v11966_v3, 7 }
 0x155   : > { %v6434_v20 = vpop.eup %6433  ;;  %v804_v21 = vadd.f32 1.0, %v6432_v13  ;;  %6447 = vpow2.f32 %v5555_v31 }
 0x156   : > { %v8318_v22 = vpack.c.bf16 %v895_v34, %v894_v17  ;;  %v805_v23 = vadd.f32 1.0, %v6434_v20  ;;  %6449 = vpow2.f32 %v5556_v32  ;;  %12211 = vst [vmem:[#allocation24_spill] sm:$0xff] %v8428_v18  ;;  %v8437_v4 = vsub.s32 0, %v8428_v18 }
 0x157   : > { %5584 = vmatmul.mubr.msk.bf16.gmra.mxu1 %vm1096_vm3, %v8267_v37  ;;  %5600 = vmatmul.mubr.msk.bf16.gmra.mxu0 %vm1096_vm3, %v8267_v37  ;;  %6451 = vrcp.f32 %v804_v21  ;;  %v8444_v12 = vsub.s32 1, %v8428_v18 }
 0x158   : > { %1257 = vmatprep.mubr.bf16.mxu1 %v11969_v30  ;;  %1450 = vmatprep.mubr.bf16.mxu0 %v11969_v30  ;;  %v6436_v42 = vpop.eup %6435  ;;  %12205 = vst [vmem:[#allocation18_spill] sm:$0xff] %v8318_v22  ;;  %6453 = vrcp.f32 %v805_v23  ;;  %12212 = vst [vmem:[#allocation25_spill] sm:$0xff] %v8437_v4  ;;  %v8448_v26 = vrot.slane %v942_v7, %v8437_v4 }
 0x159   : > { %v6438_v25 = vpop.eup %6437  ;;  %v896_v5 = vmul.f32 %v6436_v42, %v8228_v62  ;;  %12213 = vst [vmem:[#allocation26_spill] sm:$0xff] %v8444_v12  ;;  %v8455_v13 = vrot.slane %v942_v7, %v8444_v12 }
 0x15a   : > { %v6440_v44 = vpop.eup %6439  ;;  %v897_v27 = vmul.f32 %v6438_v25, %v8233_v1 }
 0x15b   : > { %v6442_v55 = vpop.eup %6441  ;;  %v806_v28 = vadd.f32 1.0, %v6440_v44 }
 0x15c   : > { %v8328_v33 = vpack.c.bf16 %v897_v27, %v896_v5  ;;  %v807_v36 = vadd.f32 1.0, %v6442_v55 }
 0x15d   : > { %6455 = vrcp.f32 %v806_v28 }
 0x15e   : > { %12206 = vst [vmem:[#allocation19_spill] sm:$0xff] %v8328_v33  ;;  %6457 = vrcp.f32 %v807_v36 }
 0x15f   : > { %5585 = vmatmul.mubr.msk.bf16.gmra.mxu1 %vm1096_vm3, %v8285_v54  ;;  %5601 = vmatmul.mubr.msk.bf16.gmra.mxu0 %vm1096_vm3, %v8285_v54 }
 0x160   : > { %1267 = vmatprep.mubr.bf16.mxu1 %v11969_v30  ;;  %1460 = vmatprep.mubr.bf16.mxu0 %v11969_v30  ;;  %v6444_v60 = vpop.eup %6443 }
 0x161   : > { %v6446_v58 = vpop.eup %6445  ;;  %v898_v1 = vmul.f32 %v6444_v60, %v8246_v49 }
 0x162   : > { %v6448_v62 = vpop.eup %6447  ;;  %v899_v41 = vmul.f32 %v6446_v58, %v8251_v19 }
 0x163   : > { %v6450_v38 = vpop.eup %6449  ;;  %v808_v43 = vadd.f32 1.0, %v6448_v62 }
 0x164   : > { %v6452_v46 = vpop.eup %6451  ;;  %v8338_v47 = vpack.c.bf16 %v899_v41, %v898_v1  ;;  %v809_v48 = vadd.f32 1.0, %v6450_v38 }
 0x165   : > { %v6454_v50 = vpop.eup %6453  ;;  %6459 = vrcp.f32 %v808_v43  ;;  %v900_v49 = vmul.f32 %v6452_v46, %v8265_v35 }
 0x166   : > { %12207 = vst [vmem:[#allocation20_spill] sm:$0xff] %v8338_v47  ;;  %v901_v19 = vmul.f32 %v6454_v50, %v8270_v39  ;;  %6461 = vrcp.f32 %v809_v48 }
 0x167   : > { %5586 = vmatmul.mubr.msk.bf16.gmra.mxu1 %vm1096_vm3, %v8303_v10  ;;  %5602 = vmatmul.mubr.msk.bf16.gmra.mxu0 %vm1096_vm3, %v8303_v10 }
 0x168   : > { %1277 = vmatprep.mubr.bf16.mxu1 %v11969_v30  ;;  %1470 = vmatprep.mubr.bf16.mxu0 %v11969_v30  ;;  %v8348_v52 = vpack.c.bf16 %v901_v19, %v900_v49 }
 0x16a   : > { %v6456_v8 = vpop.eup %6455  ;;  %12208 = vst [vmem:[#allocation21_spill] sm:$0xff] %v8348_v52 }
 0x16b   : > { %v6458_v40 = vpop.eup %6457  ;;  %v902_v57 = vmul.f32 %v6456_v8, %v8283_v53 }
 0x16c   : > { %v903_v35 = vmul.f32 %v6458_v40, %v8288_v59  ;;  %v6329_v59 = vld [vmem:[%s11959_s3 + $0x70] ss:$40 sps:$4 sm:$0xff]  }
 0x16e   : > { %v8358_v11 = vpack.c.bf16 %v903_v35, %v902_v57 }
 0x16f   : > { %5587 = vmatmul.mubr.msk.bf16.gmra.mxu1 %vm1096_vm3, %v8318_v22  ;;  %5603 = vmatmul.mubr.msk.bf16.gmra.mxu0 %vm1096_vm3, %v8318_v22 }
 0x170   : > { %1287 = vmatprep.mubr.bf16.mxu1 %v11969_v30  ;;  %1480 = vmatprep.mubr.bf16.mxu0 %v11969_v30  ;;  %12209 = vst [vmem:[#allocation22_spill] sm:$0xff] %v8358_v11 }
 0x172   : > { %v6460_v39 = vpop.eup %6459 }
 0x173   : > { %v6462_v14 = vpop.eup %6461  ;;  %v904_v61 = vmul.f32 %v6460_v39, %v8301_v6  ;;  %v11964_v6 = vsub.s32 2, %v8428_v18 }
 0x174   : > { %v905_v53 = vmul.f32 %v6462_v14, %v8306_v51  ;;  %v11965_v51 = vsub.s32 3, %v8428_v18 }
 0x175   : > { %v8452_v31 = vrot.slane %v942_v7, %v11964_v6 }
 0x176   : > { %v8368_v0 = vpack.c.bf16 %v905_v53, %v904_v61  ;;  %v8459_v17 = vrot.slane %v942_v7, %v11965_v51 }
 0x177   : > { %5588 = vmatmul.mubr.msk.bf16.gmra.mxu1 %vm1096_vm3, %v8328_v33  ;;  %5604 = vmatmul.mubr.msk.bf16.gmra.mxu0 %vm1096_vm3, %v8328_v33 }
 0x178   : > { %1297 = vmatprep.mubr.bf16.mxu1 %v11969_v30  ;;  %1490 = vmatprep.mubr.bf16.mxu0 %v11969_v30  ;;  %12210 = vst [vmem:[#allocation23_spill] sm:$0xff] %v8368_v0 }
 0x17f   : > { %5589 = vmatmul.mubr.msk.bf16.gmra.mxu1 %vm1096_vm3, %v8338_v47  ;;  %5605 = vmatmul.mubr.msk.bf16.gmra.mxu0 %vm1096_vm3, %v8338_v47 }
 0x180   : > { %1307 = vmatprep.mubr.bf16.mxu1 %v11969_v30  ;;  %1500 = vmatprep.mubr.bf16.mxu0 %v11969_v30 }
 0x187   : > { %5590 = vmatmul.mubr.msk.bf16.gmra.mxu1 %vm1096_vm3, %v8348_v52  ;;  %5606 = vmatmul.mubr.msk.bf16.gmra.mxu0 %vm1096_vm3, %v8348_v52 }
 0x188   : > { %1317 = vmatprep.mubr.bf16.mxu1 %v11969_v30  ;;  %1510 = vmatprep.mubr.bf16.mxu0 %v11969_v30 }
 0x18f   : > { %5591 = vmatmul.mubr.msk.bf16.gmra.mxu1 %vm1096_vm3, %v8358_v11  ;;  %5607 = vmatmul.mubr.msk.bf16.gmra.mxu0 %vm1096_vm3, %v8358_v11 }
 0x190   : > { %1327 = vmatprep.mubr.bf16.mxu1 %v11969_v30  ;;  %1520 = vmatprep.mubr.bf16.mxu0 %v11969_v30 }
 0x197   : > { %5592 = vmatmul.mubr.msk.bf16.gmra.mxu1 %vm1096_vm3, %v8368_v0  ;;  %5608 = vmatmul.mubr.msk.bf16.gmra.mxu0 %vm1096_vm3, %v8368_v0 }
 0x198   : > { %1563 = vmatprep.mubr.bf16.mxu1 %v11969_v30  ;;  %1756 = vmatprep.mubr.bf16.mxu0 %v11969_v30 }
 0x19f   : > { %5609 = vmatmul.mubr.msk.bf16.vlgmr.msra.gmra.mxu1 %vm1096_vm3, %v8110_v29  ;;  %5625 = vmatmul.mubr.msk.bf16.vlgmr.msra.gmra.mxu0 %vm1096_vm3, %v8110_v29 }
 0x1a0   : > { %1930 = vmatpush1.bf16.msra.mxu1 %v6329_v59  ;;  %1573 = vmatprep.mubr.bf16.mxu1 %v11969_v30 }
 0x1a1   : > { %1766 = vmatprep.mubr.bf16.mxu0 %v11969_v30  ;;  %1931 = vmatprep.subr.bf16.mxu1 %v6334_v15 }
 0x1a4   : > { %1932 = vmatpush1.bf16.msra.mxu1 %v6332_v2 }
 0x1a7   : > { %5610 = vmatmul.mubr.msk.bf16.gmra.mxu1 %vm1096_vm3, %v8148_v56  ;;  %5626 = vmatmul.mubr.msk.bf16.gmra.mxu0 %vm1096_vm3, %v8148_v56 }
 0x1a8   : > { %1583 = vmatprep.mubr.bf16.mxu1 %v11969_v30  ;;  %1776 = vmatprep.mubr.bf16.mxu0 %v11969_v30 }
 0x1af   : > { %5611 = vmatmul.mubr.msk.bf16.gmra.mxu1 %vm1096_vm3, %v8167_v9  ;;  %5627 = vmatmul.mubr.msk.bf16.gmra.mxu0 %vm1096_vm3, %v8167_v9 }
 0x1b0   : > { %1593 = vmatprep.mubr.bf16.mxu1 %v11969_v30  ;;  %1786 = vmatprep.mubr.bf16.mxu0 %v11969_v30 }
 0x1b7   : > { %5612 = vmatmul.mubr.msk.bf16.gmra.mxu1 %vm1096_vm3, %v8187_v24  ;;  %5628 = vmatmul.mubr.msk.bf16.gmra.mxu0 %vm1096_vm3, %v8187_v24 }
 0x1b8   : > { %1603 = vmatprep.mubr.bf16.mxu1 %v11969_v30  ;;  %1796 = vmatprep.mubr.bf16.mxu0 %v11969_v30 }
 0x1bf   : > { %5613 = vmatmul.mubr.msk.bf16.gmra.mxu1 %vm1096_vm3, %v8209_v45  ;;  %5629 = vmatmul.mubr.msk.bf16.gmra.mxu0 %vm1096_vm3, %v8209_v45 }
 0x1c0   : > { %1613 = vmatprep.mubr.bf16.mxu1 %v11969_v30  ;;  %1806 = vmatprep.mubr.bf16.mxu0 %v11969_v30 }
 0x1c7   : > { %5614 = vmatmul.mubr.msk.bf16.gmra.mxu1 %vm1096_vm3, %v8230_v63  ;;  %5630 = vmatmul.mubr.msk.bf16.gmra.mxu0 %vm1096_vm3, %v8230_v63 }
 0x1c8   : > { %1623 = vmatprep.mubr.bf16.mxu1 %v11969_v30  ;;  %1816 = vmatprep.mubr.bf16.mxu0 %v11969_v30 }
 0x1cf   : > { %5615 = vmatmul.mubr.msk.bf16.gmra.mxu1 %vm1096_vm3, %v8248_v16  ;;  %5631 = vmatmul.mubr.msk.bf16.gmra.mxu0 %vm1096_vm3, %v8248_v16 }
 0x1d0   : > { %1633 = vmatprep.mubr.bf16.mxu1 %v11969_v30  ;;  %1826 = vmatprep.mubr.bf16.mxu0 %v11969_v30 }
 0x1d7   : > { %5616 = vmatmul.mubr.msk.bf16.gmra.mxu1 %vm1096_vm3, %v8267_v37  ;;  %5632 = vmatmul.mubr.msk.bf16.gmra.mxu0 %vm1096_vm3, %v8267_v37 }
 0x1d8   : > { %1643 = vmatprep.mubr.bf16.mxu1 %v11969_v30  ;;  %1836 = vmatprep.mubr.bf16.mxu0 %v11969_v30 }
 0x1df   : > { %v1179_v34 = vpop.f32.mrf.mxu1  ;;  %v1372_v32 = vpop.f32.mrf.mxu0  ;;  %5617 = vmatmul.mubr.msk.bf16.gmra.mxu1 %vm1096_vm3, %v8285_v54  ;;  %5633 = vmatmul.mubr.msk.bf16.gmra.mxu0 %vm1096_vm3, %v8285_v54 }
 0x1e0   : > { %v8466_v20 = vadd.f32 %v1179_v34, %v8448_v26  ;;  %v8469_v21 = vadd.f32 %v1372_v32, %v8452_v31  ;;  %1653 = vmatprep.mubr.bf16.mxu1 %v11969_v30  ;;  %1846 = vmatprep.mubr.bf16.mxu0 %v11969_v30 }
 0x1e1   : > { %v1181_v42 = vpop.f32.mrf.mxu1  ;;  %v1374_v23 = vpop.f32.mrf.mxu0 }
 0x1e2   : > { %v5657_v25 = vmul.f32 -1.442695, %v8466_v20  ;;  %v5659_v44 = vmul.f32 -1.442695, %v8469_v21  ;;  %v8476_v5 = vadd.f32 %v1181_v42, %v8455_v13  ;;  %v8479_v27 = vadd.f32 %v1374_v23, %v8459_v17 }
 0x1e3   : > { %v1183_v55 = vpop.f32.mrf.mxu1  ;;  %v1376_v28 = vpop.f32.mrf.mxu0 }
 0x1e4   : > { %6463 = vpow2.f32 %v5657_v25  ;;  %v5658_v60 = vmul.f32 -1.442695, %v8476_v5  ;;  %v5660_v36 = vmul.f32 -1.442695, %v8479_v27  ;;  %v8484_v58 = vadd.f32 %v1183_v55, %v8448_v26 }
 0x1e5   : > { %6465 = vpow2.f32 %v5659_v44  ;;  %v8487_v62 = vadd.f32 %v1376_v28, %v8452_v31  ;;  %v1185_v1 = vpop.f32.mrf.mxu1  ;;  %v1378_v41 = vpop.f32.mrf.mxu0 }
 0x1e6   : > { %6467 = vpow2.f32 %v5658_v60  ;;  %v5667_v38 = vmul.f32 -1.442695, %v8484_v58  ;;  %v8491_v43 = vadd.f32 %v1185_v1, %v8455_v13  ;;  %v8494_v46 = vadd.f32 %v1378_v41, %v8459_v17 }
 0x1e7   : > { %6469 = vpow2.f32 %v5660_v36  ;;  %v5669_v48 = vmul.f32 -1.442695, %v8487_v62  ;;  %v1189_v50 = vpop.f32.mrf.mxu1  ;;  %v1382_v49 = vpop.f32.mrf.mxu0  ;;  %5618 = vmatmul.mubr.msk.bf16.gmra.mxu1 %vm1096_vm3, %v8303_v10  ;;  %5634 = vmatmul.mubr.msk.bf16.gmra.mxu0 %vm1096_vm3, %v8303_v10 }
 0x1e8   : > { %6471 = vpow2.f32 %v5667_v38  ;;  %v5668_v19 = vmul.f32 -1.442695, %v8491_v43  ;;  %v5670_v8 = vmul.f32 -1.442695, %v8494_v46  ;;  %v8504_v40 = vadd.f32 %v1189_v50, %v8448_v26  ;;  %1663 = vmatprep.mubr.bf16.mxu1 %v11969_v30  ;;  %1856 = vmatprep.mubr.bf16.mxu0 %v11969_v30 }
 0x1e9   : > { %6473 = vpow2.f32 %v5669_v48  ;;  %v8509_v57 = vadd.f32 %v1382_v49, %v8452_v31  ;;  %v1191_v35 = vpop.f32.mrf.mxu1  ;;  %v1384_v39 = vpop.f32.mrf.mxu0 }
 0x1ea   : > { %6475 = vpow2.f32 %v5668_v19  ;;  %v5677_v14 = vmul.f32 -1.442695, %v8504_v40  ;;  %v8513_v61 = vadd.f32 %v1191_v35, %v8455_v13  ;;  %v8516_v53 = vadd.f32 %v1384_v39, %v8459_v17 }
 0x1eb   : > { %6477 = vpow2.f32 %v5670_v8  ;;  %v5679_v59 = vmul.f32 -1.442695, %v8509_v57  ;;  %v1193_v15 = vpop.f32.mrf.mxu1  ;;  %v1386_v2 = vpop.f32.mrf.mxu0 }
 0x1ec   : > { %6479 = vpow2.f32 %v5677_v14  ;;  %v5678_v7 = vmul.f32 -1.442695, %v8513_v61  ;;  %v5680_v34 = vmul.f32 -1.442695, %v8516_v53  ;;  %v8522_v32 = vadd.f32 %v1193_v15, %v8448_v26 }
 0x1ed   : > { %6481 = vpow2.f32 %v5679_v59  ;;  %v8525_v42 = vadd.f32 %v1386_v2, %v8452_v31  ;;  %v1195_v23 = vpop.f32.mrf.mxu1  ;;  %v1388_v25 = vpop.f32.mrf.mxu0 }
 0x1ee   : > { %6483 = vpow2.f32 %v5678_v7  ;;  %v5687_v44 = vmul.f32 -1.442695, %v8522_v32  ;;  %v8529_v55 = vadd.f32 %v1195_v23, %v8455_v13  ;;  %v8532_v28 = vadd.f32 %v1388_v25, %v8459_v17 }
 0x1ef   : > { %6485 = vpow2.f32 %v5680_v34  ;;  %v5689_v60 = vmul.f32 -1.442695, %v8525_v42  ;;  %v1199_v36 = vpop.f32.mrf.mxu1  ;;  %v1392_v1 = vpop.f32.mrf.mxu0  ;;  %5619 = vmatmul.mubr.msk.bf16.gmra.mxu1 %vm1096_vm3, %v8318_v22  ;;  %5635 = vmatmul.mubr.msk.bf16.gmra.mxu0 %vm1096_vm3, %v8318_v22 }
 0x1f0   : > { %6487 = vpow2.f32 %v5687_v44  ;;  %v5688_v41 = vmul.f32 -1.442695, %v8529_v55  ;;  %v5690_v38 = vmul.f32 -1.442695, %v8532_v28  ;;  %1673 = vmatprep.mubr.bf16.mxu1 %v11969_v30  ;;  %1866 = vmatprep.mubr.bf16.mxu0 %v11969_v30 }
 0x1f1   : > { %v6464_v48 = vpop.eup %6463  ;;  %6489 = vpow2.f32 %v5689_v60  ;;  %v1201_v50 = vpop.f32.mrf.mxu1 }
 0x1f2   : > { %v1394_v49 = vpop.f32.mrf.mxu0  ;;  %v6466_v19 = vpop.eup %6465  ;;  %v3070_v8 = vadd.f32 1.0, %v6464_v48  ;;  %6491 = vpow2.f32 %v5688_v41  ;;  %v8560_v18 = vadd.f32 %v1201_v50, %v8455_v13 }
 0x1f3   : > { %v6468_v35 = vpop.eup %6467  ;;  %v3072_v39 = vadd.f32 1.0, %v6466_v19  ;;  %6493 = vpow2.f32 %v5690_v38  ;;  %v1203_v14 = vpop.f32.mrf.mxu1 }
 0x1f4   : > { %v1396_v59 = vpop.f32.mrf.mxu0  ;;  %v6470_v15 = vpop.eup %6469  ;;  %6495 = vrcp.f32 %v3070_v8  ;;  %v3071_v2 = vadd.f32 1.0, %v6468_v35  ;;  %v8548_v8 = vadd.f32 %v1199_v36, %v8448_v26  ;;  %12214 = vst [vmem:[#allocation27_spill] sm:$0xff] %v8560_v18 }
 0x1f5   : > { %v6472_v7 = vpop.eup %6471  ;;  %6497 = vrcp.f32 %v3072_v39  ;;  %v3073_v34 = vadd.f32 1.0, %v6470_v15  ;;  %v1205_v23 = vpop.f32.mrf.mxu1  ;;  %v8553_v15 = vadd.f32 %v1392_v1, %v8452_v31 }
 0x1f6   : > { %v1398_v25 = vpop.f32.mrf.mxu0  ;;  %v6474_v44 = vpop.eup %6473  ;;  %6499 = vrcp.f32 %v3071_v2  ;;  %v3080_v60 = vadd.f32 1.0, %v6472_v7  ;;  %v8576_v50 = vadd.f32 %v1205_v23, %v8455_v13  ;;  %v12221_v23 = vmov 0  }
 0x1f7   : > { %v6476_v6 = vpop.eup %6475  ;;  %6501 = vrcp.f32 %v3073_v34  ;;  %v3082_v48 = vadd.f32 1.0, %v6474_v44  ;;  %v1209_v41 = vpop.f32.mrf.mxu1  ;;  %5620 = vmatmul.mubr.msk.bf16.gmra.mxu1 %vm1096_vm3, %v8328_v33  ;;  %5636 = vmatmul.mubr.msk.bf16.gmra.mxu0 %vm1096_vm3, %v8328_v33  ;;  %v5699_v4 = vmul.f32 -1.442695, %v8553_v15  ;;  %v8573_v33 = vadd.f32 %v1396_v59, %v8452_v31 }
 0x1f8   : > { %v1402_v51 = vpop.f32.mrf.mxu0  ;;  %v6478_v38 = vpop.eup %6477  ;;  %6503 = vrcp.f32 %v3080_v60  ;;  %v3081_v19 = vadd.f32 1.0, %v6476_v6  ;;  %1683 = vmatprep.mubr.bf16.mxu1 %v11969_v30  ;;  %1876 = vmatprep.mubr.bf16.mxu0 %v11969_v30  ;;  %12218 = vst [vmem:[#allocation31_spill] sm:$0xff] %v8576_v50  ;;  %v8590_v59 = vadd.f32 %v1209_v41, %v8448_v26  ;;  %v5698_v41 = vmul.f32 -1.442695, %v8560_v18 }
 0x1f9   : > { %v6480_v35 = vpop.eup %6479  ;;  %6505 = vrcp.f32 %v3082_v48  ;;  %v3083_v39 = vadd.f32 1.0, %v6478_v38  ;;  %v1211_v2 = vpop.f32.mrf.mxu1  ;;  %v5697_v48 = vmul.f32 -1.442695, %v8548_v8  ;;  %12217 = vst [vmem:[#allocation30_spill] sm:$0xff] %v8573_v33 }
 0x1fa   : > { %v1404_v7 = vpop.f32.mrf.mxu0  ;;  %v6482_v34 = vpop.eup %6481  ;;  %6507 = vrcp.f32 %v3081_v19  ;;  %v3090_v44 = vadd.f32 1.0, %v6480_v35  ;;  %12220 = vst [vmem:[#allocation33_spill] sm:$0xff] %v8590_v59 }
 0x1fb   : > { %v6484_v60 = vpop.eup %6483  ;;  %6509 = vrcp.f32 %v3083_v39  ;;  %v3092_v6 = vadd.f32 1.0, %v6482_v34  ;;  %v1213_v36 = vpop.f32.mrf.mxu1  ;;  %v8606_v54 = vadd.f32 %v1404_v7, %v8459_v17  ;;  %v5717_v7 = vmul.f32 -1.442695, %v8590_v59 }
 0x1fc   : > { %v8555_v3 = vpop.f32.mrf.mxu0  ;;  %v6486_v12 = vpop.eup %6485  ;;  %6511 = vrcp.f32 %v3090_v44  ;;  %v3091_v30 = vadd.f32 1.0, %v6484_v60  ;;  %v8567_v44 = vadd.f32 %v1394_v49, %v8459_v17  ;;  %v8570_v60 = vadd.f32 %v1203_v14, %v8448_v26 }
 0x1fd   : > { %v6488_v38 = vpop.eup %6487  ;;  %6513 = vrcp.f32 %v3092_v6  ;;  %v3093_v1 = vadd.f32 1.0, %v6486_v12  ;;  %v8562_v19 = vpop.f32.mrf.mxu1  ;;  %v8587_v14 = vadd.f32 %v1398_v25, %v8459_v17  ;;  %v8621_v56 = vadd.f32 %v1213_v36, %v8448_v26 }
 0x1fe   : > { %v8564_v35 = vpop.f32.mrf.mxu0  ;;  %v6490_v39 = vpop.eup %6489  ;;  %6515 = vrcp.f32 %v3091_v30  ;;  %v3100_v34 = vadd.f32 1.0, %v6488_v38  ;;  %12215 = vst [vmem:[#allocation28_spill] sm:$0xff] %v8567_v44  ;;  %12216 = vst [vmem:[#allocation29_spill] sm:$0xff] %v8570_v60  ;;  %v5720_v59 = vmul.f32 -1.442695, %v8606_v54  ;;  %v8634_v36 = vadd.f32 %v8555_v3, %v8452_v31 }
 0x1ff   : > { %v6492_v6 = vpop.eup %6491  ;;  %6517 = vrcp.f32 %v3093_v1  ;;  %v3102_v12 = vadd.f32 1.0, %v6490_v39  ;;  %v8578_v22 = vpop.f32.mrf.mxu1  ;;  %5621 = vmatmul.mubr.msk.bf16.gmra.mxu1 %vm1096_vm3, %v8338_v47  ;;  %5637 = vmatmul.mubr.msk.bf16.gmra.mxu0 %vm1096_vm3, %v8338_v47  ;;  %12219 = vst [vmem:[#allocation32_spill] sm:$0xff] %v8587_v14  ;;  %v8595_v39 = vadd.f32 %v1402_v51, %v8452_v31  ;;  %v8598_v47 = vadd.f32 %v1211_v2, %v8455_v13 }
 0x200   : > { %v8580_v10 = vpop.f32.mrf.mxu0  ;;  %v6494_v30 = vpop.eup %6493  ;;  %6519 = vrcp.f32 %v3100_v34  ;;  %v3101_v49 = vadd.f32 1.0, %v6492_v6  ;;  %1693 = vmatprep.mubr.bf16.mxu1 %v12221_v23  ;;  %1886 = vmatprep.mubr.bf16.mxu0 %v12221_v23  ;;  %v5707_v51 = vmul.f32 -1.442695, %v8570_v60  ;;  %v5709_v2 = vmul.f32 -1.442695, %v8573_v33 }
 0x201   : > { %v6496_v38 = vpop.eup %6495  ;;  %6521 = vrcp.f32 %v3102_v12  ;;  %v3103_v1 = vadd.f32 1.0, %v6494_v30  ;;  %12222 = vst [vmem:[#allocation34_spill] sm:$0xff] %v8595_v39  ;;  %12223 = vst [vmem:[#allocation35_spill] sm:$0xff] %v8598_v47  ;;  %v8600_v34 = vpop.f32.mrf.mxu1  ;;  %v5700_v12 = vmul.f32 -1.442695, %v8567_v44 }
 0x202   : > { %v8602_v25 = vpop.f32.mrf.mxu0  ;;  %v6498_v6 = vpop.eup %6497  ;;  %6523 = vrcp.f32 %v3101_v49  ;;  %v5708_v49 = vmul.f32 -1.442695, %v8576_v50  ;;  %v5710_v45 = vmul.f32 -1.442695, %v8587_v14  ;;  %v5718_v9 = vmul.f32 -1.442695, %v8598_v47 }
 0x203   : > { %v6500_v37 = vpop.eup %6499  ;;  %6525 = vrcp.f32 %v3103_v1  ;;  %v8611_v30 = vpop.f32.mrf.mxu1  ;;  %v5719_v1 = vmul.f32 -1.442695, %v8595_v39  ;;  %v4030_v50 = vmul.f32 %v6496_v38, %v8466_v20  ;;  %v4032_v39 = vmul.f32 %v6498_v6, %v8469_v21 }
 0x204   : > { %v8613_v16 = vpop.f32.mrf.mxu0  ;;  %v6502_v63 = vpop.eup %6501  ;;  %6527 = vpow2.f32 %v5697_v48  ;;  %v4031_v20 = vmul.f32 %v6500_v37, %v8476_v5 }
 0x205   : > { %v6504_v24 = vpop.eup %6503  ;;  %6529 = vpow2.f32 %v5699_v4  ;;  %v8623_v33 = vpop.f32.mrf.mxu1 }
 0x206   : > { %v8625_v60 = vpop.f32.mrf.mxu0  ;;  %v6506_v48 = vpop.eup %6505  ;;  %v4040_v14 = vmul.f32 %v6504_v24, %v8484_v58  ;;  %6531 = vpow2.f32 %v5698_v41 }
 0x207   : > { %v6508_v4 = vpop.eup %6507  ;;  %v4042_v47 = vmul.f32 %v6506_v48, %v8487_v62  ;;  %6533 = vpow2.f32 %v5700_v12  ;;  %v8636_v44 = vpop.f32.mrf.mxu1  ;;  %5622 = vmatmul.mubr.msk.bf16.gmra.mxu1 %vm1096_vm3, %v8348_v52  ;;  %5638 = vmatmul.mubr.msk.bf16.gmra.mxu0 %vm1096_vm3, %v8348_v52  ;;  %v4033_v62 = vmul.f32 %v6502_v63, %v8479_v27 }
 0x208   : > { %v8638_v18 = vpop.f32.mrf.mxu0  ;;  %v6510_v24 = vpop.eup %6509  ;;  %v4352_v21 = vadd.f32 %v4040_v14, %v4030_v50  ;;  %v4041_v58 = vmul.f32 %v6508_v4, %v8491_v43  ;;  %6535 = vpow2.f32 %v5707_v51  ;;  %1703 = vmatprep.mubr.bf16.mxu1 %v12221_v23  ;;  %1896 = vmatprep.mubr.bf16.mxu0 %v12221_v23  ;;  %v8657_v50 = vadd.f32 %v8562_v19, %v8455_v13 }
 0x209   : > { %v6512_v3 = vpop.eup %6511  ;;  %v4426_v38 = vadd.f32 %v4042_v47, %v4032_v39  ;;  %v4043_v6 = vmul.f32 %v6510_v24, %v8494_v46  ;;  %6537 = vpow2.f32 %v5709_v2  ;;  %v8650_v41 = vpop.f32.mrf.mxu1  ;;  %v8662_v47 = vadd.f32 %v8564_v35, %v8459_v17 }
 0x20a   : > { %v8652_v12 = vpop.f32.mrf.mxu0  ;;  %v6514_v37 = vpop.eup %6513  ;;  %v4389_v5 = vadd.f32 %v4041_v58, %v4031_v20  ;;  %v4050_v43 = vmul.f32 %v6512_v3, %v8504_v40  ;;  %6539 = vpow2.f32 %v5708_v49  ;;  %v5727_v19 = vmul.f32 -1.442695, %v8621_v56 }
 0x20b   : > { %v6516_v14 = vpop.eup %6515  ;;  %v4463_v51 = vadd.f32 %v4043_v6, %v4033_v62  ;;  %v4052_v63 = vmul.f32 %v6514_v37, %v8509_v57  ;;  %6541 = vpow2.f32 %v5710_v45  ;;  %v8664_v27 = vpop.f32.mrf.mxu1  ;;  %v5729_v45 = vmul.f32 -1.442695, %v8634_v36 }
 0x20c   : > { %v8666_v46 = vpop.f32.mrf.mxu0  ;;  %v6518_v39 = vpop.eup %6517  ;;  %v4353_v40 = vadd.f32 %v4352_v21, %v4050_v43  ;;  %v4051_v2 = vmul.f32 %v6516_v14, %v8513_v61  ;;  %6543 = vpow2.f32 %v5717_v7  ;;  %v5728_v61 = vmul.f32 -1.442695, %v8657_v50 }
 0x20d   : > { %v6520_v49 = vpop.eup %6519  ;;  %v4427_v48 = vadd.f32 %v4426_v38, %v4052_v63  ;;  %v4053_v57 = vmul.f32 %v6518_v39, %v8516_v53  ;;  %6545 = vpow2.f32 %v5719_v1  ;;  %v8672_v35 = vpop.f32.mrf.mxu1  ;;  %v5730_v53 = vmul.f32 -1.442695, %v8662_v47 }
 0x20e   : > { %v8674_v4 = vpop.f32.mrf.mxu0  ;;  %v6522_v24 = vpop.eup %6521  ;;  %v4390_v20 = vadd.f32 %v4389_v5, %v4051_v2  ;;  %v4060_v21 = vmul.f32 %v6520_v49, %v8522_v32  ;;  %6547 = vpow2.f32 %v5718_v9 }
 0x20f   : > { %v6524_v7 = vpop.eup %6523  ;;  %v4464_v58 = vadd.f32 %v4463_v51, %v4053_v57  ;;  %v4062_v3 = vmul.f32 %v6522_v24, %v8525_v42  ;;  %6549 = vpow2.f32 %v5720_v59  ;;  %v8680_v1 = vpop.f32.mrf.mxu1  ;;  %5623 = vmatmul.mubr.msk.bf16.gmra.mxu1 %vm1096_vm3, %v8358_v11  ;;  %5639 = vmatmul.mubr.msk.bf16.gmra.mxu0 %vm1096_vm3, %v8358_v11 }
 0x210   : > { %v8682_v62 = vpop.f32.mrf.mxu0  ;;  %v6526_v9 = vpop.eup %6525  ;;  %v8688_v32 = vadd.f32 %v4353_v40, %v4060_v21  ;;  %v4061_v38 = vmul.f32 %v6524_v7, %v8529_v55  ;;  %6551 = vpow2.f32 %v5727_v19  ;;  %1713 = vmatprep.mubr.bf16.mxu1 %v12221_v23  ;;  %1906 = vmatprep.mubr.bf16.mxu0 %v12221_v23 }
 0x211   : > { %v6528_v42 = vpop.eup %6527  ;;  %v8693_v59 = vadd.f32 %v4427_v48, %v4062_v3  ;;  %v4063_v6 = vmul.f32 %v6526_v9, %v8532_v28  ;;  %6553 = vpow2.f32 %v5729_v45  ;;  %v8696_v37 = vpop.f32.mrf.mxu1  ;;  %v8722_v9 = vadd.f32 %v8578_v22, %v8448_v26 }
 0x212   : > { %v8698_v5 = vpop.f32.mrf.mxu0  ;;  %v6530_v43 = vpop.eup %6529  ;;  %v8700_v14 = vadd.f32 %v4390_v20, %v4061_v38  ;;  %v3110_v51 = vadd.f32 1.0, %v6528_v42  ;;  %6555 = vpow2.f32 %v5728_v61  ;;  %v8735_v22 = vadd.f32 %v8600_v34, %v8455_v13 }
 0x213   : > { %v6532_v55 = vpop.eup %6531  ;;  %v8702_v63 = vadd.f32 %v4464_v58, %v4063_v6  ;;  %v3112_v39 = vadd.f32 1.0, %v6530_v43  ;;  %6557 = vpow2.f32 %v5730_v53  ;;  %v8704_v40 = vpop.f32.mrf.mxu1  ;;  %v8727_v6 = vadd.f32 %v8580_v10, %v8452_v31 }
 0x214   : > { %v8706_v2 = vpop.f32.mrf.mxu0  ;;  %v6534_v28 = vpop.eup %6533  ;;  %6559 = vrcp.f32 %v3110_v51  ;;  %v3111_v19 = vadd.f32 1.0, %v6532_v55 }
 0x215   : > { %v6536_v49 = vpop.eup %6535  ;;  %6561 = vrcp.f32 %v3112_v39  ;;  %v3113_v48 = vadd.f32 1.0, %v6534_v28  ;;  %v8708_v57 = vpop.f32.mrf.mxu1 }
 0x216   : > { %v8710_v45 = vpop.f32.mrf.mxu0  ;;  %v6538_v24 = vpop.eup %6537  ;;  %6563 = vrcp.f32 %v3111_v19  ;;  %v3120_v20 = vadd.f32 1.0, %v6536_v49  ;;  %v8739_v49 = vadd.f32 %v8602_v25, %v8459_v17  ;;  %v8753_v25 = vadd.f32 %v8613_v16, %v8452_v31 }
 0x217   : > { %v6540_v21 = vpop.eup %6539  ;;  %6565 = vrcp.f32 %v3113_v48  ;;  %v3122_v61 = vadd.f32 1.0, %v6538_v24  ;;  %v8712_v7 = vpop.f32.mrf.mxu1  ;;  %5624 = vmatmul.mubr.msk.bf16.gmra.mxu1 %vm1096_vm3, %v8368_v0  ;;  %5640 = vmatmul.mubr.msk.bf16.gmra.mxu0 %vm1096_vm3, %v8368_v0  ;;  %v8765_v16 = vadd.f32 %v8625_v60, %v8459_v17 }
 0x218   : > { %v8714_v58 = vpop.f32.mrf.mxu0  ;;  %v6542_v3 = vpop.eup %6541  ;;  %6567 = vrcp.f32 %v3120_v20  ;;  %v3121_v53 = vadd.f32 1.0, %v6540_v21  ;;  %1949 = vmatprep.mubr.bf16.mxu1 %v12221_v23  ;;  %12224 = vst [vmem:[#allocation36_spill] sm:$0xff] %v8739_v49  ;;  %v5737_v20 = vmul.f32 -1.442695, %v8722_v9  ;;  %v8746_v21 = vadd.f32 %v8611_v30, %v8448_v26 }
 0x219   : > { %v6544_v38 = vpop.eup %6543  ;;  %6569 = vrcp.f32 %v3122_v61  ;;  %v3123_v42 = vadd.f32 1.0, %v6542_v3  ;;  %v8729_v43 = vpop.f32.mrf.mxu1  ;;  %v8760_v30 = vadd.f32 %v8623_v33, %v8455_v13  ;;  %12228 = vst [vmem:[#allocation40_spill] sm:$0xff] %v8765_v16  ;;  %v5749_v52 = vmul.f32 -1.442695, %v8753_v25 }
 0x21a   : > { %v8731_v51 = vpop.f32.mrf.mxu0  ;;  %v6546_v55 = vpop.eup %6545  ;;  %6571 = vrcp.f32 %v3121_v53  ;;  %v3130_v39 = vadd.f32 1.0, %v6544_v38  ;;  %v5739_v53 = vmul.f32 -1.442695, %v8727_v6  ;;  %v5747_v33 = vmul.f32 -1.442695, %v8746_v21 }
 0x21b   : > { %v6548_v28 = vpop.eup %6547  ;;  %6573 = vrcp.f32 %v3123_v42  ;;  %v3132_v19 = vadd.f32 1.0, %v6546_v55  ;;  %v8741_v10 = vpop.f32.mrf.mxu1 }
 0x21c   : > { %12225 = vst [vmem:[#allocation37_spill] sm:$0xff] %v8741_v10  ;;  %v6550_v48 = vpop.eup %6549  ;;  %6575 = vrcp.f32 %v3130_v39  ;;  %v3131_v24 = vadd.f32 1.0, %v6548_v28  ;;  %v8748_v34 = vpop.f32.mrf.mxu0  ;;  %v5738_v39 = vmul.f32 -1.442695, %v8735_v22 }
 0x21d   : > { %12226 = vst [vmem:[#allocation38_spill] sm:$0xff] %v8748_v34  ;;  %v6552_v61 = vpop.eup %6551  ;;  %6577 = vrcp.f32 %v3132_v19  ;;  %v3133_v3 = vadd.f32 1.0, %v6550_v48  ;;  %v8755_v38 = vpop.f32.mrf.mxu1  ;;  %v5740_v48 = vmul.f32 -1.442695, %v8739_v49 }
 0x21e   : > { %12227 = vst [vmem:[#allocation39_spill] sm:$0xff] %v8755_v38  ;;  %v6554_v42 = vpop.eup %6553  ;;  %6579 = vrcp.f32 %v3131_v24  ;;  %v3140_v55 = vadd.f32 1.0, %v6552_v61 }
 0x21f   : > { %v6556_v28 = vpop.eup %6555  ;;  %6581 = vrcp.f32 %v3133_v3  ;;  %v3142_v19 = vadd.f32 1.0, %v6554_v42  ;;  %v8767_v0 = vpop.f32.mrf.mxu1  ;;  %5641 = vmatmul.mubr.msk.bf16.vlgmr.msra.gmra.mxu1 %vm1096_vm3, %v8110_v29  ;;  %v8774_v3 = vadd.f32 %v8636_v44, %v8448_v26  ;;  %v8782_v29 = vadd.f32 %v8638_v18, %v8452_v31 }
 0x220   : > { %12229 = vst [vmem:[#allocation41_spill] sm:$0xff] %v8767_v0  ;;  %v6558_v24 = vpop.eup %6557  ;;  %6583 = vrcp.f32 %v3140_v55  ;;  %v3141_v61 = vadd.f32 1.0, %v6556_v28  ;;  %v8776_v42 = vpop.f32.mrf.mxu0  ;;  %1959 = vmatprep.mubr.bf16.mxu1 %v12221_v23  ;;  %v5748_v44 = vmul.f32 -1.442695, %v8760_v30  ;;  %v8790_v0 = vadd.f32 %v8650_v41, %v8455_v13 }
 0x221   : > { %12230 = vst [vmem:[#allocation42_spill] sm:$0xff] %v8774_v3  ;;  %12231 = vst [vmem:[#allocation43_spill] sm:$0xff] %v8776_v42  ;;  %v6560_v60 = vpop.eup %6559  ;;  %6585 = vrcp.f32 %v3142_v19  ;;  %v3143_v11 = vadd.f32 1.0, %v6558_v24  ;;  %v8784_v55 = vpop.f32.mrf.mxu1  ;;  %v5750_v42 = vmul.f32 -1.442695, %v8765_v16  ;;  %v8796_v18 = vadd.f32 %v8652_v12, %v8459_v17 }
 0x222   : > { %12232 = vst [vmem:[#allocation44_spill] sm:$0xff] %v8784_v55  ;;  %v6562_v28 = vpop.eup %6561  ;;  %v4070_v49 = vmul.f32 %v6560_v60, %v8548_v8  ;;  %6587 = vrcp.f32 %v3141_v61  ;;  %v12234_v60 = vld [vmem:[#allocation27_spill] sm:$0xff]  ;;  %v5757_v41 = vmul.f32 -1.442695, %v8774_v3  ;;  %v8803_v34 = vpop.f32.mrf.mxu0  ;;  %v5759_v12 = vmul.f32 -1.442695, %v8782_v29 }
 0x223   : > { %v6564_v19 = vpop.eup %6563  ;;  %v4072_v24 = vmul.f32 %v6562_v28, %v8553_v15  ;;  %6589 = vrcp.f32 %v3143_v11  ;;  %v8798_v55 = vpop.f32.mrf.mxu1  ;;  %12235 = vst [vmem:[#allocation27_spill] sm:$0xff] %v8803_v34  ;;  %v12236_v28 = vld [vmem:[#allocation28_spill] sm:$0xff]  ;;  %v12238_v3 = vld [vmem:[#allocation30_spill] sm:$0xff] }
 0x224   : > { %12233 = vst [vmem:[#allocation45_spill] sm:$0xff] %v8798_v55  ;;  %v6566_v8 = vpop.eup %6565  ;;  %v4355_v61 = vadd.f32 %v8688_v32, %v4070_v49  ;;  %v4071_v38 = vmul.f32 %v6564_v19, %v12234_v60  ;;  %6591 = vpow2.f32 %v5737_v20  ;;  %v12237_v49 = vld [vmem:[#allocation29_spill] sm:$0xff]  ;;  %v5758_v20 = vmul.f32 -1.442695, %v8790_v0 }
 0x225   : > { %v6568_v15 = vpop.eup %6567  ;;  %v4429_v11 = vadd.f32 %v8693_v59, %v4072_v24  ;;  %v4073_v16 = vmul.f32 %v6566_v8, %v12236_v28  ;;  %6593 = vpow2.f32 %v5739_v53  ;;  %v8808_v10 = vpop.f32.mrf.mxu1  ;;  %v5760_v53 = vmul.f32 -1.442695, %v8796_v18  ;;  %v12239_v8 = vld [vmem:[#allocation9_spill] sm:$0xff] }
 0x226   : > { %v6570_v55 = vpop.eup %6569  ;;  %v4392_v32 = vadd.f32 %v8700_v14, %v4071_v38  ;;  %v4080_v19 = vmul.f32 %v6568_v15, %v12237_v49  ;;  %6595 = vpow2.f32 %v5738_v39  ;;  %v12240_v38 = vld [vmem:[#allocation31_spill] sm:$0xff]  ;;  %v8823_v39 = vadd.f32 %v8664_v27, %v8448_v26 }
 0x227   : > { %v6572_v60 = vpop.eup %6571  ;;  %v4466_v34 = vadd.f32 %v8702_v63, %v4073_v16  ;;  %v4082_v59 = vmul.f32 %v6570_v55, %v12238_v3  ;;  %6597 = vpow2.f32 %v5740_v48  ;;  %v8816_v24 = vpop.f32.mrf.mxu1  ;;  %5642 = vmatmul.mubr.msk.bf16.gmra.mxu1 %vm1096_vm3, %v12239_v8  ;;  %v12241_v3 = vld [vmem:[#allocation32_spill] sm:$0xff]  ;;  %v8831_v49 = vadd.f32 %v8666_v46, %v8452_v31 }
 0x228   : > { %v6574_v28 = vpop.eup %6573  ;;  %v4356_v14 = vadd.f32 %v4355_v61, %v4080_v19  ;;  %v4081_v15 = vmul.f32 %v6572_v60, %v12240_v38  ;;  %6599 = vpow2.f32 %v5747_v33  ;;  %v8825_v63 = vpop.f32.mrf.mxu0  ;;  %1969 = vmatprep.mubr.bf16.mxu1 %v12221_v23  ;;  %v12242_v60 = vld [vmem:[#allocation33_spill] sm:$0xff]  ;;  %v8838_v8 = vadd.f32 %v8672_v35, %v8455_v13 }
 0x229   : > { %v6576_v48 = vpop.eup %6575  ;;  %v4430_v16 = vadd.f32 %v4429_v11, %v4082_v59  ;;  %v4083_v55 = vmul.f32 %v6574_v28, %v12241_v3  ;;  %6601 = vpow2.f32 %v5749_v52  ;;  %v8833_v61 = vpop.f32.mrf.mxu1  ;;  %v12243_v59 = vld [vmem:[#allocation34_spill] sm:$0xff]  ;;  %v8843_v52 = vadd.f32 %v8674_v4, %v8459_v17 }
 0x22a   : > { %v6578_v33 = vpop.eup %6577  ;;  %v4393_v19 = vadd.f32 %v4392_v32, %v4081_v15  ;;  %v4090_v27 = vmul.f32 %v6576_v48, %v12242_v60  ;;  %6603 = vpow2.f32 %v5748_v44  ;;  %v12244_v15 = vld [vmem:[#allocation35_spill] sm:$0xff]  ;;  %v5767_v44 = vmul.f32 -1.442695, %v8823_v39  ;;  %v8849_v35 = vpop.f32.mrf.mxu0 }
 0x22b   : > { %v6580_v38 = vpop.eup %6579  ;;  %v4467_v11 = vadd.f32 %v4466_v34, %v4083_v55  ;;  %v4092_v28 = vmul.f32 %v6578_v33, %v12243_v59  ;;  %6605 = vpow2.f32 %v5750_v42  ;;  %v8845_v46 = vpop.f32.mrf.mxu1  ;;  %v5769_v42 = vmul.f32 -1.442695, %v8831_v49 }
 0x22c   : > { %v6582_v3 = vpop.eup %6581  ;;  %v4357_v32 = vadd.f32 %v4356_v14, %v4090_v27  ;;  %v4091_v48 = vmul.f32 %v6580_v38, %v12244_v15  ;;  %6607 = vpow2.f32 %v5757_v41  ;;  %v5768_v41 = vmul.f32 -1.442695, %v8838_v8 }
 0x22d   : > { %v6584_v60 = vpop.eup %6583  ;;  %v4431_v34 = vadd.f32 %v4430_v16, %v4092_v28  ;;  %v4093_v55 = vmul.f32 %v6582_v3, %v8606_v54  ;;  %6609 = vpow2.f32 %v5759_v12  ;;  %v8853_v4 = vpop.f32.mrf.mxu1  ;;  %v5770_v16 = vmul.f32 -1.442695, %v8843_v52  ;;  %v12246_v12 = vld [vmem:[#allocation10_spill] sm:$0xff] }
 0x22e   : > { %v6586_v33 = vpop.eup %6585  ;;  %v4394_v59 = vadd.f32 %v4393_v19, %v4091_v48  ;;  %v4100_v14 = vmul.f32 %v6584_v60, %v8621_v56  ;;  %6611 = vpow2.f32 %v5758_v20  ;;  %v8866_v20 = vpop.f32.mrf.mxu0 }
 0x22f   : > { %v6588_v27 = vpop.eup %6587  ;;  %v4468_v38 = vadd.f32 %v4467_v11, %v4093_v55  ;;  %v4102_v15 = vmul.f32 %v6586_v33, %v8634_v36  ;;  %6613 = vpow2.f32 %v5760_v53  ;;  %v8859_v54 = vpop.f32.mrf.mxu1  ;;  %5643 = vmatmul.mubr.msk.bf16.gmra.mxu1 %vm1096_vm3, %v12246_v12 }
 0x230   : > { %12245 = vst [vmem:[#allocation28_spill] sm:$0xff] %v8859_v54  ;;  %v6590_v28 = vpop.eup %6589  ;;  %v8863_v3 = vadd.f32 %v4357_v32, %v4100_v14  ;;  %v4101_v56 = vmul.f32 %v6588_v27, %v8657_v50  ;;  %6615 = vpow2.f32 %v5767_v44  ;;  %1979 = vmatprep.mubr.bf16.mxu1 %v12221_v23  ;;  %v8880_v27 = vpop.f32.mrf.mxu0 }
 0x231   : > { %v6592_v19 = vpop.eup %6591  ;;  %v8869_v36 = vadd.f32 %v4431_v34, %v4102_v15  ;;  %v4103_v53 = vmul.f32 %v6590_v28, %v8662_v47  ;;  %6617 = vpow2.f32 %v5769_v42  ;;  %v8872_v11 = vpop.f32.mrf.mxu1 }
 0x232   : > { %12247 = vst [vmem:[#allocation29_spill] sm:$0xff] %v8872_v11  ;;  %v6594_v48 = vpop.eup %6593  ;;  %v8874_v60 = vadd.f32 %v4394_v59, %v4101_v56  ;;  %v3150_v32 = vadd.f32 1.0, %v6592_v19  ;;  %6619 = vpow2.f32 %v5768_v41 }
 0x233   : > { %v6596_v55 = vpop.eup %6595  ;;  %v8876_v50 = vadd.f32 %v4468_v38, %v4103_v53  ;;  %v3152_v44 = vadd.f32 1.0, %v6594_v48  ;;  %6621 = vpow2.f32 %v5770_v16  ;;  %v8878_v33 = vpop.f32.mrf.mxu1  ;;  %v12251_v16 = vld [vmem:[#allocation11_spill] sm:$0xff] }
 0x234   : > { %12248 = vst [vmem:[#allocation30_spill] sm:$0xff] %v8878_v33  ;;  %v6598_v14 = vpop.eup %6597  ;;  %6623 = vrcp.f32 %v3150_v32  ;;  %v3151_v34 = vadd.f32 1.0, %v6596_v55  ;;  %v8888_v53 = vpop.f32.mrf.mxu0 }
 0x235   : > { %v6600_v47 = vpop.eup %6599  ;;  %6625 = vrcp.f32 %v3152_v44  ;;  %v3153_v42 = vadd.f32 1.0, %v6598_v14  ;;  %v8882_v15 = vpop.f32.mrf.mxu1 }
 0x236   : > { %12249 = vst [vmem:[#allocation9_spill] sm:$0xff] %v8882_v15  ;;  %v6602_v59 = vpop.eup %6601  ;;  %6627 = vrcp.f32 %v3151_v34  ;;  %v3160_v41 = vadd.f32 1.0, %v6600_v47  ;;  %v8895_v34 = vadd.f32 %v8680_v1, %v8448_v26  ;;  %v8948_v15 = vadd.f32 %v8712_v7, %v8448_v26 }
 0x237   : > { %v6604_v12 = vpop.eup %6603  ;;  %6629 = vrcp.f32 %v3153_v42  ;;  %v3162_v38 = vadd.f32 1.0, %v6602_v59  ;;  %v8884_v28 = vpop.f32.mrf.mxu1  ;;  %5644 = vmatmul.mubr.msk.bf16.gmra.mxu1 %vm1096_vm3, %v12251_v16  ;;  %v8899_v59 = vadd.f32 %v8682_v62, %v8452_v31  ;;  %v8905_v16 = vadd.f32 %v8696_v37, %v8455_v13 }
 0x238   : > { %12250 = vst [vmem:[#allocation31_spill] sm:$0xff] %v8884_v28  ;;  %v6606_v56 = vpop.eup %6605  ;;  %6631 = vrcp.f32 %v3160_v41  ;;  %v3161_v19 = vadd.f32 1.0, %v6604_v12  ;;  %1989 = vmatprep.mubr.bf16.mxu1 %v12221_v23  ;;  %v8918_v37 = vadd.f32 %v8704_v40, %v8448_v26 }
 0x239   : > { %v6608_v48 = vpop.eup %6607  ;;  %6633 = vrcp.f32 %v3162_v38  ;;  %v3163_v32 = vadd.f32 1.0, %v6606_v56  ;;  %v8891_v55 = vpop.f32.mrf.mxu1  ;;  %v5778_v40 = vmul.f32 -1.442695, %v8905_v16 }
 0x23a   : > { %12252 = vst [vmem:[#allocation32_spill] sm:$0xff] %v8891_v55  ;;  %v6610_v44 = vpop.eup %6609  ;;  %6635 = vrcp.f32 %v3161_v19  ;;  %v3170_v14 = vadd.f32 1.0, %v6608_v48  ;;  %v8907_v56 = vpop.f32.mrf.mxu0  ;;  %v8911_v48 = vadd.f32 %v8698_v5, %v8459_v17  ;;  %v8923_v5 = vadd.f32 %v8706_v2, %v8452_v31 }
 0x23b   : > { %v6612_v47 = vpop.eup %6611  ;;  %6637 = vrcp.f32 %v3163_v32  ;;  %v3172_v42 = vadd.f32 1.0, %v6610_v44  ;;  %v8901_v41 = vpop.f32.mrf.mxu1 }
 0x23c   : > { %12253 = vst [vmem:[#allocation33_spill] sm:$0xff] %v8901_v41  ;;  %v6614_v12 = vpop.eup %6613  ;;  %6639 = vrcp.f32 %v3170_v14  ;;  %v3171_v38 = vadd.f32 1.0, %v6612_v47  ;;  %v5777_v14 = vmul.f32 -1.442695, %v8895_v34  ;;  %v5789_v33 = vmul.f32 -1.442695, %v8923_v5 }
 0x23d   : > { %v6616_v1 = vpop.eup %6615  ;;  %6641 = vrcp.f32 %v3172_v42  ;;  %v3173_v19 = vadd.f32 1.0, %v6614_v12  ;;  %v8913_v62 = vpop.f32.mrf.mxu1  ;;  %v5779_v42 = vmul.f32 -1.442695, %v8899_v59 }
 0x23e   : > { %12254 = vst [vmem:[#allocation34_spill] sm:$0xff] %v8913_v62  ;;  %v6618_v32 = vpop.eup %6617  ;;  %6643 = vrcp.f32 %v3171_v38  ;;  %v3180_v44 = vadd.f32 1.0, %v6616_v1  ;;  %v12256_v62 = vld [vmem:[#allocation12_spill] sm:$0xff] }
 0x23f   : > { %v6620_v47 = vpop.eup %6619  ;;  %6645 = vrcp.f32 %v3173_v19  ;;  %v3182_v41 = vadd.f32 1.0, %v6618_v32  ;;  %v8925_v12 = vpop.f32.mrf.mxu1  ;;  %5645 = vmatmul.mubr.msk.bf16.gmra.mxu1 %vm1096_vm3, %v12256_v62  ;;  %v8932_v19 = vadd.f32 %v8708_v57, %v8455_v13  ;;  %v8940_v62 = vadd.f32 %v8710_v45, %v8459_v17 }
 0x240   : > { %12255 = vst [vmem:[#allocation35_spill] sm:$0xff] %v8925_v12  ;;  %v6622_v38 = vpop.eup %6621  ;;  %6647 = vrcp.f32 %v3180_v44  ;;  %v3181_v1 = vadd.f32 1.0, %v6620_v47  ;;  %v8934_v32 = vpop.f32.mrf.mxu0  ;;  %1999 = vmatprep.mubr.bf16.mxu1 %v12221_v23  ;;  %v5780_v12 = vmul.f32 -1.442695, %v8911_v48  ;;  %v5787_v57 = vmul.f32 -1.442695, %v8918_v37 }
 0x241   : > { %v6624_v2 = vpop.eup %6623  ;;  %6649 = vrcp.f32 %v3182_v41  ;;  %v3183_v55 = vadd.f32 1.0, %v6622_v38  ;;  %v8942_v44 = vpop.f32.mrf.mxu1  ;;  %v8954_v45 = vadd.f32 %v8714_v58, %v8452_v31  ;;  %v5788_v7 = vmul.f32 -1.442695, %v8932_v19 }
 0x242   : > { %12257 = vst [vmem:[#allocation10_spill] sm:$0xff] %v8942_v44  ;;  %v6626_v47 = vpop.eup %6625  ;;  %v4110_v28 = vmul.f32 %v6624_v2, %v8722_v9  ;;  %6651 = vrcp.f32 %v3181_v1  ;;  %v8963_v11 = vpop.f32.mrf.mxu0  ;;  %v5790_v58 = vmul.f32 -1.442695, %v8940_v62 }
 0x243   : > { %v6628_v41 = vpop.eup %6627  ;;  %v4112_v38 = vmul.f32 %v6626_v47, %v8727_v6  ;;  %6653 = vrcp.f32 %v3183_v55  ;;  %v8956_v44 = vpop.f32.mrf.mxu1  ;;  %12259 = vst [vmem:[#allocation12_spill] sm:$0xff] %v8963_v11  ;;  %v8969_v47 = vadd.f32 %v8729_v43, %v8455_v13  ;;  %v8980_v43 = vadd.f32 %v8731_v51, %v8459_v17 }
 0x244   : > { %12258 = vst [vmem:[#allocation11_spill] sm:$0xff] %v8956_v44  ;;  %v8958_v9 = vpop.eup %6629  ;;  %v4359_v1 = vadd.f32 %v8863_v3, %v4110_v28  ;;  %v4111_v2 = vmul.f32 %v6628_v41, %v8735_v22  ;;  %6655 = vpow2.f32 %v5777_v14  ;;  %v5797_v14 = vmul.f32 -1.442695, %v8948_v15 }
 0x245   : > { %v6632_v6 = vpop.eup %6631  ;;  %v4433_v55 = vadd.f32 %v8869_v36, %v4112_v38  ;;  %6657 = vpow2.f32 %v5779_v42  ;;  %v8971_v44 = vpop.f32.mrf.mxu1  ;;  %v5799_v42 = vmul.f32 -1.442695, %v8954_v45 }
 0x246   : > { %12260 = vst [vmem:[#allocation46_spill] sm:$0xff] %v8971_v44  ;;  %v6634_v3 = vpop.eup %6633  ;;  %v4396_v22 = vadd.f32 %v8874_v60, %v4111_v2  ;;  %v4120_v28 = vmul.f32 %v6632_v6, %v8746_v21  ;;  %6659 = vpow2.f32 %v5778_v40  ;;  %v12262_v44 = vld [vmem:[#allocation13_spill] sm:$0xff]  ;;  %v8993_v2 = vpop.f32.mrf.mxu0 }
 0x247   : > { %v6636_v41 = vpop.eup %6635  ;;  %v4122_v36 = vmul.f32 %v6634_v3, %v8753_v25  ;;  %6661 = vpow2.f32 %v5780_v12  ;;  %v8982_v38 = vpop.f32.mrf.mxu1  ;;  %5646 = vmatmul.mubr.msk.bf16.gmra.mxu1 %vm1096_vm3, %v12262_v44  ;;  %v12263_v25 = vld [vmem:[#allocation37_spill] sm:$0xff]  ;;  %12264 = vst [vmem:[#allocation13_spill] sm:$0xff] %v8993_v2  ;;  %v5798_v3 = vmul.f32 -1.442695, %v8969_v47  ;;  %v12265_v44 = vld [vmem:[#allocation38_spill] sm:$0xff] }
 0x248   : > { %12261 = vst [vmem:[#allocation47_spill] sm:$0xff] %v8982_v38  ;;  %v8986_v60 = vpop.eup %6637  ;;  %v4360_v21 = vadd.f32 %v4359_v1, %v4120_v28  ;;  %v4121_v40 = vmul.f32 %v6636_v41, %v8760_v30  ;;  %6663 = vpow2.f32 %v5787_v57  ;;  %v8991_v12 = vadd.f32 %v12263_v25, %v8448_v26  ;;  %2009 = vmatprep.mubr.bf16.mxu1 %v12221_v23  ;;  %v12267_v28 = vld [vmem:[#allocation42_spill] sm:$0xff]  ;;  %v12268_v25 = vld [vmem:[#allocation39_spill] sm:$0xff] }
 0x249   : > { %v6640_v51 = vpop.eup %6639  ;;  %v4434_v6 = vadd.f32 %v4433_v55, %v4122_v36  ;;  %6665 = vpow2.f32 %v5789_v33  ;;  %v8999_v38 = vadd.f32 %v12265_v44, %v8452_v31  ;;  %v9001_v1 = vpop.f32.mrf.mxu1  ;;  %v9006_v2 = vadd.f32 %v12268_v25, %v8455_v13  ;;  %v12269_v36 = vld [vmem:[#allocation43_spill] sm:$0xff] }
 0x24a   : > { %12266 = vst [vmem:[#allocation37_spill] sm:$0xff] %v9001_v1  ;;  %v6642_v30 = vpop.eup %6641  ;;  %v4397_v57 = vadd.f32 %v4396_v22, %v4121_v40  ;;  %v4130_v41 = vmul.f32 %v6640_v51, %v12267_v28  ;;  %6667 = vpow2.f32 %v5788_v7  ;;  %v5800_v55 = vmul.f32 -1.442695, %v8980_v43  ;;  %v9020_v28 = vpop.f32.mrf.mxu0 }
 0x24b   : > { %v6644_v11 = vpop.eup %6643  ;;  %v4132_v33 = vmul.f32 %v6642_v30, %v8782_v29  ;;  %6669 = vpow2.f32 %v5790_v58  ;;  %v9012_v44 = vadd.f32 %v12269_v36, %v8459_v17  ;;  %v9014_v1 = vpop.f32.mrf.mxu1  ;;  %v5807_v51 = vmul.f32 -1.442695, %v8991_v12 }
 0x24c   : > { %12270 = vst [vmem:[#allocation38_spill] sm:$0xff] %v9014_v1  ;;  %v9016_v22 = vpop.eup %6645  ;;  %v4361_v40 = vadd.f32 %v4360_v21, %v4130_v41  ;;  %v4131_v7 = vmul.f32 %v6644_v11, %v8790_v0  ;;  %6671 = vpow2.f32 %v5797_v14  ;;  %v5809_v30 = vmul.f32 -1.442695, %v8999_v38 }
 0x24d   : > { %v6648_v29 = vpop.eup %6647  ;;  %v4435_v58 = vadd.f32 %v4434_v6, %v4132_v33  ;;  %6673 = vpow2.f32 %v5799_v42  ;;  %v9023_v25 = vpop.f32.mrf.mxu1  ;;  %v5808_v21 = vmul.f32 -1.442695, %v9006_v2  ;;  %v5810_v14 = vmul.f32 -1.442695, %v9012_v44  ;;  %v12273_v42 = vld [vmem:[#allocation14_spill] sm:$0xff] }
 0x24e   : > { %12271 = vst [vmem:[#allocation42_spill] sm:$0xff] %v9023_v25  ;;  %v6650_v36 = vpop.eup %6649  ;;  %v4398_v54 = vadd.f32 %v4397_v57, %v4131_v7  ;;  %v4140_v1 = vmul.f32 %v6648_v29, %v8823_v39  ;;  %6675 = vpow2.f32 %v5798_v3  ;;  %v9038_v3 = vpop.f32.mrf.mxu0 }
 0x24f   : > { %v6652_v0 = vpop.eup %6651  ;;  %v4142_v11 = vmul.f32 %v6650_v36, %v8831_v49  ;;  %6677 = vpow2.f32 %v5800_v55  ;;  %v9029_v41 = vpop.f32.mrf.mxu1  ;;  %5647 = vmatmul.mubr.msk.bf16.gmra.mxu1 %vm1096_vm3, %v12273_v42  ;;  %v12276_v42 = vld [vmem:[#allocation41_spill] sm:$0xff] }
 0x250   : > { %12272 = vst [vmem:[#allocation39_spill] sm:$0xff] %v9029_v41  ;;  %v9033_v6 = vpop.eup %6653  ;;  %v9035_v33 = vadd.f32 %v4361_v40, %v4140_v1  ;;  %v4141_v39 = vmul.f32 %v6652_v0, %v8838_v8  ;;  %6679 = vpow2.f32 %v5807_v51  ;;  %2019 = vmatprep.mubr.bf16.mxu1 %v12221_v23 }
 0x251   : > { %v6656_v49 = vpop.eup %6655  ;;  %v9041_v57 = vadd.f32 %v4435_v58, %v4142_v11  ;;  %6681 = vpow2.f32 %v5809_v30  ;;  %v9043_v55 = vpop.f32.mrf.mxu1  ;;  %v9051_v58 = vadd.f32 %v12276_v42, %v8448_v26  ;;  %v9067_v42 = vadd.f32 %v8825_v63, %v8459_v17 }
 0x252   : > { %12274 = vst [vmem:[#allocation43_spill] sm:$0xff] %v9043_v55  ;;  %v6658_v7 = vpop.eup %6657  ;;  %v9045_v29 = vadd.f32 %v4398_v54, %v4141_v39  ;;  %v3190_v36 = vadd.f32 1.0, %v6656_v49  ;;  %6683 = vpow2.f32 %v5808_v21  ;;  %v9053_v30 = vpop.f32.mrf.mxu0  ;;  %v12278_v39 = vld [vmem:[#allocation27_spill] sm:$0xff] }
 0x253   : > { %v6660_v1 = vpop.eup %6659  ;;  %v3192_v40 = vadd.f32 1.0, %v6658_v7  ;;  %6685 = vpow2.f32 %v5810_v14  ;;  %v9047_v8 = vpop.f32.mrf.mxu1  ;;  %12277 = vst [vmem:[#allocation41_spill] sm:$0xff] %v9051_v58  ;;  %v9057_v21 = vadd.f32 %v12278_v39, %v8452_v31  ;;  %12283 = vst [vmem:[#allocation49_spill] sm:$0xff] %v9067_v42  ;;  %v9096_v25 = vmul.f32 -1.442695, %v9067_v42 }
 0x254   : > { %12275 = vst [vmem:[#allocation14_spill] sm:$0xff] %v9047_v8  ;;  %v6662_v51 = vpop.eup %6661  ;;  %6687 = vrcp.f32 %v3190_v36  ;;  %v3191_v0 = vadd.f32 1.0, %v6660_v1  ;;  %v12281_v36 = vld [vmem:[#allocation44_spill] sm:$0xff]  ;;  %v9080_v63 = vpop.f32.mrf.mxu0  ;;  %v9111_v42 = vadd.f32 %v8866_v20, %v8459_v17  ;;  %v9124_v20 = vadd.f32 %v8816_v24, %v8448_v26 }
 0x255   : > { %v6664_v11 = vpop.eup %6663  ;;  %6689 = vrcp.f32 %v3192_v40  ;;  %v3193_v54 = vadd.f32 1.0, %v6662_v51  ;;  %12279 = vst [vmem:[#allocation27_spill] sm:$0xff] %v9057_v21  ;;  %v9059_v49 = vpop.f32.mrf.mxu1  ;;  %v9063_v1 = vadd.f32 %v12281_v36, %v8455_v13  ;;  %v12284_v51 = vld [vmem:[#allocation45_spill] sm:$0xff]  ;;  %v9078_v36 = vmul.f32 -1.442695, %v9051_v58 }
 0x256   : > { %12280 = vst [vmem:[#allocation48_spill] sm:$0xff] %v9059_v49  ;;  %v6666_v14 = vpop.eup %6665  ;;  %6691 = vrcp.f32 %v3191_v0  ;;  %v3200_v7 = vadd.f32 1.0, %v6664_v11  ;;  %v9071_v39 = vadd.f32 %v12284_v51, %v8448_v26  ;;  %v12287_v49 = vld [vmem:[#allocation15_spill] sm:$0xff]  ;;  %v9084_v51 = vmul.f32 -1.442695, %v9057_v21 }
 0x257   : > { %12282 = vst [vmem:[#allocation44_spill] sm:$0xff] %v9063_v1  ;;  %v6668_v8 = vpop.eup %6667  ;;  %6693 = vrcp.f32 %v3193_v54  ;;  %v3202_v40 = vadd.f32 1.0, %v6666_v14  ;;  %v9073_v55 = vpop.f32.mrf.mxu1  ;;  %5648 = vmatmul.mubr.msk.bf16.gmra.mxu1 %vm1096_vm3, %v12287_v49  ;;  %12288 = vst [vmem:[#allocation15_spill] sm:$0xff] %v9080_v63  ;;  %v9093_v41 = vmul.f32 -1.442695, %v9063_v1 }
 0x258   : > { %12285 = vst [vmem:[#allocation45_spill] sm:$0xff] %v9071_v39  ;;  %12286 = vst [vmem:[#allocation50_spill] sm:$0xff] %v9073_v55  ;;  %v6670_v0 = vpop.eup %6669  ;;  %6695 = vrcp.f32 %v3200_v7  ;;  %v3201_v11 = vadd.f32 1.0, %v6668_v8  ;;  %2029 = vmatprep.mubr.bf16.mxu1 %v12221_v23  ;;  %v9088_v55 = vadd.f32 %v8849_v35, %v8452_v31  ;;  %v9101_v35 = vmul.f32 -1.442695, %v9071_v39  ;;  %v9113_v1 = vpop.f32.mrf.mxu0 }
 0x259   : > { %v6672_v54 = vpop.eup %6671  ;;  %6697 = vrcp.f32 %v3202_v40  ;;  %v3203_v14 = vadd.f32 1.0, %v6670_v0  ;;  %v9090_v49 = vpop.f32.mrf.mxu1  ;;  %v12291_v0 = vld [vmem:[#allocation36_spill] sm:$0xff]  ;;  %12293 = vst [vmem:[#allocation53_spill] sm:$0xff] %v9113_v1  ;;  %v9128_v1 = vadd.f32 %v8880_v27, %v8452_v31  ;;  %v9139_v27 = vmul.f32 -1.442695, %v9111_v42 }
 0x25a   : > { %12289 = vst [vmem:[#allocation51_spill] sm:$0xff] %v9088_v55  ;;  %12290 = vst [vmem:[#allocation52_spill] sm:$0xff] %v9090_v49  ;;  %v6674_v8 = vpop.eup %6673  ;;  %6699 = vrcp.f32 %v3201_v11  ;;  %v3210_v7 = vadd.f32 1.0, %v6672_v54  ;;  %v4113_v63 = vmul.f32 %v8958_v9, %v12291_v0  ;;  %v9107_v54 = vadd.f32 %v8808_v10, %v8455_v13 }
 0x25b   : > { %v6676_v40 = vpop.eup %6675  ;;  %6701 = vrcp.f32 %v3203_v14  ;;  %v3212_v21 = vadd.f32 1.0, %v6674_v8  ;;  %v9103_v58 = vpop.f32.mrf.mxu1  ;;  %v12294_v14 = vld [vmem:[#allocation40_spill] sm:$0xff] }
 0x25c   : > { %12292 = vst [vmem:[#allocation36_spill] sm:$0xff] %v9103_v58  ;;  %v6678_v49 = vpop.eup %6677  ;;  %6703 = vrcp.f32 %v3210_v7  ;;  %v3211_v11 = vadd.f32 1.0, %v6676_v40  ;;  %v4123_v8 = vmul.f32 %v8986_v60, %v12294_v14  ;;  %v9118_v58 = vmul.f32 -1.442695, %v9088_v55  ;;  %v9141_v55 = vpop.f32.mrf.mxu0 }
 0x25d   : > { %v6680_v9 = vpop.eup %6679  ;;  %6705 = vrcp.f32 %v3212_v21  ;;  %v3213_v0 = vadd.f32 1.0, %v6678_v49  ;;  %v9120_v7 = vpop.f32.mrf.mxu1  ;;  %v4470_v60 = vadd.f32 %v8876_v50, %v4113_v63  ;;  %v4133_v21 = vmul.f32 %v9016_v22, %v8796_v18 }
 0x25e   : > { %12295 = vst [vmem:[#allocation40_spill] sm:$0xff] %v9120_v7  ;;  %v6682_v40 = vpop.eup %6681  ;;  %6707 = vrcp.f32 %v3211_v11  ;;  %v3220_v10 = vadd.f32 1.0, %v6680_v9  ;;  %v12297_v11 = vld [vmem:[#allocation16_spill] sm:$0xff]  ;;  %v5828_v7 = vmul.f32 -1.442695, %v9107_v54  ;;  %v4143_v22 = vmul.f32 %v9033_v6, %v8843_v52 }
 0x25f   : > { %v6684_v39 = vpop.eup %6683  ;;  %6709 = vrcp.f32 %v3213_v0  ;;  %v3222_v49 = vadd.f32 1.0, %v6682_v40  ;;  %v9133_v14 = vpop.f32.mrf.mxu1  ;;  %5649 = vmatmul.mubr.msk.bf16.gmra.mxu1 %vm1096_vm3, %v12297_v11  ;;  %12298 = vst [vmem:[#allocation16_spill] sm:$0xff] %v9141_v55  ;;  %v4471_v50 = vadd.f32 %v4470_v60, %v4123_v8  ;;  %v5839_v52 = vmul.f32 -1.442695, %v9128_v1 }
 0x260   : > { %12296 = vst [vmem:[#allocation54_spill] sm:$0xff] %v9133_v14  ;;  %v6686_v9 = vpop.eup %6685  ;;  %6711 = vrcp.f32 %v3220_v10  ;;  %v3221_v24 = vadd.f32 1.0, %v6684_v39  ;;  %2039 = vmatprep.mubr.bf16.mxu1 %v12221_v23  ;;  %v5837_v39 = vmul.f32 -1.442695, %v9124_v20  ;;  %v9150_v10 = vadd.f32 %v8833_v61, %v8455_v13 }
 0x261   : > { %v6688_v18 = vpop.eup %6687  ;;  %6713 = vrcp.f32 %v3222_v49  ;;  %v3223_v63 = vadd.f32 1.0, %v6686_v9  ;;  %v9152_v11 = vpop.f32.mrf.mxu1  ;;  %v4472_v55 = vadd.f32 %v4471_v50, %v4133_v21  ;;  %v9161_v61 = vadd.f32 %v8888_v53, %v8459_v17 }
 0x262   : > { %v6690_v0 = vpop.eup %6689  ;;  %v4150_v40 = vmul.f32 %v6688_v18, %v8895_v34  ;;  %6715 = vrcp.f32 %v3221_v24  ;;  %12299 = vst [vmem:[#allocation55_spill] sm:$0xff] %v9152_v11  ;;  %v9163_v49 = vpop.f32.mrf.mxu0  ;;  %v5838_v53 = vmul.f32 -1.442695, %v9150_v10 }
 0x263   : > { %v6692_v14 = vpop.eup %6691  ;;  %v4152_v8 = vmul.f32 %v6690_v0, %v8899_v59  ;;  %6717 = vrcp.f32 %v3223_v63  ;;  %v4473_v21 = vadd.f32 %v4472_v55, %v4143_v22  ;;  %v9192_v63 = vadd.f32 %v8907_v56, %v8452_v31 }
 0x264   : > { %v6694_v6 = vpop.eup %6693  ;;  %v4363_v60 = vadd.f32 %v9035_v33, %v4150_v40  ;;  %v4151_v34 = vmul.f32 %v6692_v14, %v8905_v16  ;;  %6719 = vpow2.f32 %v9078_v36  ;;  %v9172_v36 = vpop.f32.mrf.mxu1  ;;  %v9197_v40 = vadd.f32 %v8853_v4, %v8455_v13 }
 0x265   : > { %v6696_v9 = vpop.eup %6695  ;;  %v4437_v59 = vadd.f32 %v9041_v57, %v4152_v8  ;;  %v4153_v24 = vmul.f32 %v6694_v6, %v8911_v48  ;;  %6721 = vpow2.f32 %v9084_v51  ;;  %12300 = vst [vmem:[#allocation56_spill] sm:$0xff] %v9172_v36  ;;  %v9178_v48 = vadd.f32 %v8845_v46, %v8448_v26  ;;  %v12301_v57 = vld [vmem:[#allocation17_spill] sm:$0xff]  ;;  %v9185_v22 = vpop.f32.mrf.mxu0 }
 0x266   : > { %v6698_v18 = vpop.eup %6697  ;;  %v4400_v33 = vadd.f32 %v9045_v29, %v4151_v34  ;;  %v4160_v16 = vmul.f32 %v6696_v9, %v8918_v37  ;;  %6723 = vpow2.f32 %v9093_v41  ;;  %v5840_v51 = vmul.f32 -1.442695, %v9161_v61  ;;  %v9199_v8 = vpop.f32.mrf.mxu1 }
 0x267   : > { %v6700_v14 = vpop.eup %6699  ;;  %v4474_v50 = vadd.f32 %v4473_v21, %v4153_v24  ;;  %v4162_v55 = vmul.f32 %v6698_v18, %v8923_v5  ;;  %6725 = vpow2.f32 %v9096_v25  ;;  %5650 = vmatmul.mubr.msk.bf16.gmra.mxu1 %vm1096_vm3, %v12301_v57  ;;  %12302 = vst [vmem:[#allocation17_spill] sm:$0xff] %v9199_v8  ;;  %v9205_v56 = vadd.f32 %v8934_v32, %v8459_v17 }
 0x268   : > { %v6702_v37 = vpop.eup %6701  ;;  %v4364_v29 = vadd.f32 %v4363_v60, %v4160_v16  ;;  %v4161_v41 = vmul.f32 %v6700_v14, %v8932_v19  ;;  %6727 = vpow2.f32 %v9101_v35  ;;  %2049 = vmatprep.mubr.bf16.mxu1 %v12221_v23  ;;  %v5847_v4 = vmul.f32 -1.442695, %v9178_v48 }
 0x269   : > { %v6704_v5 = vpop.eup %6703  ;;  %v4438_v25 = vadd.f32 %v4437_v59, %v4162_v55  ;;  %v4163_v46 = vmul.f32 %v6702_v37, %v8940_v62  ;;  %6729 = vpow2.f32 %v9118_v58  ;;  %v5848_v18 = vmul.f32 -1.442695, %v9197_v40 }
 0x26a   : > { %v6706_v0 = vpop.eup %6705  ;;  %v4401_v19 = vadd.f32 %v4400_v33, %v4161_v41  ;;  %v4170_v35 = vmul.f32 %v6704_v5, %v8948_v15  ;;  %6731 = vpow2.f32 %v5828_v7  ;;  %v9209_v7 = vpop.f32.mrf.mxu0  ;;  %v5850_v14 = vmul.f32 -1.442695, %v9205_v56 }
 0x26b   : > { %v6708_v6 = vpop.eup %6707  ;;  %v4475_v60 = vadd.f32 %v4474_v50, %v4163_v46  ;;  %v4172_v62 = vmul.f32 %v6706_v0, %v8954_v45  ;;  %6733 = vpow2.f32 %v9139_v27  ;;  %v5849_v45 = vmul.f32 -1.442695, %v9192_v63 }
 0x26c   : > { %v6710_v58 = vpop.eup %6709  ;;  %v4365_v34 = vadd.f32 %v4364_v29, %v4170_v35  ;;  %v4171_v15 = vmul.f32 %v6708_v6, %v8969_v47  ;;  %6735 = vpow2.f32 %v5837_v39  ;;  %v9215_v47 = vpop.f32.mrf.mxu1 }
 0x26d   : > { %v6712_v9 = vpop.eup %6711  ;;  %v4439_v21 = vadd.f32 %v4438_v25, %v4172_v62  ;;  %v4173_v59 = vmul.f32 %v6710_v58, %v8980_v43  ;;  %6737 = vpow2.f32 %v5839_v52  ;;  %12303 = vst [vmem:[#allocation57_spill] sm:$0xff] %v9215_v47  ;;  %v12304_v43 = vld [vmem:[#allocation18_spill] sm:$0xff] }
 0x26e   : > { %v6714_v27 = vpop.eup %6713  ;;  %v4402_v24 = vadd.f32 %v4401_v19, %v4171_v15  ;;  %v4180_v32 = vmul.f32 %v6712_v9, %v8991_v12  ;;  %6739 = vpow2.f32 %v5838_v53  ;;  %v9224_v53 = vpop.f32.mrf.mxu0  ;;  %v12307_v15 = vld [vmem:[#allocation19_spill] sm:$0xff] }
 0x26f   : > { %v6716_v39 = vpop.eup %6715  ;;  %v4476_v33 = vadd.f32 %v4475_v60, %v4173_v59  ;;  %v4182_v16 = vmul.f32 %v6714_v27, %v8999_v38  ;;  %6741 = vpow2.f32 %v5840_v51  ;;  %5651 = vmatmul.mubr.msk.bf16.gmra.mxu1 %vm1096_vm3, %v12304_v43  ;;  %v9232_v51 = vpop.f32.mrf.mxu1 }
 0x270   : > { %v6718_v52 = vpop.eup %6717  ;;  %v9221_v50 = vadd.f32 %v4365_v34, %v4180_v32  ;;  %v4181_v12 = vmul.f32 %v6716_v39, %v9006_v2  ;;  %6743 = vpow2.f32 %v5847_v4  ;;  %2059 = vmatprep.mubr.bf16.mxu1 %v12221_v23  ;;  %12305 = vst [vmem:[#allocation18_spill] sm:$0xff] %v9232_v51  ;;  %v9236_v19 = vpop.f32.mrf.mxu0  ;;  %v12309_v32 = vld [vmem:[#allocation12_spill] sm:$0xff] }
 0x271   : > { %v6720_v55 = vpop.eup %6719  ;;  %v9227_v57 = vadd.f32 %v4439_v21, %v4182_v16  ;;  %v4183_v38 = vmul.f32 %v6718_v52, %v9012_v44  ;;  %6745 = vpow2.f32 %v5849_v45  ;;  %v9238_v62 = vpop.f32.mrf.mxu1  ;;  %v12308_v21 = vld [vmem:[#allocation28_spill] sm:$0xff]  ;;  %v12310_v16 = vld [vmem:[#allocation29_spill] sm:$0xff] }
 0x272   : > { %v6722_v37 = vpop.eup %6721  ;;  %v9230_v29 = vadd.f32 %v4402_v24, %v4181_v12  ;;  %v3230_v41 = vadd.f32 1.0, %v6720_v55  ;;  %6747 = vpow2.f32 %v5848_v18  ;;  %12306 = vst [vmem:[#allocation58_spill] sm:$0xff] %v9238_v62  ;;  %v9244_v59 = vadd.f32 %v12308_v21, %v8448_v26  ;;  %v9246_v45 = vpop.f32.mrf.mxu0  ;;  %v12312_v55 = vld [vmem:[#allocation13_spill] sm:$0xff] }
 0x273   : > { %v6724_v5 = vpop.eup %6723  ;;  %v9234_v2 = vadd.f32 %v4476_v33, %v4183_v38  ;;  %v3232_v25 = vadd.f32 1.0, %v6722_v37  ;;  %6749 = vpow2.f32 %v5850_v14  ;;  %v9251_v18 = vadd.f32 %v12309_v32, %v8452_v31  ;;  %v9257_v43 = vpop.f32.mrf.mxu1 }
 0x274   : > { %v6726_v46 = vpop.eup %6725  ;;  %6751 = vrcp.f32 %v3230_v41  ;;  %v3231_v0 = vadd.f32 1.0, %v6724_v5  ;;  %v9255_v14 = vadd.f32 %v12310_v16, %v8455_v13  ;;  %12311 = vst [vmem:[#allocation19_spill] sm:$0xff] %v9257_v43  ;;  %v9261_v38 = vadd.f32 %v12312_v55, %v8459_v17 }
 0x275   : > { %v6728_v35 = vpop.eup %6727  ;;  %6753 = vrcp.f32 %v3232_v25  ;;  %v3233_v44 = vadd.f32 1.0, %v6726_v46  ;;  %v5857_v5 = vmul.f32 -1.442695, %v9244_v59  ;;  %v12313_v25 = vld [vmem:[#allocation30_spill] sm:$0xff]  ;;  %v9280_v21 = vpop.f32.mrf.mxu1 }
 0x276   : > { %v6730_v6 = vpop.eup %6729  ;;  %6755 = vrcp.f32 %v3231_v0  ;;  %v3240_v60 = vadd.f32 1.0, %v6728_v35  ;;  %v9266_v46 = vadd.f32 %v12313_v25, %v8448_v26  ;;  %v9268_v0 = vpop.f32.mrf.mxu0  ;;  %12315 = vst [vmem:[#allocation28_spill] sm:$0xff] %v9280_v21  ;;  %v5860_v32 = vmul.f32 -1.442695, %v9261_v38 }
 0x277   : > { %v6732_v58 = vpop.eup %6731  ;;  %6757 = vrcp.f32 %v3233_v44  ;;  %v3242_v34 = vadd.f32 1.0, %v6730_v6  ;;  %5652 = vmatmul.mubr.msk.bf16.gmra.mxu1 %vm1096_vm3, %v12307_v15  ;;  %v5859_v6 = vmul.f32 -1.442695, %v9251_v18  ;;  %v5858_v15 = vmul.f32 -1.442695, %v9255_v14 }
 0x278   : > { %v6734_v4 = vpop.eup %6733  ;;  %6759 = vrcp.f32 %v3240_v60  ;;  %v3241_v9 = vadd.f32 1.0, %v6732_v58  ;;  %2069 = vmatprep.mubr.bf16.mxu1 %v12221_v23  ;;  %v9273_v60 = vadd.f32 %v9020_v28, %v8452_v31  ;;  %v9285_v28 = vadd.f32 %v9038_v3, %v8459_v17 }
 0x279   : > { %v6736_v27 = vpop.eup %6735  ;;  %6761 = vrcp.f32 %v3242_v34  ;;  %v3243_v24 = vadd.f32 1.0, %v6734_v4  ;;  %v12314_v4 = vld [vmem:[#allocation9_spill] sm:$0xff] }
 0x27a   : > { %v6738_v39 = vpop.eup %6737  ;;  %6763 = vrcp.f32 %v3241_v9  ;;  %v3250_v33 = vadd.f32 1.0, %v6736_v27  ;;  %v9278_v9 = vadd.f32 %v12314_v4, %v8455_v13  ;;  %v5869_v25 = vmul.f32 -1.442695, %v9273_v60 }
 0x27b   : > { %v6740_v52 = vpop.eup %6739  ;;  %6765 = vrcp.f32 %v3243_v24  ;;  %v3252_v12 = vadd.f32 1.0, %v6738_v39  ;;  %v12316_v39 = vld [vmem:[#allocation20_spill] sm:$0xff]  ;;  %v5870_v43 = vmul.f32 -1.442695, %v9285_v28 }
 0x27c   : > { %v6742_v37 = vpop.eup %6741  ;;  %6767 = vrcp.f32 %v3250_v33  ;;  %v3251_v41 = vadd.f32 1.0, %v6740_v52  ;;  %v5867_v52 = vmul.f32 -1.442695, %v9266_v46  ;;  %v5868_v4 = vmul.f32 -1.442695, %v9278_v9 }
 0x27d   : > { %v6744_v35 = vpop.eup %6743  ;;  %6769 = vrcp.f32 %v3252_v12  ;;  %v3253_v44 = vadd.f32 1.0, %v6742_v37  ;;  %v12317_v12 = vld [vmem:[#allocation31_spill] sm:$0xff]  ;;  %v9294_v37 = vpop.f32.mrf.mxu0 }
 0x27e   : > { %v6746_v58 = vpop.eup %6745  ;;  %6771 = vrcp.f32 %v3251_v41  ;;  %v3260_v34 = vadd.f32 1.0, %v6744_v35  ;;  %v9292_v55 = vadd.f32 %v12317_v12, %v8448_v26  ;;  %v9300_v35 = vadd.f32 %v9053_v30, %v8452_v31  ;;  %v9308_v12 = vpop.f32.mrf.mxu1  ;;  %v12322_v30 = vld [vmem:[#allocation15_spill] sm:$0xff] }
 0x27f   : > { %v6748_v27 = vpop.eup %6747  ;;  %6773 = vrcp.f32 %v3253_v44  ;;  %v3262_v24 = vadd.f32 1.0, %v6746_v58  ;;  %5653 = vmatmul.mubr.msk.bf16.gmra.mxu1 %vm1096_vm3, %v12316_v39  ;;  %v12318_v58 = vld [vmem:[#allocation41_spill] sm:$0xff]  ;;  %12320 = vst [vmem:[#allocation12_spill] sm:$0xff] %v9308_v12  ;;  %v9314_v62 = vadd.f32 %v12322_v30, %v8459_v17  ;;  %v9319_v47 = vpop.f32.mrf.mxu0 }
 0x280   : > { %v6750_v33 = vpop.eup %6749  ;;  %6775 = vrcp.f32 %v3260_v34  ;;  %v3261_v16 = vadd.f32 1.0, %v6748_v27  ;;  %2079 = vmatprep.mubr.bf16.mxu1 %v12221_v23  ;;  %v12319_v27 = vld [vmem:[#allocation32_spill] sm:$0xff]  ;;  %12324 = vst [vmem:[#allocation29_spill] sm:$0xff] %v9319_v47  ;;  %v9321_v12 = vpop.f32.mrf.mxu1  ;;  %v5879_v30 = vmul.f32 -1.442695, %v9300_v35 }
 0x281   : > { %v6752_v41 = vpop.eup %6751  ;;  %6777 = vrcp.f32 %v3262_v24  ;;  %v3263_v3 = vadd.f32 1.0, %v6750_v33  ;;  %v9306_v39 = vadd.f32 %v12319_v27, %v8455_v13  ;;  %v12321_v33 = vld [vmem:[#allocation27_spill] sm:$0xff]  ;;  %v5877_v27 = vmul.f32 -1.442695, %v9292_v55  ;;  %12325 = vst [vmem:[#allocation13_spill] sm:$0xff] %v9321_v12 }
 0x282   : > { %v6754_v44 = vpop.eup %6753  ;;  %v4190_v34 = vmul.f32 %v6752_v41, %v12318_v58  ;;  %6779 = vrcp.f32 %v3261_v16  ;;  %v12323_v58 = vld [vmem:[#allocation44_spill] sm:$0xff]  ;;  %v12328_v12 = vld [vmem:[#allocation51_spill] sm:$0xff] }
 0x283   : > { %v6756_v24 = vpop.eup %6755  ;;  %v4192_v21 = vmul.f32 %v6754_v44, %v12321_v33  ;;  %6781 = vrcp.f32 %v3263_v3  ;;  %v12326_v33 = vld [vmem:[#allocation49_spill] sm:$0xff] }
 0x284   : > { %v6758_v41 = vpop.eup %6757  ;;  %v4367_v16 = vadd.f32 %v9221_v50, %v4190_v34  ;;  %v4191_v51 = vmul.f32 %v6756_v24, %v12323_v58  ;;  %6783 = vpow2.f32 %v5857_v5  ;;  %v12327_v34 = vld [vmem:[#allocation45_spill] sm:$0xff]  ;;  %v5878_v5 = vmul.f32 -1.442695, %v9306_v39 }
 0x285   : > { %v6760_v44 = vpop.eup %6759  ;;  %v4441_v3 = vadd.f32 %v9227_v57, %v4192_v21  ;;  %v4193_v8 = vmul.f32 %v6758_v41, %v12326_v33  ;;  %6785 = vpow2.f32 %v5859_v6  ;;  %v5880_v57 = vmul.f32 -1.442695, %v9314_v62  ;;  %v9332_v21 = vpop.f32.mrf.mxu1  ;;  %v12330_v6 = vld [vmem:[#allocation21_spill] sm:$0xff] }
 0x286   : > { %v6762_v36 = vpop.eup %6761  ;;  %v4404_v50 = vadd.f32 %v9230_v29, %v4191_v51  ;;  %v4200_v24 = vmul.f32 %v6760_v44, %v12327_v34  ;;  %6787 = vpow2.f32 %v5858_v15  ;;  %12329 = vst [vmem:[#allocation30_spill] sm:$0xff] %v9332_v21  ;;  %v12331_v15 = vld [vmem:[#allocation33_spill] sm:$0xff]  ;;  %v12333_v34 = vld [vmem:[#allocation34_spill] sm:$0xff] }
 0x287   : > { %v6764_v58 = vpop.eup %6763  ;;  %v4478_v11 = vadd.f32 %v9234_v2, %v4193_v8  ;;  %v4202_v47 = vmul.f32 %v6762_v36, %v12328_v12  ;;  %6789 = vpow2.f32 %v5860_v32  ;;  %5654 = vmatmul.mubr.msk.bf16.gmra.mxu1 %vm1096_vm3, %v12330_v6  ;;  %v9339_v44 = vadd.f32 %v12331_v15, %v8448_v26  ;;  %v9341_v8 = vpop.f32.mrf.mxu0  ;;  %v12332_v12 = vld [vmem:[#allocation53_spill] sm:$0xff] }
 0x288   : > { %v6766_v41 = vpop.eup %6765  ;;  %v4368_v29 = vadd.f32 %v4367_v16, %v4200_v24  ;;  %v4201_v51 = vmul.f32 %v6764_v58, %v9107_v54  ;;  %6791 = vpow2.f32 %v5867_v52  ;;  %2089 = vmatprep.mubr.bf16.mxu1 %v12221_v23  ;;  %v9347_v33 = vadd.f32 %v12332_v12, %v8452_v31 }
 0x289   : > { %v6768_v36 = vpop.eup %6767  ;;  %v4442_v2 = vadd.f32 %v4441_v3, %v4202_v47  ;;  %v4203_v32 = vmul.f32 %v6766_v41, %v9111_v42  ;;  %6793 = vpow2.f32 %v5869_v25  ;;  %v9352_v24 = vadd.f32 %v12333_v34, %v8455_v13  ;;  %v12334_v42 = vld [vmem:[#allocation16_spill] sm:$0xff]  ;;  %v9359_v3 = vpop.f32.mrf.mxu1 }
 0x28a   : > { %v6770_v16 = vpop.eup %6769  ;;  %v4405_v54 = vadd.f32 %v4404_v50, %v4201_v51  ;;  %v4210_v52 = vmul.f32 %v6768_v36, %v9124_v20  ;;  %6795 = vpow2.f32 %v5868_v4  ;;  %v9357_v25 = vadd.f32 %v12334_v42, %v8459_v17  ;;  %12335 = vst [vmem:[#allocation9_spill] sm:$0xff] %v9359_v3  ;;  %v9363_v51 = vpop.f32.mrf.mxu0 }
 0x28b   : > { %v6772_v58 = vpop.eup %6771  ;;  %v4479_v6 = vadd.f32 %v4478_v11, %v4203_v32  ;;  %v4212_v47 = vmul.f32 %v6770_v16, %v9128_v1  ;;  %6797 = vpow2.f32 %v5870_v43  ;;  %v5887_v4 = vmul.f32 -1.442695, %v9339_v44 }
 0x28c   : > { %v6774_v41 = vpop.eup %6773  ;;  %v4369_v50 = vadd.f32 %v4368_v29, %v4210_v52  ;;  %v4211_v20 = vmul.f32 %v6772_v58, %v9150_v10  ;;  %6799 = vpow2.f32 %v5877_v27  ;;  %v5889_v43 = vmul.f32 -1.442695, %v9347_v33 }
 0x28d   : > { %v6776_v15 = vpop.eup %6775  ;;  %v4443_v11 = vadd.f32 %v4442_v2, %v4212_v47  ;;  %v4213_v1 = vmul.f32 %v6774_v41, %v9161_v61  ;;  %6801 = vpow2.f32 %v5879_v30  ;;  %v5888_v29 = vmul.f32 -1.442695, %v9352_v24  ;;  %v9371_v2 = vpop.f32.mrf.mxu1  ;;  %v12337_v61 = vld [vmem:[#allocation22_spill] sm:$0xff] }
 0x28e   : > { %v6778_v36 = vpop.eup %6777  ;;  %v4406_v32 = vadd.f32 %v4405_v54, %v4211_v20  ;;  %v4220_v12 = vmul.f32 %v6776_v15, %v9178_v48  ;;  %6803 = vpow2.f32 %v5878_v5  ;;  %v5890_v52 = vmul.f32 -1.442695, %v9357_v25  ;;  %12336 = vst [vmem:[#allocation20_spill] sm:$0xff] %v9371_v2  ;;  %v9378_v5 = vpop.f32.mrf.mxu0 }
 0x28f   : > { %v6780_v10 = vpop.eup %6779  ;;  %v4480_v27 = vadd.f32 %v4479_v6, %v4213_v1  ;;  %v4222_v16 = vmul.f32 %v6778_v36, %v9192_v63  ;;  %6805 = vpow2.f32 %v5880_v57  ;;  %5655 = vmatmul.mubr.msk.bf16.gmra.mxu1 %vm1096_vm3, %v12337_v61 }
 0x290   : > { %v6782_v30 = vpop.eup %6781  ;;  %v9375_v34 = vadd.f32 %v4369_v50, %v4220_v12  ;;  %v4221_v48 = vmul.f32 %v6780_v10, %v9197_v40  ;;  %6807 = vpow2.f32 %v5887_v4  ;;  %2099 = vmatprep.mubr.bf16.mxu1 %v12221_v23  ;;  %v9388_v50 = vpop.f32.mrf.mxu1  ;;  %v12341_v10 = vld [vmem:[#allocation23_spill] sm:$0xff] }
 0x291   : > { %v6784_v54 = vpop.eup %6783  ;;  %v9381_v63 = vadd.f32 %v4443_v11, %v4222_v16  ;;  %v4223_v57 = vmul.f32 %v6782_v30, %v9205_v56  ;;  %6809 = vpow2.f32 %v5889_v43  ;;  %12338 = vst [vmem:[#allocation31_spill] sm:$0xff] %v9388_v50  ;;  %v9390_v4 = vpop.f32.mrf.mxu0 }
 0x292   : > { %v6786_v58 = vpop.eup %6785  ;;  %v9384_v6 = vadd.f32 %v4406_v32, %v4221_v48  ;;  %v3270_v47 = vadd.f32 1.0, %v6784_v54  ;;  %6811 = vpow2.f32 %v5888_v29  ;;  %v12339_v32 = vld [vmem:[#allocation35_spill] sm:$0xff]  ;;  %v9396_v29 = vpop.f32.mrf.mxu1  ;;  %v9404_v48 = vadd.f32 %v9163_v49, %v8452_v31 }
 0x293   : > { %v6788_v42 = vpop.eup %6787  ;;  %v9386_v41 = vadd.f32 %v4480_v27, %v4223_v57  ;;  %v3272_v40 = vadd.f32 1.0, %v6786_v58  ;;  %6813 = vpow2.f32 %v5890_v52  ;;  %v9394_v12 = vadd.f32 %v12339_v32, %v8448_v26  ;;  %12340 = vst [vmem:[#allocation41_spill] sm:$0xff] %v9396_v29  ;;  %v9400_v52 = vpop.f32.mrf.mxu0  ;;  %v12342_v58 = vld [vmem:[#allocation10_spill] sm:$0xff]  ;;  %v12343_v49 = vld [vmem:[#allocation11_spill] sm:$0xff] }
 0x294   : > { %v6790_v20 = vpop.eup %6789  ;;  %6815 = vrcp.f32 %v3270_v47  ;;  %v3271_v23 = vadd.f32 1.0, %v6788_v42  ;;  %v9408_v47 = vadd.f32 %v12342_v58, %v8455_v13  ;;  %v5899_v32 = vmul.f32 -1.442695, %v9404_v48 }
 0x295   : > { %v6792_v15 = vpop.eup %6791  ;;  %6817 = vrcp.f32 %v3272_v40  ;;  %v3273_v56 = vadd.f32 1.0, %v6790_v20  ;;  %v5897_v20 = vmul.f32 -1.442695, %v9394_v12 }
 0x296   : > { %v6794_v11 = vpop.eup %6793  ;;  %6819 = vrcp.f32 %v3271_v23  ;;  %v3280_v1 = vadd.f32 1.0, %v6792_v15 }
 0x297   : > { %v6796_v43 = vpop.eup %6795  ;;  %6821 = vrcp.f32 %v3273_v56  ;;  %v3282_v36 = vadd.f32 1.0, %v6794_v11  ;;  %5656 = vmatmul.mubr.msk.bf16.gmra.mxu1 %vm1096_vm3, %v12341_v10  ;;  %v9413_v56 = vadd.f32 %v9185_v22, %v8459_v17  ;;  %v9417_v11 = vadd.f32 %v12343_v49, %v8448_v26 }
 0x298   : > { %v6798_v27 = vpop.eup %6797  ;;  %6823 = vrcp.f32 %v3280_v1  ;;  %v3281_v16 = vadd.f32 1.0, %v6796_v43  ;;  %v9419_v1 = vpop.f32.mrf.mxu0  ;;  %v9424_v10 = vadd.f32 %v9209_v7, %v8452_v31  ;;  %v5898_v22 = vmul.f32 -1.442695, %v9408_v47  ;;  %v12346_v7 = vld [vmem:[#allocation47_spill] sm:$0xff] }
 0x299   : > { %v6800_v61 = vpop.eup %6799  ;;  %6825 = vrcp.f32 %v3282_v36  ;;  %v3283_v30 = vadd.f32 1.0, %v6798_v27  ;;  %v5900_v49 = vmul.f32 -1.442695, %v9413_v56 }
 0x29a   : > { %v6802_v54 = vpop.eup %6801  ;;  %6827 = vrcp.f32 %v3281_v16  ;;  %v3290_v57 = vadd.f32 1.0, %v6800_v61  ;;  %v12344_v61 = vld [vmem:[#allocation46_spill] sm:$0xff] }
 0x29b   : > { %v6804_v42 = vpop.eup %6803  ;;  %6829 = vrcp.f32 %v3283_v30  ;;  %v3292_v40 = vadd.f32 1.0, %v6802_v54  ;;  %v9429_v30 = vadd.f32 %v12344_v61, %v8455_v13  ;;  %v9431_v54 = vpop.f32.mrf.mxu1 }
 0x29c   : > { %v6806_v23 = vpop.eup %6805  ;;  %6831 = vrcp.f32 %v3290_v57  ;;  %v3291_v15 = vadd.f32 1.0, %v6804_v42  ;;  %12345 = vst [vmem:[#allocation32_spill] sm:$0xff] %v9431_v54  ;;  %v9435_v42 = vadd.f32 %v9224_v53, %v8459_v17  ;;  %v9443_v61 = vpop.f32.mrf.mxu0  ;;  %v9448_v53 = vadd.f32 %v9236_v19, %v8452_v31 }
 0x29d   : > { %v6808_v43 = vpop.eup %6807  ;;  %6833 = vrcp.f32 %v3292_v40  ;;  %v3293_v36 = vadd.f32 1.0, %v6806_v23  ;;  %v9439_v40 = vadd.f32 %v12346_v7, %v8448_v26  ;;  %12347 = vst [vmem:[#allocation27_spill] sm:$0xff] %v9443_v61  ;;  %v9456_v2 = vpop.f32.mrf.mxu1 }
 0x29e   : > { %v6810_v27 = vpop.eup %6809  ;;  %6835 = vrcp.f32 %v3291_v15  ;;  %v3300_v16 = vadd.f32 1.0, %v6808_v43  ;;  %v5907_v43 = vmul.f32 -1.442695, %v9417_v11  ;;  %12349 = vst [vmem:[#allocation15_spill] sm:$0xff] %v9456_v2  ;;  %v5910_v3 = vmul.f32 -1.442695, %v9435_v42 }
 0x29f   : > { %v6812_v57 = vpop.eup %6811  ;;  %6837 = vrcp.f32 %v3293_v36  ;;  %v3302_v58 = vadd.f32 1.0, %v6810_v27  ;;  %v5909_v27 = vmul.f32 -1.442695, %v9424_v10  ;;  %v5917_v19 = vmul.f32 -1.442695, %v9439_v40 }
 0x2a0   : > { %v6814_v23 = vpop.eup %6813  ;;  %6839 = vrcp.f32 %v3300_v16  ;;  %v3301_v15 = vadd.f32 1.0, %v6812_v57  ;;  %v5908_v16 = vmul.f32 -1.442695, %v9429_v30  ;;  %v12348_v57 = vld [vmem:[#allocation37_spill] sm:$0xff] }
 0x2a1   : > { %v6816_v54 = vpop.eup %6815  ;;  %6841 = vrcp.f32 %v3302_v58  ;;  %v3303_v36 = vadd.f32 1.0, %v6814_v23  ;;  %v9454_v50 = vadd.f32 %v12348_v57, %v8455_v13  ;;  %v9467_v57 = vpop.f32.mrf.mxu0 }
 0x2a2   : > { %v6818_v7 = vpop.eup %6817  ;;  %v4230_v29 = vmul.f32 %v6816_v54, %v9244_v59  ;;  %6843 = vrcp.f32 %v3301_v15  ;;  %v9465_v15 = vadd.f32 %v9246_v45, %v8459_v17  ;;  %v9475_v45 = vpop.f32.mrf.mxu1 }
 0x2a3   : > { %v6820_v58 = vpop.eup %6819  ;;  %v4232_v23 = vmul.f32 %v6818_v7, %v9251_v18  ;;  %6845 = vrcp.f32 %v3303_v36  ;;  %v5919_v7 = vmul.f32 -1.442695, %v9448_v53  ;;  %12350 = vst [vmem:[#allocation44_spill] sm:$0xff] %v9475_v45 }
 0x2a4   : > { %v6822_v21 = vpop.eup %6821  ;;  %v4371_v59 = vadd.f32 %v9375_v34, %v4230_v29  ;;  %v4231_v54 = vmul.f32 %v6820_v58, %v9255_v14  ;;  %6847 = vpow2.f32 %v5897_v20  ;;  %v5918_v29 = vmul.f32 -1.442695, %v9454_v50 }
 0x2a5   : > { %v6824_v2 = vpop.eup %6823  ;;  %v4445_v18 = vadd.f32 %v9381_v63, %v4232_v23  ;;  %v4233_v36 = vmul.f32 %v6822_v21, %v9261_v38  ;;  %6849 = vpow2.f32 %v5899_v32  ;;  %v12351_v38 = vld [vmem:[#allocation38_spill] sm:$0xff] }
 0x2a6   : > { %v6826_v61 = vpop.eup %6825  ;;  %v4408_v34 = vadd.f32 %v9384_v6, %v4231_v54  ;;  %v4240_v14 = vmul.f32 %v6824_v2, %v9266_v46  ;;  %6851 = vpow2.f32 %v5898_v22  ;;  %v9481_v21 = vadd.f32 %v12351_v38, %v8448_v26  ;;  %v9485_v2 = vpop.f32.mrf.mxu0 }
 0x2a7   : > { %v6828_v20 = vpop.eup %6827  ;;  %v4482_v58 = vadd.f32 %v9386_v41, %v4233_v36  ;;  %v4242_v63 = vmul.f32 %v6826_v61, %v9273_v60  ;;  %6853 = vpow2.f32 %v5900_v49  ;;  %v5920_v46 = vmul.f32 -1.442695, %v9465_v15  ;;  %v9497_v36 = vpop.f32.mrf.mxu1 }
 0x2a8   : > { %v6830_v32 = vpop.eup %6829  ;;  %v4372_v23 = vadd.f32 %v4371_v59, %v4240_v14  ;;  %v4241_v6 = vmul.f32 %v6828_v20, %v9278_v9  ;;  %6855 = vpow2.f32 %v5907_v43  ;;  %v9490_v60 = vadd.f32 %v9268_v0, %v8452_v31  ;;  %v12352_v9 = vld [vmem:[#allocation42_spill] sm:$0xff]  ;;  %12353 = vst [vmem:[#allocation49_spill] sm:$0xff] %v9497_v36  ;;  %v9506_v20 = vpop.f32.mrf.mxu0 }
 0x2a9   : > { %v6832_v22 = vpop.eup %6831  ;;  %v4446_v54 = vadd.f32 %v4445_v18, %v4242_v63  ;;  %v4243_v41 = vmul.f32 %v6830_v32, %v9285_v28  ;;  %6857 = vpow2.f32 %v5909_v27  ;;  %v9495_v43 = vadd.f32 %v12352_v9, %v8455_v13 }
 0x2aa   : > { %v6834_v49 = vpop.eup %6833  ;;  %v4409_v61 = vadd.f32 %v4408_v34, %v4241_v6  ;;  %v4250_v59 = vmul.f32 %v6832_v22, %v9292_v55  ;;  %6859 = vpow2.f32 %v5908_v16  ;;  %v9502_v0 = vadd.f32 %v9294_v37, %v8459_v17 }
 0x2ab   : > { %v6836_v14 = vpop.eup %6835  ;;  %v4483_v18 = vadd.f32 %v4482_v58, %v4243_v41  ;;  %v4252_v28 = vmul.f32 %v6834_v49, %v9300_v35  ;;  %6861 = vpow2.f32 %v5910_v3  ;;  %v5927_v16 = vmul.f32 -1.442695, %v9481_v21  ;;  %v9519_v49 = vpop.f32.mrf.mxu0 }
 0x2ac   : > { %v6838_v27 = vpop.eup %6837  ;;  %v4373_v34 = vadd.f32 %v4372_v23, %v4250_v59  ;;  %v4251_v55 = vmul.f32 %v6836_v14, %v9306_v39  ;;  %6863 = vpow2.f32 %v5917_v19  ;;  %v5929_v35 = vmul.f32 -1.442695, %v9490_v60  ;;  %v9512_v39 = vpop.f32.mrf.mxu1 }
 0x2ad   : > { %v6840_v63 = vpop.eup %6839  ;;  %v4447_v38 = vadd.f32 %v4446_v54, %v4252_v28  ;;  %v4253_v58 = vmul.f32 %v6838_v27, %v9314_v62  ;;  %6865 = vpow2.f32 %v5919_v7  ;;  %v5928_v23 = vmul.f32 -1.442695, %v9495_v43  ;;  %12354 = vst [vmem:[#allocation45_spill] sm:$0xff] %v9512_v39 }
 0x2ae   : > { %v6842_v3 = vpop.eup %6841  ;;  %v4410_v32 = vadd.f32 %v4409_v61, %v4251_v55  ;;  %v4260_v37 = vmul.f32 %v6840_v63, %v9339_v44  ;;  %6867 = vpow2.f32 %v5918_v29  ;;  %v5930_v54 = vmul.f32 -1.442695, %v9502_v0 }
 0x2af   : > { %v6844_v19 = vpop.eup %6843  ;;  %v4484_v6 = vadd.f32 %v4483_v18, %v4253_v58  ;;  %v4262_v22 = vmul.f32 %v6842_v3, %v9347_v33  ;;  %6869 = vpow2.f32 %v5920_v46  ;;  %v9526_v46 = vpop.f32.mrf.mxu1 }
 0x2b0   : > { %v6846_v62 = vpop.eup %6845  ;;  %v9516_v7 = vadd.f32 %v4373_v34, %v4260_v37  ;;  %v4261_v41 = vmul.f32 %v6844_v19, %v9352_v24  ;;  %6871 = vpow2.f32 %v5927_v16  ;;  %12355 = vst [vmem:[#allocation51_spill] sm:$0xff] %v9526_v46  ;;  %v9530_v34 = vpop.f32.mrf.mxu0  ;;  %v12356_v16 = vld [vmem:[#allocation39_spill] sm:$0xff] }
 0x2b1   : > { %v6848_v44 = vpop.eup %6847  ;;  %v9521_v29 = vadd.f32 %v4447_v38, %v4262_v22  ;;  %v4263_v61 = vmul.f32 %v6846_v62, %v9357_v25  ;;  %6873 = vpow2.f32 %v5929_v35  ;;  %v9534_v63 = vadd.f32 %v12356_v16, %v8448_v26  ;;  %v12357_v35 = vld [vmem:[#allocation29_spill] sm:$0xff]  ;;  %v12359_v19 = vld [vmem:[#allocation43_spill] sm:$0xff] }
 0x2b2   : > { %v6850_v59 = vpop.eup %6849  ;;  %v9524_v9 = vadd.f32 %v4410_v32, %v4261_v41  ;;  %v3310_v33 = vadd.f32 1.0, %v6848_v44  ;;  %6875 = vpow2.f32 %v5928_v23  ;;  %v9538_v3 = vadd.f32 %v12357_v35, %v8452_v31  ;;  %v9540_v32 = vpop.f32.mrf.mxu1 }
 0x2b3   : > { %v6852_v14 = vpop.eup %6851  ;;  %v9528_v18 = vadd.f32 %v4484_v6, %v4263_v61  ;;  %v3312_v24 = vadd.f32 1.0, %v6850_v59  ;;  %6877 = vpow2.f32 %v5930_v54  ;;  %12358 = vst [vmem:[#allocation21_spill] sm:$0xff] %v9540_v32  ;;  %v9544_v6 = vadd.f32 %v12359_v19, %v8455_v13  ;;  %v9550_v41 = vpop.f32.mrf.mxu0  ;;  %v12367_v32 = vld [vmem:[#allocation52_spill] sm:$0xff] }
 0x2b4   : > { %v6854_v28 = vpop.eup %6853  ;;  %6879 = vrcp.f32 %v3310_v33  ;;  %v3311_v27 = vadd.f32 1.0, %v6852_v14  ;;  %v9548_v62 = vadd.f32 %v9341_v8, %v8459_v17  ;;  %v5937_v59 = vmul.f32 -1.442695, %v9534_v63 }
 0x2b5   : > { %v6856_v55 = vpop.eup %6855  ;;  %6881 = vrcp.f32 %v3312_v24  ;;  %v3313_v25 = vadd.f32 1.0, %v6854_v28  ;;  %v5939_v24 = vmul.f32 -1.442695, %v9538_v3  ;;  %v12360_v28 = vld [vmem:[#allocation14_spill] sm:$0xff]  ;;  %v5938_v16 = vmul.f32 -1.442695, %v9544_v6 }
 0x2b6   : > { %v6858_v38 = vpop.eup %6857  ;;  %6883 = vrcp.f32 %v3311_v27  ;;  %v3320_v58 = vadd.f32 1.0, %v6856_v55  ;;  %v9556_v27 = vadd.f32 %v12360_v28, %v8448_v26  ;;  %v9558_v55 = vpop.f32.mrf.mxu1 }
 0x2b7   : > { %v6860_v37 = vpop.eup %6859  ;;  %6885 = vrcp.f32 %v3313_v25  ;;  %v3322_v23 = vadd.f32 1.0, %v6858_v38  ;;  %12361 = vst [vmem:[#allocation33_spill] sm:$0xff] %v9558_v55  ;;  %v9563_v38 = vadd.f32 %v9363_v51, %v8452_v31  ;;  %v12364_v51 = vld [vmem:[#allocation50_spill] sm:$0xff] }
 0x2b8   : > { %v6862_v22 = vpop.eup %6861  ;;  %6887 = vrcp.f32 %v3320_v58  ;;  %v3321_v54 = vadd.f32 1.0, %v6860_v37  ;;  %v5940_v37 = vmul.f32 -1.442695, %v9548_v62  ;;  %v9585_v55 = vpop.f32.mrf.mxu1 }
 0x2b9   : > { %v6864_v44 = vpop.eup %6863  ;;  %6889 = vrcp.f32 %v3322_v23  ;;  %v3323_v61 = vadd.f32 1.0, %v6862_v22  ;;  %v12362_v23 = vld [vmem:[#allocation48_spill] sm:$0xff]  ;;  %v9570_v22 = vpop.f32.mrf.mxu0  ;;  %12366 = vst [vmem:[#allocation16_spill] sm:$0xff] %v9585_v55 }
 0x2ba   : > { %v6866_v33 = vpop.eup %6865  ;;  %6891 = vrcp.f32 %v3321_v54  ;;  %v3330_v14 = vadd.f32 1.0, %v6864_v44  ;;  %v9568_v19 = vadd.f32 %v12362_v23, %v8455_v13  ;;  %v9583_v23 = vadd.f32 %v9390_v4, %v8452_v31 }
 0x2bb   : > { %v6868_v8 = vpop.eup %6867  ;;  %6893 = vrcp.f32 %v3323_v61  ;;  %v3332_v25 = vadd.f32 1.0, %v6866_v33  ;;  %v9574_v61 = vadd.f32 %v9378_v5, %v8459_v17  ;;  %v9578_v33 = vadd.f32 %v12364_v51, %v8448_v26  ;;  %v9597_v39 = vpop.f32.mrf.mxu0 }
 0x2bc   : > { %v6870_v58 = vpop.eup %6869  ;;  %6895 = vrcp.f32 %v3330_v14  ;;  %v3331_v35 = vadd.f32 1.0, %v6868_v8  ;;  %12363 = vst [vmem:[#allocation53_spill] sm:$0xff] %v9568_v19  ;;  %v5947_v8 = vmul.f32 -1.442695, %v9556_v27  ;;  %v5949_v5 = vmul.f32 -1.442695, %v9563_v38 }
 0x2bd   : > { %v6872_v54 = vpop.eup %6871  ;;  %6897 = vrcp.f32 %v3332_v25  ;;  %v3333_v44 = vadd.f32 1.0, %v6870_v58  ;;  %12365 = vst [vmem:[#allocation34_spill] sm:$0xff] %v9578_v33  ;;  %v9590_v51 = vadd.f32 %v12367_v32, %v8455_v13  ;;  %v9595_v4 = vadd.f32 %v9400_v52, %v8459_v17  ;;  %12369 = vst [vmem:[#allocation35_spill] sm:$0xff] %v9597_v39  ;;  %v9607_v52 = vpop.f32.mrf.mxu1 }
 0x2be   : > { %v6874_v14 = vpop.eup %6873  ;;  %6899 = vrcp.f32 %v3331_v35  ;;  %v3340_v28 = vadd.f32 1.0, %v6872_v54  ;;  %v5948_v54 = vmul.f32 -1.442695, %v9568_v19  ;;  %v5957_v36 = vmul.f32 -1.442695, %v9578_v33  ;;  %12371 = vst [vmem:[#allocation23_spill] sm:$0xff] %v9607_v52 }
 0x2bf   : > { %v6876_v25 = vpop.eup %6875  ;;  %6901 = vrcp.f32 %v3333_v44  ;;  %v3342_v58 = vadd.f32 1.0, %v6874_v14  ;;  %12368 = vst [vmem:[#allocation22_spill] sm:$0xff] %v9590_v51  ;;  %v5950_v14 = vmul.f32 -1.442695, %v9574_v61  ;;  %v9613_v33 = vadd.f32 %v9419_v1, %v8452_v31 }
 0x2c0   : > { %v6878_v46 = vpop.eup %6877  ;;  %6903 = vrcp.f32 %v3340_v28  ;;  %v3341_v35 = vadd.f32 1.0, %v6876_v25  ;;  %v5959_v28 = vmul.f32 -1.442695, %v9583_v23  ;;  %v12370_v25 = vld [vmem:[#allocation36_spill] sm:$0xff] }
 0x2c1   : > { %v6880_v55 = vpop.eup %6879  ;;  %6905 = vrcp.f32 %v3342_v58  ;;  %v3343_v44 = vadd.f32 1.0, %v6878_v46  ;;  %v9605_v19 = vadd.f32 %v12370_v25, %v8448_v26  ;;  %v5958_v46 = vmul.f32 -1.442695, %v9590_v51  ;;  %v9618_v25 = vpop.f32.mrf.mxu0 }
 0x2c2   : > { %v6882_v32 = vpop.eup %6881  ;;  %v4270_v45 = vmul.f32 %v6880_v55, %v9394_v12  ;;  %6907 = vrcp.f32 %v3341_v35  ;;  %v5960_v26 = vmul.f32 -1.442695, %v9595_v4 }
 0x2c3   : > { %v6884_v39 = vpop.eup %6883  ;;  %v4272_v58 = vmul.f32 %v6882_v32, %v9404_v48  ;;  %6909 = vrcp.f32 %v3343_v44  ;;  %v12372_v32 = vld [vmem:[#allocation24_spill] sm:$0xff] }
 0x2c4   : > { %v6886_v12 = vpop.eup %6885  ;;  %v4375_v55 = vadd.f32 %v9516_v7, %v4270_v45  ;;  %v4271_v35 = vmul.f32 %v6884_v39, %v9408_v47  ;;  %6911 = vpow2.f32 %v5937_v59  ;;  %v12011_v51 = vsub.s32 4, %v12372_v32  ;;  %v9626_v39 = vpop.f32.mrf.mxu1 }
 0x2c5   : > { %v6888_v52 = vpop.eup %6887  ;;  %v4449_v48 = vadd.f32 %v9521_v29, %v4272_v58  ;;  %v4273_v44 = vmul.f32 %v6886_v12, %v9413_v56  ;;  %6913 = vpow2.f32 %v5939_v24  ;;  %v5967_v47 = vmul.f32 -1.442695, %v9605_v19 }
 0x2c6   : > { %v6890_v31 = vpop.eup %6889  ;;  %v4412_v1 = vadd.f32 %v9524_v9, %v4271_v35  ;;  %v4280_v45 = vmul.f32 %v6888_v52, %v9417_v11  ;;  %6915 = vpow2.f32 %v5938_v16  ;;  %v5969_v56 = vmul.f32 -1.442695, %v9613_v33  ;;  %v9633_v9 = vpop.f32.mrf.mxu0 }
 0x2c7   : > { %v6892_v7 = vpop.eup %6891  ;;  %v4486_v59 = vadd.f32 %v9528_v18, %v4273_v44  ;;  %v4282_v29 = vmul.f32 %v6890_v31, %v9424_v10  ;;  %6917 = vpow2.f32 %v5940_v37  ;;  %v12012_v11 = vsub.s32 5, %v12372_v32  ;;  %v9639_v10 = vld [vmem:[%s11960_s4] sm:$0xff] }
 0x2c8   : > { %v6894_v24 = vpop.eup %6893  ;;  %v4376_v58 = vadd.f32 %v4375_v55, %v4280_v45  ;;  %v4281_v12 = vmul.f32 %v6892_v7, %v9429_v30  ;;  %6919 = vpow2.f32 %v5947_v8  ;;  %v9644_v18 = vrot.slane %v9639_v10, %v12011_v51  ;;  %v12373_v55 = vld [vmem:[#allocation40_spill] sm:$0xff]  ;;  %v12374_v45 = vld [vmem:[#allocation27_spill] sm:$0xff] }
 0x2c9   : > { %v6896_v16 = vpop.eup %6895  ;;  %v4450_v52 = vadd.f32 %v4449_v48, %v4282_v29  ;;  %v4283_v35 = vmul.f32 %v6894_v24, %v9435_v42  ;;  %6921 = vpow2.f32 %v5949_v5  ;;  %v9649_v48 = vadd.f32 %v12373_v55, %v8455_v13  ;;  %v9651_v42 = vpop.f32.mrf.mxu1 }
 0x2ca   : > { %v6898_v30 = vpop.eup %6897  ;;  %v4413_v37 = vadd.f32 %v4412_v1, %v4281_v12  ;;  %v4290_v8 = vmul.f32 %v6896_v16, %v9439_v40  ;;  %6923 = vpow2.f32 %v5948_v54  ;;  %v9656_v7 = vadd.f32 %v12374_v45, %v8459_v17  ;;  %v9660_v13 = vpop.f32.mrf.mxu0 }
 0x2cb   : > { %v6900_v5 = vpop.eup %6899  ;;  %v4487_v44 = vadd.f32 %v4486_v59, %v4283_v35  ;;  %v4292_v31 = vmul.f32 %v6898_v30, %v9448_v53  ;;  %6925 = vpow2.f32 %v5950_v14  ;;  %v12013_v54 = vsub.s32 6, %v12372_v32 }
 0x2cc   : > { %v6902_v29 = vpop.eup %6901  ;;  %v4377_v1 = vadd.f32 %v4376_v58, %v4290_v8  ;;  %v4291_v40 = vmul.f32 %v6900_v5, %v9454_v50  ;;  %6927 = vpow2.f32 %v5957_v36  ;;  %v5968_v17 = vmul.f32 -1.442695, %v9649_v48  ;;  %v9665_v58 = vpop.f32.mrf.mxu1 }
 0x2cd   : > { %v6904_v24 = vpop.eup %6903  ;;  %v4451_v12 = vadd.f32 %v4450_v52, %v4292_v31  ;;  %v4293_v59 = vmul.f32 %v6902_v29, %v9465_v15  ;;  %6929 = vpow2.f32 %v5959_v28  ;;  %v5970_v30 = vmul.f32 -1.442695, %v9656_v7  ;;  %v9677_v28 = vpop.f32.mrf.mxu0 }
 0x2ce   : > { %v6906_v53 = vpop.eup %6905  ;;  %v4414_v14 = vadd.f32 %v4413_v37, %v4291_v40  ;;  %v4300_v16 = vmul.f32 %v6904_v24, %v9481_v21  ;;  %6931 = vpow2.f32 %v5958_v46  ;;  %v9675_v21 = vrot.slane %v9639_v10, %v12012_v11  ;;  %v9685_v31 = vpop.f32.mrf.mxu1 }
 0x2cf   : > { %v6908_v50 = vpop.eup %6907  ;;  %v4488_v36 = vadd.f32 %v4487_v44, %v4293_v59  ;;  %v4302_v35 = vmul.f32 %v6906_v53, %v9490_v60  ;;  %6933 = vpow2.f32 %v5960_v26  ;;  %v7858_v26 = vmov 1966171168   ;;  %12375 = vst [vmem:[#allocation10_spill] sm:$0xff] %v9685_v31  ;;  %v9694_v24 = vpop.f32.mrf.mxu0 }
 0x2d0   : > { %v6910_v52 = vpop.eup %6909  ;;  %v9669_v8 = vadd.f32 %v4377_v1, %v4300_v16  ;;  %v4301_v15 = vmul.f32 %v6908_v50, %v9495_v43  ;;  %6935 = vpow2.f32 %v5967_v47  ;;  %v4737_v55 = vunpack.c.l.s4 %v7858_v26  ;;  %v12376_v50 = vld [vmem:[#allocation54_spill] sm:$0xff] }
 0x2d1   : > { %v6912_v46 = vpop.eup %6911  ;;  %v9679_v37 = vadd.f32 %v4451_v12, %v4302_v35  ;;  %v4303_v60 = vmul.f32 %v6910_v52, %v9502_v0  ;;  %6937 = vpow2.f32 %v5969_v56  ;;  %v12014_v47 = vsub.s32 7, %v12372_v32  ;;  %v9705_v35 = vpop.f32.mrf.mxu1 }
 0x2d2   : > { %v6914_v5 = vpop.eup %6913  ;;  %v9682_v44 = vadd.f32 %v4414_v14, %v4301_v15  ;;  %v3350_v43 = vadd.f32 1.0, %v6912_v46  ;;  %6939 = vpow2.f32 %v5968_v17  ;;  %v9692_v0 = vrot.slane %v9639_v10, %v12013_v54  ;;  %12377 = vst [vmem:[#allocation11_spill] sm:$0xff] %v9705_v35  ;;  %v12379_v46 = vld [vmem:[#allocation55_spill] sm:$0xff] }
 0x2d3   : > { %v6916_v45 = vpop.eup %6915  ;;  %v9687_v29 = vadd.f32 %v4488_v36, %v4303_v60  ;;  %v3352_v1 = vadd.f32 1.0, %v6914_v5  ;;  %6941 = vpow2.f32 %v5970_v30  ;;  %v4738_v53 = vunpack.c.0.s8 %v4737_v55  ;;  %v9715_v55 = vpop.f32.mrf.mxu0 }
 0x2d4   : > { %v6918_v56 = vpop.eup %6917  ;;  %6943 = vrcp.f32 %v3350_v43  ;;  %v3351_v40 = vadd.f32 1.0, %v6916_v45  ;;  %v9699_v17 = vrot.slane %v9639_v10, %v12014_v47  ;;  %v9703_v36 = vadd.f32 %v12376_v50, %v9644_v18 }
 0x2d5   : > { %v6920_v12 = vpop.eup %6919  ;;  %6945 = vrcp.f32 %v3352_v1  ;;  %v3353_v59 = vadd.f32 1.0, %v6918_v56  ;;  %v9709_v15 = vadd.f32 %v9467_v57, %v9692_v0  ;;  %v9713_v60 = vadd.f32 %v12379_v46, %v9675_v21 }
 0x2d6   : > { %v6922_v14 = vpop.eup %6921  ;;  %6947 = vrcp.f32 %v3351_v40  ;;  %v3360_v16 = vadd.f32 1.0, %v6920_v12  ;;  %v9718_v45 = vsub.s32 %v4738_v53, %v12372_v32  ;;  %v5661_v57 = vmul.f32 -1.442695, %v9703_v36  ;;  %v9725_v12 = vpop.f32.mrf.mxu1 }
 0x2d7   : > { %v6924_v30 = vpop.eup %6923  ;;  %6949 = vrcp.f32 %v3353_v59  ;;  %v3362_v52 = vadd.f32 1.0, %v6922_v14  ;;  %12378 = vst [vmem:[#allocation46_spill] sm:$0xff] %v9709_v15  ;;  %v9723_v40 = vadd.f32 %v9485_v2, %v9699_v17  ;;  %12382 = vst [vmem:[#allocation38_spill] sm:$0xff] %v9725_v12  ;;  %v5662_v50 = vmul.f32 -1.442695, %v9713_v60 }
 0x2d8   : > { %v6926_v26 = vpop.eup %6925  ;;  %6951 = vrcp.f32 %v3360_v16  ;;  %v3361_v10 = vadd.f32 1.0, %v6924_v30  ;;  %12380 = vst [vmem:[#allocation47_spill] sm:$0xff] %v9718_v45  ;;  %v5663_v16 = vmul.f32 -1.442695, %v9709_v15  ;;  %v9735_v2 = vadd.f32 %v9506_v20, %v9692_v0  ;;  %v12387_v20 = vld [vmem:[#allocation57_spill] sm:$0xff]  ;;  %v9752_v54 = vpop.f32.mrf.mxu1 }
 0x2d9   : > { %v6928_v5 = vpop.eup %6927  ;;  %6953 = vrcp.f32 %v3362_v52  ;;  %v3363_v43 = vadd.f32 1.0, %v6926_v26  ;;  %12381 = vst [vmem:[#allocation37_spill] sm:$0xff] %v9723_v40  ;;  %v12383_v52 = vld [vmem:[#allocation56_spill] sm:$0xff]  ;;  %v9737_v26 = vpop.f32.mrf.mxu0  ;;  %v5664_v51 = vmul.f32 -1.442695, %v9723_v40  ;;  %v9750_v11 = vadd.f32 %v12387_v20, %v9644_v18  ;;  %12388 = vst [vmem:[#allocation29_spill] sm:$0xff] %v9752_v54 }
 0x2da   : > { %v6930_v1 = vpop.eup %6929  ;;  %6955 = vrcp.f32 %v3361_v10  ;;  %v3370_v56 = vadd.f32 1.0, %v6928_v5  ;;  %v9731_v46 = vadd.f32 %v12383_v52, %v9644_v18  ;;  %12384 = vst [vmem:[#allocation42_spill] sm:$0xff] %v9735_v2  ;;  %v5673_v20 = vmul.f32 -1.442695, %v9735_v2  ;;  %v9774_v2 = vpop.f32.mrf.mxu1 }
 0x2db   : > { %v6932_v59 = vpop.eup %6931  ;;  %6957 = vrcp.f32 %v3363_v43  ;;  %v3372_v14 = vadd.f32 1.0, %v6930_v1  ;;  %v12385_v43 = vld [vmem:[#allocation17_spill] sm:$0xff]  ;;  %v9764_v40 = vpop.f32.mrf.mxu0  ;;  %12392 = vst [vmem:[#allocation48_spill] sm:$0xff] %v9774_v2 }
 0x2dc   : > { %v6934_v53 = vpop.eup %6933  ;;  %6959 = vrcp.f32 %v3370_v56  ;;  %v3371_v30 = vadd.f32 1.0, %v6932_v59  ;;  %v9741_v1 = vadd.f32 %v12385_v43, %v9675_v21  ;;  %v9745_v56 = vadd.f32 %v9519_v49, %v9699_v17  ;;  %v12390_v49 = vld [vmem:[#allocation18_spill] sm:$0xff] }
 0x2dd   : > { %v6936_v10 = vpop.eup %6935  ;;  %6961 = vrcp.f32 %v3372_v14  ;;  %v3373_v5 = vadd.f32 1.0, %v6934_v53  ;;  %v9756_v43 = vadd.f32 %v9530_v34, %v9692_v0  ;;  %v9760_v47 = vadd.f32 %v12390_v49, %v9675_v21  ;;  %v9785_v31 = vpop.f32.mrf.mxu0 }
 0x2de   : > { %12386 = vst [vmem:[#allocation39_spill] sm:$0xff] %v9745_v56  ;;  %v6938_v59 = vpop.eup %6937  ;;  %6963 = vrcp.f32 %v3371_v30  ;;  %v3380_v52 = vadd.f32 1.0, %v6936_v10  ;;  %v5671_v32 = vmul.f32 -1.442695, %v9731_v46  ;;  %v5674_v34 = vmul.f32 -1.442695, %v9745_v56 }
 0x2df   : > { %v6940_v14 = vpop.eup %6939  ;;  %6965 = vrcp.f32 %v3373_v5  ;;  %v3382_v53 = vadd.f32 1.0, %v6938_v59  ;;  %12389 = vst [vmem:[#allocation43_spill] sm:$0xff] %v9756_v43  ;;  %v5672_v59 = vmul.f32 -1.442695, %v9741_v1  ;;  %v5682_v56 = vmul.f32 -1.442695, %v9760_v47 }
 0x2e0   : > { %v6942_v30 = vpop.eup %6941  ;;  %6967 = vrcp.f32 %v3380_v52  ;;  %v3381_v10 = vadd.f32 1.0, %v6940_v14  ;;  %v5681_v52 = vmul.f32 -1.442695, %v9750_v11  ;;  %v9772_v14 = vadd.f32 %v9550_v41, %v9699_v17 }
 0x2e1   : > { %v6944_v15 = vpop.eup %6943  ;;  %6969 = vrcp.f32 %v3382_v53  ;;  %v3383_v5 = vadd.f32 1.0, %v6942_v30  ;;  %v5683_v30 = vmul.f32 -1.442695, %v9756_v43 }
 0x2e2   : > { %v6946_v54 = vpop.eup %6945  ;;  %v4310_v49 = vmul.f32 %v6944_v15, %v9534_v63  ;;  %6971 = vrcp.f32 %v3381_v10  ;;  %12391 = vst [vmem:[#allocation14_spill] sm:$0xff] %v9772_v14  ;;  %v12393_v10 = vld [vmem:[#allocation58_spill] sm:$0xff] }
 0x2e3   : > { %v6948_v12 = vpop.eup %6947  ;;  %v4312_v53 = vmul.f32 %v6946_v54, %v9538_v3  ;;  %6973 = vrcp.f32 %v3383_v5  ;;  %v9783_v41 = vadd.f32 %v12393_v10, %v9644_v18  ;;  %v9791_v5 = vadd.f32 %v9570_v22, %v9692_v0 }
 0x2e4   : > { %v6950_v35 = vpop.eup %6949  ;;  %v4379_v63 = vadd.f32 %v9669_v8, %v4310_v49  ;;  %v4311_v15 = vmul.f32 %v6948_v12, %v9544_v6  ;;  %6975 = vpow2.f32 %v5661_v57  ;;  %v5684_v12 = vmul.f32 -1.442695, %v9772_v14  ;;  %v9796_v49 = vpop.f32.mrf.mxu1 }
 0x2e5   : > { %v6952_v2 = vpop.eup %6951  ;;  %v4453_v3 = vadd.f32 %v9679_v37, %v4312_v53  ;;  %v4313_v54 = vmul.f32 %v6950_v35, %v9548_v62  ;;  %6977 = vpow2.f32 %v5663_v16  ;;  %12394 = vst [vmem:[#allocation50_spill] sm:$0xff] %v9791_v5  ;;  %v12395_v35 = vld [vmem:[#allocation19_spill] sm:$0xff] }
 0x2e6   : > { %v6954_v8 = vpop.eup %6953  ;;  %v4416_v6 = vadd.f32 %v9682_v44, %v4311_v15  ;;  %v4320_v57 = vmul.f32 %v6952_v2, %v9556_v27  ;;  %6979 = vpow2.f32 %v5662_v50  ;;  %v9802_v22 = vadd.f32 %v12395_v35, %v9675_v21  ;;  %v12396_v44 = vld [vmem:[#allocation53_spill] sm:$0xff]  ;;  %v9806_v50 = vpop.f32.mrf.mxu0 }
 0x2e7   : > { %v6956_v10 = vpop.eup %6955  ;;  %v4490_v37 = vadd.f32 %v9687_v29, %v4313_v54  ;;  %v4322_v62 = vmul.f32 %v6954_v8, %v9563_v38  ;;  %6981 = vpow2.f32 %v5664_v51  ;;  %v5691_v27 = vmul.f32 -1.442695, %v9783_v41  ;;  %v12397_v8 = vld [vmem:[#allocation34_spill] sm:$0xff] }
 0x2e8   : > { %v6958_v16 = vpop.eup %6957  ;;  %v4380_v53 = vadd.f32 %v4379_v63, %v4320_v57  ;;  %v4321_v15 = vmul.f32 %v6956_v10, %v12396_v44  ;;  %6983 = vpow2.f32 %v5671_v32  ;;  %v5693_v38 = vmul.f32 -1.442695, %v9791_v5  ;;  %v12398_v63 = vld [vmem:[#allocation35_spill] sm:$0xff]  ;;  %v9815_v32 = vpop.f32.mrf.mxu1 }
 0x2e9   : > { %v6960_v2 = vpop.eup %6959  ;;  %v4454_v14 = vadd.f32 %v4453_v3, %v4322_v62  ;;  %v4323_v29 = vmul.f32 %v6958_v16, %v9574_v61  ;;  %6985 = vpow2.f32 %v5673_v20  ;;  %v9813_v57 = vadd.f32 %v12398_v63, %v9699_v17  ;;  %v12400_v16 = vld [vmem:[#allocation22_spill] sm:$0xff] }
 0x2ea   : > { %v6962_v51 = vpop.eup %6961  ;;  %v4417_v54 = vadd.f32 %v4416_v6, %v4321_v15  ;;  %v4330_v35 = vmul.f32 %v6960_v2, %v12397_v8  ;;  %6987 = vpow2.f32 %v5672_v59  ;;  %v5692_v61 = vmul.f32 -1.442695, %v9802_v22  ;;  %v12401_v59 = vld [vmem:[#allocation28_spill] sm:$0xff]  ;;  %v9824_v2 = vpop.f32.mrf.mxu0 }
 0x2eb   : > { %12399 = vst [vmem:[#allocation52_spill] sm:$0xff] %v9813_v57  ;;  %v6964_v10 = vpop.eup %6963  ;;  %v4491_v44 = vadd.f32 %v4490_v37, %v4323_v29  ;;  %v4332_v3 = vmul.f32 %v6962_v51, %v9583_v23  ;;  %6989 = vpow2.f32 %v5674_v34  ;;  %v9822_v15 = vadd.f32 %v12401_v59, %v9644_v18  ;;  %v9833_v51 = vpop.f32.mrf.mxu1 }
 0x2ec   : > { %v6966_v20 = vpop.eup %6965  ;;  %v4381_v62 = vadd.f32 %v4380_v53, %v4330_v35  ;;  %v4331_v6 = vmul.f32 %v6964_v10, %v12400_v16  ;;  %6991 = vpow2.f32 %v5681_v52  ;;  %v9829_v23 = vadd.f32 %v9618_v25, %v9692_v0 }
 0x2ed   : > { %v6968_v8 = vpop.eup %6967  ;;  %v4455_v63 = vadd.f32 %v4454_v14, %v4332_v3  ;;  %v4333_v37 = vmul.f32 %v6966_v20, %v9595_v4  ;;  %6993 = vpow2.f32 %v5683_v30  ;;  %v5694_v52 = vmul.f32 -1.442695, %v9813_v57  ;;  %v12403_v4 = vld [vmem:[#allocation12_spill] sm:$0xff] }
 0x2ee   : > { %12402 = vst [vmem:[#allocation36_spill] sm:$0xff] %v9829_v23  ;;  %v6970_v34 = vpop.eup %6969  ;;  %v4418_v53 = vadd.f32 %v4417_v54, %v4331_v6  ;;  %v4340_v29 = vmul.f32 %v6968_v8, %v9605_v19  ;;  %6995 = vpow2.f32 %v5682_v56  ;;  %v9838_v30 = vadd.f32 %v12403_v4, %v9675_v21  ;;  %v9844_v56 = vpop.f32.mrf.mxu0 }
 0x2ef   : > { %v6972_v35 = vpop.eup %6971  ;;  %v4492_v10 = vadd.f32 %v4491_v44, %v4333_v37  ;;  %v4342_v14 = vmul.f32 %v6970_v34, %v9613_v33  ;;  %6997 = vpow2.f32 %v5684_v12  ;;  %v9842_v19 = vmul.f32 -1.442695, %v9822_v15 }
 0x2f0   : > { %v6974_v25 = vpop.eup %6973  ;;  %v4382_v3 = vadd.f32 %v4381_v62, %v4340_v29  ;;  %v4341_v54 = vmul.f32 %v6972_v35, %v9649_v48  ;;  %6999 = vpow2.f32 %v5691_v27  ;;  %v9849_v33 = vadd.f32 %v9633_v9, %v9699_v17  ;;  %v9851_v48 = vpop.f32.mrf.mxu1 }
 0x2f1   : > { %v6976_v20 = vpop.eup %6975  ;;  %v4456_v16 = vadd.f32 %v4455_v63, %v4342_v14  ;;  %v4343_v44 = vmul.f32 %v6974_v25, %v9656_v7  ;;  %7001 = vpow2.f32 %v5693_v38  ;;  %12405 = vst [vmem:[#allocation27_spill] sm:$0xff] %v9851_v48  ;;  %v9853_v35 = vpop.f32.mrf.mxu0 }
 0x2f2   : > { %12404 = vst [vmem:[#allocation40_spill] sm:$0xff] %v9849_v33  ;;  %v6978_v12 = vpop.eup %6977  ;;  %v4383_v6 = vrot.slane %v4382_v3, 4  ;;  %v4419_v62 = vadd.f32 %v4418_v53, %v4341_v54  ;;  %v3074_v59 = vadd.f32 1.0, %v6976_v20  ;;  %7003 = vpow2.f32 %v5692_v61 }
 0x2f3   : > { %v6980_v27 = vpop.eup %6979  ;;  %v4457_v8 = vrot.slane %v4456_v16, 4  ;;  %v4493_v37 = vadd.f32 %v4492_v10, %v4343_v44  ;;  %v3076_v34 = vadd.f32 1.0, %v6978_v12  ;;  %7005 = vpow2.f32 %v5694_v52  ;;  %v9855_v10 = vpop.f32.mrf.mxu1 }
 0x2f4   : > { %v6982_v63 = vpop.eup %6981  ;;  %v4384_v29 = vadd.f32 %v4383_v6, %v4382_v3  ;;  %v4420_v7 = vrot.slane %v4419_v62, 4  ;;  %7007 = vrcp.f32 %v3074_v59  ;;  %v3075_v38 = vadd.f32 1.0, %v6980_v27  ;;  %12406 = vst [vmem:[#allocation54_spill] sm:$0xff] %v9855_v10 }
 0x2f5   : > { %v6984_v9 = vpop.eup %6983  ;;  %v4458_v14 = vadd.f32 %v4457_v8, %v4456_v16  ;;  %v4494_v4 = vrot.slane %v4493_v37, 4  ;;  %7009 = vrcp.f32 %v3076_v34  ;;  %v3077_v53 = vadd.f32 1.0, %v6982_v63  ;;  %v9857_v8 = vpop.f32.mrf.mxu0 }
 0x2f6   : > { %v6986_v61 = vpop.eup %6985  ;;  %v4385_v25 = vrot.slane %v4384_v29, 2  ;;  %v4421_v54 = vadd.f32 %v4420_v7, %v4419_v62  ;;  %7011 = vrcp.f32 %v3075_v38  ;;  %v3084_v20 = vadd.f32 1.0, %v6984_v9 }
 0x2f7   : > { %v6988_v52 = vpop.eup %6987  ;;  %v4459_v44 = vrot.slane %v4458_v14, 2  ;;  %v4495_v3 = vadd.f32 %v4494_v4, %v4493_v37  ;;  %7013 = vrcp.f32 %v3077_v53  ;;  %v3086_v12 = vadd.f32 1.0, %v6986_v61  ;;  %v9859_v37 = vpop.f32.mrf.mxu1 }
 0x2f8   : > { %v6990_v6 = vpop.eup %6989  ;;  %v4386_v59 = vadd.f32 %v4385_v25, %v4384_v29  ;;  %v4422_v27 = vrot.slane %v4421_v54, 2  ;;  %7015 = vrcp.f32 %v3084_v20  ;;  %v3085_v16 = vadd.f32 1.0, %v6988_v52  ;;  %12407 = vst [vmem:[#allocation55_spill] sm:$0xff] %v9859_v37 }
 0x2f9   : > { %v6992_v34 = vpop.eup %6991  ;;  %v4460_v63 = vadd.f32 %v4459_v44, %v4458_v14  ;;  %v4496_v57 = vrot.slane %v4495_v3, 2  ;;  %7017 = vrcp.f32 %v3086_v12  ;;  %v3087_v62 = vadd.f32 1.0, %v6990_v6  ;;  %v12408_v14 = vld [vmem:[#allocation13_spill] sm:$0xff]  ;;  %v9865_v12 = vpop.f32.mrf.mxu0 }
 0x2fa   : > { %v6994_v7 = vpop.eup %6993  ;;  %v4387_v38 = vrot.slane %v4386_v59, 1  ;;  %v4423_v9 = vadd.f32 %v4422_v27, %v4421_v54  ;;  %7019 = vrcp.f32 %v3085_v16  ;;  %v3094_v5 = vadd.f32 1.0, %v6992_v34 }
 0x2fb   : > { %v6996_v4 = vpop.eup %6995  ;;  %v4461_v53 = vrot.slane %v4460_v63, 1  ;;  %v4497_v29 = vadd.f32 %v4496_v57, %v4495_v3  ;;  %7021 = vrcp.f32 %v3087_v62  ;;  %v3096_v61 = vadd.f32 1.0, %v6994_v7  ;;  %v9871_v62 = vpop.f32.mrf.mxu1 }
 0x2fc   : > { %v6998_v25 = vpop.eup %6997  ;;  %v4424_v20 = vrot.slane %v4423_v9, 1  ;;  %7023 = vrcp.f32 %v3094_v5  ;;  %v3095_v52 = vadd.f32 1.0, %v6996_v4  ;;  %v9863_v44 = vadd.f32 %v12408_v14, %v9644_v18  ;;  %v9877_v48 = vpop.f32.mrf.mxu0 }
 0x2fd   : > { %v7000_v54 = vpop.eup %6999  ;;  %v4498_v6 = vrot.slane %v4497_v29, 1  ;;  %7025 = vrcp.f32 %v3096_v61  ;;  %v3097_v27 = vadd.f32 1.0, %v6998_v25  ;;  %v9869_v16 = vadd.f32 %v9660_v13, %v9692_v0  ;;  %v12410_v25 = vld [vmem:[#allocation30_spill] sm:$0xff] }
 0x2fe   : > { %v7002_v57 = vpop.eup %7001  ;;  %v4388_v3 = vadd.f32 %v4387_v38, %v4386_v59  ;;  %v4425_v34 = vadd.f32 %v4424_v20, %v4423_v9  ;;  %7027 = vrcp.f32 %v3095_v52  ;;  %v3104_v5 = vadd.f32 1.0, %v7000_v54  ;;  %v9890_v54 = vpop.f32.mrf.mxu1 }
 0x2ff   : > { %12409 = vst [vmem:[#allocation56_spill] sm:$0xff] %v9869_v16  ;;  %v7004_v7 = vpop.eup %7003  ;;  %v4462_v4 = vadd.f32 %v4461_v53, %v4460_v63  ;;  %v4499_v14 = vadd.f32 %v4498_v6, %v4497_v29  ;;  %7029 = vrcp.f32 %v3097_v27  ;;  %v3106_v43 = vadd.f32 1.0, %v7002_v57  ;;  %v12414_v27 = vld [vmem:[#allocation9_spill] sm:$0xff] }
 0x300   : > { %v7006_v37 = vpop.eup %7005  ;;  %v4732_v10 = vcombine.low %v4388_v3, %v4425_v34  ;;  %7031 = vrcp.f32 %v3104_v5  ;;  %v3105_v61 = vadd.f32 1.0, %v7004_v7  ;;  %v9875_v13 = vadd.f32 %v12410_v25, %v9675_v21  ;;  %v9906_v5 = vpop.f32.mrf.mxu0 }
 0x301   : > { %v7008_v59 = vpop.eup %7007  ;;  %v4733_v38 = vcombine.low %v4462_v4, %v4499_v14  ;;  %7033 = vrcp.f32 %v3106_v43  ;;  %v3107_v9 = vadd.f32 1.0, %v7006_v37  ;;  %v5703_v20 = vmul.f32 -1.442695, %v9829_v23 }
 0x302   : > { %v9880_v63 = vpop.eup %7009  ;;  %v9883_v53 = vrot.slane %v4732_v10, %v9718_v45  ;;  %7035 = vrcp.f32 %v3105_v61  ;;  %v5702_v29 = vmul.f32 -1.442695, %v9838_v30  ;;  %v9888_v52 = vadd.f32 %v9677_v28, %v9699_v17  ;;  %v12416_v61 = vld [vmem:[#allocation20_spill] sm:$0xff] }
 0x303   : > { %v7012_v6 = vpop.eup %7011  ;;  %v9893_v43 = vrot.slane %v4733_v38, %v9718_v45  ;;  %7037 = vrcp.f32 %v3107_v9  ;;  %v5704_v37 = vmul.f32 -1.442695, %v9849_v33  ;;  %v9898_v10 = vadd.f32 %v12414_v27, %v9644_v18  ;;  %v9923_v45 = vpop.f32.mrf.mxu1 }
 0x304   : > { %12411 = vst [vmem:[#allocation17_spill] sm:$0xff] %v9883_v53  ;;  %12412 = vst [vmem:[#allocation57_spill] sm:$0xff] %v9888_v52  ;;  %v9900_v57 = vpop.eup %7013  ;;  %7039 = vpow2.f32 %v9842_v19  ;;  %v5711_v28 = vmul.f32 -1.442695, %v9863_v44  ;;  %v5713_v3 = vmul.f32 -1.442695, %v9869_v16  ;;  %v9912_v14 = vadd.f32 %v9694_v24, %v9692_v0 }
 0x305   : > { %12413 = vst [vmem:[#allocation18_spill] sm:$0xff] %v9893_v43  ;;  %v5712_v34 = vmul.f32 -1.442695, %v9875_v13  ;;  %v7016_v7 = vpop.eup %7015  ;;  %7041 = vpow2.f32 %v5703_v20  ;;  %v9916_v19 = vadd.f32 %v12416_v61, %v9675_v21  ;;  %v4034_v38 = vmul.f32 %v7008_v59, %v9703_v36  ;;  %v12418_v61 = vld [vmem:[#allocation31_spill] sm:$0xff] }
 0x306   : > { %12415 = vst [vmem:[#allocation58_spill] sm:$0xff] %v9912_v14  ;;  %v9918_v25 = vpop.eup %7017  ;;  %v4044_v9 = vmul.f32 %v7016_v7, %v9731_v46  ;;  %7043 = vpow2.f32 %v5702_v29  ;;  %v5714_v27 = vmul.f32 -1.442695, %v9888_v52  ;;  %v5721_v24 = vmul.f32 -1.442695, %v9898_v10  ;;  %v9938_v7 = vpop.f32.mrf.mxu0 }
 0x307   : > { %v7020_v20 = vpop.eup %7019  ;;  %7045 = vpow2.f32 %v5704_v37  ;;  %v9928_v4 = vadd.f32 %v9715_v55, %v9699_v17  ;;  %v9932_v43 = vadd.f32 %v12418_v61, %v9644_v18  ;;  %v4035_v46 = vmul.f32 %v7012_v6, %v9713_v60 }
 0x308   : > { %v9934_v36 = vpop.eup %7021  ;;  %v4500_v59 = vadd.f32 %v4044_v9, %v4034_v38  ;;  %v4045_v29 = vmul.f32 %v7020_v20, %v9741_v1  ;;  %7047 = vpow2.f32 %v5711_v28  ;;  %v5723_v53 = vmul.f32 -1.442695, %v9912_v14  ;;  %v12420_v1 = vld [vmem:[#allocation41_spill] sm:$0xff]  ;;  %v9953_v28 = vpop.f32.mrf.mxu1 }
 0x309   : > { %12417 = vst [vmem:[#allocation19_spill] sm:$0xff] %v9928_v4  ;;  %v7024_v37 = vpop.eup %7023  ;;  %7049 = vpow2.f32 %v5713_v3  ;;  %v5722_v55 = vmul.f32 -1.442695, %v9916_v19  ;;  %v9944_v61 = vadd.f32 %v9737_v26, %v9692_v0  ;;  %v9951_v6 = vadd.f32 %v12420_v1, %v9675_v21 }
 0x30a   : > { %v9946_v52 = vpop.eup %7025  ;;  %v4537_v16 = vadd.f32 %v4045_v29, %v4035_v46  ;;  %v4054_v60 = vmul.f32 %v7024_v37, %v9750_v11  ;;  %7051 = vpow2.f32 %v5712_v34  ;;  %v5724_v38 = vmul.f32 -1.442695, %v9928_v4  ;;  %v9964_v46 = vpop.f32.mrf.mxu0 }
 0x30b   : > { %12419 = vst [vmem:[#allocation53_spill] sm:$0xff] %v9944_v61  ;;  %v7028_v3 = vpop.eup %7027  ;;  %7053 = vpow2.f32 %v5714_v27  ;;  %v9958_v26 = vadd.f32 %v9764_v40, %v9699_v17  ;;  %v5731_v34 = vmul.f32 -1.442695, %v9932_v43  ;;  %v5733_v27 = vmul.f32 -1.442695, %v9944_v61 }
 0x30c   : > { %v9960_v9 = vpop.eup %7029  ;;  %v4501_v20 = vadd.f32 %v4500_v59, %v4054_v60  ;;  %v4055_v11 = vmul.f32 %v7028_v3, %v9760_v47  ;;  %7055 = vpow2.f32 %v5721_v24  ;;  %v5732_v4 = vmul.f32 -1.442695, %v9951_v6  ;;  %v9971_v59 = vpop.f32.mrf.mxu1 }
 0x30d   : > { %12421 = vst [vmem:[#allocation34_spill] sm:$0xff] %v9958_v26  ;;  %v7032_v29 = vpop.eup %7031  ;;  %7057 = vpow2.f32 %v5723_v53  ;;  %12422 = vst [vmem:[#allocation35_spill] sm:$0xff] %v9971_v59  ;;  %v5734_v24 = vmul.f32 -1.442695, %v9958_v26  ;;  %v9979_v61 = vpop.f32.mrf.mxu0 }
 0x30e   : > { %v9967_v37 = vpop.eup %7033  ;;  %v4538_v1 = vadd.f32 %v4537_v16, %v4055_v11  ;;  %v4064_v40 = vmul.f32 %v7032_v29, %v9783_v41  ;;  %7059 = vpow2.f32 %v5722_v55  ;;  %v9983_v29 = vpop.f32.mrf.mxu1 }
 0x30f   : > { %v7036_v47 = vpop.eup %7035  ;;  %7061 = vpow2.f32 %v5724_v38  ;;  %12423 = vst [vmem:[#allocation22_spill] sm:$0xff] %v9983_v29 }
 0x310   : > { %v9974_v60 = vpop.eup %7037  ;;  %v9976_v3 = vadd.f32 %v4501_v20, %v4064_v40  ;;  %v4065_v53 = vmul.f32 %v7036_v47, %v9802_v22  ;;  %7063 = vpow2.f32 %v5731_v34  ;;  %v9985_v40 = vpop.f32.mrf.mxu0 }
 0x311   : > { %v7040_v16 = vpop.eup %7039  ;;  %7065 = vpow2.f32 %v5733_v27 }
 0x312   : > { %v7042_v41 = vpop.eup %7041  ;;  %v9981_v55 = vadd.f32 %v4538_v1, %v4065_v53  ;;  %v3114_v11 = vadd.f32 1.0, %v7040_v16  ;;  %7067 = vpow2.f32 %v5732_v4  ;;  %v9987_v1 = vpop.f32.mrf.mxu1 }
 0x313   : > { %v7044_v38 = vpop.eup %7043  ;;  %v3116_v26 = vadd.f32 1.0, %v7042_v41  ;;  %7069 = vpow2.f32 %v5734_v24  ;;  %12424 = vst [vmem:[#allocation28_spill] sm:$0xff] %v9987_v1  ;;  %v9989_v24 = vpop.f32.mrf.mxu0 }
 0x314   : > { %v7046_v14 = vpop.eup %7045  ;;  %7071 = vrcp.f32 %v3114_v11  ;;  %v3115_v20 = vadd.f32 1.0, %v7044_v38 }
 0x315   : > { %v7048_v22 = vpop.eup %7047  ;;  %7073 = vrcp.f32 %v3116_v26  ;;  %v3117_v34 = vadd.f32 1.0, %v7046_v14  ;;  %v9991_v14 = vpop.f32.mrf.mxu1 }
 0x316   : > { %v7050_v47 = vpop.eup %7049  ;;  %7075 = vrcp.f32 %v3115_v20  ;;  %v3124_v27 = vadd.f32 1.0, %v7048_v22  ;;  %12425 = vst [vmem:[#allocation12_spill] sm:$0xff] %v9991_v14 }
 0x317   : > { %v7052_v53 = vpop.eup %7051  ;;  %7077 = vrcp.f32 %v3117_v34  ;;  %v3126_v4 = vadd.f32 1.0, %v7050_v47  ;;  %v12426_v47 = vld [vmem:[#allocation32_spill] sm:$0xff] }
 0x318   : > { %v7054_v16 = vpop.eup %7053  ;;  %7079 = vrcp.f32 %v3124_v27  ;;  %v3125_v41 = vadd.f32 1.0, %v7052_v53  ;;  %v9995_v27 = vadd.f32 %v12426_v47, %v9644_v18  ;;  %v9997_v53 = vpop.f32.mrf.mxu0 }
 0x319   : > { %v7056_v11 = vpop.eup %7055  ;;  %7081 = vrcp.f32 %v3126_v4  ;;  %v3127_v38 = vadd.f32 1.0, %v7054_v16  ;;  %v10001_v16 = vadd.f32 %v9785_v31, %v9692_v0 }
 0x31a   : > { %v7058_v33 = vpop.eup %7057  ;;  %7083 = vrcp.f32 %v3125_v41  ;;  %v3134_v26 = vadd.f32 1.0, %v7056_v11  ;;  %12427 = vst [vmem:[#allocation13_spill] sm:$0xff] %v9995_v27  ;;  %v5741_v14 = vmul.f32 -1.442695, %v9995_v27 }
 0x31b   : > { %v7060_v20 = vpop.eup %7059  ;;  %7085 = vrcp.f32 %v3127_v38  ;;  %v3136_v22 = vadd.f32 1.0, %v7058_v33  ;;  %12428 = vst [vmem:[#allocation30_spill] sm:$0xff] %v10001_v16  ;;  %v12429_v33 = vld [vmem:[#allocation15_spill] sm:$0xff] }
 0x31c   : > { %v7062_v23 = vpop.eup %7061  ;;  %7087 = vrcp.f32 %v3134_v26  ;;  %v3135_v34 = vadd.f32 1.0, %v7060_v20  ;;  %v10005_v38 = vadd.f32 %v12429_v33, %v9675_v21  ;;  %v10007_v26 = vpop.f32.mrf.mxu1 }
 0x31d   : > { %v7064_v1 = vpop.eup %7063  ;;  %7089 = vrcp.f32 %v3136_v22  ;;  %v3137_v4 = vadd.f32 1.0, %v7062_v23  ;;  %12431 = vst [vmem:[#allocation20_spill] sm:$0xff] %v10007_v26  ;;  %v10011_v22 = vadd.f32 %v9806_v50, %v9699_v17  ;;  %v10018_v33 = vpop.f32.mrf.mxu0  ;;  %v10023_v50 = vadd.f32 %v9824_v2, %v9692_v0 }
 0x31e   : > { %v7066_v41 = vpop.eup %7065  ;;  %7091 = vrcp.f32 %v3135_v34  ;;  %v3144_v11 = vadd.f32 1.0, %v7064_v1  ;;  %12430 = vst [vmem:[#allocation9_spill] sm:$0xff] %v10005_v38  ;;  %v12433_v1 = vld [vmem:[#allocation44_spill] sm:$0xff]  ;;  %v10033_v59 = vpop.f32.mrf.mxu1  ;;  %v10038_v2 = vadd.f32 %v9844_v56, %v9699_v17 }
 0x31f   : > { %v7068_v20 = vpop.eup %7067  ;;  %7093 = vrcp.f32 %v3137_v4  ;;  %v3146_v47 = vadd.f32 1.0, %v7066_v41  ;;  %12432 = vst [vmem:[#allocation31_spill] sm:$0xff] %v10011_v22  ;;  %v10016_v34 = vadd.f32 %v12433_v1, %v9644_v18  ;;  %v5743_v4 = vmul.f32 -1.442695, %v10001_v16  ;;  %12435 = vst [vmem:[#allocation32_spill] sm:$0xff] %v10023_v50  ;;  %v12436_v1 = vld [vmem:[#allocation49_spill] sm:$0xff] }
 0x320   : > { %v7070_v23 = vpop.eup %7069  ;;  %7095 = vrcp.f32 %v3144_v11  ;;  %v3145_v31 = vadd.f32 1.0, %v7068_v20  ;;  %v5742_v20 = vmul.f32 -1.442695, %v10005_v38  ;;  %v10031_v27 = vadd.f32 %v12436_v1, %v9675_v21  ;;  %12438 = vst [vmem:[#allocation44_spill] sm:$0xff] %v10033_v59  ;;  %12439 = vst [vmem:[#allocation49_spill] sm:$0xff] %v10038_v2  ;;  %v12440_v16 = vld [vmem:[#allocation45_spill] sm:$0xff] }
 0x321   : > { %12434 = vst [vmem:[#allocation41_spill] sm:$0xff] %v10016_v34  ;;  %v7072_v29 = vpop.eup %7071  ;;  %7097 = vrcp.f32 %v3146_v47  ;;  %v3147_v26 = vadd.f32 1.0, %v7070_v23  ;;  %v5744_v23 = vmul.f32 -1.442695, %v10011_v22  ;;  %v5751_v38 = vmul.f32 -1.442695, %v10016_v34 }
 0x322   : > { %v10025_v41 = vpop.eup %7073  ;;  %v4074_v11 = vmul.f32 %v7072_v29, %v9822_v15  ;;  %7099 = vrcp.f32 %v3145_v31  ;;  %12437 = vst [vmem:[#allocation15_spill] sm:$0xff] %v10031_v27  ;;  %v10042_v15 = vadd.f32 %v12440_v16, %v9644_v18  ;;  %v5753_v56 = vmul.f32 -1.442695, %v10023_v50  ;;  %v12444_v16 = vld [vmem:[#allocation51_spill] sm:$0xff] }
 0x323   : > { %v7076_v47 = vpop.eup %7075  ;;  %7101 = vrcp.f32 %v3147_v26  ;;  %v10049_v26 = vpop.f32.mrf.mxu0  ;;  %v10054_v59 = vadd.f32 %v9853_v35, %v9692_v0  ;;  %v5754_v35 = vmul.f32 -1.442695, %v10038_v2 }
 0x324   : > { %12441 = vst [vmem:[#allocation45_spill] sm:$0xff] %v10042_v15  ;;  %v10044_v29 = vpop.eup %7077  ;;  %v4503_v31 = vadd.f32 %v9976_v3, %v4074_v11  ;;  %v4075_v1 = vmul.f32 %v7076_v47, %v9838_v30  ;;  %7103 = vpow2.f32 %v5741_v14  ;;  %v5752_v11 = vmul.f32 -1.442695, %v10031_v27 }
 0x325   : > { %12442 = vst [vmem:[#allocation59_spill] sm:$0xff] %v10044_v29  ;;  %v7080_v22 = vpop.eup %7079  ;;  %7105 = vpow2.f32 %v5743_v4  ;;  %12443 = vst [vmem:[#allocation60_spill] sm:$0xff] %v10054_v59  ;;  %v10058_v29 = vadd.f32 %v12444_v16, %v9675_v21  ;;  %v10065_v4 = vpop.f32.mrf.mxu1  ;;  %v5761_v50 = vmul.f32 -1.442695, %v10042_v15  ;;  %v10071_v16 = vadd.f32 %v9857_v8, %v9699_v17 }
 0x326   : > { %v10060_v3 = vpop.eup %7081  ;;  %v4540_v30 = vadd.f32 %v9981_v55, %v4075_v1  ;;  %v4084_v14 = vmul.f32 %v7080_v22, %v9863_v44  ;;  %7107 = vpow2.f32 %v5742_v20  ;;  %v12447_v22 = vld [vmem:[#allocation21_spill] sm:$0xff]  ;;  %v10080_v1 = vpop.f32.mrf.mxu0  ;;  %v5763_v15 = vmul.f32 -1.442695, %v10054_v59 }
 0x327   : > { %12445 = vst [vmem:[#allocation51_spill] sm:$0xff] %v10058_v29  ;;  %v7084_v47 = vpop.eup %7083  ;;  %7109 = vpow2.f32 %v5744_v23  ;;  %12446 = vst [vmem:[#allocation61_spill] sm:$0xff] %v10071_v16  ;;  %v10078_v20 = vadd.f32 %v12447_v22, %v9644_v18  ;;  %v5762_v2 = vmul.f32 -1.442695, %v10058_v29  ;;  %v10086_v8 = vadd.f32 %v9865_v12, %v9692_v0  ;;  %v10095_v22 = vpop.f32.mrf.mxu1 }
 0x328   : > { %v10073_v34 = vpop.eup %7085  ;;  %v4504_v55 = vadd.f32 %v4503_v31, %v4084_v14  ;;  %v4085_v44 = vmul.f32 %v7084_v47, %v9875_v13  ;;  %7111 = vpow2.f32 %v5751_v38  ;;  %v12450_v14 = vld [vmem:[#allocation33_spill] sm:$0xff]  ;;  %v5764_v29 = vmul.f32 -1.442695, %v10071_v16 }
 0x329   : > { %12448 = vst [vmem:[#allocation21_spill] sm:$0xff] %v10078_v20  ;;  %v7088_v23 = vpop.eup %7087  ;;  %7113 = vpow2.f32 %v5753_v56  ;;  %12449 = vst [vmem:[#allocation62_spill] sm:$0xff] %v10086_v8  ;;  %v10093_v47 = vadd.f32 %v12450_v14, %v9675_v21  ;;  %v10100_v12 = vadd.f32 %v9877_v48, %v9699_v17 }
 0x32a   : > { %v10088_v31 = vpop.eup %7089  ;;  %v4541_v13 = vadd.f32 %v4540_v30, %v4085_v44  ;;  %v4094_v38 = vmul.f32 %v7088_v23, %v9898_v10  ;;  %7115 = vpow2.f32 %v5752_v11  ;;  %v5771_v11 = vmul.f32 -1.442695, %v10078_v20  ;;  %v10106_v44 = vpop.f32.mrf.mxu0 }
 0x32b   : > { %12451 = vst [vmem:[#allocation33_spill] sm:$0xff] %v10093_v47  ;;  %v7092_v56 = vpop.eup %7091  ;;  %7117 = vpow2.f32 %v5754_v35  ;;  %12452 = vst [vmem:[#allocation63_spill] sm:$0xff] %v10100_v12  ;;  %v5773_v35 = vmul.f32 -1.442695, %v10086_v8  ;;  %v5772_v27 = vmul.f32 -1.442695, %v10093_v47 }
 0x32c   : > { %v10102_v59 = vpop.eup %7093  ;;  %v4505_v30 = vadd.f32 %v4504_v55, %v4094_v38  ;;  %v4095_v10 = vmul.f32 %v7092_v56, %v9916_v19  ;;  %7119 = vpow2.f32 %v5761_v50  ;;  %v10113_v55 = vpop.f32.mrf.mxu1  ;;  %v5774_v50 = vmul.f32 -1.442695, %v10100_v12 }
 0x32d   : > { %v7096_v23 = vpop.eup %7095  ;;  %7121 = vpow2.f32 %v5763_v15  ;;  %v10121_v8 = vpop.f32.mrf.mxu0 }
 0x32e   : > { %v10109_v14 = vpop.eup %7097  ;;  %v4542_v16 = vadd.f32 %v4541_v13, %v4095_v10  ;;  %v4104_v48 = vmul.f32 %v7096_v23, %v9932_v43  ;;  %7123 = vpow2.f32 %v5762_v2  ;;  %v10125_v23 = vpop.f32.mrf.mxu1 }
 0x32f   : > { %v7100_v19 = vpop.eup %7099  ;;  %7125 = vpow2.f32 %v5764_v29 }
 0x330   : > { %v10116_v38 = vpop.eup %7101  ;;  %v10118_v56 = vadd.f32 %v4505_v30, %v4104_v48  ;;  %v4105_v15 = vmul.f32 %v7100_v19, %v9951_v6  ;;  %7127 = vpow2.f32 %v5771_v11  ;;  %v10127_v48 = vpop.f32.mrf.mxu0 }
 0x331   : > { %v7104_v13 = vpop.eup %7103  ;;  %7129 = vpow2.f32 %v5773_v35 }
 0x332   : > { %12453 = vst [vmem:[#allocation64_spill] sm:$0xff] %v10118_v56  ;;  %v7106_v43 = vpop.eup %7105  ;;  %v10123_v2 = vadd.f32 %v4542_v16, %v4105_v15  ;;  %v3154_v10 = vadd.f32 1.0, %v7104_v13  ;;  %7131 = vpow2.f32 %v5772_v27  ;;  %v10129_v16 = vpop.f32.mrf.mxu1 }
 0x333   : > { %v7108_v29 = vpop.eup %7107  ;;  %v3156_v12 = vadd.f32 1.0, %v7106_v43  ;;  %7133 = vpow2.f32 %v5774_v50  ;;  %v10131_v50 = vpop.f32.mrf.mxu0 }
 0x334   : > { %12454 = vst [vmem:[#allocation65_spill] sm:$0xff] %v10123_v2  ;;  %v7110_v47 = vpop.eup %7109  ;;  %7135 = vrcp.f32 %v3154_v10  ;;  %v3155_v30 = vadd.f32 1.0, %v7108_v29 }
 0x335   : > { %v7112_v6 = vpop.eup %7111  ;;  %7137 = vrcp.f32 %v3156_v12  ;;  %v3157_v11 = vadd.f32 1.0, %v7110_v47  ;;  %v10133_v47 = vpop.f32.mrf.mxu1 }
 0x336   : > { %v7114_v19 = vpop.eup %7113  ;;  %7139 = vrcp.f32 %v3155_v30  ;;  %v3164_v35 = vadd.f32 1.0, %v7112_v6  ;;  %12455 = vst [vmem:[#allocation66_spill] sm:$0xff] %v10133_v47 }
 0x337   : > { %v7116_v15 = vpop.eup %7115  ;;  %7141 = vrcp.f32 %v3157_v11  ;;  %v3166_v27 = vadd.f32 1.0, %v7114_v19  ;;  %v12456_v19 = vld [vmem:[#allocation16_spill] sm:$0xff] }
 0x338   : > { %v7118_v13 = vpop.eup %7117  ;;  %7143 = vrcp.f32 %v3164_v35  ;;  %v3165_v43 = vadd.f32 1.0, %v7116_v15  ;;  %v10137_v35 = vadd.f32 %v12456_v19, %v9644_v18  ;;  %v10139_v15 = vpop.f32.mrf.mxu0 }
 0x339   : > { %v7120_v10 = vpop.eup %7119  ;;  %7145 = vrcp.f32 %v3166_v27  ;;  %v3167_v29 = vadd.f32 1.0, %v7118_v13  ;;  %v10143_v13 = vadd.f32 %v9906_v5, %v9692_v0 }
 0x33a   : > { %v7122_v20 = vpop.eup %7121  ;;  %7147 = vrcp.f32 %v3165_v43  ;;  %v3174_v12 = vadd.f32 1.0, %v7120_v10  ;;  %12457 = vst [vmem:[#allocation16_spill] sm:$0xff] %v10137_v35  ;;  %v5781_v47 = vmul.f32 -1.442695, %v10137_v35 }
 0x33b   : > { %v7124_v30 = vpop.eup %7123  ;;  %7149 = vrcp.f32 %v3167_v29  ;;  %v3176_v6 = vadd.f32 1.0, %v7122_v20  ;;  %12458 = vst [vmem:[#allocation67_spill] sm:$0xff] %v10143_v13  ;;  %v12459_v20 = vld [vmem:[#allocation23_spill] sm:$0xff] }
 0x33c   : > { %v7126_v2 = vpop.eup %7125  ;;  %7151 = vrcp.f32 %v3174_v12  ;;  %v3175_v11 = vadd.f32 1.0, %v7124_v30  ;;  %v10147_v29 = vadd.f32 %v12459_v20, %v9675_v21  ;;  %v10149_v12 = vpop.f32.mrf.mxu1 }
 0x33d   : > { %v7128_v56 = vpop.eup %7127  ;;  %7153 = vrcp.f32 %v3176_v6  ;;  %v3177_v27 = vadd.f32 1.0, %v7126_v2  ;;  %v10153_v6 = vadd.f32 %v9938_v7, %v9699_v17  ;;  %v10167_v7 = vadd.f32 %v9964_v46, %v9692_v0 }
 0x33e   : > { %v7130_v43 = vpop.eup %7129  ;;  %7155 = vrcp.f32 %v3175_v11  ;;  %v3184_v10 = vadd.f32 1.0, %v7128_v56  ;;  %12460 = vst [vmem:[#allocation23_spill] sm:$0xff] %v10147_v29  ;;  %v10158_v56 = vadd.f32 %v9626_v39, %v9644_v18  ;;  %v10160_v11 = vpop.f32.mrf.mxu0  ;;  %v10174_v39 = vadd.f32 %v9651_v42, %v9675_v21 }
 0x33f   : > { %v7132_v30 = vpop.eup %7131  ;;  %7157 = vrcp.f32 %v3177_v27  ;;  %v3186_v19 = vadd.f32 1.0, %v7130_v43  ;;  %12461 = vst [vmem:[#allocation68_spill] sm:$0xff] %v10153_v6  ;;  %v5783_v43 = vmul.f32 -1.442695, %v10143_v13  ;;  %12464 = vst [vmem:[#allocation71_spill] sm:$0xff] %v10167_v7  ;;  %v10176_v35 = vpop.f32.mrf.mxu1  ;;  %v10183_v46 = vadd.f32 %v9979_v61, %v9699_v17 }
 0x340   : > { %v7134_v2 = vpop.eup %7133  ;;  %7159 = vrcp.f32 %v3184_v10  ;;  %v3185_v5 = vadd.f32 1.0, %v7132_v30  ;;  %12462 = vst [vmem:[#allocation69_spill] sm:$0xff] %v10158_v56  ;;  %v5782_v30 = vmul.f32 -1.442695, %v10147_v29  ;;  %12466 = vst [vmem:[#allocation73_spill] sm:$0xff] %v10174_v39  ;;  %v10190_v42 = vadd.f32 %v9665_v58, %v9644_v18  ;;  %v10192_v29 = vpop.f32.mrf.mxu0  ;;  %v12476_v58 = vld [vmem:[#allocation10_spill] sm:$0xff] }
 0x341   : > { %v10162_v20 = vpop.eup %7135  ;;  %7161 = vrcp.f32 %v3186_v19  ;;  %v3187_v27 = vadd.f32 1.0, %v7134_v2  ;;  %12467 = vst [vmem:[#allocation74_spill] sm:$0xff] %v10176_v35  ;;  %v5784_v19 = vmul.f32 -1.442695, %v10153_v6  ;;  %12469 = vst [vmem:[#allocation76_spill] sm:$0xff] %v10183_v46  ;;  %v10199_v61 = vadd.f32 %v9985_v40, %v9692_v0  ;;  %v10201_v6 = vpop.f32.mrf.mxu1 }
 0x342   : > { %12463 = vst [vmem:[#allocation70_spill] sm:$0xff] %v10162_v20  ;;  %v10169_v10 = vpop.eup %7137  ;;  %7163 = vrcp.f32 %v3185_v5  ;;  %v5791_v5 = vmul.f32 -1.442695, %v10158_v56  ;;  %12471 = vst [vmem:[#allocation78_spill] sm:$0xff] %v10190_v42  ;;  %v5792_v56 = vmul.f32 -1.442695, %v10174_v39  ;;  %v10215_v40 = vadd.f32 %v9989_v24, %v9699_v17 }
 0x343   : > { %12465 = vst [vmem:[#allocation72_spill] sm:$0xff] %v10169_v10  ;;  %v10178_v20 = vpop.eup %7139  ;;  %7165 = vrcp.f32 %v3187_v27  ;;  %v5793_v27 = vmul.f32 -1.442695, %v10167_v7  ;;  %12473 = vst [vmem:[#allocation80_spill] sm:$0xff] %v10199_v61  ;;  %v12481_v39 = vld [vmem:[#allocation11_spill] sm:$0xff]  ;;  %v10231_v24 = vadd.f32 %v9997_v53, %v9692_v0  ;;  %v10247_v53 = vadd.f32 %v10018_v33, %v9699_v17 }
 0x344   : > { %12468 = vst [vmem:[#allocation75_spill] sm:$0xff] %v10178_v20  ;;  %v10185_v2 = vpop.eup %7141  ;;  %7167 = vpow2.f32 %v5781_v47  ;;  %12474 = vst [vmem:[#allocation81_spill] sm:$0xff] %v10201_v6  ;;  %v10222_v6 = vadd.f32 %v12481_v39, %v9644_v18  ;;  %v12487_v39 = vld [vmem:[#allocation38_spill] sm:$0xff] }
 0x345   : > { %12470 = vst [vmem:[#allocation77_spill] sm:$0xff] %v10185_v2  ;;  %v10194_v13 = vpop.eup %7143  ;;  %7169 = vpow2.f32 %v5783_v43  ;;  %v10208_v2 = vadd.f32 %v12476_v58, %v9675_v21  ;;  %v5794_v43 = vmul.f32 -1.442695, %v10183_v46  ;;  %12479 = vst [vmem:[#allocation84_spill] sm:$0xff] %v10215_v40  ;;  %v10224_v58 = vpop.f32.mrf.mxu0 }
 0x346   : > { %12472 = vst [vmem:[#allocation79_spill] sm:$0xff] %v10194_v13  ;;  %v10203_v47 = vpop.eup %7145  ;;  %7171 = vpow2.f32 %v5782_v30  ;;  %v5801_v30 = vmul.f32 -1.442695, %v10190_v42  ;;  %12482 = vst [vmem:[#allocation11_spill] sm:$0xff] %v10222_v6  ;;  %v10233_v46 = vpop.f32.mrf.mxu1 }
 0x347   : > { %12475 = vst [vmem:[#allocation82_spill] sm:$0xff] %v10203_v47  ;;  %12477 = vst [vmem:[#allocation10_spill] sm:$0xff] %v10208_v2  ;;  %v10210_v20 = vpop.eup %7147  ;;  %7173 = vpow2.f32 %v5784_v19  ;;  %v5803_v19 = vmul.f32 -1.442695, %v10199_v61  ;;  %v5802_v42 = vmul.f32 -1.442695, %v10208_v2  ;;  %v10252_v2 = vpop.f32.mrf.mxu0 }
 0x348   : > { %12478 = vst [vmem:[#allocation83_spill] sm:$0xff] %v10210_v20  ;;  %v10217_v7 = vpop.eup %7149  ;;  %7175 = vpow2.f32 %v5791_v5  ;;  %12484 = vst [vmem:[#allocation87_spill] sm:$0xff] %v10231_v24  ;;  %v4844_v61 = vld [vmem:[#allocation3 + $0xf8] sm:$0xff] }
 0x349   : > { %12480 = vst [vmem:[#allocation85_spill] sm:$0xff] %v10217_v7  ;;  %v10226_v47 = vpop.eup %7151  ;;  %7177 = vpow2.f32 %v5793_v27  ;;  %12485 = vst [vmem:[#allocation88_spill] sm:$0xff] %v10233_v46  ;;  %v10240_v7 = vadd.f32 %v12487_v39, %v9675_v21  ;;  %v5804_v27 = vmul.f32 -1.442695, %v10215_v40  ;;  %v4828_v46 = vld [vmem:[#allocation3 + $0x78] sm:$0xff]  ;;  %6000 = vmatprep.subr.mxu0 %v4844_v61  ;;  %v10257_v40 = vpop.f32.mrf.mxu1 }
 0x34a   : > { %12483 = vst [vmem:[#allocation86_spill] sm:$0xff] %v10226_v47  ;;  %v10235_v5 = vpop.eup %7153  ;;  %7179 = vpow2.f32 %v5792_v56  ;;  %12490 = vst [vmem:[#allocation91_spill] sm:$0xff] %v10247_v53  ;;  %v5811_v56 = vmul.f32 -1.442695, %v10222_v6  ;;  %6001 = vmatpush3.msra.mxu0 %v4828_v46  ;;  %v10267_v61 = vpop.f32.mrf.mxu0 }
 0x34b   : > { %12486 = vst [vmem:[#allocation89_spill] sm:$0xff] %v10235_v5  ;;  %12488 = vst [vmem:[#allocation38_spill] sm:$0xff] %v10240_v7  ;;  %v10242_v20 = vpop.eup %7155  ;;  %7181 = vpow2.f32 %v5794_v43  ;;  %v5813_v43 = vmul.f32 -1.442695, %v10231_v24  ;;  %v10269_v46 = vpop.f32.mrf.mxu1  ;;  %v12506_v5 = vld [vmem:[#allocation25_spill] sm:$0xff] }
 0x34c   : > { %12489 = vst [vmem:[#allocation90_spill] sm:$0xff] %v10242_v20  ;;  %v10249_v47 = vpop.eup %7157  ;;  %7183 = vpow2.f32 %v5801_v30  ;;  %12493 = vst [vmem:[#allocation94_spill] sm:$0xff] %v10257_v40  ;;  %v5812_v20 = vmul.f32 -1.442695, %v10240_v7  ;;  %v5814_v30 = vmul.f32 -1.442695, %v10247_v53 }
 0x34d   : > { %12491 = vst [vmem:[#allocation92_spill] sm:$0xff] %v10249_v47  ;;  %v10254_v39 = vpop.eup %7159  ;;  %7185 = vpow2.f32 %v5803_v19  ;;  %12497 = vst [vmem:[#allocation98_spill] sm:$0xff] %v10269_v46  ;;  %v4843_v7 = vld [vmem:[#allocation3 + $0xf0] sm:$0xff] }
 0x34e   : > { %12492 = vst [vmem:[#allocation93_spill] sm:$0xff] %v10254_v39  ;;  %v10259_v33 = vpop.eup %7161  ;;  %7187 = vpow2.f32 %v5802_v42  ;;  %v10271_v39 = vpop.f32.mrf.mxu0  ;;  %6002 = vmatprep.subr.mxu0 %v4843_v7 }
 0x34f   : > { %12494 = vst [vmem:[#allocation95_spill] sm:$0xff] %v10259_v33  ;;  %v10262_v47 = vpop.eup %7163  ;;  %7189 = vpow2.f32 %v5804_v27 }
 0x350   : > { %12495 = vst [vmem:[#allocation96_spill] sm:$0xff] %v10262_v47  ;;  %v10265_v6 = vpop.eup %7165  ;;  %7191 = vpow2.f32 %v5811_v56  ;;  %v4827_v47 = vld [vmem:[#allocation3 + $0x70] sm:$0xff] }
 0x351   : > { %12496 = vst [vmem:[#allocation97_spill] sm:$0xff] %v10265_v6  ;;  %v7168_v19 = vpop.eup %7167  ;;  %7193 = vpow2.f32 %v5813_v43  ;;  %6003 = vmatpush3.msra.mxu0 %v4827_v47  ;;  %v10273_v43 = vpop.f32.mrf.mxu1 }
 0x352   : > { %v7170_v24 = vpop.eup %7169  ;;  %v3194_v40 = vadd.f32 1.0, %v7168_v19  ;;  %7195 = vpow2.f32 %v5812_v20  ;;  %12498 = vst [vmem:[#allocation99_spill] sm:$0xff] %v10273_v43 }
 0x353   : > { %v7172_v42 = vpop.eup %7171  ;;  %v3196_v33 = vadd.f32 1.0, %v7170_v24  ;;  %7197 = vpow2.f32 %v5814_v30  ;;  %v12499_v24 = vld [vmem:[#allocation29_spill] sm:$0xff] }
 0x354   : > { %v7174_v27 = vpop.eup %7173  ;;  %7199 = vrcp.f32 %v3194_v40  ;;  %v3195_v53 = vadd.f32 1.0, %v7172_v42  ;;  %v10277_v30 = vadd.f32 %v12499_v24, %v9644_v18  ;;  %v943_v40 = vld [vmem:[%s11960_s4 + $0x8] sm:$0x3] }
 0x355   : > { %v7176_v56 = vpop.eup %7175  ;;  %7201 = vrcp.f32 %v3196_v33  ;;  %v3197_v6 = vadd.f32 1.0, %v7174_v27  ;;  %v10284_v33 = vadd.f32 %v10049_v26, %v9692_v0  ;;  %v10299_v13 = vrot.slane %v943_v40, %v12506_v5 }
 0x356   : > { %v7178_v46 = vpop.eup %7177  ;;  %7203 = vrcp.f32 %v3195_v53  ;;  %v3204_v20 = vadd.f32 1.0, %v7176_v56  ;;  %12500 = vst [vmem:[#allocation29_spill] sm:$0xff] %v10277_v30  ;;  %v12502_v53 = vld [vmem:[#allocation48_spill] sm:$0xff]  ;;  %v10290_v56 = vpop.f32.mrf.mxu0  ;;  %v10310_v40 = vadd.f32 %v10106_v44, %v9692_v0  ;;  %v10323_v44 = vadd.f32 %v10121_v8, %v9699_v17  ;;  %v12515_v8 = vld [vmem:[#allocation27_spill] sm:$0xff] }
 0x357   : > { %v7180_v19 = vpop.eup %7179  ;;  %7205 = vrcp.f32 %v3197_v6  ;;  %v3206_v7 = vadd.f32 1.0, %v7178_v46  ;;  %12501 = vst [vmem:[#allocation100_spill] sm:$0xff] %v10284_v33  ;;  %v10288_v27 = vadd.f32 %v12502_v53, %v9675_v21  ;;  %v10294_v6 = vadd.f32 %v10080_v1, %v9699_v17  ;;  %v10296_v46 = vpop.f32.mrf.mxu1  ;;  %12507 = vst [vmem:[#allocation103_spill] sm:$0xff] %v10299_v13 }
 0x358   : > { %v7182_v47 = vpop.eup %7181  ;;  %7207 = vrcp.f32 %v3204_v20  ;;  %v3205_v42 = vadd.f32 1.0, %v7180_v19  ;;  %12505 = vst [vmem:[#allocation102_spill] sm:$0xff] %v10296_v46  ;;  %v5821_v19 = vmul.f32 -1.442695, %v10277_v30  ;;  %12509 = vst [vmem:[#allocation105_spill] sm:$0xff] %v10310_v40  ;;  %v10337_v30 = vadd.f32 %v12515_v8, %v9675_v21 }
 0x359   : > { %12503 = vst [vmem:[#allocation48_spill] sm:$0xff] %v10288_v27  ;;  %v7184_v24 = vpop.eup %7183  ;;  %7209 = vrcp.f32 %v3206_v7  ;;  %v3207_v43 = vadd.f32 1.0, %v7182_v47  ;;  %12504 = vst [vmem:[#allocation101_spill] sm:$0xff] %v10294_v6  ;;  %v5823_v7 = vmul.f32 -1.442695, %v10284_v33  ;;  %v10305_v47 = vadd.f32 %v9796_v49, %v9644_v18  ;;  %v10319_v5 = vpop.f32.mrf.mxu1 }
 0x35a   : > { %v7186_v26 = vpop.eup %7185  ;;  %7211 = vrcp.f32 %v3205_v42  ;;  %v3214_v20 = vadd.f32 1.0, %v7184_v24  ;;  %v5822_v10 = vmul.f32 -1.442695, %v10288_v27  ;;  %v10312_v42 = vpop.f32.mrf.mxu0  ;;  %v10317_v49 = vadd.f32 %v9815_v32, %v9675_v21  ;;  %12511 = vst [vmem:[#allocation107_spill] sm:$0xff] %v10319_v5  ;;  %12512 = vst [vmem:[#allocation108_spill] sm:$0xff] %v10323_v44 }
 0x35b   : > { %v7188_v53 = vpop.eup %7187  ;;  %7213 = vrcp.f32 %v3207_v43  ;;  %v3216_v35 = vadd.f32 1.0, %v7186_v26  ;;  %12508 = vst [vmem:[#allocation104_spill] sm:$0xff] %v10305_v47  ;;  %v5824_v26 = vmul.f32 -1.442695, %v10294_v6  ;;  %v10327_v27 = vadd.f32 %v9833_v51, %v9644_v18  ;;  %12516 = vst [vmem:[#allocation27_spill] sm:$0xff] %v10337_v30 }
 0x35c   : > { %v7190_v1 = vpop.eup %7189  ;;  %7215 = vrcp.f32 %v3214_v20  ;;  %v3215_v46 = vadd.f32 1.0, %v7188_v53  ;;  %12510 = vst [vmem:[#allocation106_spill] sm:$0xff] %v10317_v49  ;;  %v5831_v6 = vmul.f32 -1.442695, %v10305_v47  ;;  %v10332_v32 = vadd.f32 %v10127_v48, %v9692_v0  ;;  %v10339_v51 = vpop.f32.mrf.mxu0  ;;  %v12521_v47 = vld [vmem:[#allocation54_spill] sm:$0xff] }
 0x35d   : > { %v7192_v24 = vpop.eup %7191  ;;  %7217 = vrcp.f32 %v3216_v35  ;;  %v3217_v43 = vadd.f32 1.0, %v7190_v1  ;;  %12513 = vst [vmem:[#allocation109_spill] sm:$0xff] %v10327_v27  ;;  %v10346_v48 = vadd.f32 %v10131_v50, %v9699_v17  ;;  %v5834_v8 = vmul.f32 -1.442695, %v10323_v44 }
 0x35e   : > { %v7194_v20 = vpop.eup %7193  ;;  %7219 = vrcp.f32 %v3215_v46  ;;  %v3224_v53 = vadd.f32 1.0, %v7192_v24  ;;  %12514 = vst [vmem:[#allocation110_spill] sm:$0xff] %v10332_v32  ;;  %v5833_v24 = vmul.f32 -1.442695, %v10310_v40  ;;  %v5841_v40 = vmul.f32 -1.442695, %v10327_v27 }
 0x35f   : > { %v7196_v35 = vpop.eup %7195  ;;  %7221 = vrcp.f32 %v3217_v43  ;;  %v3226_v1 = vadd.f32 1.0, %v7194_v20  ;;  %v5832_v20 = vmul.f32 -1.442695, %v10317_v49  ;;  %12518 = vst [vmem:[#allocation112_spill] sm:$0xff] %v10346_v48  ;;  %v10363_v50 = vadd.f32 %v10139_v15, %v9692_v0  ;;  %v12525_v49 = vld [vmem:[#allocation55_spill] sm:$0xff]  ;;  %v10380_v15 = vpop.f32.mrf.mxu0 }
 0x360   : > { %v7198_v33 = vpop.eup %7197  ;;  %7223 = vrcp.f32 %v3224_v53  ;;  %v3225_v46 = vadd.f32 1.0, %v7196_v35  ;;  %v10348_v53 = vpop.f32.mrf.mxu1 }
 0x361   : > { %v10341_v5 = vpop.eup %7199  ;;  %7225 = vrcp.f32 %v3226_v1  ;;  %v3227_v43 = vadd.f32 1.0, %v7198_v33  ;;  %12519 = vst [vmem:[#allocation113_spill] sm:$0xff] %v10348_v53  ;;  %v5843_v1 = vmul.f32 -1.442695, %v10332_v32  ;;  %12524 = vst [vmem:[#allocation116_spill] sm:$0xff] %v10363_v50  ;;  %v10378_v32 = vadd.f32 %v10160_v11, %v9699_v17  ;;  %v12536_v11 = vld [vmem:[#allocation37_spill] sm:$0xff] }
 0x362   : > { %12517 = vst [vmem:[#allocation111_spill] sm:$0xff] %v10341_v5  ;;  %v10350_v35 = vpop.eup %7201  ;;  %7227 = vrcp.f32 %v3225_v46  ;;  %v10356_v5 = vadd.f32 %v12521_v47, %v9644_v18  ;;  %v10367_v46 = vadd.f32 %v12525_v49, %v9675_v21  ;;  %v10369_v44 = vpop.f32.mrf.mxu1  ;;  %v12532_v49 = vld [vmem:[#allocation46_spill] sm:$0xff] }
 0x363   : > { %12520 = vst [vmem:[#allocation114_spill] sm:$0xff] %v10350_v35  ;;  %v10358_v33 = vpop.eup %7203  ;;  %7229 = vrcp.f32 %v3227_v43  ;;  %12527 = vst [vmem:[#allocation117_spill] sm:$0xff] %v10369_v44  ;;  %v12529_v35 = vld [vmem:[#allocation42_spill] sm:$0xff]  ;;  %v5842_v43 = vmul.f32 -1.442695, %v10337_v30  ;;  %v4036_v53 = vmul.f32 %v9880_v63, %v12532_v49  ;;  %v4037_v30 = vmul.f32 %v9900_v57, %v12536_v11  ;;  %v12538_v49 = vld [vmem:[#allocation43_spill] sm:$0xff] }
 0x364   : > { %12522 = vst [vmem:[#allocation54_spill] sm:$0xff] %v10356_v5  ;;  %12523 = vst [vmem:[#allocation115_spill] sm:$0xff] %v10358_v33  ;;  %v10371_v27 = vpop.eup %7205  ;;  %v4046_v47 = vmul.f32 %v9918_v25, %v12529_v35  ;;  %7231 = vpow2.f32 %v5821_v19  ;;  %v5844_v44 = vmul.f32 -1.442695, %v10346_v48  ;;  %v10389_v25 = vadd.f32 %v9871_v62, %v9644_v18  ;;  %v10391_v19 = vpop.f32.mrf.mxu1 }
 0x365   : > { %12526 = vst [vmem:[#allocation55_spill] sm:$0xff] %v10367_v46  ;;  %12528 = vst [vmem:[#allocation118_spill] sm:$0xff] %v10371_v27  ;;  %v10382_v33 = vpop.eup %7207  ;;  %7233 = vpow2.f32 %v5823_v7  ;;  %v12537_v27 = vld [vmem:[#allocation39_spill] sm:$0xff]  ;;  %v5851_v63 = vmul.f32 -1.442695, %v10356_v5  ;;  %v4056_v48 = vmul.f32 %v9946_v52, %v12538_v49  ;;  %v10419_v52 = vpop.f32.mrf.mxu0  ;;  %v10448_v5 = vadd.f32 %v9923_v45, %v9644_v18 }
 0x366   : > { %12530 = vst [vmem:[#allocation42_spill] sm:$0xff] %v10378_v32  ;;  %12531 = vst [vmem:[#allocation119_spill] sm:$0xff] %v10382_v33  ;;  %v10393_v35 = vpop.eup %7209  ;;  %v4047_v33 = vmul.f32 %v9934_v36, %v12537_v27  ;;  %7235 = vpow2.f32 %v5822_v10  ;;  %v5853_v62 = vmul.f32 -1.442695, %v10363_v50  ;;  %v4574_v11 = vadd.f32 %v4046_v47, %v4036_v53 }
 0x367   : > { %12533 = vst [vmem:[#allocation46_spill] sm:$0xff] %v10389_v25  ;;  %12534 = vst [vmem:[#allocation120_spill] sm:$0xff] %v10391_v19  ;;  %v10400_v7 = vpop.eup %7211  ;;  %7237 = vpow2.f32 %v5824_v26  ;;  %v10406_v19 = vmul.f32 -1.442695, %v10367_v46  ;;  %v10413_v36 = vmul.f32 -1.442695, %v10378_v32  ;;  %v10417_v10 = vadd.f32 %v10192_v29, %v9692_v0  ;;  %v10465_v45 = vpop.f32.mrf.mxu0 }
 0x368   : > { %12535 = vst [vmem:[#allocation121_spill] sm:$0xff] %v10393_v35  ;;  %v10408_v35 = vpop.f32.mrf.mxu1  ;;  %v10410_v57 = vpop.eup %7213  ;;  %7239 = vpow2.f32 %v5831_v6  ;;  %v12541_v26 = vld [vmem:[#allocation14_spill] sm:$0xff]  ;;  %v10426_v46 = vmul.f32 -1.442695, %v10389_v25  ;;  %v10430_v6 = vadd.f32 %v9890_v54, %v9675_v21  ;;  %v4611_v29 = vadd.f32 %v4047_v33, %v4037_v30  ;;  %v12548_v25 = vld [vmem:[#allocation52_spill] sm:$0xff] }
 0x369   : > { %12539 = vst [vmem:[#allocation37_spill] sm:$0xff] %v10417_v10  ;;  %v10421_v27 = vpop.eup %7215  ;;  %v4057_v49 = vmul.f32 %v9960_v9, %v12541_v26  ;;  %7241 = vpow2.f32 %v5833_v24  ;;  %v12545_v32 = vld [vmem:[#allocation50_spill] sm:$0xff]  ;;  %v10440_v9 = vadd.f32 %v10224_v58, %v9699_v17  ;;  %v4575_v26 = vadd.f32 %v4574_v11, %v4056_v48  ;;  %12549 = vst [vmem:[#allocation52_spill] sm:$0xff] %v10448_v5  ;;  %v4842_v30 = vld [vmem:[#allocation3 + $0xe8] sm:$0xff] }
 0x36a   : > { %12540 = vst [vmem:[#allocation39_spill] sm:$0xff] %v10421_v27  ;;  %12542 = vst [vmem:[#allocation43_spill] sm:$0xff] %v10430_v6  ;;  %v10432_v53 = vpop.f32.mrf.mxu1  ;;  %v10434_v47 = vpop.eup %7217  ;;  %v4066_v50 = vmul.f32 %v9967_v37, %v12545_v32  ;;  %7243 = vpow2.f32 %v5832_v20  ;;  %v4067_v54 = vmul.f32 %v9974_v60, %v12548_v25  ;;  %v4826_v33 = vld [vmem:[#allocation3 + $0x68] sm:$0xff]  ;;  %v10455_v58 = vmul.f32 -1.442695, %v10417_v10  ;;  %6004 = vmatprep.subr.mxu0 %v4842_v30 }
 0x36b   : > { %12543 = vst [vmem:[#allocation14_spill] sm:$0xff] %v10432_v53  ;;  %12544 = vst [vmem:[#allocation122_spill] sm:$0xff] %v10434_v47  ;;  %v10442_v24 = vpop.eup %7219  ;;  %7245 = vpow2.f32 %v5834_v8  ;;  %v10459_v32 = vadd.f32 %v10252_v2, %v9692_v0  ;;  %v10463_v60 = vadd.f32 %v9953_v28, %v9675_v21  ;;  %v4612_v48 = vadd.f32 %v4611_v29, %v4057_v49 }
 0x36c   : > { %12546 = vst [vmem:[#allocation50_spill] sm:$0xff] %v10440_v9  ;;  %12547 = vst [vmem:[#allocation123_spill] sm:$0xff] %v10442_v24  ;;  %v10450_v47 = vpop.f32.mrf.mxu1  ;;  %v10452_v37 = vpop.eup %7221  ;;  %7247 = vpow2.f32 %v5841_v40  ;;  %v10470_v40 = vmul.f32 -1.442695, %v10430_v6  ;;  %v10474_v8 = vadd.f32 %v10267_v61, %v9699_v17  ;;  %6005 = vmatpush3.msra.mxu0 %v4826_v33  ;;  %v10480_v28 = vadd.f32 %v4575_v26, %v4066_v50 }
 0x36d   : > { %12550 = vst [vmem:[#allocation124_spill] sm:$0xff] %v10450_v47  ;;  %12551 = vst [vmem:[#allocation125_spill] sm:$0xff] %v10452_v37  ;;  %v10467_v20 = vpop.eup %7223  ;;  %7249 = vpow2.f32 %v5843_v1  ;;  %v10483_v11 = vmul.f32 -1.442695, %v10440_v9  ;;  %v12558_v1 = vld [vmem:[#allocation35_spill] sm:$0xff]  ;;  %v10491_v30 = vadd.f32 %v4612_v48, %v4067_v54  ;;  %v10498_v50 = vadd.f32 %v10271_v39, %v9692_v0  ;;  %v10514_v48 = vpop.f32.mrf.mxu0 }
 0x36e   : > { %12552 = vst [vmem:[#allocation126_spill] sm:$0xff] %v10459_v32  ;;  %12553 = vst [vmem:[#allocation127_spill] sm:$0xff] %v10463_v60  ;;  %v10476_v2 = vpop.f32.mrf.mxu1  ;;  %v10478_v25 = vpop.eup %7225  ;;  %7251 = vpow2.f32 %v5842_v43  ;;  %v10487_v49 = vadd.f32 %v12558_v1, %v9644_v18  ;;  %v10494_v61 = vmul.f32 -1.442695, %v10448_v5  ;;  %v10505_v33 = vmul.f32 -1.442695, %v10459_v32 }
 0x36f   : > { %12554 = vst [vmem:[#allocation128_spill] sm:$0xff] %v10467_v20  ;;  %12555 = vst [vmem:[#allocation129_spill] sm:$0xff] %v10474_v8  ;;  %v10489_v29 = vpop.eup %7227  ;;  %7253 = vpow2.f32 %v5844_v44  ;;  %v10508_v1 = vmul.f32 -1.442695, %v10463_v60  ;;  %v12564_v44 = vld [vmem:[#allocation22_spill] sm:$0xff]  ;;  %v12567_v32 = vld [vmem:[#allocation28_spill] sm:$0xff] }
 0x370   : > { %12556 = vst [vmem:[#allocation130_spill] sm:$0xff] %v10476_v2  ;;  %12557 = vst [vmem:[#allocation131_spill] sm:$0xff] %v10478_v25  ;;  %v10500_v43 = vpop.f32.mrf.mxu1  ;;  %v10502_v26 = vpop.eup %7229  ;;  %7255 = vpow2.f32 %v5851_v63  ;;  %v10512_v54 = vadd.f32 %v12564_v44, %v9675_v21  ;;  %v10517_v39 = vmul.f32 -1.442695, %v10474_v8  ;;  %v10521_v63 = vadd.f32 %v10290_v56, %v9699_v17 }
 0x371   : > { %12559 = vst [vmem:[#allocation35_spill] sm:$0xff] %v10487_v49  ;;  %12560 = vst [vmem:[#allocation132_spill] sm:$0xff] %v10489_v29  ;;  %v7232_v5 = vpop.eup %7231  ;;  %7257 = vpow2.f32 %v5853_v62  ;;  %v10525_v9 = vadd.f32 %v12567_v32, %v9644_v18  ;;  %v10531_v10 = vmul.f32 -1.442695, %v10487_v49  ;;  %v10535_v62 = vadd.f32 %v10312_v42, %v9692_v0 }
 0x372   : > { %12561 = vst [vmem:[#allocation133_spill] sm:$0xff] %v10498_v50  ;;  %12562 = vst [vmem:[#allocation134_spill] sm:$0xff] %v10500_v43  ;;  %v10527_v60 = vpop.f32.mrf.mxu1  ;;  %v7234_v6 = vpop.eup %7233  ;;  %v3234_v44 = vadd.f32 1.0, %v7232_v5  ;;  %7259 = vpow2.f32 %v10406_v19  ;;  %v10539_v32 = vmul.f32 -1.442695, %v10498_v50  ;;  %v10550_v42 = vadd.f32 %v10339_v51, %v9699_v17  ;;  %v12575_v51 = vld [vmem:[#allocation20_spill] sm:$0xff] }
 0x373   : > { %12563 = vst [vmem:[#allocation135_spill] sm:$0xff] %v10502_v26  ;;  %12565 = vst [vmem:[#allocation22_spill] sm:$0xff] %v10512_v54  ;;  %v7236_v8 = vpop.eup %7235  ;;  %v3236_v56 = vadd.f32 1.0, %v7234_v6  ;;  %7261 = vpow2.f32 %v10413_v36  ;;  %v10546_v49 = vmul.f32 -1.442695, %v10512_v54  ;;  %v10552_v6 = vpop.f32.mrf.mxu0  ;;  %v10567_v2 = vadd.f32 %v12575_v51, %v9644_v18 }
 0x374   : > { %12566 = vst [vmem:[#allocation136_spill] sm:$0xff] %v10521_v63  ;;  %12568 = vst [vmem:[#allocation28_spill] sm:$0xff] %v10525_v9  ;;  %v7238_v5 = vpop.eup %7237  ;;  %7263 = vrcp.f32 %v3234_v44  ;;  %v3235_v19 = vadd.f32 1.0, %v7236_v8  ;;  %v10554_v36 = vpop.f32.mrf.mxu1  ;;  %v10560_v44 = vmul.f32 -1.442695, %v10525_v9  ;;  %v10574_v9 = vadd.f32 %v10380_v15, %v9692_v0 }
 0x375   : > { %12569 = vst [vmem:[#allocation137_spill] sm:$0xff] %v10527_v60  ;;  %12570 = vst [vmem:[#allocation138_spill] sm:$0xff] %v10535_v62  ;;  %v12571_v60 = vld [vmem:[#allocation12_spill] sm:$0xff]  ;;  %v7240_v50 = vpop.eup %7239  ;;  %7265 = vrcp.f32 %v3236_v56  ;;  %v3237_v26 = vadd.f32 1.0, %v7238_v5  ;;  %v10563_v29 = vmul.f32 -1.442695, %v10535_v62 }
 0x376   : > { %v10543_v43 = vadd.f32 %v12571_v60, %v9675_v21  ;;  %12573 = vst [vmem:[#allocation139_spill] sm:$0xff] %v10550_v42  ;;  %12574 = vst [vmem:[#allocation140_spill] sm:$0xff] %v10554_v36  ;;  %v10557_v60 = vmul.f32 -1.442695, %v10521_v63  ;;  %v7242_v8 = vpop.eup %7241  ;;  %7267 = vrcp.f32 %v3235_v19  ;;  %v3244_v54 = vadd.f32 1.0, %v7240_v50  ;;  %v4841_v36 = vld [vmem:[#allocation3 + $0xe0] sm:$0xff] }
 0x377   : > { %12576 = vst [vmem:[#allocation20_spill] sm:$0xff] %v10567_v2  ;;  %v7244_v25 = vpop.eup %7243  ;;  %7269 = vrcp.f32 %v3237_v26  ;;  %v3246_v56 = vadd.f32 1.0, %v7242_v8  ;;  %12577 = vst [vmem:[#allocation141_spill] sm:$0xff] %v10574_v9  ;;  %6006 = vmatprep.subr.mxu0 %v4841_v36  ;;  %v4825_v50 = vld [vmem:[#allocation3 + $0x60] sm:$0xff]  ;;  %v12578_v62 = vld [vmem:[#allocation36_spill] sm:$0xff]  ;;  %v10581_v26 = vpop.f32.mrf.mxu0 }
 0x378   : > { %12572 = vst [vmem:[#allocation12_spill] sm:$0xff] %v10543_v43  ;;  %v10570_v5 = vmul.f32 -1.442695, %v10543_v43  ;;  %v7246_v19 = vpop.eup %7245  ;;  %v4076_v63 = vmul.f32 %v10025_v41, %v12578_v62  ;;  %7271 = vrcp.f32 %v3244_v54  ;;  %v3245_v51 = vadd.f32 1.0, %v7244_v25  ;;  %6007 = vmatpush3.msra.mxu0 %v4825_v50  ;;  %v10583_v8 = vpop.f32.mrf.mxu1  ;;  %v12580_v36 = vld [vmem:[#allocation44_spill] sm:$0xff]  ;;  %v12584_v62 = vld [vmem:[#allocation59_spill] sm:$0xff] }
 0x379   : > { %v10579_v47 = vmul.f32 -1.442695, %v10550_v42  ;;  %12579 = vst [vmem:[#allocation36_spill] sm:$0xff] %v10583_v8  ;;  %v7248_v43 = vpop.eup %7247  ;;  %7273 = vrcp.f32 %v3246_v56  ;;  %v3247_v15 = vadd.f32 1.0, %v7246_v19  ;;  %v10587_v20 = vadd.f32 %v12580_v36, %v9675_v21  ;;  %v12583_v54 = vld [vmem:[#allocation40_spill] sm:$0xff] }
 0x37a   : > { %v10591_v41 = vadd.f32 %v10419_v52, %v9699_v17  ;;  %v7250_v25 = vpop.eup %7249  ;;  %v4077_v42 = vmul.f32 %v12584_v62, %v12583_v54  ;;  %7275 = vrcp.f32 %v3245_v51  ;;  %v3254_v37 = vadd.f32 1.0, %v7248_v43  ;;  %v12585_v56 = vld [vmem:[#allocation56_spill] sm:$0xff]  ;;  %v10608_v51 = vpop.f32.mrf.mxu0 }
 0x37b   : > { %12581 = vst [vmem:[#allocation44_spill] sm:$0xff] %v10587_v20  ;;  %v10596_v50 = vmul.f32 -1.442695, %v10567_v2  ;;  %v7252_v8 = vpop.eup %7251  ;;  %v4086_v19 = vmul.f32 %v10060_v3, %v12585_v56  ;;  %7277 = vrcp.f32 %v3247_v15  ;;  %v3256_v36 = vadd.f32 1.0, %v7250_v25  ;;  %v10610_v54 = vpop.f32.mrf.mxu1  ;;  %v12590_v2 = vld [vmem:[#allocation58_spill] sm:$0xff] }
 0x37c   : > { %12582 = vst [vmem:[#allocation142_spill] sm:$0xff] %v10591_v41  ;;  %v10601_v24 = vmul.f32 -1.442695, %v10574_v9  ;;  %v7254_v52 = vpop.eup %7253  ;;  %v4577_v53 = vadd.f32 %v10480_v28, %v4076_v63  ;;  %7279 = vrcp.f32 %v3254_v37  ;;  %v3255_v27 = vadd.f32 1.0, %v7252_v8  ;;  %12587 = vst [vmem:[#allocation59_spill] sm:$0xff] %v10610_v54  ;;  %v12589_v9 = vld [vmem:[#allocation57_spill] sm:$0xff] }
 0x37d   : > { %v10606_v43 = vadd.f32 %v10065_v4, %v9644_v18  ;;  %v7256_v62 = vpop.eup %7255  ;;  %7281 = vrcp.f32 %v3256_v36  ;;  %v3257_v3 = vadd.f32 1.0, %v7254_v52  ;;  %v10613_v15 = vmul.f32 -1.442695, %v10587_v20 }
 0x37e   : > { %v10616_v25 = vmul.f32 -1.442695, %v10591_v41  ;;  %v7258_v28 = vpop.eup %7257  ;;  %v4614_v37 = vadd.f32 %v10491_v30, %v4077_v42  ;;  %7283 = vrcp.f32 %v3255_v27  ;;  %v3264_v63 = vadd.f32 1.0, %v7256_v62  ;;  %v10630_v30 = vpop.f32.mrf.mxu0  ;;  %v4940_v42 = vld [vmem:[#allocation3 + $0x3f8] sm:$0xff]  ;;  %v12593_v62 = vld [vmem:[#allocation19_spill] sm:$0xff] }
 0x37f   : > { %12586 = vst [vmem:[#allocation40_spill] sm:$0xff] %v10606_v43  ;;  %v10621_v4 = vadd.f32 %v10465_v45, %v9692_v0  ;;  %v7260_v8 = vpop.eup %7259  ;;  %v4578_v56 = vadd.f32 %v4577_v53, %v4086_v19  ;;  %v4087_v36 = vmul.f32 %v10073_v34, %v12589_v9  ;;  %7285 = vrcp.f32 %v3257_v3  ;;  %v10632_v45 = vpop.f32.mrf.mxu1  ;;  %6105 = vmatprep.subr.mxu1 %v4940_v42 }
 0x380   : > { %v3266_v52 = vadd.f32 1.0, %v7258_v28  ;;  %v7262_v20 = vpop.eup %7261  ;;  %v4096_v41 = vmul.f32 %v10088_v31, %v12590_v2  ;;  %7287 = vrcp.f32 %v3264_v63  ;;  %v3265_v54 = vadd.f32 1.0, %v7260_v8  ;;  %v4924_v2 = vld [vmem:[#allocation3 + $0x378] sm:$0xff]  ;;  %v12594_v28 = vld [vmem:[#allocation53_spill] sm:$0xff] }
 0x381   : > { %12588 = vst [vmem:[#allocation56_spill] sm:$0xff] %v10621_v4  ;;  %v10628_v27 = vmul.f32 -1.442695, %v10606_v43  ;;  %v10634_v53 = vpop.eup %7263  ;;  %v3267_v34 = vadd.f32 1.0, %v7262_v20  ;;  %v10638_v9 = vadd.f32 %v10095_v22, %v9675_v21  ;;  %v10642_v31 = vadd.f32 %v10514_v48, %v9699_v17  ;;  %6106 = vmatpush3.msra.mxu1 %v4924_v2  ;;  %v4939_v22 = vld [vmem:[#allocation3 + $0x3f0] sm:$0xff]  ;;  %v12617_v43 = vld [vmem:[#allocation72_spill] sm:$0xff] }
 0x382   : > { %7289 = vrcp.f32 %v3266_v52  ;;  %v10644_v19 = vpop.eup %7265  ;;  %v4097_v3 = vmul.f32 %v10102_v59, %v12593_v62  ;;  %v4106_v63 = vmul.f32 %v10109_v14, %v12594_v28  ;;  %v10651_v20 = vmul.f32 -1.442695, %v10621_v4  ;;  %6107 = vmatprep.subr.mxu1 %v4939_v22  ;;  %v4923_v14 = vld [vmem:[#allocation3 + $0x370] sm:$0xff]  ;;  %v12597_v62 = vld [vmem:[#allocation34_spill] sm:$0xff] }
 0x383   : > { %12591 = vst [vmem:[#allocation57_spill] sm:$0xff] %v10638_v9  ;;  %12592 = vst [vmem:[#allocation58_spill] sm:$0xff] %v10642_v31  ;;  %7291 = vrcp.f32 %v3265_v54  ;;  %v10653_v8 = vpop.eup %7267  ;;  %v4615_v48 = vadd.f32 %v4614_v37, %v4087_v36  ;;  %v10657_v52 = vadd.f32 %v10113_v55, %v9644_v18  ;;  %v10661_v59 = vadd.f32 %v10552_v6, %v9692_v0  ;;  %v1898_v55 = vpop.f32.mrf.mxu0  ;;  %v4938_v6 = vld [vmem:[#allocation3 + $0x3e8] sm:$0xff] }
 0x384   : > { %7293 = vrcp.f32 %v3267_v34  ;;  %v10663_v54 = vpop.eup %7269  ;;  %v4579_v42 = vadd.f32 %v4578_v56, %v4096_v41  ;;  %v4107_v2 = vmul.f32 %v10116_v38, %v12597_v62  ;;  %v10670_v37 = vadd.f32 %v10125_v23, %v9675_v21  ;;  %v10672_v36 = vpop.f32.mrf.mxu1  ;;  %6108 = vmatpush3.msra.mxu1 %v4923_v14  ;;  %v4922_v23 = vld [vmem:[#allocation3 + $0x368] sm:$0xff]  ;;  %v4937_v14 = vld [vmem:[#allocation3 + $0x3e0] sm:$0xff] }
 0x385   : > { %12595 = vst [vmem:[#allocation19_spill] sm:$0xff] %v10657_v52  ;;  %12596 = vst [vmem:[#allocation53_spill] sm:$0xff] %v10661_v59  ;;  %7295 = vpow2.f32 %v10426_v46  ;;  %v10674_v34 = vpop.eup %7271  ;;  %v10678_v41 = vmul.f32 -1.442695, %v10638_v9  ;;  %v10681_v38 = vmul.f32 -1.442695, %v10642_v31  ;;  %v10685_v46 = vadd.f32 %v10581_v26, %v9699_v17  ;;  %6109 = vmatprep.subr.mxu1 %v4938_v6 }
 0x386   : > { %12598 = vst [vmem:[#allocation34_spill] sm:$0xff] %v10670_v37  ;;  %12599 = vst [vmem:[#allocation143_spill] sm:$0xff] %v10674_v34  ;;  %7297 = vpow2.f32 %v10455_v58  ;;  %v10687_v56 = vpop.eup %7273  ;;  %v4616_v28 = vadd.f32 %v4615_v48, %v4097_v3  ;;  %v10689_v22 = vadd.f32 %v4579_v42, %v4106_v63  ;;  %v10694_v58 = vadd.f32 %v10129_v16, %v9644_v18  ;;  %v4921_v16 = vld [vmem:[#allocation3 + $0x360] sm:$0xff]  ;;  %v12606_v42 = vld [vmem:[#allocation66_spill] sm:$0xff] }
 0x387   : > { %12600 = vst [vmem:[#allocation144_spill] sm:$0xff] %v10685_v46  ;;  %12601 = vst [vmem:[#allocation145_spill] sm:$0xff] %v10687_v56  ;;  %7299 = vpow2.f32 %v10470_v40  ;;  %6110 = vmatpush3.msra.mxu1 %v4922_v23  ;;  %v10696_v62 = vpop.eup %7275  ;;  %v10700_v26 = vmul.f32 -1.442695, %v10657_v52  ;;  %v10703_v6 = vmul.f32 -1.442695, %v10661_v59  ;;  %v10707_v3 = vadd.f32 %v10608_v51, %v9692_v0  ;;  %v1900_v59 = vpop.f32.mrf.mxu0 }
 0x388   : > { %12602 = vst [vmem:[#allocation146_spill] sm:$0xff] %v10694_v58  ;;  %12603 = vst [vmem:[#allocation147_spill] sm:$0xff] %v10696_v62  ;;  %7301 = vpow2.f32 %v10483_v11  ;;  %v4840_v40 = vld [vmem:[#allocation3 + $0xd8] sm:$0xff]  ;;  %6111 = vmatprep.subr.mxu1 %v4937_v14  ;;  %v10709_v63 = vpop.eup %7277  ;;  %v10711_v48 = vadd.f32 %v4616_v28, %v4107_v2  ;;  %v10715_v11 = vmul.f32 -1.442695, %v10670_v37  ;;  %v10719_v23 = vadd.f32 %v12606_v42, %v9675_v21  ;;  %v10721_v52 = vpop.f32.mrf.mxu1  ;;  %v12612_v37 = vld [vmem:[#allocation13_spill] sm:$0xff] }
 0x389   : > { %12604 = vst [vmem:[#allocation148_spill] sm:$0xff] %v10707_v3  ;;  %12605 = vst [vmem:[#allocation149_spill] sm:$0xff] %v10709_v63  ;;  %7303 = vpow2.f32 %v10494_v61  ;;  %6008 = vmatprep.subr.mxu0 %v4840_v40  ;;  %v4824_v51 = vld [vmem:[#allocation3 + $0x58] sm:$0xff]  ;;  %6112 = vmatpush3.msra.mxu1 %v4921_v16  ;;  %v10723_v31 = vpop.eup %7279  ;;  %v10727_v61 = vmul.f32 -1.442695, %v10685_v46  ;;  %v10731_v2 = vadd.f32 %v10630_v30, %v9699_v17  ;;  %v4839_v40 = vld [vmem:[#allocation3 + $0xd0] sm:$0xff] }
 0x38a   : > { %12607 = vst [vmem:[#allocation66_spill] sm:$0xff] %v10719_v23  ;;  %v4936_v14 = vld [vmem:[#allocation3 + $0x3d8] sm:$0xff]  ;;  %12608 = vst [vmem:[#allocation150_spill] sm:$0xff] %v10723_v31  ;;  %7305 = vpow2.f32 %v10505_v33  ;;  %v10735_v28 = vadd.f32 %v10149_v12, %v9644_v18  ;;  %6009 = vmatpush3.msra.mxu0 %v4824_v51  ;;  %v10737_v42 = vpop.eup %7281  ;;  %v10743_v46 = vmul.f32 -1.442695, %v10694_v58  ;;  %v10746_v30 = vadd.f32 %v1898_v55, %v9692_v0  ;;  %v4823_v12 = vld [vmem:[#allocation3 + $0x50] sm:$0xff] }
 0x38b   : > { %12609 = vst [vmem:[#allocation151_spill] sm:$0xff] %v10731_v2  ;;  %6113 = vmatprep.subr.mxu1 %v4936_v14  ;;  %v4920_v16 = vld [vmem:[#allocation3 + $0x358] sm:$0xff]  ;;  %12611 = vst [vmem:[#allocation153_spill] sm:$0xff] %v10737_v42  ;;  %7307 = vpow2.f32 %v10508_v1  ;;  %6010 = vmatprep.subr.mxu0 %v4839_v40  ;;  %v4935_v51 = vld [vmem:[#allocation3 + $0x3d0] sm:$0xff]  ;;  %v10748_v4 = vpop.eup %7283 }
 0x38c   : > { %12610 = vst [vmem:[#allocation152_spill] sm:$0xff] %v10735_v28  ;;  %v12613_v9 = vld [vmem:[#allocation70_spill] sm:$0xff]  ;;  %12614 = vst [vmem:[#allocation13_spill] sm:$0xff] %v10746_v30  ;;  %6114 = vmatpush3.msra.mxu1 %v4920_v16  ;;  %7309 = vpow2.f32 %v10517_v39  ;;  %6011 = vmatpush3.msra.mxu0 %v4823_v12  ;;  %v4838_v55 = vld [vmem:[#allocation3 + $0xc8] sm:$0xff]  ;;  %v10760_v16 = vpop.eup %7285  ;;  %v10766_v39 = vmul.f32 -1.442695, %v10719_v23  ;;  %v10771_v12 = vpop.f32.mrf.mxu1 }
 0x38d   : > { %v4114_v33 = vmul.f32 %v12613_v9, %v12612_v37  ;;  %12615 = vst [vmem:[#allocation70_spill] sm:$0xff] %v10748_v4  ;;  %v12616_v14 = vld [vmem:[#allocation30_spill] sm:$0xff]  ;;  %v10754_v9 = vmul.f32 -1.442695, %v10707_v3  ;;  %6115 = vmatprep.subr.mxu1 %v4935_v51  ;;  %v4919_v40 = vld [vmem:[#allocation3 + $0x350] sm:$0xff]  ;;  %12620 = vst [vmem:[#allocation72_spill] sm:$0xff] %v10760_v16  ;;  %7311 = vpow2.f32 %v10531_v10  ;;  %6012 = vmatprep.subr.mxu0 %v4838_v55  ;;  %v10773_v3 = vpop.eup %7287 }
 0x38e   : > { %v4116_v42 = vmul.f32 %v12617_v43, %v12616_v14  ;;  %v12618_v1 = vld [vmem:[#allocation74_spill] sm:$0xff]  ;;  %v12621_v58 = vld [vmem:[#allocation9_spill] sm:$0xff]  ;;  %v12622_v4 = vld [vmem:[#allocation75_spill] sm:$0xff]  ;;  %v10769_v43 = vadd.f32 %v1900_v59, %v9699_v17  ;;  %v1902_v14 = vpop.f32.mrf.mxu0  ;;  %6116 = vmatpush3.msra.mxu1 %v4919_v40  ;;  %7313 = vpow2.f32 %v10539_v32  ;;  %v10779_v10 = vmul.f32 -1.442695, %v10731_v2 }
 0x38f   : > { %v10758_v37 = vadd.f32 %v12618_v1, %v9675_v21  ;;  %v4115_v31 = vmul.f32 %v12622_v4, %v12621_v58  ;;  %v4822_v1 = vld [vmem:[#allocation3 + $0x48] sm:$0xff]  ;;  %12624 = vst [vmem:[#allocation9_spill] sm:$0xff] %v10773_v3  ;;  %v12625_v16 = vld [vmem:[#allocation31_spill] sm:$0xff]  ;;  %v12626_v63 = vld [vmem:[#allocation77_spill] sm:$0xff]  ;;  %v10782_v59 = vmul.f32 -1.442695, %v10735_v28  ;;  %v10784_v23 = vpop.eup %7289  ;;  %7315 = vpow2.f32 %v10546_v49 }
 0x390   : > { %12623 = vst [vmem:[#allocation74_spill] sm:$0xff] %v10769_v43  ;;  %v4934_v51 = vld [vmem:[#allocation3 + $0x3c8] sm:$0xff]  ;;  %v4117_v4 = vmul.f32 %v12626_v63, %v12625_v16  ;;  %6013 = vmatpush3.msra.mxu0 %v4822_v1  ;;  %v4837_v58 = vld [vmem:[#allocation3 + $0xc0] sm:$0xff]  ;;  %12627 = vst [vmem:[#allocation75_spill] sm:$0xff] %v10784_v23  ;;  %v10791_v32 = vmul.f32 -1.442695, %v10746_v30  ;;  %v10793_v1 = vpop.eup %7291  ;;  %7317 = vpow2.f32 %v10557_v60  ;;  %v10813_v60 = vpop.f32.mrf.mxu0 }
 0x391   : > { %12619 = vst [vmem:[#allocation30_spill] sm:$0xff] %v10758_v37  ;;  %6117 = vmatprep.subr.mxu1 %v4934_v51  ;;  %v4918_v55 = vld [vmem:[#allocation3 + $0x348] sm:$0xff]  ;;  %v12629_v3 = vld [vmem:[#allocation41_spill] sm:$0xff]  ;;  %v12630_v56 = vld [vmem:[#allocation79_spill] sm:$0xff]  ;;  %6014 = vmatprep.subr.mxu0 %v4837_v58  ;;  %v4581_v51 = vadd.f32 %v10689_v22, %v4116_v42  ;;  %7319 = vpow2.f32 %v10560_v44  ;;  %v10807_v22 = vmul.f32 -1.442695, %v10769_v43  ;;  %v10815_v42 = vpop.f32.mrf.mxu1  ;;  %v10822_v43 = vadd.f32 %v1902_v14, %v9692_v0 }
 0x392   : > { %v12628_v40 = vld [vmem:[#allocation64_spill] sm:$0xff]  ;;  %v4124_v34 = vmul.f32 %v12630_v56, %v12629_v3  ;;  %12631 = vst [vmem:[#allocation31_spill] sm:$0xff] %v10791_v32  ;;  %v4821_v63 = vld [vmem:[#allocation3 + $0x40] sm:$0xff]  ;;  %6118 = vmatpush3.msra.mxu1 %v4918_v55  ;;  %12632 = vst [vmem:[#allocation77_spill] sm:$0xff] %v10793_v1  ;;  %v10800_v56 = vmul.f32 -1.442695, %v10758_v37  ;;  %7321 = vpow2.f32 %v10563_v29 }
 0x393   : > { %v4507_v62 = vadd.f32 %v12628_v40, %v4114_v33  ;;  %v4933_v16 = vld [vmem:[#allocation3 + $0x3c0] sm:$0xff]  ;;  %v12633_v28 = vld [vmem:[#allocation32_spill] sm:$0xff]  ;;  %v12634_v2 = vld [vmem:[#allocation82_spill] sm:$0xff]  ;;  %6015 = vmatpush3.msra.mxu0 %v4821_v63  ;;  %v10802_v33 = vpop.eup %7293  ;;  %12638 = vst [vmem:[#allocation79_spill] sm:$0xff] %v10807_v22  ;;  %7323 = vpow2.f32 %v10570_v5 }
 0x394   : > { %v4126_v23 = vmul.f32 %v12634_v2, %v12633_v28  ;;  %12635 = vst [vmem:[#allocation64_spill] sm:$0xff] %v10800_v56  ;;  %v4836_v49 = vld [vmem:[#allocation3 + $0xb8] sm:$0xff]  ;;  %6119 = vmatprep.subr.mxu1 %v4933_v16  ;;  %v4917_v3 = vld [vmem:[#allocation3 + $0x340] sm:$0xff]  ;;  %12636 = vst [vmem:[#allocation41_spill] sm:$0xff] %v10802_v33  ;;  %v7296_v16 = vpop.eup %7295  ;;  %7325 = vpow2.f32 %v10579_v47 }
 0x395   : > { %v12637_v58 = vld [vmem:[#allocation65_spill] sm:$0xff]  ;;  %6016 = vmatprep.subr.mxu0 %v4836_v49  ;;  %v4820_v40 = vld [vmem:[#allocation3 + $0x38] sm:$0xff]  ;;  %6120 = vmatpush3.msra.mxu1 %v4917_v3  ;;  %v12642_v44 = vld [vmem:[#allocation83_spill] sm:$0xff]  ;;  %12643 = vst [vmem:[#allocation82_spill] sm:$0xff] %v10822_v43  ;;  %v7298_v33 = vpop.eup %7297  ;;  %v4508_v49 = vadd.f32 %v4507_v62, %v4124_v34  ;;  %v3274_v56 = vadd.f32 1.0, %v7296_v16 }
 0x396   : > { %v4544_v55 = vadd.f32 %v12637_v58, %v4115_v31  ;;  %v12639_v2 = vld [vmem:[#allocation81_spill] sm:$0xff]  ;;  %v4932_v63 = vld [vmem:[#allocation3 + $0x3b8] sm:$0xff]  ;;  %v4618_v31 = vadd.f32 %v10711_v48, %v4117_v4  ;;  %v12641_v58 = vld [vmem:[#allocation15_spill] sm:$0xff]  ;;  %6017 = vmatpush3.msra.mxu0 %v4820_v40  ;;  %v7300_v29 = vpop.eup %7299  ;;  %v3276_v32 = vadd.f32 1.0, %v7298_v33 }
 0x397   : > { %v10811_v28 = vadd.f32 %v12639_v2, %v9644_v18  ;;  %v4125_v37 = vmul.f32 %v12642_v44, %v12641_v58  ;;  %v4835_v2 = vld [vmem:[#allocation3 + $0xb0] sm:$0xff]  ;;  %6121 = vmatprep.subr.mxu1 %v4932_v63  ;;  %v4916_v30 = vld [vmem:[#allocation3 + $0x338] sm:$0xff]  ;;  %v4582_v58 = vadd.f32 %v4581_v51, %v4126_v23  ;;  %v4834_v34 = vld [vmem:[#allocation3 + $0xa8] sm:$0xff]  ;;  %7327 = vrcp.f32 %v3274_v56  ;;  %v10835_v23 = vpop.f32.mrf.mxu0  ;;  %v10837_v51 = vpop.f32.mrf.mxu1 }
 0x398   : > { %v12644_v1 = vld [vmem:[#allocation49_spill] sm:$0xff]  ;;  %6018 = vmatprep.subr.mxu0 %v4835_v2  ;;  %6122 = vmatpush3.msra.mxu1 %v4916_v30  ;;  %v12647_v44 = vld [vmem:[#allocation86_spill] sm:$0xff]  ;;  %v12648_v63 = vld [vmem:[#allocation60_spill] sm:$0xff]  ;;  %v3275_v2 = vadd.f32 1.0, %v7300_v29  ;;  %12651 = vst [vmem:[#allocation81_spill] sm:$0xff] %v10837_v51  ;;  %7329 = vrcp.f32 %v3276_v32 }
 0x399   : > { %12640 = vst [vmem:[#allocation32_spill] sm:$0xff] %v10811_v28  ;;  %v12645_v3 = vld [vmem:[#allocation85_spill] sm:$0xff]  ;;  %v10833_v30 = vmul.f32 -1.442695, %v10811_v28  ;;  %v4818_v33 = vld [vmem:[#allocation3 + $0x28] sm:$0xff]  ;;  %v4833_v56 = vld [vmem:[#allocation3 + $0xa0] sm:$0xff] }
 0x39a   : > { %v4127_v22 = vmul.f32 %v12645_v3, %v12644_v1  ;;  %v4819_v48 = vld [vmem:[#allocation3 + $0x30] sm:$0xff]  ;;  %v7302_v1 = vpop.eup %7301  ;;  %v4930_v47 = vld [vmem:[#allocation3 + $0x3a8] sm:$0xff]  ;;  %7331 = vrcp.f32 %v3275_v2  ;;  %v4929_v32 = vld [vmem:[#allocation3 + $0x3a0] sm:$0xff] }
 0x39b   : > { %v4931_v4 = vld [vmem:[#allocation3 + $0x3b0] sm:$0xff]  ;;  %6019 = vmatpush3.msra.mxu0 %v4819_v48  ;;  %12650 = vst [vmem:[#allocation65_spill] sm:$0xff] %v10833_v30  ;;  %v7304_v3 = vpop.eup %7303  ;;  %v4545_v48 = vadd.f32 %v4544_v55, %v4125_v37  ;;  %v4914_v29 = vld [vmem:[#allocation3 + $0x328] sm:$0xff]  ;;  %v4817_v37 = vld [vmem:[#allocation3 + $0x20] sm:$0xff] }
 0x39c   : > { %v12646_v14 = vld [vmem:[#allocation45_spill] sm:$0xff]  ;;  %6123 = vmatprep.subr.mxu1 %v4931_v4  ;;  %6020 = vmatprep.subr.mxu0 %v4834_v34  ;;  %v3277_v4 = vadd.f32 1.0, %v7302_v1  ;;  %v12653_v34 = vld [vmem:[#allocation88_spill] sm:$0xff]  ;;  %v12663_v30 = vld [vmem:[#allocation62_spill] sm:$0xff] }
 0x39d   : > { %v4134_v40 = vmul.f32 %v12647_v44, %v12646_v14  ;;  %v4915_v62 = vld [vmem:[#allocation3 + $0x330] sm:$0xff]  ;;  %v10840_v14 = vmul.f32 -1.442695, %v10822_v43  ;;  %6021 = vmatpush3.msra.mxu0 %v4818_v33  ;;  %v7306_v44 = vpop.eup %7305  ;;  %v12655_v43 = vld [vmem:[#allocation51_spill] sm:$0xff]  ;;  %v12656_v33 = vld [vmem:[#allocation90_spill] sm:$0xff] }
 0x39e   : > { %v12649_v16 = vld [vmem:[#allocation89_spill] sm:$0xff]  ;;  %6124 = vmatpush3.msra.mxu1 %v4915_v62  ;;  %v10846_v62 = vadd.f32 %v12653_v34, %v9675_v21  ;;  %6022 = vmatprep.subr.mxu0 %v4833_v56  ;;  %v7308_v55 = vpop.eup %7307  ;;  %v4135_v28 = vmul.f32 %v12656_v33, %v12655_v43  ;;  %7333 = vrcp.f32 %v3277_v4  ;;  %v10852_v56 = vadd.f32 %v10813_v60, %v9699_v17  ;;  %v4816_v43 = vld [vmem:[#allocation3 + $0x18] sm:$0xff] }
 0x39f   : > { %v4136_v5 = vmul.f32 %v12649_v16, %v12648_v63  ;;  %12652 = vst [vmem:[#allocation15_spill] sm:$0xff] %v10840_v14  ;;  %6125 = vmatprep.subr.mxu1 %v4930_v47  ;;  %v10842_v63 = vadd.f32 %v4618_v31, %v4127_v22  ;;  %v3284_v16 = vadd.f32 1.0, %v7304_v3  ;;  %v4509_v1 = vadd.f32 %v4508_v49, %v4134_v40  ;;  %v4832_v22 = vld [vmem:[#allocation3 + $0x98] sm:$0xff]  ;;  %v4913_v31 = vld [vmem:[#allocation3 + $0x320] sm:$0xff]  ;;  %v7310_v2 = vpop.eup %7309  ;;  %v10856_v49 = vpop.f32.mrf.mxu1  ;;  %v12661_v33 = vld [vmem:[#allocation21_spill] sm:$0xff] }
 0x3a0   : > { %12654 = vst [vmem:[#allocation83_spill] sm:$0xff] %v10846_v62  ;;  %6126 = vmatpush3.msra.mxu1 %v4914_v29  ;;  %v3286_v47 = vadd.f32 1.0, %v7306_v44  ;;  %6023 = vmatpush3.msra.mxu0 %v4817_v37  ;;  %v3285_v34 = vadd.f32 1.0, %v7308_v55  ;;  %12657 = vst [vmem:[#allocation49_spill] sm:$0xff] %v10852_v56  ;;  %v10854_v29 = vpop.f32.mrf.mxu0  ;;  %v4928_v40 = vld [vmem:[#allocation3 + $0x398] sm:$0xff]  ;;  %v7312_v4 = vpop.eup %7311  ;;  %v12659_v44 = vld [vmem:[#allocation61_spill] sm:$0xff] }
 0x3a1   : > { %6127 = vmatprep.subr.mxu1 %v4929_v32  ;;  %v4583_v3 = vadd.f32 %v4582_v58, %v4136_v5  ;;  %7335 = vrcp.f32 %v3284_v16  ;;  %12658 = vst [vmem:[#allocation85_spill] sm:$0xff] %v10856_v49  ;;  %6024 = vmatprep.subr.mxu0 %v4832_v22  ;;  %v12660_v37 = vld [vmem:[#allocation92_spill] sm:$0xff]  ;;  %v12662_v58 = vld [vmem:[#allocation93_spill] sm:$0xff]  ;;  %v3287_v16 = vadd.f32 1.0, %v7310_v2  ;;  %v4912_v55 = vld [vmem:[#allocation3 + $0x318] sm:$0xff]  ;;  %v7314_v14 = vpop.eup %7313 }
 0x3a2   : > { %6128 = vmatpush3.msra.mxu1 %v4913_v31  ;;  %v4137_v32 = vmul.f32 %v12660_v37, %v12659_v44  ;;  %v4144_v5 = vmul.f32 %v12662_v58, %v12661_v33  ;;  %7337 = vrcp.f32 %v3286_v47  ;;  %6025 = vmatpush3.msra.mxu0 %v4816_v43  ;;  %v4831_v60 = vld [vmem:[#allocation3 + $0x90] sm:$0xff]  ;;  %v12664_v49 = vld [vmem:[#allocation95_spill] sm:$0xff]  ;;  %v3294_v31 = vadd.f32 1.0, %v7312_v4  ;;  %v7316_v33 = vpop.eup %7315  ;;  %v12666_v43 = vld [vmem:[#allocation94_spill] sm:$0xff] }
 0x3a3   : > { %6129 = vmatprep.subr.mxu1 %v4928_v40  ;;  %v4146_v22 = vmul.f32 %v12664_v49, %v12663_v30  ;;  %7339 = vrcp.f32 %v3285_v34  ;;  %v10865_v51 = vmul.f32 -1.442695, %v10846_v62  ;;  %6026 = vmatprep.subr.mxu0 %v4831_v60  ;;  %v4815_v44 = vld [vmem:[#allocation3 + $0x10] sm:$0xff]  ;;  %v4546_v47 = vadd.f32 %v4545_v48, %v4135_v28  ;;  %v4830_v30 = vld [vmem:[#allocation3 + $0x88] sm:$0xff]  ;;  %v7318_v49 = vpop.eup %7317  ;;  %v1912_v28 = vpop.f32.mrf.mxu0 }
 0x3a4   : > { %6130 = vmatpush3.msra.mxu1 %v4912_v55  ;;  %v4927_v37 = vld [vmem:[#allocation3 + $0x390] sm:$0xff]  ;;  %7341 = vrcp.f32 %v3287_v16  ;;  %v3296_v2 = vadd.f32 1.0, %v7314_v14  ;;  %v10869_v40 = vadd.f32 %v12666_v43, %v9644_v18  ;;  %6027 = vmatpush3.msra.mxu0 %v4815_v44  ;;  %v12669_v58 = vld [vmem:[#allocation96_spill] sm:$0xff]  ;;  %v3295_v60 = vadd.f32 1.0, %v7316_v33  ;;  %v10876_v48 = vpop.f32.mrf.mxu1  ;;  %v7320_v44 = vpop.eup %7319 }
 0x3a5   : > { %12665 = vst [vmem:[#allocation45_spill] sm:$0xff] %v10865_v51  ;;  %6131 = vmatprep.subr.mxu1 %v4927_v37  ;;  %v4911_v34 = vld [vmem:[#allocation3 + $0x310] sm:$0xff]  ;;  %7343 = vrcp.f32 %v3294_v31  ;;  %v10874_v55 = vmul.f32 -1.442695, %v10852_v56  ;;  %12670 = vst [vmem:[#allocation60_spill] sm:$0xff] %v10876_v48  ;;  %6028 = vmatprep.subr.mxu0 %v4830_v30  ;;  %v4814_v14 = vld [vmem:[#allocation3 + $0x8] sm:$0xff]  ;;  %v4620_v37 = vadd.f32 %v10842_v63, %v4137_v32 }
 0x3a6   : > { %12667 = vst [vmem:[#allocation86_spill] sm:$0xff] %v10869_v40  ;;  %v12668_v4 = vld [vmem:[#allocation33_spill] sm:$0xff]  ;;  %6132 = vmatpush3.msra.mxu1 %v4911_v34  ;;  %v4926_v16 = vld [vmem:[#allocation3 + $0x388] sm:$0xff]  ;;  %v10879_v43 = vadd.f32 %v4509_v1, %v4144_v5  ;;  %7345 = vrcp.f32 %v3296_v2  ;;  %v3297_v51 = vadd.f32 1.0, %v7318_v49  ;;  %6029 = vmatpush3.msra.mxu0 %v4814_v14  ;;  %v4829_v31 = vld [vmem:[#allocation3 + $0x80] sm:$0xff]  ;;  %v3304_v48 = vadd.f32 1.0, %v7320_v44  ;;  %v1914_v44 = vpop.f32.mrf.mxu0 }
 0x3a7   : > { %v4145_v62 = vmul.f32 %v12669_v58, %v12668_v4  ;;  %6133 = vmatprep.subr.mxu1 %v4926_v16  ;;  %v4910_v33 = vld [vmem:[#allocation3 + $0x308] sm:$0xff]  ;;  %v7322_v4 = vpop.eup %7321  ;;  %v10881_v58 = vadd.f32 %v4583_v3, %v4146_v22  ;;  %7347 = vrcp.f32 %v3295_v60  ;;  %v10885_v30 = vadd.f32 %v10835_v23, %v9692_v0  ;;  %6030 = vmatprep.subr.mxu0 %v4829_v31  ;;  %v4813_v63 = vld [vmem:[#allocation3] sm:$0xff]  ;;  %v12673_v2 = vld [vmem:[#allocation97_spill] sm:$0xff] }
 0x3a8   : > { %6134 = vmatpush3.msra.mxu1 %v4910_v33  ;;  %v4925_v1 = vld [vmem:[#allocation3 + $0x380] sm:$0xff]  ;;  %v7324_v32 = vpop.eup %7323  ;;  %7349 = vrcp.f32 %v3297_v51  ;;  %v3306_v49 = vadd.f32 1.0, %v7322_v4  ;;  %v10890_v14 = vmul.f32 -1.442695, %v10869_v40  ;;  %6031 = vmatpush3.msra.mxu0 %v4813_v63  ;;  %v4876_v3 = vld [vmem:[#allocation3 + $0x1f8] sm:$0xff]  ;;  %v10898_v51 = vpop.f32.mrf.mxu1 }
 0x3a9   : > { %12671 = vst [vmem:[#allocation89_spill] sm:$0xff] %v10885_v30  ;;  %v12672_v5 = vld [vmem:[#allocation63_spill] sm:$0xff]  ;;  %6135 = vmatprep.subr.mxu1 %v4925_v1  ;;  %v7326_v60 = vpop.eup %7325  ;;  %v4547_v23 = vadd.f32 %v4546_v47, %v4145_v62  ;;  %7351 = vrcp.f32 %v3304_v48  ;;  %v3305_v16 = vadd.f32 1.0, %v7324_v32  ;;  %v7744_v31 = vld [vmem:[%s11960_s4 + $0x8] sm:$0x3]  ;;  %12676 = vst [vmem:[#allocation51_spill] sm:$0xff] %v10898_v51  ;;  %6035 = vmatprep.subr.mxu0 %v4876_v3 }
 0x3aa   : > { %v4147_v34 = vmul.f32 %v12673_v2, %v12672_v5  ;;  %v4909_v22 = vld [vmem:[#allocation3 + $0x300] sm:$0xff]  ;;  %v12674_v33 = vld [vmem:[#allocation26_spill] sm:$0xff]  ;;  %v10900_v4 = vpop.eup %7327  ;;  %7353 = vrcp.f32 %v3306_v49  ;;  %v3307_v63 = vadd.f32 1.0, %v7326_v60  ;;  %v10908_v48 = vadd.f32 %v10854_v29, %v9699_v17 }
 0x3ab   : > { %v10896_v5 = vrot.slane %v7744_v31, %v12674_v33  ;;  %6136 = vmatpush3.msra.mxu1 %v4909_v22  ;;  %v12677_v62 = vld [vmem:[#allocation98_spill] sm:$0xff]  ;;  %v10910_v1 = vpop.eup %7329  ;;  %7355 = vrcp.f32 %v3305_v16  ;;  %v12680_v32 = vld [vmem:[#allocation99_spill] sm:$0xff]  ;;  %v10917_v3 = vadd.f32 %v1912_v28, %v9692_v0  ;;  %v10926_v29 = vmul.f32 -1.442695, %v10885_v30  ;;  %v12688_v28 = vld [vmem:[#allocation16_spill] sm:$0xff]  ;;  %v10944_v33 = vpop.f32.mrf.mxu1 }
 0x3ac   : > { %v10904_v47 = vadd.f32 %v12677_v62, %v9675_v21  ;;  %12679 = vst [vmem:[#allocation61_spill] sm:$0xff] %v10908_v48  ;;  %v10914_v2 = vadd.f32 %v12680_v32, %v9644_v18  ;;  %v12683_v49 = vld [vmem:[#allocation102_spill] sm:$0xff]  ;;  %v10923_v60 = vpop.eup %7331  ;;  %7357 = vrcp.f32 %v3307_v63  ;;  %v10929_v31 = vadd.f32 %v1914_v44, %v9699_v17  ;;  %v12686_v16 = vld [vmem:[#allocation107_spill] sm:$0xff]  ;;  %v12690_v63 = vld [vmem:[#allocation113_spill] sm:$0xff] }
 0x3ad   : > { %12675 = vst [vmem:[#allocation88_spill] sm:$0xff] %v10896_v5  ;;  %12682 = vst [vmem:[#allocation21_spill] sm:$0xff] %v10917_v3  ;;  %v10921_v22 = vadd.f32 %v12683_v49, %v9675_v21  ;;  %v10933_v18 = vadd.f32 %v12686_v16, %v10299_v13  ;;  %v10935_v62 = vpop.eup %7333  ;;  %v4621_v0 = vadd.f32 %v4620_v37, %v4147_v34  ;;  %v12689_v32 = vld [vmem:[#allocation111_spill] sm:$0xff]  ;;  %7359 = vpow2.f32 %v10596_v50  ;;  %v12694_v51 = vld [vmem:[#allocation114_spill] sm:$0xff] }
 0x3ae   : > { %12678 = vst [vmem:[#allocation90_spill] sm:$0xff] %v10904_v47  ;;  %12681 = vst [vmem:[#allocation92_spill] sm:$0xff] %v10914_v2  ;;  %v4154_v21 = vmul.f32 %v12689_v32, %v12688_v28  ;;  %v10942_v49 = vadd.f32 %v12690_v63, %v10896_v5  ;;  %v10946_v17 = vpop.eup %7335  ;;  %v12693_v44 = vld [vmem:[#allocation67_spill] sm:$0xff]  ;;  %7361 = vpow2.f32 %v10601_v24  ;;  %v10952_v37 = vmul.f32 -1.442695, %v10904_v47  ;;  %v12699_v47 = vld [vmem:[#allocation68_spill] sm:$0xff] }
 0x3af   : > { %12684 = vst [vmem:[#allocation93_spill] sm:$0xff] %v10921_v22  ;;  %12685 = vst [vmem:[#allocation62_spill] sm:$0xff] %v10929_v31  ;;  %v4156_v16 = vmul.f32 %v12694_v51, %v12693_v44  ;;  %v10955_v34 = vmul.f32 -1.442695, %v10908_v48  ;;  %v10957_v50 = vpop.eup %7337  ;;  %7363 = vpow2.f32 %v10613_v15  ;;  %v10961_v28 = vmul.f32 -1.442695, %v10914_v2 }
 0x3b0   : > { %12687 = vst [vmem:[#allocation95_spill] sm:$0xff] %v10933_v18  ;;  %12691 = vst [vmem:[#allocation94_spill] sm:$0xff] %v10942_v49  ;;  %v10964_v32 = vmul.f32 -1.442695, %v10917_v3  ;;  %v10967_v51 = vmul.f32 -1.442695, %v10921_v22  ;;  %v10969_v24 = vpop.eup %7339  ;;  %7365 = vpow2.f32 %v10616_v25  ;;  %v4511_v3 = vadd.f32 %v10879_v43, %v4154_v21 }
 0x3b1   : > { %12692 = vst [vmem:[#allocation33_spill] sm:$0xff] %v10944_v33  ;;  %v12695_v63 = vld [vmem:[#allocation23_spill] sm:$0xff]  ;;  %v10975_v48 = vmul.f32 -1.442695, %v10929_v31  ;;  %v10978_v15 = vmul.f32 -1.442695, %v10933_v18  ;;  %v10980_v2 = vpop.eup %7341  ;;  %7367 = vpow2.f32 %v10628_v27 }
 0x3b2   : > { %v12696_v44 = vld [vmem:[#allocation115_spill] sm:$0xff]  ;;  %v12700_v22 = vld [vmem:[#allocation118_spill] sm:$0xff]  ;;  %v10987_v56 = vmul.f32 -1.442695, %v10942_v49  ;;  %v10991_v25 = vpop.eup %7343  ;;  %v12703_v18 = vld [vmem:[#allocation69_spill] sm:$0xff]  ;;  %7369 = vpow2.f32 %v10651_v20 }
 0x3b3   : > { %v4155_v33 = vmul.f32 %v12696_v44, %v12695_v63  ;;  %12697 = vst [vmem:[#allocation96_spill] sm:$0xff] %v10975_v48  ;;  %12698 = vst [vmem:[#allocation63_spill] sm:$0xff] %v10978_v15  ;;  %v4157_v30 = vmul.f32 %v12700_v22, %v12699_v47  ;;  %v10989_v63 = vpop.f32.mrf.mxu1  ;;  %v4585_v44 = vadd.f32 %v10881_v58, %v4156_v16  ;;  %v12704_v31 = vld [vmem:[#allocation119_spill] sm:$0xff]  ;;  %v12705_v43 = vld [vmem:[#allocation117_spill] sm:$0xff]  ;;  %v11001_v47 = vpop.eup %7345  ;;  %7371 = vpow2.f32 %v10678_v41 }
 0x3b4   : > { %12701 = vst [vmem:[#allocation97_spill] sm:$0xff] %v10987_v56  ;;  %12702 = vst [vmem:[#allocation98_spill] sm:$0xff] %v10989_v63  ;;  %v4164_v40 = vmul.f32 %v12704_v31, %v12703_v18  ;;  %v10999_v21 = vadd.f32 %v12705_v43, %v10299_v13  ;;  %v12707_v27 = vld [vmem:[#allocation71_spill] sm:$0xff]  ;;  %v12708_v22 = vld [vmem:[#allocation121_spill] sm:$0xff]  ;;  %v11012_v31 = vpop.eup %7347  ;;  %7373 = vpow2.f32 %v10681_v38 }
 0x3b5   : > { %v4166_v49 = vmul.f32 %v12708_v22, %v12707_v27  ;;  %v12709_v56 = vld [vmem:[#allocation73_spill] sm:$0xff]  ;;  %v12710_v58 = vld [vmem:[#allocation120_spill] sm:$0xff]  ;;  %v4548_v20 = vadd.f32 %v4547_v23, %v4155_v33  ;;  %v11019_v27 = vadd.f32 %v10408_v35, %v10299_v13  ;;  %v11021_v22 = vpop.eup %7349  ;;  %v12714_v41 = vld [vmem:[#allocation78_spill] sm:$0xff]  ;;  %7375 = vpow2.f32 %v10700_v26  ;;  %v11030_v33 = vpop.f32.mrf.mxu1 }
 0x3b6   : > { %12706 = vst [vmem:[#allocation99_spill] sm:$0xff] %v10999_v21  ;;  %v4165_v63 = vmul.f32 %v10400_v7, %v12709_v56  ;;  %v11010_v16 = vadd.f32 %v12710_v58, %v10896_v5  ;;  %v12712_v18 = vld [vmem:[#allocation76_spill] sm:$0xff]  ;;  %v4622_v7 = vadd.f32 %v4621_v0, %v4157_v30  ;;  %v12715_v56 = vld [vmem:[#allocation39_spill] sm:$0xff]  ;;  %v12716_v58 = vld [vmem:[#allocation14_spill] sm:$0xff]  ;;  %v4512_v38 = vadd.f32 %v4511_v3, %v4164_v40 }
 0x3b7   : > { %v4167_v43 = vmul.f32 %v10410_v57, %v12712_v18  ;;  %12713 = vst [vmem:[#allocation107_spill] sm:$0xff] %v11019_v27  ;;  %v4174_v15 = vmul.f32 %v12715_v56, %v12714_v41  ;;  %v11028_v23 = vadd.f32 %v12716_v58, %v10896_v5  ;;  %12718 = vst [vmem:[#allocation111_spill] sm:$0xff] %v11030_v33  ;;  %v11032_v57 = vpop.eup %7351  ;;  %v12719_v18 = vld [vmem:[#allocation80_spill] sm:$0xff]  ;;  %v12720_v35 = vld [vmem:[#allocation122_spill] sm:$0xff]  ;;  %7377 = vpow2.f32 %v10703_v6 }
 0x3b8   : > { %12711 = vst [vmem:[#allocation102_spill] sm:$0xff] %v11010_v16  ;;  %v4176_v48 = vmul.f32 %v12720_v35, %v12719_v18  ;;  %v11038_v30 = vmul.f32 -1.442695, %v10999_v21  ;;  %v11040_v0 = vpop.eup %7353  ;;  %v4586_v26 = vadd.f32 %v4585_v44, %v4166_v49  ;;  %v4549_v41 = vadd.f32 %v4548_v20, %v4165_v63  ;;  %v12723_v3 = vld [vmem:[#allocation10_spill] sm:$0xff]  ;;  %v12724_v33 = vld [vmem:[#allocation123_spill] sm:$0xff]  ;;  %v12726_v63 = vld [vmem:[#allocation84_spill] sm:$0xff] }
 0x3b9   : > { %12717 = vst [vmem:[#allocation16_spill] sm:$0xff] %v11028_v23  ;;  %7379 = vpow2.f32 %v10715_v11  ;;  %v11044_v56 = vmul.f32 -1.442695, %v11010_v16  ;;  %v11046_v58 = vpop.eup %7355  ;;  %v4623_v40 = vadd.f32 %v4622_v7, %v4167_v43  ;;  %v4175_v18 = vmul.f32 %v12724_v33, %v12723_v3  ;;  %v12727_v44 = vld [vmem:[#allocation125_spill] sm:$0xff]  ;;  %v11062_v43 = vpop.f32.mrf.mxu1  ;;  %v12730_v3 = vld [vmem:[#allocation11_spill] sm:$0xff] }
 0x3ba   : > { %12721 = vst [vmem:[#allocation113_spill] sm:$0xff] %v11038_v30  ;;  %7381 = vpow2.f32 %v10727_v61  ;;  %v11052_v6 = vmul.f32 -1.442695, %v11019_v27  ;;  %v11054_v35 = vpop.eup %7357  ;;  %v4513_v49 = vadd.f32 %v4512_v38, %v4174_v15  ;;  %v4177_v11 = vmul.f32 %v12727_v44, %v12726_v63  ;;  %12729 = vst [vmem:[#allocation115_spill] sm:$0xff] %v11062_v43  ;;  %v12731_v61 = vld [vmem:[#allocation128_spill] sm:$0xff]  ;;  %v12734_v63 = vld [vmem:[#allocation87_spill] sm:$0xff] }
 0x3bb   : > { %12722 = vst [vmem:[#allocation67_spill] sm:$0xff] %v11044_v56  ;;  %7383 = vpow2.f32 %v10743_v46  ;;  %v11060_v20 = vmul.f32 -1.442695, %v11028_v23  ;;  %v7360_v7 = vpop.eup %7359  ;;  %v4587_v33 = vadd.f32 %v4586_v26, %v4176_v48  ;;  %v4184_v16 = vmul.f32 %v12731_v61, %v12730_v3  ;;  %v12732_v27 = vld [vmem:[#allocation124_spill] sm:$0xff]  ;;  %v12735_v44 = vld [vmem:[#allocation131_spill] sm:$0xff]  ;;  %v12736_v23 = vld [vmem:[#allocation130_spill] sm:$0xff] }
 0x3bc   : > { %12725 = vst [vmem:[#allocation114_spill] sm:$0xff] %v11052_v6  ;;  %7385 = vpow2.f32 %v10754_v9  ;;  %v11069_v15 = vadd.f32 %v12732_v27, %v10299_v13  ;;  %v7362_v38 = vpop.eup %7361  ;;  %v4186_v46 = vmul.f32 %v12735_v44, %v12734_v63  ;;  %v3314_v21 = vadd.f32 1.0, %v7360_v7  ;;  %v12738_v3 = vld [vmem:[#allocation38_spill] sm:$0xff]  ;;  %v12739_v61 = vld [vmem:[#allocation132_spill] sm:$0xff]  ;;  %v12740_v56 = vld [vmem:[#allocation91_spill] sm:$0xff] }
 0x3bd   : > { %12728 = vst [vmem:[#allocation23_spill] sm:$0xff] %v11060_v20  ;;  %7387 = vpow2.f32 %v10766_v39  ;;  %v11076_v43 = vadd.f32 %v12736_v23, %v10896_v5  ;;  %v7364_v48 = vpop.eup %7363  ;;  %v4550_v26 = vadd.f32 %v4549_v41, %v4175_v18  ;;  %v4185_v9 = vmul.f32 %v12739_v61, %v12738_v3  ;;  %v12741_v30 = vld [vmem:[#allocation135_spill] sm:$0xff]  ;;  %v11083_v39 = vpop.f32.mrf.mxu1 }
 0x3be   : > { %12733 = vst [vmem:[#allocation68_spill] sm:$0xff] %v11069_v15  ;;  %v3316_v20 = vadd.f32 1.0, %v7362_v38  ;;  %7389 = vpow2.f32 %v10779_v10  ;;  %v7366_v27 = vpop.eup %7365  ;;  %v4624_v6 = vadd.f32 %v4623_v40, %v4177_v11  ;;  %v4187_v63 = vmul.f32 %v12741_v30, %v12740_v56  ;;  %12742 = vst [vmem:[#allocation69_spill] sm:$0xff] %v11083_v39 }
 0x3bf   : > { %12737 = vst [vmem:[#allocation118_spill] sm:$0xff] %v11076_v43  ;;  %7391 = vrcp.f32 %v3314_v21  ;;  %v3315_v7 = vadd.f32 1.0, %v7364_v48  ;;  %v7368_v44 = vpop.eup %7367  ;;  %v11085_v23 = vadd.f32 %v4513_v49, %v4184_v16  ;;  %v3317_v41 = vadd.f32 1.0, %v7366_v27  ;;  %v12743_v16 = vld [vmem:[#allocation134_spill] sm:$0xff]  ;;  %v11107_v61 = vpop.f32.mrf.mxu1 }
 0x3c0   : > { %7393 = vrcp.f32 %v3316_v20  ;;  %v11088_v18 = vmul.f32 -1.442695, %v11069_v15  ;;  %v7370_v38 = vpop.eup %7369  ;;  %v11090_v3 = vadd.f32 %v4587_v33, %v4186_v46  ;;  %v3324_v10 = vadd.f32 1.0, %v7368_v44  ;;  %v12745_v46 = vld [vmem:[#allocation137_spill] sm:$0xff]  ;;  %12747 = vst [vmem:[#allocation71_spill] sm:$0xff] %v11107_v61  ;;  %v12750_v44 = vld [vmem:[#allocation36_spill] sm:$0xff] }
 0x3c1   : > { %7395 = vrcp.f32 %v3315_v7  ;;  %v11093_v40 = vmul.f32 -1.442695, %v11076_v43  ;;  %v7372_v21 = vpop.eup %7371  ;;  %v11095_v30 = vadd.f32 %v4550_v26, %v4185_v9  ;;  %v3326_v56 = vadd.f32 1.0, %v7370_v38  ;;  %v12748_v9 = vld [vmem:[#allocation140_spill] sm:$0xff]  ;;  %v12752_v38 = vld [vmem:[#allocation59_spill] sm:$0xff] }
 0x3c2   : > { %7397 = vrcp.f32 %v3317_v41  ;;  %v11099_v49 = vadd.f32 %v12743_v16, %v10299_v13  ;;  %v7374_v11 = vpop.eup %7373  ;;  %v11101_v20 = vadd.f32 %v4624_v6, %v4187_v63  ;;  %v3325_v33 = vadd.f32 1.0, %v7372_v21  ;;  %v12771_v61 = vld [vmem:[#allocation143_spill] sm:$0xff] }
 0x3c3   : > { %7399 = vrcp.f32 %v3324_v10  ;;  %v11105_v48 = vadd.f32 %v12745_v46, %v10896_v5  ;;  %v7376_v27 = vpop.eup %7375  ;;  %v3327_v26 = vadd.f32 1.0, %v7374_v11  ;;  %v11111_v7 = vadd.f32 %v12748_v9, %v10299_v13 }
 0x3c4   : > { %12744 = vst [vmem:[#allocation119_spill] sm:$0xff] %v11099_v49  ;;  %7401 = vrcp.f32 %v3326_v56  ;;  %v11115_v41 = vadd.f32 %v12750_v44, %v10896_v5  ;;  %v7378_v6 = vpop.eup %7377  ;;  %v3334_v63 = vadd.f32 1.0, %v7376_v27  ;;  %v11119_v10 = vadd.f32 %v12752_v38, %v10299_v13  ;;  %v11139_v44 = vpop.f32.mrf.mxu1 }
 0x3c5   : > { %12746 = vst [vmem:[#allocation117_spill] sm:$0xff] %v11105_v48  ;;  %12749 = vst [vmem:[#allocation121_spill] sm:$0xff] %v11111_v7  ;;  %7403 = vrcp.f32 %v3325_v33  ;;  %v11123_v21 = vadd.f32 %v10632_v45, %v10896_v5  ;;  %v3336_v16 = vadd.f32 1.0, %v7378_v6  ;;  %v11126_v11 = vmul.f32 -1.442695, %v11099_v49 }
 0x3c6   : > { %12751 = vst [vmem:[#allocation73_spill] sm:$0xff] %v11115_v41  ;;  %12753 = vst [vmem:[#allocation120_spill] sm:$0xff] %v11119_v10  ;;  %v7380_v56 = vpop.eup %7379  ;;  %7405 = vrcp.f32 %v3327_v26  ;;  %v11130_v46 = vadd.f32 %v10672_v36, %v10299_v13  ;;  %v11133_v9 = vmul.f32 -1.442695, %v11105_v48  ;;  %v11137_v45 = vadd.f32 %v10721_v52, %v10896_v5 }
 0x3c7   : > { %12754 = vst [vmem:[#allocation76_spill] sm:$0xff] %v11123_v21  ;;  %v7382_v33 = vpop.eup %7381  ;;  %7407 = vrcp.f32 %v3334_v63  ;;  %v3335_v27 = vadd.f32 1.0, %v7380_v56  ;;  %12757 = vst [vmem:[#allocation14_spill] sm:$0xff] %v11139_v44  ;;  %v11142_v38 = vmul.f32 -1.442695, %v11111_v7  ;;  %v12763_v7 = vld [vmem:[#allocation29_spill] sm:$0xff] }
 0x3c8   : > { %12755 = vst [vmem:[#allocation78_spill] sm:$0xff] %v11130_v46  ;;  %12756 = vst [vmem:[#allocation39_spill] sm:$0xff] %v11137_v45  ;;  %v7384_v26 = vpop.eup %7383  ;;  %7409 = vrcp.f32 %v3336_v16  ;;  %v3337_v6 = vadd.f32 1.0, %v7382_v33  ;;  %v11145_v36 = vmul.f32 -1.442695, %v11115_v41  ;;  %v11158_v33 = vadd.f32 %v10771_v12, %v10299_v13 }
 0x3c9   : > { %v7386_v63 = vpop.eup %7385  ;;  %7411 = vrcp.f32 %v3335_v27  ;;  %v3344_v56 = vadd.f32 1.0, %v7384_v26  ;;  %v11148_v48 = vmul.f32 -1.442695, %v11119_v10  ;;  %v11151_v52 = vmul.f32 -1.442695, %v11123_v21  ;;  %v11165_v21 = vpop.f32.mrf.mxu1 }
 0x3ca   : > { %12758 = vst [vmem:[#allocation80_spill] sm:$0xff] %v11145_v36  ;;  %v7388_v49 = vpop.eup %7387  ;;  %7413 = vrcp.f32 %v3337_v6  ;;  %v3346_v43 = vadd.f32 1.0, %v7386_v63  ;;  %v11154_v16 = vmul.f32 -1.442695, %v11130_v46  ;;  %12762 = vst [vmem:[#allocation84_spill] sm:$0xff] %v11158_v33  ;;  %v4194_v27 = vmul.f32 %v10634_v53, %v12763_v7  ;;  %v12766_v63 = vld [vmem:[#allocation100_spill] sm:$0xff] }
 0x3cb   : > { %12759 = vst [vmem:[#allocation122_spill] sm:$0xff] %v11148_v48  ;;  %12760 = vst [vmem:[#allocation10_spill] sm:$0xff] %v11151_v52  ;;  %v7390_v41 = vpop.eup %7389  ;;  %7415 = vrcp.f32 %v3344_v56  ;;  %v3345_v26 = vadd.f32 1.0, %v7388_v49  ;;  %v11163_v10 = vmul.f32 -1.442695, %v11137_v45  ;;  %v4196_v46 = vmul.f32 %v10644_v19, %v12766_v63  ;;  %v12768_v53 = vld [vmem:[#allocation48_spill] sm:$0xff] }
 0x3cc   : > { %12761 = vst [vmem:[#allocation123_spill] sm:$0xff] %v11154_v16  ;;  %12765 = vst [vmem:[#allocation11_spill] sm:$0xff] %v11165_v21  ;;  %v11167_v6 = vpop.eup %7391  ;;  %7417 = vrcp.f32 %v3346_v43  ;;  %v3347_v15 = vadd.f32 1.0, %v7390_v41  ;;  %v11173_v12 = vadd.f32 %v10815_v42, %v10896_v5  ;;  %v4195_v49 = vmul.f32 %v10653_v8, %v12768_v53  ;;  %v12769_v7 = vld [vmem:[#allocation101_spill] sm:$0xff]  ;;  %v12770_v21 = vld [vmem:[#allocation104_spill] sm:$0xff] }
 0x3cd   : > { %12764 = vst [vmem:[#allocation125_spill] sm:$0xff] %v11163_v10  ;;  %v11175_v44 = vpop.eup %7393  ;;  %v4197_v56 = vmul.f32 %v10663_v54, %v12769_v7  ;;  %7419 = vrcp.f32 %v3345_v26  ;;  %v4204_v19 = vmul.f32 %v12771_v61, %v12770_v21  ;;  %v12772_v43 = vld [vmem:[#allocation105_spill] sm:$0xff]  ;;  %v11188_v42 = vmul.f32 -1.442695, %v11158_v33  ;;  %v12775_v53 = vld [vmem:[#allocation106_spill] sm:$0xff]  ;;  %v12776_v5 = vld [vmem:[#allocation147_spill] sm:$0xff]  ;;  %v11200_v61 = vpop.f32.mrf.mxu1 }
 0x3ce   : > { %12767 = vst [vmem:[#allocation128_spill] sm:$0xff] %v11173_v12  ;;  %v11181_v45 = vpop.eup %7395  ;;  %v12773_v41 = vld [vmem:[#allocation145_spill] sm:$0xff]  ;;  %7421 = vrcp.f32 %v3347_v15  ;;  %v4515_v8 = vadd.f32 %v11085_v23, %v4194_v27  ;;  %v4205_v54 = vmul.f32 %v12776_v5, %v12775_v53  ;;  %12779 = vst [vmem:[#allocation131_spill] sm:$0xff] %v11200_v61  ;;  %v4589_v15 = vadd.f32 %v11090_v3, %v4196_v46  ;;  %v12793_v16 = vld [vmem:[#allocation72_spill] sm:$0xff] }
 0x3cf   : > { %v4206_v63 = vmul.f32 %v12773_v41, %v12772_v43  ;;  %12774 = vst [vmem:[#allocation124_spill] sm:$0xff] %v11188_v42  ;;  %v11190_v39 = vpop.eup %7397  ;;  %7423 = vpow2.f32 %v10782_v59  ;;  %v12777_v26 = vld [vmem:[#allocation81_spill] sm:$0xff]  ;;  %v12780_v43 = vld [vmem:[#allocation108_spill] sm:$0xff]  ;;  %v12782_v42 = vld [vmem:[#allocation31_spill] sm:$0xff]  ;;  %v11209_v23 = vmul.f32 -1.442695, %v11173_v12  ;;  %v4552_v59 = vadd.f32 %v11095_v30, %v4195_v49 }
 0x3d0   : > { %v11198_v7 = vadd.f32 %v12777_v26, %v10299_v13  ;;  %v11202_v21 = vpop.eup %7399  ;;  %v12781_v41 = vld [vmem:[#allocation149_spill] sm:$0xff]  ;;  %7425 = vpow2.f32 %v12782_v42  ;;  %v4626_v27 = vadd.f32 %v11101_v20, %v4197_v56  ;;  %v12785_v26 = vld [vmem:[#allocation150_spill] sm:$0xff]  ;;  %v4516_v46 = vadd.f32 %v4515_v8, %v4204_v19  ;;  %v12789_v12 = vld [vmem:[#allocation79_spill] sm:$0xff] }
 0x3d1   : > { %v4207_v33 = vmul.f32 %v12781_v41, %v12780_v43  ;;  %12783 = vst [vmem:[#allocation130_spill] sm:$0xff] %v11209_v23  ;;  %v11211_v5 = vpop.eup %7401  ;;  %v12784_v53 = vld [vmem:[#allocation109_spill] sm:$0xff]  ;;  %v4590_v43 = vadd.f32 %v4589_v15, %v4206_v63  ;;  %v12787_v41 = vld [vmem:[#allocation110_spill] sm:$0xff]  ;;  %v4553_v10 = vadd.f32 %v4552_v59, %v4205_v54  ;;  %v12790_v30 = vld [vmem:[#allocation27_spill] sm:$0xff] }
 0x3d2   : > { %12778 = vst [vmem:[#allocation87_spill] sm:$0xff] %v11198_v7  ;;  %v4214_v61 = vmul.f32 %v12785_v26, %v12784_v53  ;;  %v12786_v7 = vld [vmem:[#allocation64_spill] sm:$0xff]  ;;  %v11218_v3 = vpop.eup %7403  ;;  %v12788_v42 = vld [vmem:[#allocation153_spill] sm:$0xff]  ;;  %v12791_v49 = vld [vmem:[#allocation70_spill] sm:$0xff] }
 0x3d3   : > { %7427 = vpow2.f32 %v12786_v7  ;;  %v4216_v13 = vmul.f32 %v12788_v42, %v12787_v41  ;;  %v11223_v23 = vpop.eup %7405  ;;  %v4215_v20 = vmul.f32 %v12791_v49, %v12790_v30  ;;  %v12792_v56 = vld [vmem:[#allocation112_spill] sm:$0xff]  ;;  %v12794_v26 = vld [vmem:[#allocation65_spill] sm:$0xff]  ;;  %v11230_v7 = vpop.f32.mrf.mxu1  ;;  %v4627_v63 = vadd.f32 %v4626_v27, %v4207_v33  ;;  %v12796_v8 = vld [vmem:[#allocation54_spill] sm:$0xff] }
 0x3d4   : > { %7429 = vpow2.f32 %v12789_v12  ;;  %v4217_v53 = vmul.f32 %v12793_v16, %v12792_v56  ;;  %12795 = vst [vmem:[#allocation38_spill] sm:$0xff] %v11230_v7  ;;  %v11232_v19 = vpop.eup %7407  ;;  %v12797_v15 = vld [vmem:[#allocation9_spill] sm:$0xff]  ;;  %v12798_v12 = vld [vmem:[#allocation116_spill] sm:$0xff]  ;;  %v12799_v42 = vld [vmem:[#allocation75_spill] sm:$0xff]  ;;  %v4517_v30 = vadd.f32 %v4516_v46, %v4214_v61 }
 0x3d5   : > { %7431 = vpow2.f32 %v12794_v26  ;;  %v4224_v41 = vmul.f32 %v12797_v15, %v12796_v8  ;;  %v4226_v52 = vmul.f32 %v12799_v42, %v12798_v12  ;;  %v12800_v54 = vld [vmem:[#allocation15_spill] sm:$0xff]  ;;  %v11239_v59 = vpop.eup %7409  ;;  %v12802_v16 = vld [vmem:[#allocation77_spill] sm:$0xff]  ;;  %v12803_v26 = vld [vmem:[#allocation42_spill] sm:$0xff]  ;;  %v4591_v27 = vadd.f32 %v4590_v43, %v4216_v13 }
 0x3d6   : > { %7433 = vpow2.f32 %v12800_v54  ;;  %v12801_v49 = vld [vmem:[#allocation55_spill] sm:$0xff]  ;;  %v12804_v48 = vld [vmem:[#allocation41_spill] sm:$0xff]  ;;  %v11246_v33 = vpop.eup %7411  ;;  %v12806_v8 = vld [vmem:[#allocation46_spill] sm:$0xff]  ;;  %v4554_v46 = vadd.f32 %v4553_v10, %v4215_v20  ;;  %v4628_v54 = vadd.f32 %v4627_v63, %v4217_v53 }
 0x3d7   : > { %v4225_v56 = vmul.f32 %v12802_v16, %v12801_v49  ;;  %v4227_v7 = vmul.f32 %v12804_v48, %v12803_v26  ;;  %v12805_v36 = vld [vmem:[#allocation45_spill] sm:$0xff]  ;;  %v4234_v15 = vmul.f32 %v10900_v4, %v12806_v8  ;;  %v11253_v61 = vpop.eup %7413  ;;  %v12808_v49 = vld [vmem:[#allocation43_spill] sm:$0xff]  ;;  %v4518_v43 = vadd.f32 %v4517_v30, %v4224_v41  ;;  %v12809_v16 = vld [vmem:[#allocation50_spill] sm:$0xff] }
 0x3d8   : > { %7435 = vpow2.f32 %v12805_v36  ;;  %v12807_v12 = vld [vmem:[#allocation37_spill] sm:$0xff]  ;;  %v4235_v48 = vmul.f32 %v10923_v60, %v12808_v49  ;;  %v11258_v36 = vpop.f32.mrf.mxu1  ;;  %v11260_v13 = vpop.eup %7415  ;;  %v4592_v4 = vadd.f32 %v4591_v27, %v4226_v52  ;;  %v12810_v53 = vld [vmem:[#allocation52_spill] sm:$0xff]  ;;  %v12811_v41 = vld [vmem:[#allocation126_spill] sm:$0xff] }
 0x3d9   : > { %v4236_v42 = vmul.f32 %v10910_v1, %v12807_v12  ;;  %7437 = vpow2.f32 %v10874_v55  ;;  %v4237_v1 = vmul.f32 %v10935_v62, %v12809_v16  ;;  %v11265_v55 = vpop.eup %7417  ;;  %v4555_v10 = vadd.f32 %v4554_v46, %v4225_v56  ;;  %v12812_v30 = vld [vmem:[#allocation127_spill] sm:$0xff]  ;;  %v12813_v56 = vld [vmem:[#allocation129_spill] sm:$0xff] }
 0x3da   : > { %7439 = vpow2.f32 %v10890_v14  ;;  %v4629_v20 = vadd.f32 %v4628_v54, %v4227_v7  ;;  %v4244_v60 = vmul.f32 %v10946_v17, %v12810_v53  ;;  %v11270_v14 = vpop.eup %7419  ;;  %v4519_v63 = vadd.f32 %v4518_v43, %v4234_v15  ;;  %v12814_v15 = vld [vmem:[#allocation35_spill] sm:$0xff]  ;;  %v12815_v12 = vld [vmem:[#allocation133_spill] sm:$0xff] }
 0x3db   : > { %7441 = vpow2.f32 %v10926_v29  ;;  %v4593_v26 = vadd.f32 %v4592_v4, %v4236_v42  ;;  %v4246_v52 = vmul.f32 %v10957_v50, %v12811_v41  ;;  %v11275_v62 = vpop.eup %7421  ;;  %v4556_v29 = vadd.f32 %v4555_v10, %v4235_v48  ;;  %v12817_v48 = vld [vmem:[#allocation136_spill] sm:$0xff] }
 0x3dc   : > { %7443 = vpow2.f32 %v10952_v37  ;;  %v4245_v7 = vmul.f32 %v10969_v24, %v12812_v30  ;;  %v4247_v17 = vmul.f32 %v10980_v2, %v12813_v56  ;;  %v11282_v37 = vpop.f32.mrf.mxu1  ;;  %v7424_v27 = vpop.eup %7423  ;;  %v4630_v8 = vadd.f32 %v4629_v20, %v4237_v1  ;;  %v12816_v24 = vld [vmem:[#allocation22_spill] sm:$0xff] }
 0x3dd   : > { %7445 = vpow2.f32 %v10955_v34  ;;  %v4254_v50 = vmul.f32 %v10991_v25, %v12814_v15  ;;  %v4256_v34 = vmul.f32 %v11001_v47, %v12815_v12  ;;  %v7426_v42 = vpop.eup %7425  ;;  %v4520_v46 = vadd.f32 %v4519_v63, %v4244_v60  ;;  %v12818_v25 = vld [vmem:[#allocation96_spill] sm:$0xff]  ;;  %v12822_v15 = vld [vmem:[#allocation139_spill] sm:$0xff] }
 0x3de   : > { %7447 = vpow2.f32 %v10961_v28  ;;  %v4255_v54 = vmul.f32 %v11012_v31, %v12816_v24  ;;  %v3354_v2 = vadd.f32 1.0, %v7424_v27  ;;  %v4594_v49 = vadd.f32 %v4593_v26, %v4246_v52  ;;  %v11295_v10 = vpop.f32.mrf.mxu1  ;;  %v12819_v26 = vld [vmem:[#allocation28_spill] sm:$0xff]  ;;  %v12824_v24 = vld [vmem:[#allocation141_spill] sm:$0xff] }
 0x3df   : > { %7449 = vpow2.f32 %v10964_v32  ;;  %v4257_v43 = vmul.f32 %v11021_v22, %v12817_v48  ;;  %v3356_v4 = vadd.f32 1.0, %v7426_v42  ;;  %v4557_v47 = vadd.f32 %v4556_v29, %v4245_v7  ;;  %v12820_v29 = vld [vmem:[#allocation138_spill] sm:$0xff]  ;;  %v12821_v27 = vld [vmem:[#allocation12_spill] sm:$0xff] }
 0x3e0   : > { %7451 = vpow2.f32 %v10967_v51  ;;  %v7428_v28 = vpop.eup %7427  ;;  %v4631_v1 = vadd.f32 %v4630_v8, %v4247_v17  ;;  %v4521_v31 = vadd.f32 %v4520_v46, %v4254_v50  ;;  %v4595_v53 = vadd.f32 %v4594_v49, %v4256_v34  ;;  %v11305_v34 = vpop.f32.mrf.mxu1  ;;  %v12823_v42 = vld [vmem:[#allocation20_spill] sm:$0xff] }
 0x3e1   : > { %7453 = vpow2.f32 %v12818_v25  ;;  %v7430_v16 = vpop.eup %7429  ;;  %v3355_v32 = vadd.f32 1.0, %v7428_v28  ;;  %v4558_v63 = vadd.f32 %v4557_v47, %v4255_v54  ;;  %v4264_v22 = vmul.f32 %v11032_v57, %v12819_v26  ;;  %v12825_v49 = vld [vmem:[#allocation44_spill] sm:$0xff] }
 0x3e2   : > { %7455 = vrcp.f32 %v3354_v2  ;;  %v7432_v20 = vpop.eup %7431  ;;  %v3357_v51 = vadd.f32 1.0, %v7430_v16  ;;  %v4632_v30 = vadd.f32 %v4631_v1, %v4257_v43  ;;  %v4266_v7 = vmul.f32 %v11040_v0, %v12820_v29 }
 0x3e3   : > { %7457 = vrcp.f32 %v3356_v4  ;;  %v7434_v60 = vpop.eup %7433  ;;  %v3364_v41 = vadd.f32 1.0, %v7432_v20  ;;  %v4265_v8 = vmul.f32 %v11046_v58, %v12821_v27  ;;  %v4267_v50 = vmul.f32 %v11054_v35, %v12822_v15  ;;  %v12826_v4 = vld [vmem:[#allocation142_spill] sm:$0xff] }
 0x3e4   : > { %7459 = vrcp.f32 %v3355_v32  ;;  %v3366_v56 = vadd.f32 1.0, %v7434_v60  ;;  %v4274_v46 = vmul.f32 %v11167_v6, %v12823_v42  ;;  %v4276_v0 = vmul.f32 %v11175_v44, %v12824_v24  ;;  %v11315_v32 = vpop.f32.mrf.mxu1  ;;  %v12830_v27 = vld [vmem:[#allocation58_spill] sm:$0xff]  ;;  %v12832_v42 = vld [vmem:[#allocation53_spill] sm:$0xff] }
 0x3e5   : > { %v7436_v52 = vpop.eup %7435  ;;  %7461 = vrcp.f32 %v3357_v51  ;;  %v4522_v28 = vadd.f32 %v4521_v31, %v4264_v22  ;;  %v4275_v58 = vmul.f32 %v11181_v45, %v12825_v49  ;;  %v4596_v43 = vadd.f32 %v4595_v53, %v4266_v7  ;;  %v12827_v53 = vld [vmem:[#allocation40_spill] sm:$0xff] }
 0x3e6   : > { %v7438_v17 = vpop.eup %7437  ;;  %7463 = vrcp.f32 %v3364_v41  ;;  %v3365_v12 = vadd.f32 1.0, %v7436_v52  ;;  %v4277_v25 = vmul.f32 %v11190_v39, %v12826_v4  ;;  %v4559_v47 = vadd.f32 %v4558_v63, %v4265_v8  ;;  %v12828_v63 = vld [vmem:[#allocation56_spill] sm:$0xff] }
 0x3e7   : > { %v7440_v57 = vpop.eup %7439  ;;  %7465 = vrcp.f32 %v3366_v56  ;;  %v3367_v54 = vadd.f32 1.0, %v7438_v17  ;;  %v4633_v1 = vadd.f32 %v4632_v30, %v4267_v50  ;;  %v4523_v31 = vadd.f32 %v4522_v28, %v4274_v46  ;;  %v12829_v56 = vld [vmem:[#allocation57_spill] sm:$0xff]  ;;  %v11325_v50 = vpop.f32.mrf.mxu1 }
 0x3e8   : > { %v7442_v2 = vpop.eup %7441  ;;  %7467 = vrcp.f32 %v3365_v12  ;;  %v3374_v35 = vadd.f32 1.0, %v7440_v57  ;;  %v4597_v51 = vadd.f32 %v4596_v43, %v4276_v0  ;;  %v4560_v26 = vadd.f32 %v4559_v47, %v4275_v58  ;;  %v12831_v12 = vld [vmem:[#allocation19_spill] sm:$0xff]  ;;  %v12835_v58 = vld [vmem:[#allocation146_spill] sm:$0xff] }
 0x3e9   : > { %v7444_v48 = vpop.eup %7443  ;;  %7469 = vrcp.f32 %v3367_v54  ;;  %v3376_v16 = vadd.f32 1.0, %v7442_v2  ;;  %v4284_v22 = vmul.f32 %v11202_v21, %v12827_v53  ;;  %v4634_v52 = vadd.f32 %v4633_v1, %v4277_v25  ;;  %v12833_v54 = vld [vmem:[#allocation34_spill] sm:$0xff]  ;;  %v12834_v2 = vld [vmem:[#allocation144_spill] sm:$0xff] }
 0x3ea   : > { %v7446_v6 = vpop.eup %7445  ;;  %7471 = vrcp.f32 %v3374_v35  ;;  %v3375_v44 = vadd.f32 1.0, %v7444_v48  ;;  %v4286_v30 = vmul.f32 %v11211_v5, %v12828_v63  ;;  %v4285_v17 = vmul.f32 %v11218_v3, %v12829_v56  ;;  %v12837_v25 = vld [vmem:[#allocation66_spill] sm:$0xff] }
 0x3eb   : > { %v7448_v20 = vpop.eup %7447  ;;  %7473 = vrcp.f32 %v3376_v16  ;;  %v3377_v45 = vadd.f32 1.0, %v7446_v6  ;;  %v4287_v8 = vmul.f32 %v11223_v23, %v12830_v27  ;;  %v4294_v57 = vmul.f32 %v11232_v19, %v12831_v12  ;;  %v12836_v19 = vld [vmem:[#allocation148_spill] sm:$0xff]  ;;  %v11342_v6 = vpop.f32.mrf.mxu1 }
 0x3ec   : > { %v7450_v60 = vpop.eup %7449  ;;  %7475 = vrcp.f32 %v3375_v44  ;;  %v3384_v39 = vadd.f32 1.0, %v7448_v20  ;;  %v4296_v5 = vmul.f32 %v11239_v59, %v12832_v42  ;;  %v4524_v0 = vadd.f32 %v4523_v31, %v4284_v22  ;;  %v12839_v44 = vld [vmem:[#allocation151_spill] sm:$0xff]  ;;  %v12840_v20 = vld [vmem:[#allocation97_spill] sm:$0xff] }
 0x3ed   : > { %v7452_v41 = vpop.eup %7451  ;;  %7477 = vrcp.f32 %v3377_v45  ;;  %v3386_v29 = vadd.f32 1.0, %v7450_v60  ;;  %v4295_v3 = vmul.f32 %v11246_v33, %v12833_v54  ;;  %v4297_v23 = vmul.f32 %v11253_v61, %v12834_v2  ;;  %v12838_v33 = vld [vmem:[#allocation63_spill] sm:$0xff]  ;;  %v12841_v45 = vld [vmem:[#allocation152_spill] sm:$0xff]  ;;  %v11354_v27 = vpop.f32.mrf.mxu1 }
 0x3ee   : > { %v7454_v7 = vpop.eup %7453  ;;  %7479 = vrcp.f32 %v3384_v39  ;;  %v3385_v15 = vadd.f32 1.0, %v7452_v41  ;;  %v4598_v49 = vadd.f32 %v4597_v51, %v4286_v30  ;;  %v4304_v35 = vmul.f32 %v11260_v13, %v12835_v58  ;;  %v12843_v39 = vld [vmem:[#allocation13_spill] sm:$0xff] }
 0x3ef   : > { %v7456_v21 = vpop.eup %7455  ;;  %7481 = vrcp.f32 %v3386_v29  ;;  %v3387_v46 = vadd.f32 1.0, %v7454_v7  ;;  %v4306_v48 = vmul.f32 %v11265_v55, %v12836_v19  ;;  %v4561_v43 = vadd.f32 %v4560_v26, %v4285_v17  ;;  %v12842_v26 = vld [vmem:[#allocation113_spill] sm:$0xff]  ;;  %v12845_v29 = vld [vmem:[#allocation30_spill] sm:$0xff]  ;;  %v12846_v7 = vld [vmem:[#allocation32_spill] sm:$0xff] }
 0x3f0   : > { %v7458_v24 = vpop.eup %7457  ;;  %7483 = vrcp.f32 %v3385_v15  ;;  %v4635_v4 = vadd.f32 %v4634_v52, %v4287_v8  ;;  %v4305_v16 = vmul.f32 %v11270_v14, %v12837_v25  ;;  %v4525_v47 = vadd.f32 %v4524_v0, %v4294_v57  ;;  %v12844_v52 = vld [vmem:[#allocation67_spill] sm:$0xff]  ;;  %v12847_v17 = vld [vmem:[#allocation114_spill] sm:$0xff] }
 0x3f1   : > { %v7460_v28 = vpop.eup %7459  ;;  %7485 = vrcp.f32 %v3387_v46  ;;  %v4599_v1 = vadd.f32 %v4598_v49, %v4296_v5  ;;  %v4307_v13 = vmul.f32 %v11275_v62, %v12839_v44  ;;  %v4562_v31 = vadd.f32 %v4561_v43, %v4295_v3  ;;  %v12849_v57 = vld [vmem:[#allocation82_spill] sm:$0xff]  ;;  %v12850_v5 = vld [vmem:[#allocation23_spill] sm:$0xff]  ;;  %v12853_v49 = vld [vmem:[#allocation49_spill] sm:$0xff] }
 0x3f2   : > { %v7462_v59 = vpop.eup %7461  ;;  %7487 = vpow2.f32 %v12838_v33  ;;  %v4636_v51 = vadd.f32 %v4635_v4, %v4297_v23  ;;  %v4314_v60 = vmul.f32 %v7456_v21, %v12841_v45  ;;  %v4526_v53 = vadd.f32 %v4525_v47, %v4304_v35  ;;  %v12848_v21 = vld [vmem:[#allocation74_spill] sm:$0xff]  ;;  %v12851_v0 = vld [vmem:[#allocation83_spill] sm:$0xff]  ;;  %v12854_v35 = vld [vmem:[#allocation89_spill] sm:$0xff] }
 0x3f3   : > { %v7464_v61 = vpop.eup %7463  ;;  %7489 = vpow2.f32 %v12840_v20  ;;  %v4600_v22 = vadd.f32 %v4599_v1, %v4306_v48  ;;  %v4316_v41 = vmul.f32 %v7458_v24, %v12843_v39  ;;  %v4563_v30 = vadd.f32 %v4562_v31, %v4305_v16  ;;  %v12852_v3 = vld [vmem:[#allocation86_spill] sm:$0xff]  ;;  %v11367_v16 = vpop.f32.mrf.mxu1  ;;  %v12856_v47 = vld [vmem:[#allocation61_spill] sm:$0xff] }
 0x3f4   : > { %v7466_v55 = vpop.eup %7465  ;;  %7491 = vpow2.f32 %v12842_v26  ;;  %v4315_v62 = vmul.f32 %v7460_v28, %v12845_v29  ;;  %v4324_v56 = vmul.f32 %v7464_v61, %v12846_v7  ;;  %v4637_v15 = vadd.f32 %v4636_v51, %v4307_v13  ;;  %v12855_v4 = vld [vmem:[#allocation90_spill] sm:$0xff]  ;;  %v12859_v26 = vld [vmem:[#allocation80_spill] sm:$0xff]  ;;  %v12860_v39 = vld [vmem:[#allocation93_spill] sm:$0xff] }
 0x3f5   : > { %v7468_v14 = vpop.eup %7467  ;;  %7493 = vpow2.f32 %v12844_v52  ;;  %v4317_v12 = vmul.f32 %v7462_v59, %v12848_v21  ;;  %v4326_v42 = vmul.f32 %v7466_v55, %v12849_v57  ;;  %v4527_v24 = vadd.f32 %v4526_v53, %v4314_v60  ;;  %v11377_v52 = vpop.f32.mrf.mxu1  ;;  %v12863_v7 = vld [vmem:[#allocation10_spill] sm:$0xff]  ;;  %v12864_v21 = vld [vmem:[#allocation123_spill] sm:$0xff] }
 0x3f6   : > { %v7470_v63 = vpop.eup %7469  ;;  %7495 = vpow2.f32 %v12847_v17  ;;  %v4325_v54 = vmul.f32 %v7468_v14, %v12851_v0  ;;  %v4601_v28 = vadd.f32 %v4600_v22, %v4316_v41  ;;  %v4564_v59 = vadd.f32 %v4563_v30, %v4315_v62 }
 0x3f7   : > { %v7472_v8 = vpop.eup %7471  ;;  %7497 = vpow2.f32 %v12850_v5  ;;  %v4327_v58 = vmul.f32 %v7470_v63, %v12853_v49  ;;  %v4528_v43 = vadd.f32 %v4527_v24, %v4324_v56  ;;  %v4638_v61 = vadd.f32 %v4637_v15, %v4317_v12 }
 0x3f8   : > { %v7474_v46 = vpop.eup %7473  ;;  %v4334_v2 = vmul.f32 %v7472_v8, %v12852_v3  ;;  %7499 = vpow2.f32 %v11088_v18  ;;  %v4602_v18 = vadd.f32 %v4601_v28, %v4326_v42  ;;  %v4565_v13 = vadd.f32 %v4564_v59, %v4325_v54 }
 0x3f9   : > { %v7476_v23 = vpop.eup %7475  ;;  %v4336_v19 = vmul.f32 %v7474_v46, %v12854_v35  ;;  %7501 = vpow2.f32 %v11093_v40  ;;  %v12857_v40 = vld [vmem:[#allocation92_spill] sm:$0xff]  ;;  %v4639_v51 = vadd.f32 %v4638_v61, %v4327_v58  ;;  %v12865_v46 = vld [vmem:[#allocation125_spill] sm:$0xff] }
 0x3fa   : > { %v7478_v48 = vpop.eup %7477  ;;  %v4335_v25 = vmul.f32 %v7476_v23, %v12855_v4  ;;  %7503 = vpow2.f32 %v11126_v11  ;;  %v4529_v20 = vadd.f32 %v4528_v43, %v4334_v2  ;;  %v12858_v11 = vld [vmem:[#allocation21_spill] sm:$0xff]  ;;  %v11383_v2 = vpop.f32.mrf.mxu1 }
 0x3fb   : > { %v7480_v33 = vpop.eup %7479  ;;  %v4337_v1 = vmul.f32 %v7478_v48, %v12856_v47  ;;  %7505 = vpow2.f32 %v11133_v9  ;;  %v4603_v45 = vadd.f32 %v4602_v18, %v4336_v19  ;;  %v12861_v9 = vld [vmem:[#allocation122_spill] sm:$0xff] }
 0x3fc   : > { %v7482_v44 = vpop.eup %7481  ;;  %v4344_v55 = vmul.f32 %v7480_v33, %v12857_v40  ;;  %7507 = vpow2.f32 %v11142_v38  ;;  %v4566_v53 = vadd.f32 %v4565_v13, %v4335_v25  ;;  %v12862_v38 = vld [vmem:[#allocation62_spill] sm:$0xff] }
 0x3fd   : > { %v7484_v31 = vpop.eup %7483  ;;  %v4346_v60 = vmul.f32 %v7482_v44, %v12858_v11  ;;  %7509 = vpow2.f32 %v12859_v26  ;;  %v4640_v30 = vadd.f32 %v4639_v51, %v4337_v1  ;;  %v11385_v44 = vpop.f32.mrf.mxu1 }
 0x3fe   : > { %v7486_v14 = vpop.eup %7485  ;;  %v4530_v22 = vadd.f32 %v4529_v20, %v4344_v55  ;;  %v4345_v41 = vmul.f32 %v7484_v31, %v12860_v39  ;;  %7511 = vpow2.f32 %v12861_v9  ;;  %v12866_v9 = vld [vmem:[#allocation88_spill] sm:$0xff] }
 0x3ff   : > { %v7488_v63 = vpop.eup %7487  ;;  %v4604_v29 = vadd.f32 %v4603_v45, %v4346_v60  ;;  %v4347_v62 = vmul.f32 %v7486_v14, %v12862_v38  ;;  %7513 = vpow2.f32 %v12863_v7 }
 0x400   : > { %v7490_v56 = vpop.eup %7489  ;;  %v4531_v17 = vrot.slane %v4530_v22, 4  ;;  %v4567_v8 = vadd.f32 %v4566_v53, %v4345_v41  ;;  %v3078_v15 = vadd.f32 1.0, %v7488_v63  ;;  %7515 = vpow2.f32 %v12864_v21  ;;  %v12867_v63 = vld [vmem:[#allocation85_spill] sm:$0xff] }
 0x401   : > { %v7492_v12 = vpop.eup %7491  ;;  %v4605_v57 = vrot.slane %v4604_v29, 4  ;;  %v4641_v42 = vadd.f32 %v4640_v30, %v4347_v62  ;;  %v3079_v5 = vadd.f32 1.0, %v7490_v56  ;;  %7517 = vpow2.f32 %v12865_v46 }
 0x402   : > { %v7494_v24 = vpop.eup %7493  ;;  %v4532_v0 = vadd.f32 %v4531_v17, %v4530_v22  ;;  %v4568_v54 = vrot.slane %v4567_v8, 4  ;;  %7519 = vrcp.f32 %v3078_v15  ;;  %v3088_v3 = vadd.f32 1.0, %v7492_v12 }
 0x403   : > { %v7496_v23 = vpop.eup %7495  ;;  %v4606_v28 = vadd.f32 %v4605_v57, %v4604_v29  ;;  %v4642_v49 = vrot.slane %v4641_v42, 4  ;;  %7521 = vrcp.f32 %v3079_v5  ;;  %v3089_v58 = vadd.f32 1.0, %v7494_v24  ;;  %v11391_v29 = vpop.f32.mrf.mxu1 }
 0x404   : > { %v7498_v35 = vpop.eup %7497  ;;  %v4533_v19 = vrot.slane %v4532_v0, 2  ;;  %v4569_v48 = vadd.f32 %v4568_v54, %v4567_v8  ;;  %7523 = vrcp.f32 %v3088_v3  ;;  %v3098_v59 = vadd.f32 1.0, %v7496_v23  ;;  %v12872_v23 = vld [vmem:[#allocation103_spill] sm:$0xff] }
 0x405   : > { %v7500_v43 = vpop.eup %7499  ;;  %v4607_v4 = vrot.slane %v4606_v28, 2  ;;  %v4643_v25 = vadd.f32 %v4642_v49, %v4641_v42  ;;  %7525 = vrcp.f32 %v3089_v58  ;;  %v3099_v33 = vadd.f32 1.0, %v7498_v35  ;;  %v11404_v58 = vpop.f32.mrf.mxu1 }
 0x406   : > { %v7502_v61 = vpop.eup %7501  ;;  %v4534_v18 = vadd.f32 %v4533_v19, %v4532_v0  ;;  %v4570_v47 = vrot.slane %v4569_v48, 2  ;;  %7527 = vrcp.f32 %v3098_v59  ;;  %v3108_v1 = vadd.f32 1.0, %v7500_v43  ;;  %v12874_v59 = vld [vmem:[#allocation51_spill] sm:$0xff] }
 0x407   : > { %v7504_v13 = vpop.eup %7503  ;;  %v4608_v20 = vadd.f32 %v4607_v4, %v4606_v28  ;;  %v4644_v40 = vrot.slane %v4643_v25, 2  ;;  %7529 = vrcp.f32 %v3099_v33  ;;  %v3109_v55 = vadd.f32 1.0, %v7502_v61  ;;  %v12873_v28 = vld [vmem:[#allocation60_spill] sm:$0xff]  ;;  %v12876_v61 = vld [vmem:[#allocation87_spill] sm:$0xff] }
 0x408   : > { %v7506_v31 = vpop.eup %7505  ;;  %v4535_v51 = vrot.slane %v4534_v18, 1  ;;  %v4571_v45 = vadd.f32 %v4570_v47, %v4569_v48  ;;  %7531 = vrcp.f32 %v3108_v1  ;;  %v3118_v11 = vadd.f32 1.0, %v7504_v13  ;;  %v12877_v47 = vld [vmem:[#allocation33_spill] sm:$0xff] }
 0x409   : > { %v7508_v60 = vpop.eup %7507  ;;  %v4609_v26 = vrot.slane %v4608_v20, 1  ;;  %v4645_v14 = vadd.f32 %v4644_v40, %v4643_v25  ;;  %7533 = vrcp.f32 %v3109_v55  ;;  %v3119_v53 = vadd.f32 1.0, %v7506_v31  ;;  %v12875_v25 = vld [vmem:[#allocation47_spill] sm:$0xff]  ;;  %v12878_v55 = vld [vmem:[#allocation98_spill] sm:$0xff] }
 0x40a   : > { %v7510_v22 = vpop.eup %7509  ;;  %v4572_v39 = vrot.slane %v4571_v45, 1  ;;  %7535 = vrcp.f32 %v3118_v11  ;;  %v3128_v41 = vadd.f32 1.0, %v7508_v60  ;;  %v11389_v30 = vadd.f32 %v12867_v63, %v12866_v9  ;;  %v12881_v60 = vld [vmem:[#allocation111_spill] sm:$0xff] }
 0x40b   : > { %v7512_v38 = vpop.eup %7511  ;;  %v4536_v62 = vadd.f32 %v4535_v51, %v4534_v18  ;;  %v4646_v7 = vrot.slane %v4645_v14, 1  ;;  %7537 = vrcp.f32 %v3119_v53  ;;  %v3129_v56 = vadd.f32 1.0, %v7510_v22  ;;  %v12884_v63 = vld [vmem:[#allocation115_spill] sm:$0xff] }
 0x40c   : > { %v7514_v17 = vpop.eup %7513  ;;  %v4573_v8 = vadd.f32 %v4572_v39, %v4571_v45  ;;  %7539 = vrcp.f32 %v3128_v41  ;;  %v3138_v15 = vadd.f32 1.0, %v7512_v38  ;;  %v12868_v21 = vlaneseq  ;;  %v12880_v45 = vld [vmem:[#allocation124_spill] sm:$0xff]  ;;  %v12883_v39 = vld [vmem:[#allocation130_spill] sm:$0xff] }
 0x40d   : > { %v12869_v12 = vmov 0  ;;  %v7516_v57 = vpop.eup %7515  ;;  %v4610_v42 = vadd.f32 %v4609_v26, %v4608_v20  ;;  %v4647_v5 = vadd.f32 %v4646_v7, %v4645_v14  ;;  %7541 = vrcp.f32 %v3129_v56  ;;  %v11436_v14 = vpop.f32.mrf.mxu1  ;;  %v12886_v7 = vld [vmem:[#allocation17_spill] sm:$0xff]  ;;  %v12887_v56 = vld [vmem:[#allocation18_spill] sm:$0xff] }
 0x40e   : > { %vm11394_vm4 = vcmp.lt.s32.totalorder %v12868_v21, 256  ;;  %v3139_v46 = vadd.f32 1.0, %v7514_v17  ;;  %v7859_v24 = vmov 0.0   ;;  %v7518_v0 = vpop.eup %7517  ;;  %v4734_v54 = vcombine.low %v4536_v62, %v4573_v8  ;;  %v12889_v21 = vld [vmem:[#allocation69_spill] sm:$0xff] }
 0x40f   : > { %v12870_v12 = vsel %vm11394_vm4, 4294967295, %v12869_v12  ;;  %330 = vst.msk [vmem:[#allocation2 + $0x8] sm:$0x3] %vm11394_vm4, %v7859_v24  ;;  %7543 = vrcp.f32 %v3138_v15  ;;  %v3148_v3 = vadd.f32 1.0, %v7516_v57  ;;  %v11402_v49 = vadd.f32 %v12873_v28, %v12872_v23  ;;  %v11406_v35 = vpop.eup %7519  ;;  %v12891_v24 = vld [vmem:[#allocation71_spill] sm:$0xff]  ;;  %v12893_v28 = vld [vmem:[#allocation14_spill] sm:$0xff] }
 0x410   : > { %12871 = vst [vmem:[#allocation132_spill] sm:$0xff] %v12870_v12  ;;  %v4735_v19 = vcombine.low %v4610_v42, %v4647_v5  ;;  %7545 = vrcp.f32 %v3139_v46  ;;  %v3149_v48 = vadd.f32 1.0, %v7518_v0  ;;  %v11410_v43 = vadd.f32 %v12874_v59, %v12866_v9  ;;  %v11412_v4 = vpop.eup %7521  ;;  %v12905_v12 = vld [vmem:[#allocation25_spill] sm:$0xff] }
 0x411   : > { %v4756_v33 = vrot.slane %v4734_v54, %v12875_v25  ;;  %7547 = vrcp.f32 %v3148_v3  ;;  %v5755_v18 = vmul.f32 -1.442695, %v12876_v61  ;;  %v11418_v1 = vadd.f32 %v12877_v47, %v12872_v23  ;;  %v11420_v13 = vpop.eup %7523  ;;  %v12895_v47 = vld [vmem:[#allocation11_spill] sm:$0xff] }
 0x412   : > { %v4763_v20 = vrot.slane %v4735_v19, %v12875_v25  ;;  %7549 = vrcp.f32 %v3149_v48  ;;  %v5756_v40 = vmul.f32 -1.442695, %v11389_v30  ;;  %v11426_v31 = vadd.f32 %v12878_v55, %v12866_v9  ;;  %v11428_v51 = vpop.eup %7525  ;;  %v11472_v48 = vpop.f32.mrf.mxu1 }
 0x413   : > { %7551 = vpow2.f32 %v12880_v45  ;;  %v5765_v11 = vmul.f32 -1.442695, %v11402_v49  ;;  %v11434_v26 = vadd.f32 %v12881_v60, %v12872_v23  ;;  %v11438_v53 = vpop.eup %7527  ;;  %v5766_v41 = vmul.f32 -1.442695, %v11410_v43  ;;  %v12897_v45 = vld [vmem:[#allocation131_spill] sm:$0xff] }
 0x414   : > { %12879 = vst [vmem:[#allocation91_spill] sm:$0xff] %v11426_v31  ;;  %v4765_v22 = vcombine.low %v4756_v33, %v4763_v20  ;;  %7553 = vpow2.f32 %v12883_v39  ;;  %v11444_v38 = vadd.f32 %v12884_v63, %v12866_v9  ;;  %v11446_v62 = vpop.eup %7529  ;;  %v12888_v17 = vcombine.low %v12886_v7, %v12887_v56  ;;  %v12899_v39 = vld [vmem:[#allocation38_spill] sm:$0xff]  ;;  %v11498_v56 = vpop.f32.mrf.mxu1 }
 0x415   : > { %12882 = vst [vmem:[#allocation135_spill] sm:$0xff] %v11434_v26  ;;  %7555 = vpow2.f32 %v5755_v18  ;;  %v5775_v15 = vmul.f32 -1.442695, %v11418_v1  ;;  %v11455_v57 = vadd.f32 %v12889_v21, %v12872_v23  ;;  %v11457_v42 = vpop.eup %7531  ;;  %v5776_v46 = vmul.f32 -1.442695, %v11426_v31 }
 0x416   : > { %12885 = vst [vmem:[#allocation134_spill] sm:$0xff] %v11444_v38  ;;  %v4772_v8 = vrot.slane %v12888_v17, %v12875_v25  ;;  %v4779_v5 = vrot.slane %v4765_v22, %v12875_v25  ;;  %7557 = vpow2.f32 %v5756_v40  ;;  %v11463_v0 = vadd.f32 %v12891_v24, %v12866_v9  ;;  %v11465_v54 = vpop.eup %7533  ;;  %v4860_v25 = vld [vmem:[#allocation3 + $0x178] sm:$0xff] }
 0x417   : > { %12890 = vst [vmem:[#allocation137_spill] sm:$0xff] %v11455_v57  ;;  %7559 = vpow2.f32 %v5765_v11  ;;  %v5785_v3 = vmul.f32 -1.442695, %v11434_v26  ;;  %v11470_v19 = vadd.f32 %v12893_v28, %v12872_v23  ;;  %v11474_v59 = vpop.eup %7535  ;;  %v5786_v18 = vmul.f32 -1.442695, %v11444_v38  ;;  %v4872_v26 = vld [vmem:[#allocation3 + $0x1d8] sm:$0xff] }
 0x418   : > { %12892 = vst [vmem:[#allocation140_spill] sm:$0xff] %v11463_v0  ;;  %v4780_v33 = vcombine.low %v4772_v8, %v4779_v5  ;;  %7561 = vpow2.f32 %v5766_v41  ;;  %v11479_v20 = vadd.f32 %v12895_v47, %v12866_v9  ;;  %v11481_v40 = vpop.eup %7537  ;;  %v5795_v55 = vmul.f32 -1.442695, %v11455_v57 }
 0x419   : > { %12894 = vst [vmem:[#allocation36_spill] sm:$0xff] %v11470_v19  ;;  %7563 = vpow2.f32 %v5775_v15  ;;  %v11486_v11 = vadd.f32 %v12897_v45, %v12872_v23  ;;  %v11488_v60 = vpop.eup %7539  ;;  %v5796_v22 = vmul.f32 -1.442695, %v11463_v0  ;;  %v11493_v41 = vadd.f32 %v12899_v39, %v12866_v9  ;;  %v11518_v39 = vpop.f32.mrf.mxu1  ;;  %v4859_v0 = vld [vmem:[#allocation3 + $0x170] sm:$0xff] }
 0x41a   : > { %12896 = vst [vmem:[#allocation59_spill] sm:$0xff] %v11479_v20  ;;  %7565 = vpow2.f32 %v5776_v46  ;;  %v11495_v63 = vpop.eup %7541  ;;  %v5805_v7 = vmul.f32 -1.442695, %v11470_v19  ;;  %v5806_v8 = vmul.f32 -1.442695, %v11479_v20  ;;  %v11503_v15 = vmul.f32 0.00390625, %v4780_v33 }
 0x41b   : > { %12898 = vst [vmem:[#allocation29_spill] sm:$0xff] %v11486_v11  ;;  %12900 = vst [vmem:[#allocation100_spill] sm:$0xff] %v11493_v41  ;;  %7567 = vpow2.f32 %v5785_v3  ;;  %v5815_v5 = vmul.f32 -1.442695, %v11486_v11  ;;  %v5816_v24 = vmul.f32 -1.442695, %v11493_v41 }
 0x41c   : > { %v11500_v17 = vpop.eup %7543  ;;  %7569 = vpow2.f32 %v5786_v18  ;;  %12901 = vst [vmem:[#allocation48_spill] sm:$0xff] %v11503_v15  ;;  %v12902_v3 = vld [vmem:[#allocation26_spill] sm:$0xff]  ;;  %v12903_v18 = vld [vmem:[#allocation24_spill] sm:$0xff]  ;;  %v4875_v20 = vld [vmem:[#allocation3 + $0x1f0] sm:$0xff] }
 0x41d   : > { %v11505_v21 = vpop.eup %7545  ;;  %7571 = vpow2.f32 %v5795_v55  ;;  %v4983_v28 = vrot.slane %v11503_v15, %v12902_v3  ;;  %v12904_v45 = vsub.s32 7, %v12903_v18  ;;  %v12906_v3 = vsub.s32 6, %v12903_v18 }
 0x41e   : > { %v11508_v46 = vpop.eup %7547  ;;  %7573 = vpow2.f32 %v5796_v22  ;;  %v4979_v22 = vrot.slane %v11503_v15, %v12905_v12 }
 0x41f   : > { %v11513_v47 = vpop.eup %7549  ;;  %7575 = vpow2.f32 %v5805_v7  ;;  %v5007_v33 = vrot.slane %v11503_v15, %v12904_v45  ;;  %5090 = vmatprep.mubr.f32.mxu0 %v4983_v28  ;;  %v5003_v7 = vrot.slane %v11503_v15, %v12906_v3 }
 0x420   : > { %v7552_v55 = vpop.eup %7551  ;;  %7577 = vpow2.f32 %v5806_v8  ;;  %5091 = vmatmul.mubr.f32.vlgmr.msra.gmra.mxu0 %v4979_v22  ;;  %v12907_v8 = vsub.s32 3, %v12903_v18 }
 0x421   : > { %v7554_v41 = vpop.eup %7553  ;;  %v3158_v11 = vadd.f32 1.0, %v7552_v55  ;;  %7579 = vpow2.f32 %v5815_v5  ;;  %5300 = vmatprep.mubr.f32.mxu1 %v5007_v33  ;;  %6036 = vmatpush3.msra.mxu0 %v4860_v25  ;;  %v4874_v5 = vld [vmem:[#allocation3 + $0x1e8] sm:$0xff]  ;;  %v11528_v33 = vpop.f32.mrf.mxu1  ;;  %v4857_v25 = vld [vmem:[#allocation3 + $0x160] sm:$0xff] }
 0x422   : > { %v7556_v19 = vpop.eup %7555  ;;  %v3159_v45 = vadd.f32 1.0, %v7554_v41  ;;  %7581 = vpow2.f32 %v5816_v24  ;;  %v4991_v28 = vrot.slane %v11503_v15, %v12907_v8  ;;  %5301 = vmatmul.mubr.f32.vlgmr.msra.gmra.mxu1 %v5003_v7  ;;  %6037 = vmatprep.subr.mxu0 %v4875_v20  ;;  %v4858_v41 = vld [vmem:[#allocation3 + $0x168] sm:$0xff]  ;;  %v4873_v8 = vld [vmem:[#allocation3 + $0x1e0] sm:$0xff] }
 0x423   : > { %v7558_v12 = vpop.eup %7557  ;;  %7583 = vrcp.f32 %v3158_v11  ;;  %v3168_v57 = vadd.f32 1.0, %v7556_v19  ;;  %6038 = vmatpush3.msra.mxu0 %v4859_v0 }
 0x424   : > { %v7560_v55 = vpop.eup %7559  ;;  %7585 = vrcp.f32 %v3159_v45  ;;  %v3169_v3 = vadd.f32 1.0, %v7558_v12  ;;  %5160 = vmatprep.mubr.f32.mxu0 %v4991_v28  ;;  %6039 = vmatprep.subr.mxu0 %v4874_v5  ;;  %v11530_v45 = vpop.f32.mrf.mxu1 }
 0x425   : > { %v7562_v24 = vpop.eup %7561  ;;  %7587 = vrcp.f32 %v3168_v57  ;;  %v3178_v22 = vadd.f32 1.0, %v7560_v55  ;;  %6040 = vmatpush3.msra.mxu0 %v4858_v41  ;;  %v4856_v57 = vld [vmem:[#allocation3 + $0x158] sm:$0xff]  ;;  %v4871_v55 = vld [vmem:[#allocation3 + $0x1d0] sm:$0xff] }
 0x426   : > { %v7564_v38 = vpop.eup %7563  ;;  %7589 = vrcp.f32 %v3169_v3  ;;  %v3179_v11 = vadd.f32 1.0, %v7562_v24  ;;  %6041 = vmatprep.subr.mxu0 %v4873_v8  ;;  %v4855_v24 = vld [vmem:[#allocation3 + $0x150] sm:$0xff]  ;;  %v4870_v8 = vld [vmem:[#allocation3 + $0x1c8] sm:$0xff] }
 0x427   : > { %v7566_v19 = vpop.eup %7565  ;;  %7591 = vrcp.f32 %v3178_v22  ;;  %v3188_v7 = vadd.f32 1.0, %v7564_v38  ;;  %6042 = vmatpush3.msra.mxu0 %v4857_v25  ;;  %v11534_v22 = vadd.f32 %v11258_v36, %v12872_v23  ;;  %v11544_v36 = vadd.f32 %v11295_v10, %v12872_v23 }
 0x428   : > { %v7568_v12 = vpop.eup %7567  ;;  %7593 = vrcp.f32 %v3179_v11  ;;  %v3189_v20 = vadd.f32 1.0, %v7566_v19  ;;  %6043 = vmatprep.subr.mxu0 %v4872_v26  ;;  %v11536_v11 = vpop.f32.mrf.mxu1  ;;  %v4854_v26 = vld [vmem:[#allocation3 + $0x148] sm:$0xff]  ;;  %v11553_v10 = vadd.f32 %v11315_v32, %v12872_v23 }
 0x429   : > { %v7570_v28 = vpop.eup %7569  ;;  %7595 = vrcp.f32 %v3188_v7  ;;  %v3198_v0 = vadd.f32 1.0, %v7568_v12  ;;  %12908 = vst [vmem:[#allocation101_spill] sm:$0xff] %v11534_v22  ;;  %6044 = vmatpush3.msra.mxu0 %v4856_v57  ;;  %v11540_v7 = vadd.f32 %v11282_v37, %v12866_v9  ;;  %12910 = vst [vmem:[#allocation143_spill] sm:$0xff] %v11544_v36  ;;  %v4869_v57 = vld [vmem:[#allocation3 + $0x1c0] sm:$0xff]  ;;  %v5835_v32 = vmul.f32 -1.442695, %v11544_v36 }
 0x42a   : > { %v7572_v3 = vpop.eup %7571  ;;  %7597 = vrcp.f32 %v3189_v20  ;;  %v3199_v5 = vadd.f32 1.0, %v7570_v28  ;;  %6045 = vmatprep.subr.mxu0 %v4871_v55  ;;  %v4853_v37 = vld [vmem:[#allocation3 + $0x140] sm:$0xff]  ;;  %12912 = vst [vmem:[#allocation145_spill] sm:$0xff] %v11553_v10 }
 0x42b   : > { %v7574_v38 = vpop.eup %7573  ;;  %7599 = vrcp.f32 %v3198_v0  ;;  %v3208_v41 = vadd.f32 1.0, %v7572_v3  ;;  %12909 = vst [vmem:[#allocation104_spill] sm:$0xff] %v11540_v7  ;;  %6046 = vmatpush3.msra.mxu0 %v4855_v24  ;;  %v11548_v3 = vadd.f32 %v11305_v34, %v12866_v9  ;;  %v4868_v24 = vld [vmem:[#allocation3 + $0x1b8] sm:$0xff] }
 0x42c   : > { %v7576_v19 = vpop.eup %7575  ;;  %7601 = vrcp.f32 %v3199_v5  ;;  %v3209_v25 = vadd.f32 1.0, %v7574_v38  ;;  %6047 = vmatprep.subr.mxu0 %v4870_v8  ;;  %v5825_v38 = vmul.f32 -1.442695, %v11534_v22  ;;  %v5826_v8 = vmul.f32 -1.442695, %v11540_v7  ;;  %v4865_v7 = vld [vmem:[#allocation3 + $0x1a0] sm:$0xff] }
 0x42d   : > { %v7578_v12 = vpop.eup %7577  ;;  %7603 = vrcp.f32 %v3208_v41  ;;  %v3218_v20 = vadd.f32 1.0, %v7576_v19  ;;  %12911 = vst [vmem:[#allocation105_spill] sm:$0xff] %v11548_v3  ;;  %6048 = vmatpush3.msra.mxu0 %v4854_v26  ;;  %v11555_v41 = vpop.f32.mrf.mxu1  ;;  %v11569_v26 = vadd.f32 %v11342_v6, %v12872_v23  ;;  %v5845_v6 = vmul.f32 -1.442695, %v11553_v10  ;;  %v4850_v10 = vld [vmem:[#allocation3 + $0x128] sm:$0xff] }
 0x42e   : > { %v7580_v28 = vpop.eup %7579  ;;  %7605 = vrcp.f32 %v3209_v25  ;;  %v3219_v0 = vadd.f32 1.0, %v7578_v12  ;;  %v11562_v25 = vadd.f32 %v11325_v50, %v12866_v9  ;;  %6049 = vmatprep.subr.mxu0 %v4869_v57  ;;  %v4852_v12 = vld [vmem:[#allocation3 + $0x138] sm:$0xff]  ;;  %v11576_v50 = vadd.f32 %v11354_v27, %v12866_v9  ;;  %v4866_v27 = vld [vmem:[#allocation3 + $0x1a8] sm:$0xff] }
 0x42f   : > { %v7582_v55 = vpop.eup %7581  ;;  %7607 = vrcp.f32 %v3218_v20  ;;  %v3228_v5 = vadd.f32 1.0, %v7580_v28  ;;  %12914 = vst [vmem:[#allocation147_spill] sm:$0xff] %v11569_v26  ;;  %6050 = vmatpush3.msra.mxu0 %v4853_v37  ;;  %v4867_v28 = vld [vmem:[#allocation3 + $0x1b0] sm:$0xff]  ;;  %v11580_v57 = vadd.f32 %v11367_v16, %v12872_v23  ;;  %v11587_v37 = vadd.f32 %v11377_v52, %v12866_v9 }
 0x430   : > { %v11557_v19 = vpop.eup %7583  ;;  %7609 = vrcp.f32 %v3219_v0  ;;  %v3229_v34 = vadd.f32 1.0, %v7582_v55  ;;  %12913 = vst [vmem:[#allocation106_spill] sm:$0xff] %v11562_v25  ;;  %v5836_v55 = vmul.f32 -1.442695, %v11548_v3  ;;  %12915 = vst [vmem:[#allocation81_spill] sm:$0xff] %v11576_v50  ;;  %6051 = vmatprep.subr.mxu0 %v4868_v24  ;;  %v2085_v3 = vpop.f32.mrf.mxu1 }
 0x431   : > { %v11564_v20 = vpop.eup %7585  ;;  %7611 = vrcp.f32 %v3228_v5  ;;  %12916 = vst [vmem:[#allocation108_spill] sm:$0xff] %v11580_v57  ;;  %v4851_v5 = vld [vmem:[#allocation3 + $0x130] sm:$0xff]  ;;  %12917 = vst [vmem:[#allocation149_spill] sm:$0xff] %v11587_v37  ;;  %6052 = vmatpush3.msra.mxu0 %v4852_v12  ;;  %v5846_v24 = vmul.f32 -1.442695, %v11562_v25  ;;  %v11605_v12 = vadd.f32 %v11391_v29, %v12872_v23  ;;  %v4864_v29 = vld [vmem:[#allocation3 + $0x198] sm:$0xff] }
 0x432   : > { %v11571_v0 = vpop.eup %7587  ;;  %7613 = vrcp.f32 %v3229_v34  ;;  %v11591_v34 = vadd.f32 %v11383_v2, %v12872_v23  ;;  %6053 = vmatprep.subr.mxu0 %v4867_v28  ;;  %v5855_v2 = vmul.f32 -1.442695, %v11569_v26  ;;  %v5856_v25 = vmul.f32 -1.442695, %v11576_v50  ;;  %v4849_v28 = vld [vmem:[#allocation3 + $0x120] sm:$0xff] }
 0x433   : > { %v11582_v36 = vpop.eup %7589  ;;  %7615 = vpow2.f32 %v5825_v38  ;;  %v11598_v38 = vadd.f32 %v11385_v44, %v12866_v9  ;;  %12920 = vst [vmem:[#allocation150_spill] sm:$0xff] %v11605_v12  ;;  %6054 = vmatpush3.msra.mxu0 %v4851_v5  ;;  %v5865_v44 = vmul.f32 -1.442695, %v11580_v57  ;;  %v2087_v5 = vpop.f32.mrf.mxu1  ;;  %v11620_v57 = vadd.f32 %v11404_v58, %v12866_v9  ;;  %v4863_v58 = vld [vmem:[#allocation3 + $0x190] sm:$0xff]  ;;  %v4861_v50 = vld [vmem:[#allocation3 + $0x180] sm:$0xff] }
 0x434   : > { %12918 = vst [vmem:[#allocation31_spill] sm:$0xff] %v11591_v34  ;;  %v11593_v16 = vpop.eup %7591  ;;  %7617 = vpow2.f32 %v5826_v8  ;;  %6055 = vmatprep.subr.mxu0 %v4866_v27  ;;  %v5875_v26 = vmul.f32 -1.442695, %v11591_v34  ;;  %v11624_v27 = vadd.f32 %v11436_v14, %v12872_v23  ;;  %v11641_v14 = vadd.f32 %v11518_v39, %v12866_v9 }
 0x435   : > { %12919 = vst [vmem:[#allocation109_spill] sm:$0xff] %v11598_v38  ;;  %v11600_v52 = vpop.eup %7593  ;;  %7619 = vpow2.f32 %v5835_v32  ;;  %v5866_v32 = vmul.f32 -1.442695, %v11587_v37  ;;  %6056 = vmatpush3.msra.mxu0 %v4850_v10  ;;  %12921 = vst [vmem:[#allocation64_spill] sm:$0xff] %v11620_v57  ;;  %v5885_v10 = vmul.f32 -1.442695, %v11605_v12  ;;  %v11659_v39 = vadd.f32 %v11555_v41, %v12866_v9 }
 0x436   : > { %v11607_v8 = vpop.eup %7595  ;;  %7621 = vpow2.f32 %v5836_v55  ;;  %v5876_v55 = vmul.f32 -1.442695, %v11598_v38  ;;  %12922 = vst [vmem:[#allocation110_spill] sm:$0xff] %v11624_v27  ;;  %6057 = vmatprep.subr.mxu0 %v4865_v7  ;;  %v11635_v38 = vadd.f32 %v11498_v56, %v12872_v23  ;;  %12926 = vst [vmem:[#allocation70_spill] sm:$0xff] %v11641_v14  ;;  %v11645_v7 = vadd.f32 %v11528_v33, %v12872_v23 }
 0x437   : > { %v11611_v22 = vpop.eup %7597  ;;  %7623 = vpow2.f32 %v5845_v6  ;;  %v4848_v6 = vld [vmem:[#allocation3 + $0x118] sm:$0xff]  ;;  %6058 = vmatpush3.msra.mxu0 %v4849_v28  ;;  %v4862_v28 = vld [vmem:[#allocation3 + $0x188] sm:$0xff]  ;;  %12931 = vst [vmem:[#allocation9_spill] sm:$0xff] %v11659_v39  ;;  %v11662_v33 = vadd.f32 %v2085_v3, %v12872_v23 }
 0x438   : > { %v11615_v31 = vpop.eup %7599  ;;  %7625 = vpow2.f32 %v5846_v24  ;;  %v11631_v24 = vadd.f32 %v11472_v48, %v12866_v9  ;;  %12924 = vst [vmem:[#allocation79_spill] sm:$0xff] %v11635_v38  ;;  %6059 = vmatprep.subr.mxu0 %v4864_v29  ;;  %12927 = vst [vmem:[#allocation112_spill] sm:$0xff] %v11645_v7  ;;  %v4847_v48 = vld [vmem:[#allocation3 + $0x110] sm:$0xff]  ;;  %v2091_v29 = vpop.f32.mrf.mxu1  ;;  %v11675_v41 = vmul.f32 -1.442695, %v11635_v38 }
 0x439   : > { %v11626_v37 = vpop.eup %7601  ;;  %7627 = vpow2.f32 %v5855_v2  ;;  %v11649_v2 = vadd.f32 %v11530_v45, %v12866_v9  ;;  %6060 = vmatpush3.msra.mxu0 %v4848_v6  ;;  %12932 = vst [vmem:[#allocation116_spill] sm:$0xff] %v11662_v33  ;;  %v5886_v45 = vmul.f32 -1.442695, %v11620_v57  ;;  %v4846_v6 = vld [vmem:[#allocation3 + $0x108] sm:$0xff]  ;;  %v11694_v38 = vmul.f32 -1.442695, %v11659_v39 }
 0x43a   : > { %12923 = vst [vmem:[#allocation153_spill] sm:$0xff] %v11631_v24  ;;  %v11637_v34 = vpop.eup %7603  ;;  %7629 = vpow2.f32 %v5856_v25  ;;  %v11655_v25 = vadd.f32 %v11536_v11, %v12872_v23  ;;  %6061 = vmatprep.subr.mxu0 %v4863_v58  ;;  %v11669_v11 = vadd.f32 %v2087_v5, %v12866_v9  ;;  %v5896_v3 = vmul.f32 -1.442695, %v11631_v24 }
 0x43b   : > { %12925 = vst [vmem:[#allocation27_spill] sm:$0xff] %v11637_v34  ;;  %12928 = vst [vmem:[#allocation72_spill] sm:$0xff] %v11649_v2  ;;  %v11651_v56 = vpop.eup %7605  ;;  %7631 = vpow2.f32 %v5865_v44  ;;  %v5895_v44 = vmul.f32 -1.442695, %v11624_v27  ;;  %6062 = vmatpush3.msra.mxu0 %v4847_v48  ;;  %v11680_v58 = vmul.f32 -1.442695, %v11641_v14  ;;  %v2093_v14 = vpop.f32.mrf.mxu1 }
 0x43c   : > { %12929 = vst [vmem:[#allocation65_spill] sm:$0xff] %v11651_v56  ;;  %12930 = vst [vmem:[#allocation54_spill] sm:$0xff] %v11655_v25  ;;  %v11664_v12 = vpop.eup %7607  ;;  %7633 = vpow2.f32 %v5866_v32  ;;  %v4845_v32 = vld [vmem:[#allocation3 + $0x100] sm:$0xff]  ;;  %v11683_v5 = vmul.f32 -1.442695, %v11645_v7  ;;  %6063 = vmatprep.subr.mxu0 %v4862_v28  ;;  %v12939_v28 = vsub.s32 2, %v12903_v18 }
 0x43d   : > { %12933 = vst [vmem:[#allocation75_spill] sm:$0xff] %v11664_v12  ;;  %12934 = vst [vmem:[#allocation15_spill] sm:$0xff] %v11669_v11  ;;  %v11671_v56 = vpop.eup %7609  ;;  %7635 = vpow2.f32 %v5875_v26  ;;  %v4908_v12 = vld [vmem:[#allocation3 + $0x2f8] sm:$0xff]  ;;  %v11686_v26 = vmul.f32 -1.442695, %v11649_v2  ;;  %6064 = vmatpush3.msra.mxu0 %v4846_v6  ;;  %v11706_v6 = vadd.f32 %v2091_v29, %v12872_v23  ;;  %v4891_v29 = vld [vmem:[#allocation3 + $0x270] sm:$0xff] }
 0x43e   : > { %12935 = vst [vmem:[#allocation55_spill] sm:$0xff] %v11671_v56  ;;  %v11677_v57 = vpop.eup %7611  ;;  %7637 = vpow2.f32 %v5876_v55  ;;  %v11691_v48 = vmul.f32 -1.442695, %v11655_v25  ;;  %v11697_v55 = vmul.f32 -1.442695, %v11662_v33  ;;  %6065 = vmatprep.subr.mxu0 %v4861_v50  ;;  %v4987_v2 = vrot.slane %v11503_v15, %v12939_v28  ;;  %v4892_v27 = vld [vmem:[#allocation3 + $0x278] sm:$0xff] }
 0x43f   : > { %12936 = vst [vmem:[#allocation77_spill] sm:$0xff] %v11677_v57  ;;  %v11688_v24 = vpop.eup %7613  ;;  %7639 = vpow2.f32 %v5885_v10  ;;  %v11703_v10 = vmul.f32 -1.442695, %v11669_v11  ;;  %v12941_v25 = vld [vmem:[#allocation99_spill] sm:$0xff]  ;;  %6066 = vmatpush3.msra.mxu0 %v4845_v32  ;;  %v12942_v50 = vsub.s32 5, %v12903_v18  ;;  %v4907_v57 = vld [vmem:[#allocation3 + $0x2f0] sm:$0xff] }
 0x440   : > { %12937 = vst [vmem:[#allocation42_spill] sm:$0xff] %v11688_v24  ;;  %12938 = vst [vmem:[#allocation41_spill] sm:$0xff] %v11697_v55  ;;  %v7616_v7 = vpop.eup %7615  ;;  %7641 = vpow2.f32 %v5886_v45  ;;  %v4048_v33 = vmul.f32 %v11420_v13, %v12941_v25  ;;  %v12943_v56 = vld [vmem:[#allocation102_spill] sm:$0xff]  ;;  %5161 = vmatmul.mubr.f32.vlgmr.msra.gmra.mxu0 %v4987_v2  ;;  %6070 = vmatprep.subr.mxu0 %v4908_v12  ;;  %v11716_v55 = vadd.f32 %v2093_v14, %v12866_v9  ;;  %v12947_v14 = vld [vmem:[#allocation16_spill] sm:$0xff] }
 0x441   : > { %12940 = vst [vmem:[#allocation45_spill] sm:$0xff] %v11703_v10  ;;  %v7618_v39 = vpop.eup %7617  ;;  %v3238_v24 = vadd.f32 1.0, %v7616_v7  ;;  %7643 = vpow2.f32 %v5895_v44  ;;  %v4999_v45 = vrot.slane %v11503_v15, %v12942_v50  ;;  %v4049_v11 = vmul.f32 %v11428_v51, %v12943_v56  ;;  %v12944_v7 = vld [vmem:[#allocation95_spill] sm:$0xff]  ;;  %6071 = vmatpush3.msra.mxu0 %v4892_v27  ;;  %v4906_v51 = vld [vmem:[#allocation3 + $0x2e8] sm:$0xff]  ;;  %v11722_v56 = vpop.f32.mrf.mxu1  ;;  %v12946_v12 = vld [vmem:[#allocation94_spill] sm:$0xff] }
 0x442   : > { %v7620_v28 = vpop.eup %7619  ;;  %v3239_v10 = vadd.f32 1.0, %v7618_v39  ;;  %7645 = vpow2.f32 %v5896_v3  ;;  %v4038_v25 = vmul.f32 %v11406_v35, %v12944_v7  ;;  %v12945_v44 = vld [vmem:[#allocation107_spill] sm:$0xff]  ;;  %v4039_v39 = vmul.f32 %v11412_v4, %v12946_v12  ;;  %6072 = vmatprep.subr.mxu0 %v4907_v57  ;;  %v4890_v35 = vld [vmem:[#allocation3 + $0x268] sm:$0xff]  ;;  %v12949_v34 = vld [vmem:[#allocation118_spill] sm:$0xff] }
 0x443   : > { %v7622_v13 = vpop.eup %7621  ;;  %v4058_v32 = vmul.f32 %v11438_v53, %v12945_v44  ;;  %7647 = vrcp.f32 %v3238_v24  ;;  %v3248_v50 = vadd.f32 1.0, %v7620_v28  ;;  %5230 = vmatprep.mubr.f32.mxu0 %v4999_v45  ;;  %v4059_v3 = vmul.f32 %v11446_v62, %v12947_v14  ;;  %v12948_v24 = vld [vmem:[#allocation68_spill] sm:$0xff]  ;;  %6073 = vmatpush3.msra.mxu0 %v4891_v29  ;;  %v4905_v28 = vld [vmem:[#allocation3 + $0x2e0] sm:$0xff]  ;;  %v11734_v29 = vpop.f32.mrf.mxu1 }
 0x444   : > { %v7624_v2 = vpop.eup %7623  ;;  %7649 = vrcp.f32 %v3239_v10  ;;  %v3249_v15 = vadd.f32 1.0, %v7622_v13  ;;  %v4648_v53 = vadd.f32 %v4048_v33, %v4038_v25  ;;  %v4068_v27 = vmul.f32 %v11457_v42, %v12948_v24  ;;  %6074 = vmatprep.subr.mxu0 %v4906_v51  ;;  %v4889_v10 = vld [vmem:[#allocation3 + $0x260] sm:$0xff]  ;;  %v4904_v25 = vld [vmem:[#allocation3 + $0x2d8] sm:$0xff]  ;;  %v12953_v24 = vld [vmem:[#allocation73_spill] sm:$0xff] }
 0x445   : > { %v7626_v7 = vpop.eup %7625  ;;  %7651 = vrcp.f32 %v3248_v50  ;;  %v3258_v45 = vadd.f32 1.0, %v7624_v2  ;;  %v4685_v18 = vadd.f32 %v4049_v11, %v4039_v39  ;;  %v4069_v4 = vmul.f32 %v11465_v54, %v12949_v34  ;;  %v12950_v12 = vld [vmem:[#allocation119_spill] sm:$0xff]  ;;  %6075 = vmatpush3.msra.mxu0 %v4890_v35  ;;  %v12951_v2 = vld [vmem:[#allocation117_spill] sm:$0xff]  ;;  %v4888_v34 = vld [vmem:[#allocation3 + $0x258] sm:$0xff] }
 0x446   : > { %v7628_v44 = vpop.eup %7627  ;;  %7653 = vrcp.f32 %v3249_v15  ;;  %v3259_v62 = vadd.f32 1.0, %v7626_v7  ;;  %v4649_v13 = vadd.f32 %v4648_v53, %v4058_v32  ;;  %v4078_v33 = vmul.f32 %v11474_v59, %v12950_v12  ;;  %6076 = vmatprep.subr.mxu0 %v4905_v28  ;;  %v12952_v39 = vld [vmem:[#allocation121_spill] sm:$0xff] }
 0x447   : > { %v7630_v57 = vpop.eup %7629  ;;  %7655 = vrcp.f32 %v3258_v45  ;;  %v3268_v42 = vadd.f32 1.0, %v7628_v44  ;;  %v4686_v11 = vadd.f32 %v4685_v18, %v4059_v3  ;;  %v4079_v54 = vmul.f32 %v11481_v40, %v12951_v2  ;;  %6077 = vmatpush3.msra.mxu0 %v4889_v10  ;;  %v4903_v35 = vld [vmem:[#allocation3 + $0x2d0] sm:$0xff]  ;;  %v12954_v44 = vld [vmem:[#allocation120_spill] sm:$0xff]  ;;  %v11744_v10 = vpop.f32.mrf.mxu1  ;;  %v4901_v2 = vld [vmem:[#allocation3 + $0x2c0] sm:$0xff] }
 0x448   : > { %v7632_v50 = vpop.eup %7631  ;;  %7657 = vrcp.f32 %v3259_v62  ;;  %v3269_v15 = vadd.f32 1.0, %v7630_v57  ;;  %v4650_v32 = vadd.f32 %v4649_v13, %v4068_v27  ;;  %v4088_v59 = vmul.f32 %v11488_v60, %v12952_v39  ;;  %6078 = vmatprep.subr.mxu0 %v4904_v25  ;;  %v4887_v3 = vld [vmem:[#allocation3 + $0x250] sm:$0xff]  ;;  %v4902_v62 = vld [vmem:[#allocation3 + $0x2c8] sm:$0xff] }
 0x449   : > { %v7634_v51 = vpop.eup %7633  ;;  %7659 = vrcp.f32 %v3268_v42  ;;  %v3278_v14 = vadd.f32 1.0, %v7632_v50  ;;  %v4687_v53 = vadd.f32 %v4686_v11, %v4069_v4  ;;  %v4089_v18 = vmul.f32 %v11495_v63, %v12953_v24  ;;  %6079 = vmatpush3.msra.mxu0 %v4888_v34  ;;  %v12955_v13 = vld [vmem:[#allocation76_spill] sm:$0xff]  ;;  %v12956_v50 = vld [vmem:[#allocation78_spill] sm:$0xff] }
 0x44a   : > { %v7636_v7 = vpop.eup %7635  ;;  %7661 = vrcp.f32 %v3269_v15  ;;  %v3279_v40 = vadd.f32 1.0, %v7634_v51  ;;  %v4651_v28 = vadd.f32 %v4650_v32, %v4078_v33  ;;  %v4098_v27 = vmul.f32 %v11500_v17, %v12954_v44  ;;  %6080 = vmatprep.subr.mxu0 %v4903_v35  ;;  %v4886_v42 = vld [vmem:[#allocation3 + $0x248] sm:$0xff]  ;;  %v12957_v51 = vld [vmem:[#allocation39_spill] sm:$0xff] }
 0x44b   : > { %v7638_v45 = vpop.eup %7637  ;;  %7663 = vrcp.f32 %v3278_v14  ;;  %v3288_v60 = vadd.f32 1.0, %v7636_v7  ;;  %v4688_v4 = vadd.f32 %v4687_v53, %v4079_v54  ;;  %v4099_v63 = vmul.f32 %v11505_v21, %v12955_v13  ;;  %6081 = vmatpush3.msra.mxu0 %v4887_v3  ;;  %v4885_v32 = vld [vmem:[#allocation3 + $0x240] sm:$0xff]  ;;  %v12958_v35 = vld [vmem:[#allocation84_spill] sm:$0xff]  ;;  %v4900_v7 = vld [vmem:[#allocation3 + $0x2b8] sm:$0xff]  ;;  %v11754_v53 = vpop.f32.mrf.mxu1 }
 0x44c   : > { %v7640_v57 = vpop.eup %7639  ;;  %7665 = vrcp.f32 %v3279_v40  ;;  %v3289_v12 = vadd.f32 1.0, %v7638_v45  ;;  %v4652_v33 = vadd.f32 %v4651_v28, %v4088_v59  ;;  %v4108_v17 = vmul.f32 %v11508_v46, %v12956_v50  ;;  %6082 = vmatprep.subr.mxu0 %v4902_v62  ;;  %v12959_v40 = vld [vmem:[#allocation128_spill] sm:$0xff]  ;;  %v4884_v45 = vld [vmem:[#allocation3 + $0x238] sm:$0xff] }
 0x44d   : > { %v7642_v25 = vpop.eup %7641  ;;  %7667 = vrcp.f32 %v3288_v60  ;;  %v3298_v11 = vadd.f32 1.0, %v7640_v57  ;;  %v4689_v34 = vadd.f32 %v4688_v4, %v4089_v18  ;;  %v4109_v54 = vmul.f32 %v11513_v47, %v12957_v51  ;;  %6083 = vmatpush3.msra.mxu0 %v4886_v42  ;;  %v4899_v60 = vld [vmem:[#allocation3 + $0x2b0] sm:$0xff] }
 0x44e   : > { %v7644_v15 = vpop.eup %7643  ;;  %7669 = vrcp.f32 %v3289_v12  ;;  %v3299_v21 = vadd.f32 1.0, %v7642_v25  ;;  %v4653_v14 = vadd.f32 %v4652_v33, %v4098_v27  ;;  %v4118_v59 = vmul.f32 %v11557_v19, %v12958_v35  ;;  %6084 = vmatprep.subr.mxu0 %v4901_v2  ;;  %v2105_v12 = vpop.f32.mrf.mxu1  ;;  %v4882_v33 = vld [vmem:[#allocation3 + $0x228] sm:$0xff]  ;;  %v12963_v35 = vld [vmem:[#allocation137_spill] sm:$0xff] }
 0x44f   : > { %v7646_v39 = vpop.eup %7645  ;;  %7671 = vrcp.f32 %v3298_v11  ;;  %v3308_v46 = vadd.f32 1.0, %v7644_v15  ;;  %v4690_v18 = vadd.f32 %v4689_v34, %v4099_v63  ;;  %v4119_v47 = vmul.f32 %v11564_v20, %v12959_v40  ;;  %6085 = vmatpush3.msra.mxu0 %v4885_v32  ;;  %v4881_v15 = vld [vmem:[#allocation3 + $0x220] sm:$0xff]  ;;  %v12962_v32 = vld [vmem:[#allocation134_spill] sm:$0xff] }
 0x450   : > { %v11756_v24 = vpop.eup %7647  ;;  %7673 = vrcp.f32 %v3299_v21  ;;  %v3309_v3 = vadd.f32 1.0, %v7646_v39  ;;  %v4654_v44 = vadd.f32 %v4653_v14, %v4108_v17  ;;  %v4128_v19 = vmul.f32 %v11571_v0, %v12876_v61  ;;  %6086 = vmatprep.subr.mxu0 %v4900_v7  ;;  %v4883_v61 = vld [vmem:[#allocation3 + $0x230] sm:$0xff]  ;;  %v4897_v17 = vld [vmem:[#allocation3 + $0x2a0] sm:$0xff] }
 0x451   : > { %v11760_v28 = vpop.eup %7649  ;;  %7675 = vrcp.f32 %v3308_v46  ;;  %v11766_v27 = vadd.f32 %v11722_v56, %v12872_v23  ;;  %v4691_v20 = vadd.f32 %v4690_v18, %v4109_v54  ;;  %v4129_v57 = vmul.f32 %v11582_v36, %v11389_v30  ;;  %6087 = vmatpush3.msra.mxu0 %v4884_v45  ;;  %v4898_v30 = vld [vmem:[#allocation3 + $0x2a8] sm:$0xff]  ;;  %v2107_v54 = vpop.f32.mrf.mxu1  ;;  %v12965_v7 = vld [vmem:[#allocation41_spill] sm:$0xff] }
 0x452   : > { %v11768_v62 = vpop.eup %7651  ;;  %7677 = vrcp.f32 %v3309_v3  ;;  %v11774_v4 = vadd.f32 %v11734_v29, %v12866_v9  ;;  %v4655_v13 = vadd.f32 %v4654_v44, %v4118_v59  ;;  %v4138_v56 = vmul.f32 %v11593_v16, %v11402_v49  ;;  %6088 = vmatprep.subr.mxu0 %v4899_v60  ;;  %v12964_v59 = vld [vmem:[#allocation27_spill] sm:$0xff]  ;;  %v12968_v45 = vld [vmem:[#allocation45_spill] sm:$0xff] }
 0x453   : > { %v11776_v0 = vpop.eup %7653  ;;  %7679 = vpow2.f32 %v11675_v41  ;;  %v5945_v63 = vmul.f32 -1.442695, %v11706_v6  ;;  %v4692_v42 = vadd.f32 %v4691_v20, %v4119_v47  ;;  %v4139_v29 = vmul.f32 %v11600_v52, %v11410_v43  ;;  %6089 = vmatpush3.msra.mxu0 %v4883_v61  ;;  %v12960_v52 = vld [vmem:[#allocation91_spill] sm:$0xff]  ;;  %v12967_v47 = vld [vmem:[#allocation65_spill] sm:$0xff] }
 0x454   : > { %v11782_v36 = vpop.eup %7655  ;;  %7681 = vpow2.f32 %v11680_v58  ;;  %v5946_v25 = vmul.f32 -1.442695, %v11716_v55  ;;  %v4656_v16 = vadd.f32 %v4655_v13, %v4128_v19  ;;  %v4148_v41 = vmul.f32 %v11607_v8, %v11418_v1  ;;  %6090 = vmatprep.subr.mxu0 %v4898_v30  ;;  %v12961_v8 = vld [vmem:[#allocation135_spill] sm:$0xff]  ;;  %v4879_v19 = vld [vmem:[#allocation3 + $0x210] sm:$0xff] }
 0x455   : > { %v11788_v49 = vpop.eup %7657  ;;  %7683 = vpow2.f32 %v11683_v5  ;;  %v5955_v50 = vmul.f32 -1.442695, %v11766_v27  ;;  %v4693_v43 = vadd.f32 %v4692_v42, %v4129_v57  ;;  %v4149_v58 = vmul.f32 %v11611_v22, %v12960_v52  ;;  %6091 = vmatpush3.msra.mxu0 %v4882_v33  ;;  %v4896_v22 = vld [vmem:[#allocation3 + $0x298] sm:$0xff]  ;;  %v12970_v57 = vld [vmem:[#allocation75_spill] sm:$0xff] }
 0x456   : > { %v11794_v11 = vpop.eup %7659  ;;  %7685 = vpow2.f32 %v11686_v26  ;;  %v5956_v2 = vmul.f32 -1.442695, %v11774_v4  ;;  %v4657_v1 = vadd.f32 %v4656_v16, %v4138_v56  ;;  %v4158_v5 = vmul.f32 %v11615_v31, %v12961_v8  ;;  %6092 = vmatprep.subr.mxu0 %v4897_v17  ;;  %v4894_v56 = vld [vmem:[#allocation3 + $0x288] sm:$0xff]  ;;  %v12971_v42 = vld [vmem:[#allocation59_spill] sm:$0xff] }
 0x457   : > { %v11800_v34 = vpop.eup %7661  ;;  %7687 = vpow2.f32 %v11691_v48  ;;  %v11807_v51 = vadd.f32 %v11744_v10, %v12872_v23  ;;  %v4694_v21 = vadd.f32 %v4693_v43, %v4139_v29  ;;  %v4159_v39 = vmul.f32 %v11626_v37, %v12962_v32  ;;  %v4880_v48 = vld [vmem:[#allocation3 + $0x218] sm:$0xff]  ;;  %6093 = vmatpush3.msra.mxu0 %v4881_v15  ;;  %v4895_v37 = vld [vmem:[#allocation3 + $0x290] sm:$0xff]  ;;  %v12972_v29 = vld [vmem:[#allocation55_spill] sm:$0xff] }
 0x458   : > { %v11809_v26 = vpop.eup %7663  ;;  %7689 = vpow2.f32 %v11694_v38  ;;  %v11816_v31 = vadd.f32 %v11754_v53, %v12866_v9  ;;  %v4658_v10 = vadd.f32 %v4657_v1, %v4148_v41  ;;  %v4168_v46 = vmul.f32 %v12964_v59, %v12963_v35  ;;  %v12966_v53 = vld [vmem:[#allocation140_spill] sm:$0xff]  ;;  %6094 = vmatprep.subr.mxu0 %v4896_v22  ;;  %v12973_v43 = vld [vmem:[#allocation29_spill] sm:$0xff]  ;;  %v4893_v15 = vld [vmem:[#allocation3 + $0x280] sm:$0xff] }
 0x459   : > { %v11818_v14 = vpop.eup %7665  ;;  %7691 = vpow2.f32 %v12965_v7  ;;  %v11824_v18 = vadd.f32 %v2105_v12, %v12872_v23  ;;  %v4695_v40 = vadd.f32 %v4694_v21, %v4149_v58  ;;  %v4169_v3 = vmul.f32 %v12967_v47, %v12966_v53  ;;  %v12969_v23 = vld [vmem:[#allocation36_spill] sm:$0xff]  ;;  %6095 = vmatpush3.msra.mxu0 %v4880_v48  ;;  %v4877_v21 = vld [vmem:[#allocation3 + $0x200] sm:$0xff]  ;;  %v12977_v48 = vld [vmem:[#allocation101_spill] sm:$0xff] }
 0x45a   : > { %v11826_v38 = vpop.eup %7667  ;;  %7693 = vpow2.f32 %v12968_v45  ;;  %v11832_v44 = vadd.f32 %v2107_v54, %v12866_v9  ;;  %v4659_v20 = vadd.f32 %v4658_v10, %v4158_v5  ;;  %v4178_v61 = vmul.f32 %v12970_v57, %v12969_v23  ;;  %6096 = vmatprep.subr.mxu0 %v4895_v37  ;;  %v4878_v16 = vld [vmem:[#allocation3 + $0x208] sm:$0xff]  ;;  %v4972_v10 = vld [vmem:[#allocation3 + $0x4f8] sm:$0xff]  ;;  %v4971_v23 = vld [vmem:[#allocation3 + $0x4f0] sm:$0xff] }
 0x45b   : > { %v11834_v60 = vpop.eup %7669  ;;  %7695 = vpow2.f32 %v5945_v63  ;;  %v5965_v13 = vmul.f32 -1.442695, %v11807_v51  ;;  %v4696_v30 = vadd.f32 %v4695_v40, %v4159_v39  ;;  %v4179_v9 = vmul.f32 %v12972_v29, %v12971_v42  ;;  %v12974_v63 = vld [vmem:[#allocation77_spill] sm:$0xff]  ;;  %6097 = vmatpush3.msra.mxu0 %v4879_v19  ;;  %v12975_v5 = vld [vmem:[#allocation100_spill] sm:$0xff]  ;;  %v4956_v47 = vld [vmem:[#allocation3 + $0x478] sm:$0xff] }
 0x45c   : > { %v11839_v12 = vpop.eup %7671  ;;  %7697 = vpow2.f32 %v5946_v25  ;;  %v5966_v33 = vmul.f32 -1.442695, %v11816_v31  ;;  %v4660_v17 = vadd.f32 %v4659_v20, %v4168_v46  ;;  %v4188_v52 = vmul.f32 %v12974_v63, %v12973_v43  ;;  %v12976_v25 = vld [vmem:[#allocation42_spill] sm:$0xff]  ;;  %6098 = vmatprep.subr.mxu0 %v4894_v56  ;;  %v12978_v46 = vld [vmem:[#allocation104_spill] sm:$0xff]  ;;  %v12982_v19 = vld [vmem:[#allocation143_spill] sm:$0xff] }
 0x45d   : > { %v11844_v41 = vpop.eup %7673  ;;  %7699 = vpow2.f32 %v5955_v50  ;;  %v5975_v58 = vmul.f32 -1.442695, %v11824_v18  ;;  %v4697_v8 = vadd.f32 %v4696_v30, %v4169_v3  ;;  %v4189_v54 = vmul.f32 %v12976_v25, %v12975_v5  ;;  %6099 = vmatpush3.msra.mxu0 %v4878_v16  ;;  %v12981_v40 = vld [vmem:[#allocation48_spill] sm:$0xff]  ;;  %v4955_v30 = vld [vmem:[#allocation3 + $0x470] sm:$0xff]  ;;  %v12985_v63 = vld [vmem:[#allocation106_spill] sm:$0xff] }
 0x45e   : > { %v11849_v1 = vpop.eup %7675  ;;  %7701 = vpow2.f32 %v5956_v2  ;;  %v5976_v22 = vmul.f32 -1.442695, %v11832_v44  ;;  %v4661_v39 = vadd.f32 %v4660_v17, %v4178_v61  ;;  %v4198_v50 = vmul.f32 %v11756_v24, %v12977_v48  ;;  %6100 = vmatprep.subr.mxu0 %v4893_v15  ;;  %v12979_v2 = vld [vmem:[#allocation24_spill] sm:$0xff]  ;;  %v12986_v5 = vld [vmem:[#allocation147_spill] sm:$0xff] }
 0x45f   : > { %v11854_v32 = vpop.eup %7677  ;;  %7703 = vpow2.f32 %v5965_v13  ;;  %v4698_v59 = vadd.f32 %v4697_v8, %v4179_v9  ;;  %v4199_v7 = vmul.f32 %v11760_v28, %v12978_v46  ;;  %v12980_v37 = vsub.s32 4, %v12979_v2  ;;  %6101 = vmatpush3.msra.mxu0 %v4877_v21  ;;  %v12983_v13 = vld [vmem:[#allocation105_spill] sm:$0xff]  ;;  %v4970_v16 = vld [vmem:[#allocation3 + $0x4e8] sm:$0xff] }
 0x460   : > { %v7680_v35 = vpop.eup %7679  ;;  %7705 = vpow2.f32 %v5966_v33  ;;  %v4662_v45 = vadd.f32 %v4661_v39, %v4188_v52  ;;  %v4208_v24 = vmul.f32 %v11768_v62, %v12982_v19  ;;  %v4209_v28 = vmul.f32 %v11776_v0, %v12983_v13  ;;  %6140 = vmatprep.subr.mxu0 %v4972_v10  ;;  %v12984_v9 = vld [vmem:[#allocation145_spill] sm:$0xff]  ;;  %v12990_v19 = vld [vmem:[#allocation31_spill] sm:$0xff] }
 0x461   : > { %v4995_v53 = vrot.slane %v12981_v40, %v12980_v37  ;;  %v7682_v3 = vpop.eup %7681  ;;  %v3318_v20 = vadd.f32 1.0, %v7680_v35  ;;  %7707 = vpow2.f32 %v5975_v58  ;;  %v4699_v61 = vadd.f32 %v4698_v59, %v4189_v54  ;;  %v4954_v58 = vld [vmem:[#allocation3 + $0x468] sm:$0xff]  ;;  %v4969_v54 = vld [vmem:[#allocation3 + $0x4e0] sm:$0xff]  ;;  %v12987_v39 = vld [vmem:[#allocation81_spill] sm:$0xff] }
 0x462   : > { %v7684_v57 = vpop.eup %7683  ;;  %v3319_v56 = vadd.f32 1.0, %v7682_v3  ;;  %7709 = vpow2.f32 %v5976_v22  ;;  %v4663_v29 = vadd.f32 %v4662_v45, %v4198_v50  ;;  %v4218_v33 = vmul.f32 %v11782_v36, %v12984_v9  ;;  %v4953_v50 = vld [vmem:[#allocation3 + $0x460] sm:$0xff]  ;;  %v12988_v59 = vld [vmem:[#allocation108_spill] sm:$0xff]  ;;  %v12989_v40 = vld [vmem:[#allocation149_spill] sm:$0xff] }
 0x463   : > { %5231 = vmatmul.mubr.f32.vlgmr.msra.gmra.mxu0 %v4995_v53  ;;  %v7686_v42 = vpop.eup %7685  ;;  %7711 = vrcp.f32 %v3318_v20  ;;  %v3328_v62 = vadd.f32 1.0, %v7684_v57  ;;  %v4700_v43 = vadd.f32 %v4699_v61, %v4199_v7  ;;  %v4219_v52 = vmul.f32 %v11788_v49, %v12985_v63  ;;  %v4968_v7 = vld [vmem:[#allocation3 + $0x4d8] sm:$0xff]  ;;  %v4967_v20 = vld [vmem:[#allocation3 + $0x4d0] sm:$0xff]  ;;  %v4966_v9 = vld [vmem:[#allocation3 + $0x4c8] sm:$0xff] }
 0x464   : > { %6141 = vmatpush3.msra.mxu0 %v4956_v47  ;;  %v7688_v17 = vpop.eup %7687  ;;  %7713 = vrcp.f32 %v3319_v56  ;;  %v3329_v0 = vadd.f32 1.0, %v7686_v42  ;;  %v4664_v8 = vadd.f32 %v4663_v29, %v4208_v24  ;;  %v4228_v25 = vmul.f32 %v11794_v11, %v12986_v5  ;;  %v4952_v47 = vld [vmem:[#allocation3 + $0x458] sm:$0xff]  ;;  %v12991_v61 = vld [vmem:[#allocation109_spill] sm:$0xff] }
 0x465   : > { %6142 = vmatprep.subr.mxu0 %v4971_v23  ;;  %v7690_v15 = vpop.eup %7689  ;;  %7715 = vrcp.f32 %v3328_v62  ;;  %v3338_v36 = vadd.f32 1.0, %v7688_v17  ;;  %v4701_v21 = vadd.f32 %v4700_v43, %v4209_v28  ;;  %v4229_v48 = vmul.f32 %v11800_v34, %v12987_v39  ;;  %v4951_v28 = vld [vmem:[#allocation3 + $0x450] sm:$0xff]  ;;  %v12992_v42 = vld [vmem:[#allocation150_spill] sm:$0xff]  ;;  %v4950_v43 = vld [vmem:[#allocation3 + $0x448] sm:$0xff] }
 0x466   : > { %6143 = vmatpush3.msra.mxu0 %v4955_v30  ;;  %v7692_v22 = vpop.eup %7691  ;;  %7717 = vrcp.f32 %v3329_v0  ;;  %v3339_v49 = vadd.f32 1.0, %v7690_v15  ;;  %v4665_v35 = vadd.f32 %v4664_v8, %v4218_v33  ;;  %v4238_v46 = vmul.f32 %v11809_v26, %v12988_v59  ;;  %v12994_v0 = vld [vmem:[#allocation110_spill] sm:$0xff]  ;;  %v4965_v15 = vld [vmem:[#allocation3 + $0x4c0] sm:$0xff] }
 0x467   : > { %6144 = vmatprep.subr.mxu0 %v4970_v16  ;;  %v7694_v10 = vpop.eup %7693  ;;  %7719 = vrcp.f32 %v3338_v36  ;;  %v3348_v11 = vadd.f32 1.0, %v7692_v22  ;;  %v4702_v37 = vadd.f32 %v4701_v21, %v4219_v52  ;;  %v4239_v53 = vmul.f32 %v11818_v14, %v12989_v40  ;;  %v12993_v16 = vld [vmem:[#allocation64_spill] sm:$0xff] }
 0x468   : > { %6145 = vmatpush3.msra.mxu0 %v4954_v58  ;;  %v7696_v2 = vpop.eup %7695  ;;  %7721 = vrcp.f32 %v3339_v49  ;;  %v3349_v34 = vadd.f32 1.0, %v7694_v10  ;;  %v4666_v45 = vadd.f32 %v4665_v35, %v4228_v25  ;;  %v4248_v24 = vmul.f32 %v11826_v38, %v12990_v19  ;;  %v12995_v25 = vld [vmem:[#allocation153_spill] sm:$0xff]  ;;  %v4948_v10 = vld [vmem:[#allocation3 + $0x438] sm:$0xff]  ;;  %v4962_v19 = vld [vmem:[#allocation3 + $0x4a8] sm:$0xff] }
 0x469   : > { %6146 = vmatprep.subr.mxu0 %v4969_v54  ;;  %v7698_v3 = vpop.eup %7697  ;;  %7723 = vrcp.f32 %v3348_v11  ;;  %v3358_v26 = vadd.f32 1.0, %v7696_v2  ;;  %v4703_v57 = vadd.f32 %v4702_v37, %v4229_v48  ;;  %v4249_v13 = vmul.f32 %v11834_v60, %v12991_v61  ;;  %v4949_v54 = vld [vmem:[#allocation3 + $0x440] sm:$0xff]  ;;  %v4964_v48 = vld [vmem:[#allocation3 + $0x4b8] sm:$0xff]  ;;  %v4963_v11 = vld [vmem:[#allocation3 + $0x4b0] sm:$0xff] }
 0x46a   : > { %6147 = vmatpush3.msra.mxu0 %v4953_v50  ;;  %v7700_v23 = vpop.eup %7699  ;;  %7725 = vrcp.f32 %v3349_v34  ;;  %v3359_v14 = vadd.f32 1.0, %v7698_v3  ;;  %v4667_v30 = vadd.f32 %v4666_v45, %v4238_v46  ;;  %v4258_v29 = vmul.f32 %v11839_v12, %v12992_v42  ;;  %v12996_v46 = vld [vmem:[#allocation79_spill] sm:$0xff]  ;;  %v12997_v37 = vld [vmem:[#allocation70_spill] sm:$0xff]  ;;  %v12998_v3 = vld [vmem:[#allocation112_spill] sm:$0xff] }
 0x46b   : > { %6148 = vmatprep.subr.mxu0 %v4968_v7  ;;  %v7702_v56 = vpop.eup %7701  ;;  %7727 = vrcp.f32 %v3358_v26  ;;  %v3368_v38 = vadd.f32 1.0, %v7700_v23  ;;  %v4704_v62 = vadd.f32 %v4703_v57, %v4239_v53  ;;  %v4259_v17 = vmul.f32 %v11844_v41, %v12993_v16  ;;  %v4947_v53 = vld [vmem:[#allocation3 + $0x430] sm:$0xff]  ;;  %v4946_v57 = vld [vmem:[#allocation3 + $0x428] sm:$0xff] }
 0x46c   : > { %6149 = vmatpush3.msra.mxu0 %v4952_v47  ;;  %v7704_v33 = vpop.eup %7703  ;;  %7729 = vrcp.f32 %v3359_v14  ;;  %v3369_v60 = vadd.f32 1.0, %v7702_v56  ;;  %v4668_v52 = vadd.f32 %v4667_v30, %v4248_v24  ;;  %v4268_v58 = vmul.f32 %v11849_v1, %v12994_v0  ;;  %v13000_v14 = vld [vmem:[#allocation54_spill] sm:$0xff]  ;;  %v4961_v56 = vld [vmem:[#allocation3 + $0x4a0] sm:$0xff]  ;;  %v13002_v16 = vld [vmem:[#allocation116_spill] sm:$0xff] }
 0x46d   : > { %6150 = vmatprep.subr.mxu0 %v4967_v20  ;;  %v7706_v63 = vpop.eup %7705  ;;  %7731 = vrcp.f32 %v3368_v38  ;;  %v3378_v12 = vadd.f32 1.0, %v7704_v33  ;;  %v4705_v5 = vadd.f32 %v4704_v62, %v4249_v13  ;;  %v4269_v36 = vmul.f32 %v11854_v32, %v12995_v25  ;;  %v12999_v20 = vld [vmem:[#allocation72_spill] sm:$0xff] }
 0x46e   : > { %6151 = vmatpush3.msra.mxu0 %v4951_v28  ;;  %v7708_v8 = vpop.eup %7707  ;;  %7733 = vrcp.f32 %v3369_v60  ;;  %v3379_v41 = vadd.f32 1.0, %v7706_v63  ;;  %v4669_v21 = vadd.f32 %v4668_v52, %v4258_v29  ;;  %v13001_v29 = vld [vmem:[#allocation9_spill] sm:$0xff]  ;;  %v4960_v60 = vld [vmem:[#allocation3 + $0x498] sm:$0xff]  ;;  %v13003_v52 = vld [vmem:[#allocation15_spill] sm:$0xff] }
 0x46f   : > { %6152 = vmatprep.subr.mxu0 %v4966_v9  ;;  %v7710_v22 = vpop.eup %7709  ;;  %7735 = vrcp.f32 %v3378_v12  ;;  %v3388_v39 = vadd.f32 1.0, %v7708_v8  ;;  %v4706_v49 = vadd.f32 %v4705_v5, %v4259_v17  ;;  %v4945_v9 = vld [vmem:[#allocation3 + $0x420] sm:$0xff]  ;;  %v4959_v5 = vld [vmem:[#allocation3 + $0x490] sm:$0xff] }
 0x470   : > { %6153 = vmatpush3.msra.mxu0 %v4950_v43  ;;  %v7712_v1 = vpop.eup %7711  ;;  %7737 = vrcp.f32 %v3379_v41  ;;  %v3389_v50 = vadd.f32 1.0, %v7710_v22  ;;  %v4670_v59 = vadd.f32 %v4669_v21, %v4268_v58  ;;  %v4944_v58 = vld [vmem:[#allocation3 + $0x418] sm:$0xff] }
 0x471   : > { %6154 = vmatprep.subr.mxu0 %v4965_v15  ;;  %v7714_v35 = vpop.eup %7713  ;;  %v4278_v32 = vmul.f32 %v7712_v1, %v12996_v46  ;;  %7739 = vrcp.f32 %v3388_v39  ;;  %v4707_v2 = vadd.f32 %v4706_v49, %v4269_v36 }
 0x472   : > { %6155 = vmatpush3.msra.mxu0 %v4949_v54  ;;  %v7716_v7 = vpop.eup %7715  ;;  %v4279_v40 = vmul.f32 %v7714_v35, %v12997_v37  ;;  %7741 = vrcp.f32 %v3389_v50  ;;  %v4943_v54 = vld [vmem:[#allocation3 + $0x410] sm:$0xff] }
 0x473   : > { %6156 = vmatprep.subr.mxu0 %v4964_v48  ;;  %v7718_v34 = vpop.eup %7717  ;;  %v4671_v47 = vadd.f32 %v4670_v59, %v4278_v32  ;;  %v4288_v45 = vmul.f32 %v7716_v7, %v12998_v3  ;;  %v4958_v48 = vld [vmem:[#allocation3 + $0x488] sm:$0xff] }
 0x474   : > { %6157 = vmatpush3.msra.mxu0 %v4948_v10  ;;  %v7720_v24 = vpop.eup %7719  ;;  %v4708_v26 = vadd.f32 %v4707_v2, %v4279_v40  ;;  %v4289_v23 = vmul.f32 %v7718_v34, %v12999_v20 }
 0x475   : > { %6158 = vmatprep.subr.mxu0 %v4963_v11  ;;  %v7722_v61 = vpop.eup %7721  ;;  %v4672_v13 = vadd.f32 %v4671_v47, %v4288_v45  ;;  %v4298_v28 = vmul.f32 %v7720_v24, %v13000_v14 }
 0x476   : > { %6159 = vmatpush3.msra.mxu0 %v4947_v53  ;;  %v7724_v30 = vpop.eup %7723  ;;  %v4709_v42 = vadd.f32 %v4708_v26, %v4289_v23  ;;  %v4299_v38 = vmul.f32 %v7722_v61, %v13001_v29 }
 0x477   : > { %6160 = vmatprep.subr.mxu0 %v4962_v19  ;;  %v7726_v33 = vpop.eup %7725  ;;  %v4673_v62 = vadd.f32 %v4672_v13, %v4298_v28  ;;  %v4308_v17 = vmul.f32 %v7724_v30, %v13002_v16  ;;  %v13004_v13 = vld [vmem:[#allocation47_spill] sm:$0xff] }
 0x478   : > { %6161 = vmatpush3.msra.mxu0 %v4946_v57  ;;  %v7728_v43 = vpop.eup %7727  ;;  %v4710_v63 = vadd.f32 %v4709_v42, %v4299_v38  ;;  %v4309_v0 = vmul.f32 %v7726_v33, %v13003_v52  ;;  %v13006_v38 = vld [vmem:[#allocation25_spill] sm:$0xff]  ;;  %v13007_v33 = vld [vmem:[#allocation26_spill] sm:$0xff] }
 0x479   : > { %6162 = vmatprep.subr.mxu0 %v4961_v56  ;;  %v7730_v12 = vpop.eup %7729  ;;  %v4674_v15 = vadd.f32 %v4673_v62, %v4308_v17  ;;  %v4318_v8 = vmul.f32 %v7728_v43, %v11706_v6  ;;  %v4942_v6 = vld [vmem:[#allocation3 + $0x408] sm:$0xff] }
 0x47a   : > { %6163 = vmatpush3.msra.mxu0 %v4945_v9  ;;  %v7732_v25 = vpop.eup %7731  ;;  %v4711_v36 = vadd.f32 %v4710_v63, %v4309_v0  ;;  %v4319_v41 = vmul.f32 %v7730_v12, %v11716_v55  ;;  %v4957_v55 = vld [vmem:[#allocation3 + $0x480] sm:$0xff]  ;;  %v4973_v0 = vld [vmem:[%s11962_s6] sm:$0x1] }
 0x47b   : > { %6164 = vmatprep.subr.mxu0 %v4960_v60  ;;  %v7734_v22 = vpop.eup %7733  ;;  %v4675_v21 = vadd.f32 %v4674_v15, %v4318_v8  ;;  %v4328_v39 = vmul.f32 %v7732_v25, %v11766_v27  ;;  %v4941_v27 = vld [vmem:[#allocation3 + $0x400] sm:$0xff] }
 0x47c   : > { %6165 = vmatpush3.msra.mxu0 %v4944_v58  ;;  %v7736_v1 = vpop.eup %7735  ;;  %v4712_v49 = vadd.f32 %v4711_v36, %v4319_v41  ;;  %v4329_v50 = vmul.f32 %v7734_v22, %v11774_v4 }
 0x47d   : > { %6166 = vmatprep.subr.mxu0 %v4959_v5  ;;  %v7738_v10 = vpop.eup %7737  ;;  %v4676_v35 = vadd.f32 %v4675_v21, %v4328_v39  ;;  %v4338_v59 = vmul.f32 %v7736_v1, %v11807_v51 }
 0x47e   : > { %6167 = vmatpush3.msra.mxu0 %v4943_v54  ;;  %v7740_v46 = vpop.eup %7739  ;;  %v4713_v32 = vadd.f32 %v4712_v49, %v4329_v50  ;;  %v4339_v11 = vmul.f32 %v7738_v10, %v11816_v31 }
 0x47f   : > { %6168 = vmatprep.subr.mxu0 %v4958_v48  ;;  %v7742_v7 = vpop.eup %7741  ;;  %v4677_v2 = vadd.f32 %v4676_v35, %v4338_v59  ;;  %v4348_v37 = vmul.f32 %v7740_v46, %v11824_v18 }
 0x480   : > { %6169 = vmatpush3.msra.mxu0 %v4942_v6  ;;  %v4714_v4 = vadd.f32 %v4713_v32, %v4339_v11  ;;  %v4349_v40 = vmul.f32 %v7742_v7, %v11832_v44  ;;  %v4351_v44 = vld [vmem:[#allocation2 + $0x8] sm:$0x3] }
 0x481   : > { %6170 = vmatprep.subr.mxu0 %v4957_v55  ;;  %v4678_v53 = vadd.f32 %v4677_v2, %v4348_v37 }
 0x482   : > { %6171 = vmatpush3.msra.mxu0 %v4941_v27  ;;  %v4715_v51 = vadd.f32 %v4714_v4, %v4349_v40 }
 0x483   : > { %v4679_v34 = vrot.slane %v4678_v53, 4 }
 0x484   : > { %v4716_v47 = vrot.slane %v4715_v51, 4 }
 0x485   : > { %v4680_v3 = vadd.f32 %v4679_v34, %v4678_v53 }
 0x486   : > { %v4717_v45 = vadd.f32 %v4716_v47, %v4715_v51 }
 0x487   : > { %v4681_v19 = vrot.slane %v4680_v3, 2 }
 0x488   : > { %v4718_v31 = vrot.slane %v4717_v45, 2 }
 0x489   : > { %v4682_v24 = vadd.f32 %v4681_v19, %v4680_v3 }
 0x48a   : > { %v4719_v26 = vadd.f32 %v4718_v31, %v4717_v45 }
 0x48b   : > { %v4683_v20 = vrot.slane %v4682_v24, 1 }
 0x48c   : > { %v4720_v23 = vrot.slane %v4719_v26, 1 }
 0x48d   : > { %v4684_v57 = vadd.f32 %v4683_v20, %v4682_v24 }
 0x48e   : > { %v4721_v18 = vadd.f32 %v4720_v23, %v4719_v26 }
 0x490   : > { %v4781_v61 = vcombine.low %v4684_v57, %v4721_v18 }
 0x492   : > { %v4788_v14 = vrot.slane %v4781_v61, %v13004_v13 }
 0x494   : > { %v4795_v28 = vrot.slane %v4788_v14, %v13004_v13 }
 0x496   : > { %v4799_v56 = vadd.f32 %v4795_v28, %v4351_v44 }
 0x498   : > { %4805 = vst.msk [vmem:[#allocation2 + $0x8] sm:$0x3] %vm11394_vm4, %v4799_v56 }
 0x49f   : > { %v4810_v42 = vld [vmem:[#allocation2 + $0x8] sm:$0x3] }
 0x4a0   : > { %v4812_v29 = vmul.f32 0.00390625, %v4810_v42 }
 0x4a2   : > { %v5011_v9 = vrot.slane %v4812_v29, %v13006_v38  ;;  %v5015_v62 = vrot.slane %v4812_v29, %v13007_v33 }
 0x4a4   : > { %5370 = vmatprep.mubr.f32.mxu0 %v5015_v62 }
 0x4a5   : > { %5371 = vmatmul.mubr.f32.vlgmr.msra.gmra.mxu0 %v5011_v9 }
 0x4e0   : > { %v6032_v16 = vpop.f32.mrf.mxu0 }
 0x4e2   : > { %v6033_v17 = vpop.f32.mrf.mxu0  ;;  %v6137_v15 = vpop.f32.mrf.mxu1 }
 0x4e3   : > { %v6034_v52 = vadd.f32 %v6033_v17, %v6032_v16 }
 0x4e4   : > { %v6138_v36 = vpop.f32.mrf.mxu1 }
 0x4e5   : > { %v5093_v8 = vadd.f32 %v6034_v52, %v4973_v0  ;;  %v6139_v22 = vadd.f32 %v6138_v36, %v6137_v15 }
 0x500   : > { %v6067_v60 = vpop.f32.mrf.mxu0 }
 0x502   : > { %v6068_v43 = vpop.f32.mrf.mxu0 }
 0x503   : > { %v6069_v12 = vadd.f32 %v6068_v43, %v6067_v60 }
 0x505   : > { %v5163_v25 = vadd.f32 %v6069_v12, %v5093_v8 }
 0x523   : > { %v6102_v63 = vpop.f32.mrf.mxu0 }
 0x525   : > { %v6103_v58 = vpop.f32.mrf.mxu0 }
 0x526   : > { %v6104_v5 = vadd.f32 %v6103_v58, %v6102_v63 }
 0x528   : > { %v5233_v41 = vadd.f32 %v6104_v5, %v5163_v25 }
 0x52a   : > { %v5303_v39 = vadd.f32 %v6139_v22, %v5233_v41 }
 0x565   : > { %v6172_v54 = vpop.f32.mrf.mxu0 }
 0x567   : > { %v6173_v21 = vpop.f32.mrf.mxu0 }
 0x568   : > { %v6174_v48 = vadd.f32 %v6173_v21, %v6172_v54 }
 0x56a   : > { %v5373_v1 = vadd.f32 %v6174_v48, %v5303_v39 }
 0x56c   : > { %v5379_v49 = vrot.slane %v5373_v1, %v13006_v38 }
 0x56e   : > { %5380 = vst [vmem:[%s309_s23] sm:$0xff] %v5379_v49 }
 0x56f   : > { %7784 = shalt.err (!%p7781_p3)
}
 0x570   : > { %s7785_s19 = scalar_lea.hbm %s5393_s12, 128  ;;  %s7789_s22 = scalar_lea.hbm %s11963_s7, 256 }
 0x571   : > { %p7786_p5 = scmp.ne.s32.totalorder %s5393_s12, %s7785_s19  ;;  %p7790_p9 = scmp.lt.s32.totalorder %s5393_s12, %s11963_s7 }
 0x572   : > { %p7791_p12 = scmp.lt.s32.totalorder %s7789_s22, %s7785_s19 }
 0x573   : > { %p7787_p6 = pnand %p7786_p5, %p7941_p4 }
 0x574   : > { %p7792_p10 = por %p7791_p12, %p7790_p9 }
 0x575   : > { %p7788_p7 = pneg %p7787_p6 }
 0x577   : > { %p7793_p11 = pnand %p7792_p10, %p7788_p7 }
 0x579   : > { %7796 = shalt.err (!%p7793_p11)
}
 0x57a   : > { %6219 = dma.vmem_to_hbm [thread:$0]  (%p7941_p4), %s5396_s30, 128, %s5393_s12, %s5382_s15  }
 0x57b PF: > { %p6231_p13 = scmp.ge.s32.totalorder %s7851_s29, 2  ;;  %s5407_s10 = sand.u32 1, %s7831_s24  }
 0x57c   : > { %s5408_s17 = scalar_lea.sflag [#allocation5], %s5407_s10 }
 0x57d   : > { %p6226_p0 = pnand %p6231_p13, %p7948_p8 }
 0x57f   : > { %p6227_p1 = pneg %p6226_p0 }
 0x581   : > { %7826 = dma.done.wait (%p6227_p1), %s5408_s17, 128  }
 0x582   : > { %7828 = vsyncadd (%p6227_p1), %s5408_s17, 4294967168  ;;  %s21_s29 = sadd.s32 1, %s7851_s29   ;;  %s13008_s24 = smov %s7835_s25 }
 0x583   : > { %p18_p2 = scmp.ge.s32.totalorder %s21_s29, 4   ;;  %s13009_s25 = smov %s7839_s26 }
 0x584   : > { %s13010_s26 = smov %s7954_s14  ;;  %s13011_s27 = smov %s7847_s28 }
 0x585   : > { %s13012_s28 = smov %s13014_s9  ;;  %20 = sbr.rel (!%p18_p2) target bundleno = 5 (0x5), region = 96 }
 0x58a   :  { %5413 = vsyncpa [#allocation4], 1 }
 0x58b   :  { %5415 = vsyncpa [#allocation4 + $0x1], 1 }
 0x58c   :  { %5416 = vsyncpa [#allocation5], 1 }
 0x58d   :  { %5418 = vsyncpa [#allocation5 + $0x1], 1 }

</bundles_post_ra>
